<compile_context>
chip_gen: v7x
topology: tpu7x:2x2x1
jax: 0.10.0
libtpu: 0.0.40
codegen_flags: <defaults>
</compile_context>

<pallas_src>
import functools

import jax
import jax.numpy as jnp
from jax.experimental import pallas as pl
from jax.experimental.pallas import tpu as pltpu

NUM_CLASSES = 10
EPS = 1e-5


# ----------------------------- Pallas kernels ------------------------------

def _conv_bn_relu_pool_kernel(p_ref, w_ref, t_ref, o_ref):
    """Fused conv (im2col matmul) + folded-BN + ReLU + 2x2 maxpool.

    p_ref: (4, tm, K) bf16 -- im2col patches, one slab per 2x2 pool phase
    w_ref: (K, tn)   bf16  -- conv weights with BN scale folded in
    t_ref: (1, tn)   f32   -- folded BN shift (includes conv bias)
    o_ref: (tm, tn)  bf16  -- pooled activations
    """
    w = w_ref[...]
    a0 = jnp.dot(p_ref[0], w, preferred_element_type=jnp.float32)
    a1 = jnp.dot(p_ref[1], w, preferred_element_type=jnp.float32)
    a2 = jnp.dot(p_ref[2], w, preferred_element_type=jnp.float32)
    a3 = jnp.dot(p_ref[3], w, preferred_element_type=jnp.float32)
    # maxpool commutes with the monotone (+shift, ReLU) epilogue, and the BN
    # scale is already inside the weights, so max-first is exact.
    m = jnp.maximum(jnp.maximum(a0, a1), jnp.maximum(a2, a3))
    o_ref[...] = jnp.maximum(m + t_ref[...], 0.0).astype(o_ref.dtype)


def _conv_pool_fc_kernel(p_ref, w_ref, t_ref, fcw_ref, fcb_ref, o_ref,
                         pool_sc, *, n_batch, n_pos):
    """Layer-4 kernel: conv + BN + ReLU + pool + flatten + Linear (logits).

    p_ref:   (4, n_pos*n_batch, K) bf16, pooled-row order (oh, ow, n)
    w_ref:   (K, C) bf16, BN scale folded
    t_ref:   (1, C) f32
    fcw_ref: (n_pos, C, num_classes) f32 -- fc weight regrouped per position
    fcb_ref: (1, num_classes) f32
    o_ref:   (n_batch, num_classes) f32 logits
    pool_sc: VMEM (n_pos*n_batch, C) f32 scratch for pooled activations
    """
    w = w_ref[...]
    a0 = jnp.dot(p_ref[0], w, preferred_element_type=jnp.float32)
    a1 = jnp.dot(p_ref[1], w, preferred_element_type=jnp.float32)
    a2 = jnp.dot(p_ref[2], w, preferred_element_type=jnp.float32)
    a3 = jnp.dot(p_ref[3], w, preferred_element_type=jnp.float32)
    m = jnp.maximum(jnp.maximum(a0, a1), jnp.maximum(a2, a3))
    pool_sc[...] = jnp.maximum(m + t_ref[...], 0.0)
    logits = fcb_ref[...]                               # (1, nc); broadcasts
    for s in range(n_pos):                              # static unroll (4)
        feat = pool_sc[pl.ds(s * n_batch, n_batch), :]  # (n_batch, C) f32
        logits = logits + jnp.dot(feat, fcw_ref[s],
                                  preferred_element_type=jnp.float32)
    o_ref[...] = logits


# ------------------------------- JAX glue -----------------------------------

def _phase_patches(x_nhwc, pooled_row_order="nhw", ksize=5, pad=2):
    """im2col for a k=5,s=1,p=2 conv, grouped by the 4 pooling phases.

    Returns (4, N*(H//2)*(W//2), ksize*ksize*Cin). Axis 0 is the position
    inside the 2x2 pool window; rows are pooled output positions, ordered
    (n, oh, ow) for "nhw" or (oh, ow, n) for "hwn".
    """
    N, H, W, Cin = x_nhwc.shape
    xp = jnp.pad(x_nhwc, ((0, 0), (pad, pad), (pad, pad), (0, 0)))
    cols = [xp[:, kh:kh + H, kw:kw + W, :]
            for kh in range(ksize) for kw in range(ksize)]
    patches = jnp.concatenate(cols, axis=-1)            # (N, H, W, 25*Cin)
    K = ksize * ksize * Cin
    Ho, Wo = H // 2, W // 2
    p = patches.reshape(N, Ho, 2, Wo, 2, K)             # (N, Ho, ph, Wo, pw, K)
    if pooled_row_order == "nhw":
        p = jnp.transpose(p, (2, 4, 0, 1, 3, 5))        # (ph, pw, N, Ho, Wo, K)
    else:
        p = jnp.transpose(p, (2, 4, 1, 3, 0, 5))        # (ph, pw, Ho, Wo, N, K)
    return p.reshape(4, N * Ho * Wo, K)


def _fold_bn(w_hwio, conv_b, gamma, beta, mean, var):
    """Fold eval-mode BatchNorm into the conv weights / a per-channel shift."""
    Cout = w_hwio.shape[-1]
    scale = gamma / jnp.sqrt(var + EPS)
    w_fold = (w_hwio.reshape(-1, Cout) * scale[None, :]).astype(jnp.bfloat16)
    shift = ((conv_b - mean) * scale + beta).reshape(1, Cout)
    return w_fold, shift.astype(jnp.float32)


def conv_bn_relu_pool(x_nhwc, lp):
    """Conv2d(k=5,s=1,p=2) + BatchNorm(eval) + ReLU + MaxPool2d(2,2)."""
    N, H, W, Cin = x_nhwc.shape
    Cout = lp["w"].shape[-1]
    Ho, Wo = H // 2, W // 2
    Mp, K = N * Ho * Wo, 25 * Cin
    phases = _phase_patches(x_nhwc.astype(jnp.bfloat16))          # (4, Mp, K)
    w_fold, shift = _fold_bn(lp["w"], lp["b"], lp["gamma"], lp["beta"],
                             lp["mean"], lp["var"])
    # Tiling: aim for exactly 2 grid steps on "parallel" axes (keeps both v7x
    # TensorCores busy) with blocks either full-extent or (8,128)-aligned.
    tn = min(Cout, 128)
    gn = Cout // tn
    if gn >= 2 or Mp < 16 or (Mp // 2) % 8 != 0:
        tm = Mp
    else:
        tm = Mp // 2
    gm = Mp // tm
    pooled = pl.pallas_call(
        _conv_bn_relu_pool_kernel,
        out_shape=jax.ShapeDtypeStruct((Mp, Cout), jnp.bfloat16),
        grid=(gm, gn),
        in_specs=[
            pl.BlockSpec((4, tm, K), lambda i, j: (0, i, 0)),
            pl.BlockSpec((K, tn), lambda i, j: (0, j)),
            pl.BlockSpec((1, tn), lambda i, j: (0, j)),
        ],
        out_specs=pl.BlockSpec((tm, tn), lambda i, j: (i, j)),
        compiler_params=pltpu.CompilerParams(
            dimension_semantics=("parallel", "parallel")),
    )(phases, w_fold, shift)
    return pooled.reshape(N, Ho, Wo, Cout)


def conv_bn_relu_pool_fc(x_nhwc, lp, fc_w, fc_b):
    """Final conv layer with the fully-connected head fused into its epilogue."""
    N, H, W, Cin = x_nhwc.shape
    Cout = lp["w"].shape[-1]
    Ho, Wo = H // 2, W // 2
    Mp, K = N * Ho * Wo, 25 * Cin
    n_pos = Ho * Wo
    nc = fc_w.shape[0]
    phases = _phase_patches(x_nhwc.astype(jnp.bfloat16),
                            pooled_row_order="hwn")                # (4, Mp, K)
    w_fold, shift = _fold_bn(lp["w"], lp["b"], lp["gamma"], lp["beta"],
                             lp["mean"], lp["var"])
    # fc_w is (nc, Cout*Ho*Wo) in PyTorch NCHW flatten order; regroup it per
    # spatial position s = oh*Wo + ow so the kernel contracts channels only.
    fcw = jnp.transpose(fc_w.reshape(nc, Cout, Ho, Wo), (2, 3, 1, 0))
    fcw = fcw.reshape(n_pos, Cout, nc).astype(jnp.float32)
    fcb = fc_b.reshape(1, nc).astype(jnp.float32)
    kernel = functools.partial(_conv_pool_fc_kernel, n_batch=N, n_pos=n_pos)
    return pl.pallas_call(
        kernel,
        out_shape=jax.ShapeDtypeStruct((N, nc), jnp.float32),
        grid=(1,),
        in_specs=[
            pl.BlockSpec((4, Mp, K), lambda i: (0, 0, 0)),
            pl.BlockSpec((K, Cout), lambda i: (0, 0)),
            pl.BlockSpec((1, Cout), lambda i: (0, 0)),
            pl.BlockSpec((n_pos, Cout, nc), lambda i: (0, 0, 0)),
            pl.BlockSpec((1, nc), lambda i: (0, 0)),
        ],
        out_specs=pl.BlockSpec((N, nc), lambda i: (0, 0)),
        scratch_shapes=[pltpu.VMEM((Mp, Cout), jnp.float32)],
        compiler_params=pltpu.CompilerParams(
            dimension_semantics=("arbitrary",)),
    )(phases, w_fold, shift, fcw, fcb)


def init_params(key):
    """Deterministic synthetic parameters with the PyTorch module's shapes."""
    dims = [(3, 32), (32, 64), (64, 128), (128, 256)]
    params = {"layers": []}
    for (cin, cout) in dims:
        key, kw, kb = jax.random.split(key, 3)
        fan_in = cin * 5 * 5
        w = jax.random.normal(kw, (5, 5, cin, cout), jnp.float32) / jnp.sqrt(fan_in)
        b = jax.random.normal(kb, (cout,), jnp.float32) * 0.01
        params["layers"].append({
            "w": w, "b": b,
            "gamma": jnp.ones((cout,), jnp.float32),
            "beta": jnp.zeros((cout,), jnp.float32),
            "mean": jnp.zeros((cout,), jnp.float32),
            "var": jnp.ones((cout,), jnp.float32),
        })
    key, kw, kb = jax.random.split(key, 3)
    fc_in = 256 * 2 * 2
    params["fc_w"] = jax.random.normal(kw, (NUM_CLASSES, fc_in), jnp.float32) / jnp.sqrt(fc_in)
    params["fc_b"] = jax.random.normal(kb, (NUM_CLASSES,), jnp.float32) * 0.01
    return params


@jax.jit
def convnet_forward(x_nchw, params):
    # NCHW -> NHWC; conv stack runs bf16 activations with f32 accumulation.
    x = jnp.transpose(x_nchw, (0, 2, 3, 1))
    for lp in params["layers"][:-1]:
        x = conv_bn_relu_pool(x, lp)
    return conv_bn_relu_pool_fc(x, params["layers"][-1],
                                params["fc_w"], params["fc_b"])


if __name__ == "__main__":
    key = jax.random.PRNGKey(0)
    key, kx = jax.random.split(key)
    # CIFAR10-shaped input (batch=2, NCHW).  Spatial must be 32 so that four
    # 2x2 maxpools produce the 256*2*2 features the fc layer expects.
    x = jax.random.normal(kx, (2, 3, 32, 32), jnp.float32)
    params = init_params(key)

    out = convnet_forward(x, params)
    out = jax.block_until_ready(out)
    assert out.shape == (2, NUM_CLASSES), out.shape
    assert out.dtype == jnp.float32
    print("KERNEL_OK")
</pallas_src>

<mosaic_0001>
module attributes {stable_mosaic.version = 11 : i64} {
  func.func @_conv_bn_relu_pool_kernel(%arg0: i32, %arg1: i32, %arg2: memref<4x256x75xbf16, #tpu.memory_space<vmem>>, %arg3: memref<75x32xbf16, #tpu.memory_space<vmem>>, %arg4: memref<1x32xf32, #tpu.memory_space<vmem>>, %arg5: memref<256x32xbf16, #tpu.memory_space<vmem>>) attributes {dimension_semantics = [#tpu.dimension_semantics<parallel>, #tpu.dimension_semantics<parallel>], iteration_bounds = array<i64: 2, 1>, scalar_prefetch = 0 : i64, scratch_operands = 0 : i64, tpu.core_type = #tpu.core_type<tc>, window_params = [{transform_indices = @transform_0, window_bounds = array<i64: 4, 256, 75>}, {transform_indices = @transform_1, window_bounds = array<i64: 75, 32>}, {transform_indices = @transform_2, window_bounds = array<i64: 1, 32>}, {transform_indices = @transform_3, window_bounds = array<i64: 256, 32>}]} {
    %c0 = arith.constant 0 : index
    %c0_0 = arith.constant 0 : index
    %0 = vector.load %arg3[%c0, %c0_0] : memref<75x32xbf16, #tpu.memory_space<vmem>>, vector<75x32xbf16>
    %c0_1 = arith.constant 0 : index
    %c0_2 = arith.constant 0 : index
    %c0_3 = arith.constant 0 : index
    %1 = vector.load %arg2[%c0_1, %c0_2, %c0_3] : memref<4x256x75xbf16, #tpu.memory_space<vmem>>, vector<1x256x75xbf16>
    %2 = vector.shape_cast %1 : vector<1x256x75xbf16> to vector<256x75xbf16>
    %cst = arith.constant dense<0.000000e+00> : vector<256x32xf32>
    %3 = tpu.matmul %2, %0, %cst {dimension_numbers = #tpu.dot_dimension_numbers<[1], [0], [0], [1], [0, 0, 1, 1], [], []>} : vector<256x75xbf16>, vector<75x32xbf16>, vector<256x32xf32> -> vector<256x32xf32>
    %c1 = arith.constant 1 : index
    %c0_4 = arith.constant 0 : index
    %c0_5 = arith.constant 0 : index
    %4 = vector.load %arg2[%c1, %c0_4, %c0_5] : memref<4x256x75xbf16, #tpu.memory_space<vmem>>, vector<1x256x75xbf16>
    %5 = vector.shape_cast %4 : vector<1x256x75xbf16> to vector<256x75xbf16>
    %cst_6 = arith.constant dense<0.000000e+00> : vector<256x32xf32>
    %6 = tpu.matmul %5, %0, %cst_6 {dimension_numbers = #tpu.dot_dimension_numbers<[1], [0], [0], [1], [0, 0, 1, 1], [], []>} : vector<256x75xbf16>, vector<75x32xbf16>, vector<256x32xf32> -> vector<256x32xf32>
    %c2 = arith.constant 2 : index
    %c0_7 = arith.constant 0 : index
    %c0_8 = arith.constant 0 : index
    %7 = vector.load %arg2[%c2, %c0_7, %c0_8] : memref<4x256x75xbf16, #tpu.memory_space<vmem>>, vector<1x256x75xbf16>
    %8 = vector.shape_cast %7 : vector<1x256x75xbf16> to vector<256x75xbf16>
    %cst_9 = arith.constant dense<0.000000e+00> : vector<256x32xf32>
    %9 = tpu.matmul %8, %0, %cst_9 {dimension_numbers = #tpu.dot_dimension_numbers<[1], [0], [0], [1], [0, 0, 1, 1], [], []>} : vector<256x75xbf16>, vector<75x32xbf16>, vector<256x32xf32> -> vector<256x32xf32>
    %c3 = arith.constant 3 : index
    %c0_10 = arith.constant 0 : index
    %c0_11 = arith.constant 0 : index
    %10 = vector.load %arg2[%c3, %c0_10, %c0_11] : memref<4x256x75xbf16, #tpu.memory_space<vmem>>, vector<1x256x75xbf16>
    %11 = vector.shape_cast %10 : vector<1x256x75xbf16> to vector<256x75xbf16>
    %cst_12 = arith.constant dense<0.000000e+00> : vector<256x32xf32>
    %12 = tpu.matmul %11, %0, %cst_12 {dimension_numbers = #tpu.dot_dimension_numbers<[1], [0], [0], [1], [0, 0, 1, 1], [], []>} : vector<256x75xbf16>, vector<75x32xbf16>, vector<256x32xf32> -> vector<256x32xf32>
    %13 = arith.maximumf %3, %6 : vector<256x32xf32>
    %14 = arith.maximumf %9, %12 : vector<256x32xf32>
    %15 = arith.maximumf %13, %14 : vector<256x32xf32>
    %c0_13 = arith.constant 0 : index
    %c0_14 = arith.constant 0 : index
    %16 = vector.load %arg4[%c0_13, %c0_14] : memref<1x32xf32, #tpu.memory_space<vmem>>, vector<1x32xf32>
    %17 = vector.broadcast %16 : vector<1x32xf32> to vector<256x32xf32>
    %18 = arith.addf %15, %17 : vector<256x32xf32>
    %cst_15 = arith.constant 0.000000e+00 : f32
    %19 = vector.broadcast %cst_15 : f32 to vector<256x32xf32>
    %20 = arith.maximumf %18, %19 : vector<256x32xf32>
    %21 = arith.truncf %20 : vector<256x32xf32> to vector<256x32xbf16>
    %c0_16 = arith.constant 0 : index
    %c0_17 = arith.constant 0 : index
    %22 = vector.load %arg5[%c0_16, %c0_17] : memref<256x32xbf16, #tpu.memory_space<vmem>>, vector<256x32xbf16>
    tpu.vector_store %arg5[%c0_16, %c0_17], %21 {strides = array<i32>} : memref<256x32xbf16, #tpu.memory_space<vmem>>, vector<256x32xbf16>,
    return
  }
  func.func @transform_0(%arg0: i32, %arg1: i32) -> (i32, i32, i32) {
    %c0_i32 = arith.constant 0 : i32
    %c0_i32_0 = arith.constant 0 : i32
    %c0_i32_1 = arith.constant 0 : i32
    return %c0_i32, %arg0, %c0_i32_0 : i32, i32, i32
  }
  func.func @transform_1(%arg0: i32, %arg1: i32) -> (i32, i32) {
    %c0_i32 = arith.constant 0 : i32
    %c0_i32_0 = arith.constant 0 : i32
    return %c0_i32, %arg1 : i32, i32
  }
  func.func @transform_2(%arg0: i32, %arg1: i32) -> (i32, i32) {
    %c0_i32 = arith.constant 0 : i32
    %c0_i32_0 = arith.constant 0 : i32
    return %c0_i32, %arg1 : i32, i32
  }
  func.func @transform_3(%arg0: i32, %arg1: i32) -> (i32, i32) {
    %c0_i32 = arith.constant 0 : i32
    return %arg0, %arg1 : i32, i32
  }
}

module attributes {stable_mosaic.version = 11 : i64} {
  func.func @_conv_bn_relu_pool_kernel(%arg0: i32, %arg1: i32, %arg2: memref<4x64x800xbf16, #tpu.memory_space<vmem>>, %arg3: memref<800x64xbf16, #tpu.memory_space<vmem>>, %arg4: memref<1x64xf32, #tpu.memory_space<vmem>>, %arg5: memref<64x64xbf16, #tpu.memory_space<vmem>>) attributes {dimension_semantics = [#tpu.dimension_semantics<parallel>, #tpu.dimension_semantics<parallel>], iteration_bounds = array<i64: 2, 1>, scalar_prefetch = 0 : i64, scratch_operands = 0 : i64, tpu.core_type = #tpu.core_type<tc>, window_params = [{transform_indices = @transform_0, window_bounds = array<i64: 4, 64, 800>}, {transform_indices = @transform_1, window_bounds = array<i64: 800, 64>}, {transform_indices = @transform_2, window_bounds = array<i64: 1, 64>}, {transform_indices = @transform_3, window_bounds = array<i64: 64, 64>}]} {
    %c0 = arith.constant 0 : index
    %c0_0 = arith.constant 0 : index
    %0 = vector.load %arg3[%c0, %c0_0] : memref<800x64xbf16, #tpu.memory_space<vmem>>, vector<800x64xbf16>
    %c0_1 = arith.constant 0 : index
    %c0_2 = arith.constant 0 : index
    %c0_3 = arith.constant 0 : index
    %1 = vector.load %arg2[%c0_1, %c0_2, %c0_3] : memref<4x64x800xbf16, #tpu.memory_space<vmem>>, vector<1x64x800xbf16>
    %2 = vector.shape_cast %1 : vector<1x64x800xbf16> to vector<64x800xbf16>
    %cst = arith.constant dense<0.000000e+00> : vector<64x64xf32>
    %3 = tpu.matmul %2, %0, %cst {dimension_numbers = #tpu.dot_dimension_numbers<[1], [0], [0], [1], [0, 0, 1, 1], [], []>} : vector<64x800xbf16>, vector<800x64xbf16>, vector<64x64xf32> -> vector<64x64xf32>
    %c1 = arith.constant 1 : index
    %c0_4 = arith.constant 0 : index
    %c0_5 = arith.constant 0 : index
    %4 = vector.load %arg2[%c1, %c0_4, %c0_5] : memref<4x64x800xbf16, #tpu.memory_space<vmem>>, vector<1x64x800xbf16>
    %5 = vector.shape_cast %4 : vector<1x64x800xbf16> to vector<64x800xbf16>
    %cst_6 = arith.constant dense<0.000000e+00> : vector<64x64xf32>
    %6 = tpu.matmul %5, %0, %cst_6 {dimension_numbers = #tpu.dot_dimension_numbers<[1], [0], [0], [1], [0, 0, 1, 1], [], []>} : vector<64x800xbf16>, vector<800x64xbf16>, vector<64x64xf32> -> vector<64x64xf32>
    %c2 = arith.constant 2 : index
    %c0_7 = arith.constant 0 : index
    %c0_8 = arith.constant 0 : index
    %7 = vector.load %arg2[%c2, %c0_7, %c0_8] : memref<4x64x800xbf16, #tpu.memory_space<vmem>>, vector<1x64x800xbf16>
    %8 = vector.shape_cast %7 : vector<1x64x800xbf16> to vector<64x800xbf16>
    %cst_9 = arith.constant dense<0.000000e+00> : vector<64x64xf32>
    %9 = tpu.matmul %8, %0, %cst_9 {dimension_numbers = #tpu.dot_dimension_numbers<[1], [0], [0], [1], [0, 0, 1, 1], [], []>} : vector<64x800xbf16>, vector<800x64xbf16>, vector<64x64xf32> -> vector<64x64xf32>
    %c3 = arith.constant 3 : index
    %c0_10 = arith.constant 0 : index
    %c0_11 = arith.constant 0 : index
    %10 = vector.load %arg2[%c3, %c0_10, %c0_11] : memref<4x64x800xbf16, #tpu.memory_space<vmem>>, vector<1x64x800xbf16>
    %11 = vector.shape_cast %10 : vector<1x64x800xbf16> to vector<64x800xbf16>
    %cst_12 = arith.constant dense<0.000000e+00> : vector<64x64xf32>
    %12 = tpu.matmul %11, %0, %cst_12 {dimension_numbers = #tpu.dot_dimension_numbers<[1], [0], [0], [1], [0, 0, 1, 1], [], []>} : vector<64x800xbf16>, vector<800x64xbf16>, vector<64x64xf32> -> vector<64x64xf32>
    %13 = arith.maximumf %3, %6 : vector<64x64xf32>
    %14 = arith.maximumf %9, %12 : vector<64x64xf32>
    %15 = arith.maximumf %13, %14 : vector<64x64xf32>
    %c0_13 = arith.constant 0 : index
    %c0_14 = arith.constant 0 : index
    %16 = vector.load %arg4[%c0_13, %c0_14] : memref<1x64xf32, #tpu.memory_space<vmem>>, vector<1x64xf32>
    %17 = vector.broadcast %16 : vector<1x64xf32> to vector<64x64xf32>
    %18 = arith.addf %15, %17 : vector<64x64xf32>
    %cst_15 = arith.constant 0.000000e+00 : f32
    %19 = vector.broadcast %cst_15 : f32 to vector<64x64xf32>
    %20 = arith.maximumf %18, %19 : vector<64x64xf32>
    %21 = arith.truncf %20 : vector<64x64xf32> to vector<64x64xbf16>
    %c0_16 = arith.constant 0 : index
    %c0_17 = arith.constant 0 : index
    %22 = vector.load %arg5[%c0_16, %c0_17] : memref<64x64xbf16, #tpu.memory_space<vmem>>, vector<64x64xbf16>
    tpu.vector_store %arg5[%c0_16, %c0_17], %21 {strides = array<i32>} : memref<64x64xbf16, #tpu.memory_space<vmem>>, vector<64x64xbf16>,
    return
  }
  func.func @transform_0(%arg0: i32, %arg1: i32) -> (i32, i32, i32) {
    %c0_i32 = arith.constant 0 : i32
    %c0_i32_0 = arith.constant 0 : i32
    %c0_i32_1 = arith.constant 0 : i32
    return %c0_i32, %arg0, %c0_i32_0 : i32, i32, i32
  }
  func.func @transform_1(%arg0: i32, %arg1: i32) -> (i32, i32) {
    %c0_i32 = arith.constant 0 : i32
    %c0_i32_0 = arith.constant 0 : i32
    return %c0_i32, %arg1 : i32, i32
  }
  func.func @transform_2(%arg0: i32, %arg1: i32) -> (i32, i32) {
    %c0_i32 = arith.constant 0 : i32
    %c0_i32_0 = arith.constant 0 : i32
    return %c0_i32, %arg1 : i32, i32
  }
  func.func @transform_3(%arg0: i32, %arg1: i32) -> (i32, i32) {
    %c0_i32 = arith.constant 0 : i32
    return %arg0, %arg1 : i32, i32
  }
}

module attributes {stable_mosaic.version = 11 : i64} {
  func.func @_conv_bn_relu_pool_kernel(%arg0: i32, %arg1: i32, %arg2: memref<4x16x1600xbf16, #tpu.memory_space<vmem>>, %arg3: memref<1600x128xbf16, #tpu.memory_space<vmem>>, %arg4: memref<1x128xf32, #tpu.memory_space<vmem>>, %arg5: memref<16x128xbf16, #tpu.memory_space<vmem>>) attributes {dimension_semantics = [#tpu.dimension_semantics<parallel>, #tpu.dimension_semantics<parallel>], iteration_bounds = array<i64: 2, 1>, scalar_prefetch = 0 : i64, scratch_operands = 0 : i64, tpu.core_type = #tpu.core_type<tc>, window_params = [{transform_indices = @transform_0, window_bounds = array<i64: 4, 16, 1600>}, {transform_indices = @transform_1, window_bounds = array<i64: 1600, 128>}, {transform_indices = @transform_2, window_bounds = array<i64: 1, 128>}, {transform_indices = @transform_3, window_bounds = array<i64: 16, 128>}]} {
    %c0 = arith.constant 0 : index
    %c0_0 = arith.constant 0 : index
    %0 = vector.load %arg3[%c0, %c0_0] : memref<1600x128xbf16, #tpu.memory_space<vmem>>, vector<1600x128xbf16>
    %c0_1 = arith.constant 0 : index
    %c0_2 = arith.constant 0 : index
    %c0_3 = arith.constant 0 : index
    %1 = vector.load %arg2[%c0_1, %c0_2, %c0_3] : memref<4x16x1600xbf16, #tpu.memory_space<vmem>>, vector<1x16x1600xbf16>
    %2 = vector.shape_cast %1 : vector<1x16x1600xbf16> to vector<16x1600xbf16>
    %cst = arith.constant dense<0.000000e+00> : vector<16x128xf32>
    %3 = tpu.matmul %2, %0, %cst {dimension_numbers = #tpu.dot_dimension_numbers<[1], [0], [0], [1], [0, 0, 1, 1], [], []>} : vector<16x1600xbf16>, vector<1600x128xbf16>, vector<16x128xf32> -> vector<16x128xf32>
    %c1 = arith.constant 1 : index
    %c0_4 = arith.constant 0 : index
    %c0_5 = arith.constant 0 : index
    %4 = vector.load %arg2[%c1, %c0_4, %c0_5] : memref<4x16x1600xbf16, #tpu.memory_space<vmem>>, vector<1x16x1600xbf16>
    %5 = vector.shape_cast %4 : vector<1x16x1600xbf16> to vector<16x1600xbf16>
    %cst_6 = arith.constant dense<0.000000e+00> : vector<16x128xf32>
    %6 = tpu.matmul %5, %0, %cst_6 {dimension_numbers = #tpu.dot_dimension_numbers<[1], [0], [0], [1], [0, 0, 1, 1], [], []>} : vector<16x1600xbf16>, vector<1600x128xbf16>, vector<16x128xf32> -> vector<16x128xf32>
    %c2 = arith.constant 2 : index
    %c0_7 = arith.constant 0 : index
    %c0_8 = arith.constant 0 : index
    %7 = vector.load %arg2[%c2, %c0_7, %c0_8] : memref<4x16x1600xbf16, #tpu.memory_space<vmem>>, vector<1x16x1600xbf16>
    %8 = vector.shape_cast %7 : vector<1x16x1600xbf16> to vector<16x1600xbf16>
    %cst_9 = arith.constant dense<0.000000e+00> : vector<16x128xf32>
    %9 = tpu.matmul %8, %0, %cst_9 {dimension_numbers = #tpu.dot_dimension_numbers<[1], [0], [0], [1], [0, 0, 1, 1], [], []>} : vector<16x1600xbf16>, vector<1600x128xbf16>, vector<16x128xf32> -> vector<16x128xf32>
    %c3 = arith.constant 3 : index
    %c0_10 = arith.constant 0 : index
    %c0_11 = arith.constant 0 : index
    %10 = vector.load %arg2[%c3, %c0_10, %c0_11] : memref<4x16x1600xbf16, #tpu.memory_space<vmem>>, vector<1x16x1600xbf16>
    %11 = vector.shape_cast %10 : vector<1x16x1600xbf16> to vector<16x1600xbf16>
    %cst_12 = arith.constant dense<0.000000e+00> : vector<16x128xf32>
    %12 = tpu.matmul %11, %0, %cst_12 {dimension_numbers = #tpu.dot_dimension_numbers<[1], [0], [0], [1], [0, 0, 1, 1], [], []>} : vector<16x1600xbf16>, vector<1600x128xbf16>, vector<16x128xf32> -> vector<16x128xf32>
    %13 = arith.maximumf %3, %6 : vector<16x128xf32>
    %14 = arith.maximumf %9, %12 : vector<16x128xf32>
    %15 = arith.maximumf %13, %14 : vector<16x128xf32>
    %c0_13 = arith.constant 0 : index
    %c0_14 = arith.constant 0 : index
    %16 = vector.load %arg4[%c0_13, %c0_14] : memref<1x128xf32, #tpu.memory_space<vmem>>, vector<1x128xf32>
    %17 = vector.broadcast %16 : vector<1x128xf32> to vector<16x128xf32>
    %18 = arith.addf %15, %17 : vector<16x128xf32>
    %cst_15 = arith.constant 0.000000e+00 : f32
    %19 = vector.broadcast %cst_15 : f32 to vector<16x128xf32>
    %20 = arith.maximumf %18, %19 : vector<16x128xf32>
    %21 = arith.truncf %20 : vector<16x128xf32> to vector<16x128xbf16>
    %c0_16 = arith.constant 0 : index
    %c0_17 = arith.constant 0 : index
    %22 = vector.load %arg5[%c0_16, %c0_17] : memref<16x128xbf16, #tpu.memory_space<vmem>>, vector<16x128xbf16>
    tpu.vector_store %arg5[%c0_16, %c0_17], %21 {strides = array<i32>} : memref<16x128xbf16, #tpu.memory_space<vmem>>, vector<16x128xbf16>,
    return
  }
  func.func @transform_0(%arg0: i32, %arg1: i32) -> (i32, i32, i32) {
    %c0_i32 = arith.constant 0 : i32
    %c0_i32_0 = arith.constant 0 : i32
    %c0_i32_1 = arith.constant 0 : i32
    return %c0_i32, %arg0, %c0_i32_0 : i32, i32, i32
  }
  func.func @transform_1(%arg0: i32, %arg1: i32) -> (i32, i32) {
    %c0_i32 = arith.constant 0 : i32
    %c0_i32_0 = arith.constant 0 : i32
    return %c0_i32, %arg1 : i32, i32
  }
  func.func @transform_2(%arg0: i32, %arg1: i32) -> (i32, i32) {
    %c0_i32 = arith.constant 0 : i32
    %c0_i32_0 = arith.constant 0 : i32
    return %c0_i32, %arg1 : i32, i32
  }
  func.func @transform_3(%arg0: i32, %arg1: i32) -> (i32, i32) {
    %c0_i32 = arith.constant 0 : i32
    return %arg0, %arg1 : i32, i32
  }
}

module attributes {stable_mosaic.version = 11 : i64} {
  func.func @_conv_pool_fc_kernel(%arg0: i32, %arg1: memref<4x8x3200xbf16, #tpu.memory_space<vmem>>, %arg2: memref<3200x256xbf16, #tpu.memory_space<vmem>>, %arg3: memref<1x256xf32, #tpu.memory_space<vmem>>, %arg4: memref<4x256x10xf32, #tpu.memory_space<vmem>>, %arg5: memref<1x10xf32, #tpu.memory_space<vmem>>, %arg6: memref<2x10xf32, #tpu.memory_space<vmem>>, %arg7: memref<8x256xf32, #tpu.memory_space<vmem>>) attributes {dimension_semantics = [#tpu.dimension_semantics<arbitrary>], iteration_bounds = array<i64: 1>, scalar_prefetch = 0 : i64, scratch_operands = 1 : i64, tpu.core_type = #tpu.core_type<tc>, window_params = [{pipeline_mode = #tpu.pipeline_mode<synchronous>, transform_indices = @transform_0, window_bounds = array<i64: 4, 8, 3200>}, {pipeline_mode = #tpu.pipeline_mode<synchronous>, transform_indices = @transform_1, window_bounds = array<i64: 3200, 256>}, {pipeline_mode = #tpu.pipeline_mode<synchronous>, transform_indices = @transform_2, window_bounds = array<i64: 1, 256>}, {pipeline_mode = #tpu.pipeline_mode<synchronous>, transform_indices = @transform_3, window_bounds = array<i64: 4, 256, 10>}, {pipeline_mode = #tpu.pipeline_mode<synchronous>, transform_indices = @transform_4, window_bounds = array<i64: 1, 10>}, {pipeline_mode = #tpu.pipeline_mode<synchronous>, transform_indices = @transform_5, window_bounds = array<i64: 2, 10>}]} {
    %c0 = arith.constant 0 : index
    %c0_0 = arith.constant 0 : index
    %0 = vector.load %arg2[%c0, %c0_0] : memref<3200x256xbf16, #tpu.memory_space<vmem>>, vector<3200x256xbf16>
    %c0_1 = arith.constant 0 : index
    %c0_2 = arith.constant 0 : index
    %c0_3 = arith.constant 0 : index
    %1 = vector.load %arg1[%c0_1, %c0_2, %c0_3] : memref<4x8x3200xbf16, #tpu.memory_space<vmem>>, vector<1x8x3200xbf16>
    %2 = vector.shape_cast %1 : vector<1x8x3200xbf16> to vector<8x3200xbf16>
    %cst = arith.constant dense<0.000000e+00> : vector<8x256xf32>
    %3 = tpu.matmul %2, %0, %cst {dimension_numbers = #tpu.dot_dimension_numbers<[1], [0], [0], [1], [0, 0, 1, 1], [], []>} : vector<8x3200xbf16>, vector<3200x256xbf16>, vector<8x256xf32> -> vector<8x256xf32>
    %c1 = arith.constant 1 : index
    %c0_4 = arith.constant 0 : index
    %c0_5 = arith.constant 0 : index
    %4 = vector.load %arg1[%c1, %c0_4, %c0_5] : memref<4x8x3200xbf16, #tpu.memory_space<vmem>>, vector<1x8x3200xbf16>
    %5 = vector.shape_cast %4 : vector<1x8x3200xbf16> to vector<8x3200xbf16>
    %cst_6 = arith.constant dense<0.000000e+00> : vector<8x256xf32>
    %6 = tpu.matmul %5, %0, %cst_6 {dimension_numbers = #tpu.dot_dimension_numbers<[1], [0], [0], [1], [0, 0, 1, 1], [], []>} : vector<8x3200xbf16>, vector<3200x256xbf16>, vector<8x256xf32> -> vector<8x256xf32>
    %c2 = arith.constant 2 : index
    %c0_7 = arith.constant 0 : index
    %c0_8 = arith.constant 0 : index
    %7 = vector.load %arg1[%c2, %c0_7, %c0_8] : memref<4x8x3200xbf16, #tpu.memory_space<vmem>>, vector<1x8x3200xbf16>
    %8 = vector.shape_cast %7 : vector<1x8x3200xbf16> to vector<8x3200xbf16>
    %cst_9 = arith.constant dense<0.000000e+00> : vector<8x256xf32>
    %9 = tpu.matmul %8, %0, %cst_9 {dimension_numbers = #tpu.dot_dimension_numbers<[1], [0], [0], [1], [0, 0, 1, 1], [], []>} : vector<8x3200xbf16>, vector<3200x256xbf16>, vector<8x256xf32> -> vector<8x256xf32>
    %c3 = arith.constant 3 : index
    %c0_10 = arith.constant 0 : index
    %c0_11 = arith.constant 0 : index
    %10 = vector.load %arg1[%c3, %c0_10, %c0_11] : memref<4x8x3200xbf16, #tpu.memory_space<vmem>>, vector<1x8x3200xbf16>
    %11 = vector.shape_cast %10 : vector<1x8x3200xbf16> to vector<8x3200xbf16>
    %cst_12 = arith.constant dense<0.000000e+00> : vector<8x256xf32>
    %12 = tpu.matmul %11, %0, %cst_12 {dimension_numbers = #tpu.dot_dimension_numbers<[1], [0], [0], [1], [0, 0, 1, 1], [], []>} : vector<8x3200xbf16>, vector<3200x256xbf16>, vector<8x256xf32> -> vector<8x256xf32>
    %13 = arith.maximumf %3, %6 : vector<8x256xf32>
    %14 = arith.maximumf %9, %12 : vector<8x256xf32>
    %15 = arith.maximumf %13, %14 : vector<8x256xf32>
    %c0_13 = arith.constant 0 : index
    %c0_14 = arith.constant 0 : index
    %16 = vector.load %arg3[%c0_13, %c0_14] : memref<1x256xf32, #tpu.memory_space<vmem>>, vector<1x256xf32>
    %17 = vector.broadcast %16 : vector<1x256xf32> to vector<8x256xf32>
    %18 = arith.addf %15, %17 : vector<8x256xf32>
    %cst_15 = arith.constant 0.000000e+00 : f32
    %19 = vector.broadcast %cst_15 : f32 to vector<8x256xf32>
    %20 = arith.maximumf %18, %19 : vector<8x256xf32>
    %c0_16 = arith.constant 0 : index
    %c0_17 = arith.constant 0 : index
    %21 = vector.load %arg7[%c0_16, %c0_17] : memref<8x256xf32, #tpu.memory_space<vmem>>, vector<8x256xf32>
    tpu.vector_store %arg7[%c0_16, %c0_17], %20 {strides = array<i32>} : memref<8x256xf32, #tpu.memory_space<vmem>>, vector<8x256xf32>,
    %c0_18 = arith.constant 0 : index
    %c0_19 = arith.constant 0 : index
    %22 = vector.load %arg5[%c0_18, %c0_19] : memref<1x10xf32, #tpu.memory_space<vmem>>, vector<1x10xf32>
    %c0_20 = arith.constant 0 : index
    %c0_21 = arith.constant 0 : index
    %23 = vector.load %arg7[%c0_20, %c0_21] : memref<8x256xf32, #tpu.memory_space<vmem>>, vector<2x256xf32>
    %c0_22 = arith.constant 0 : index
    %c0_23 = arith.constant 0 : index
    %c0_24 = arith.constant 0 : index
    %24 = vector.load %arg4[%c0_22, %c0_23, %c0_24] : memref<4x256x10xf32, #tpu.memory_space<vmem>>, vector<1x256x10xf32>
    %25 = vector.shape_cast %24 : vector<1x256x10xf32> to vector<256x10xf32>
    %cst_25 = arith.constant dense<0.000000e+00> : vector<2x10xf32>
    %26 = tpu.matmul %23, %25, %cst_25 {dimension_numbers = #tpu.dot_dimension_numbers<[1], [0], [0], [1], [0, 0, 1, 1], [], []>} : vector<2x256xf32>, vector<256x10xf32>, vector<2x10xf32> -> vector<2x10xf32>
    %27 = vector.broadcast %22 : vector<1x10xf32> to vector<2x10xf32>
    %28 = arith.addf %27, %26 : vector<2x10xf32>
    %c2_26 = arith.constant 2 : index
    %c0_27 = arith.constant 0 : index
    %29 = vector.load %arg7[%c2_26, %c0_27] : memref<8x256xf32, #tpu.memory_space<vmem>>, vector<2x256xf32>
    %c1_28 = arith.constant 1 : index
    %c0_29 = arith.constant 0 : index
    %c0_30 = arith.constant 0 : index
    %30 = vector.load %arg4[%c1_28, %c0_29, %c0_30] : memref<4x256x10xf32, #tpu.memory_space<vmem>>, vector<1x256x10xf32>
    %31 = vector.shape_cast %30 : vector<1x256x10xf32> to vector<256x10xf32>
    %cst_31 = arith.constant dense<0.000000e+00> : vector<2x10xf32>
    %32 = tpu.matmul %29, %31, %cst_31 {dimension_numbers = #tpu.dot_dimension_numbers<[1], [0], [0], [1], [0, 0, 1, 1], [], []>} : vector<2x256xf32>, vector<256x10xf32>, vector<2x10xf32> -> vector<2x10xf32>
    %33 = arith.addf %28, %32 : vector<2x10xf32>
    %c4 = arith.constant 4 : index
    %c0_32 = arith.constant 0 : index
    %34 = vector.load %arg7[%c4, %c0_32] : memref<8x256xf32, #tpu.memory_space<vmem>>, vector<2x256xf32>
    %c2_33 = arith.constant 2 : index
    %c0_34 = arith.constant 0 : index
    %c0_35 = arith.constant 0 : index
    %35 = vector.load %arg4[%c2_33, %c0_34, %c0_35] : memref<4x256x10xf32, #tpu.memory_space<vmem>>, vector<1x256x10xf32>
    %36 = vector.shape_cast %35 : vector<1x256x10xf32> to vector<256x10xf32>
    %cst_36 = arith.constant dense<0.000000e+00> : vector<2x10xf32>
    %37 = tpu.matmul %34, %36, %cst_36 {dimension_numbers = #tpu.dot_dimension_numbers<[1], [0], [0], [1], [0, 0, 1, 1], [], []>} : vector<2x256xf32>, vector<256x10xf32>, vector<2x10xf32> -> vector<2x10xf32>
    %38 = arith.addf %33, %37 : vector<2x10xf32>
    %c6 = arith.constant 6 : index
    %c0_37 = arith.constant 0 : index
    %39 = vector.load %arg7[%c6, %c0_37] : memref<8x256xf32, #tpu.memory_space<vmem>>, vector<2x256xf32>
    %c3_38 = arith.constant 3 : index
    %c0_39 = arith.constant 0 : index
    %c0_40 = arith.constant 0 : index
    %40 = vector.load %arg4[%c3_38, %c0_39, %c0_40] : memref<4x256x10xf32, #tpu.memory_space<vmem>>, vector<1x256x10xf32>
    %41 = vector.shape_cast %40 : vector<1x256x10xf32> to vector<256x10xf32>
    %cst_41 = arith.constant dense<0.000000e+00> : vector<2x10xf32>
    %42 = tpu.matmul %39, %41, %cst_41 {dimension_numbers = #tpu.dot_dimension_numbers<[1], [0], [0], [1], [0, 0, 1, 1], [], []>} : vector<2x256xf32>, vector<256x10xf32>, vector<2x10xf32> -> vector<2x10xf32>
    %43 = arith.addf %38, %42 : vector<2x10xf32>
    %c0_42 = arith.constant 0 : index
    %c0_43 = arith.constant 0 : index
    %44 = vector.load %arg6[%c0_42, %c0_43] : memref<2x10xf32, #tpu.memory_space<vmem>>, vector<2x10xf32>
    tpu.vector_store %arg6[%c0_42, %c0_43], %43 {strides = array<i32>} : memref<2x10xf32, #tpu.memory_space<vmem>>, vector<2x10xf32>,
    return
  }
  func.func @transform_0(%arg0: i32) -> (i32, i32, i32) {
    %c0_i32 = arith.constant 0 : i32
    %c0_i32_0 = arith.constant 0 : i32
    %c0_i32_1 = arith.constant 0 : i32
    %c0_i32_2 = arith.constant 0 : i32
    return %c0_i32, %c0_i32_0, %c0_i32_1 : i32, i32, i32
  }
  func.func @transform_1(%arg0: i32) -> (i32, i32) {
    %c0_i32 = arith.constant 0 : i32
    %c0_i32_0 = arith.constant 0 : i32
    %c0_i32_1 = arith.constant 0 : i32
    return %c0_i32, %c0_i32_0 : i32, i32
  }
  func.func @transform_2(%arg0: i32) -> (i32, i32) {
    %c0_i32 = arith.constant 0 : i32
    %c0_i32_0 = arith.constant 0 : i32
    %c0_i32_1 = arith.constant 0 : i32
    return %c0_i32, %c0_i32_0 : i32, i32
  }
  func.func @transform_3(%arg0: i32) -> (i32, i32, i32) {
    %c0_i32 = arith.constant 0 : i32
    %c0_i32_0 = arith.constant 0 : i32
    %c0_i32_1 = arith.constant 0 : i32
    %c0_i32_2 = arith.constant 0 : i32
    return %c0_i32, %c0_i32_0, %c0_i32_1 : i32, i32, i32
  }
  func.func @transform_4(%arg0: i32) -> (i32, i32) {
    %c0_i32 = arith.constant 0 : i32
    %c0_i32_0 = arith.constant 0 : i32
    %c0_i32_1 = arith.constant 0 : i32
    return %c0_i32, %c0_i32_0 : i32, i32
  }
  func.func @transform_5(%arg0: i32) -> (i32, i32) {
    %c0_i32 = arith.constant 0 : i32
    %c0_i32_0 = arith.constant 0 : i32
    %c0_i32_1 = arith.constant 0 : i32
    return %c0_i32, %c0_i32_0 : i32, i32
  }
}

</mosaic_0001>

<bundles_post_ra>
// kernel: convnet_forward.4
= control target key start
LH: loop header
LB: loop body
LE: loop exit
PB: predicated region body
PF: predicated region fallthrough
CT: control target
= control target key end

     0   :  { %s3278_s12 = smov 0   ;;  %s3280_s13 = smov 0   ;;  %s4011_s0 = inlined_call_operand.vmem [shape: bf16[4,512,75], index: 0, kind: input, shape index: {}]   ;;  %s4012_s1 = inlined_call_operand.vmem [shape: bf16[75,32], index: 1, kind: input, shape index: {}]   ;;  %s4013_s2 = inlined_call_operand.vmem [shape: f32[1,32], index: 2, kind: input, shape index: {}]   ;;  %s4014_s3 = inlined_call_operand.vmem [shape: bf16[512,32], index: 3, kind: output, shape index: {}]  }
   0x1   :  { %s3282_s14 = smov 0   ;;  %s3284_s15 = smov 0  }
   0x2   :  { %s3286_s16 = smov 0  }
   0x3 LB: > { %s25_s17 = sadd.s32 1, %s3251_s15  ;;  %p39_p1 = scmp.ne.s32.totalorder %s3243_s13, %s3239_s12  ;;  %s3255_s16 = sphi %s3286_s16, %s13_s16   ;;  %s3251_s15 = sphi %s3284_s15, %s4101_s15   ;;  %s3247_s14 = sphi %s3282_s14, %s4100_s14   ;;  %s3243_s13 = sphi %s3280_s13, %s4099_s13   ;;  %s3239_s12 = sphi %s3278_s12, %s4098_s12  }
   0x4   : > { %p27_p0 = scmp.ge.s32.totalorder %s25_s17, 2  ;;  %p40_p2 = scmp.eq.s32.totalorder %s3255_s16, 0 }
   0x5   : > { %s32_s19 = sadd.s32 1, %s3243_s13  ;;  %p2550_p5 = scmp.ge.s32.totalorder %s3255_s16, 2 }
   0x6   : > { %s4103_s17 = smov (%p27_p0, %s25_s17), 0  ;;  %p41_p3 = por %p40_p2, %p39_p1 }
   0x7   : > { %s29_s18 = ssub.s32 %s3251_s15, %s4103_s17  ;;  %158 = sbr.rel (%p2550_p5) target bundleno = 50 (0x32), region = 24 }
   0x8   : > { %p30_p4 = scmp.eq.s32.totalorder %s29_s18, 0 }
   0xa   : > { %s3313_s20 = scalar_select %p30_p4, %s3243_s13, %s32_s19  }
   0xe   : > { %161 = sbr.rel (!%p41_p3) target bundleno = 50 (0x32), region = 28  ;;  %s163_s21 = sand.u32 (%p41_p3), 1, %s3243_s13  }
   0xf   : > { %s2822_s22 = sshll.u32 (%p41_p3), %s3251_s15, 7  ;;  %s2551_s23 = sshll.u32 (%p41_p3), %s163_s21, 9 }
  0x10   : > { %s3321_s26 = scalar_lea.vmem (%p41_p3), %s4011_s0, %s2822_s22  ;;  %s3326_s27 = scalar_lea.vmem (%p41_p3), [#allocation2], %s2551_s23 }
  0x11   : > { %v184_v0 = vld [vmem:[%s3321_s26] sm:$0xff] (%p41_p3)   ;;  %v188_v1 = vld [vmem:[%s3321_s26 + $0x8] sm:$0xff] (%p41_p3)   ;;  %v192_v2 = vld [vmem:[%s3321_s26 + $0x10] sm:$0xff] (%p41_p3)  }
  0x12   : > { %185 = vst [vmem:[%s3326_s27] sm:$0xff] (%p41_p3), %v184_v0   ;;  %189 = vst [vmem:[%s3326_s27 + $0x8] sm:$0xff] (%p41_p3), %v188_v1   ;;  %v196_v3 = vld [vmem:[%s3321_s26 + $0x18] sm:$0xff] (%p41_p3)   ;;  %v200_v4 = vld [vmem:[%s3321_s26 + $0x20] sm:$0xff] (%p41_p3)  }
  0x13   : > { %193 = vst [vmem:[%s3326_s27 + $0x10] sm:$0xff] (%p41_p3), %v192_v2   ;;  %v204_v5 = vld [vmem:[%s3321_s26 + $0x28] sm:$0xff] (%p41_p3)   ;;  %197 = vst [vmem:[%s3326_s27 + $0x18] sm:$0xff] (%p41_p3), %v196_v3   ;;  %v208_v6 = vld [vmem:[%s3321_s26 + $0x30] sm:$0xff] (%p41_p3)  }
  0x14   : > { %201 = vst [vmem:[%s3326_s27 + $0x20] sm:$0xff] (%p41_p3), %v200_v4   ;;  %205 = vst [vmem:[%s3326_s27 + $0x28] sm:$0xff] (%p41_p3), %v204_v5   ;;  %v212_v7 = vld [vmem:[%s3321_s26 + $0x38] sm:$0xff] (%p41_p3)   ;;  %v216_v8 = vld [vmem:[%s3321_s26 + $0x40] sm:$0xff] (%p41_p3)  }
  0x15   : > { %209 = vst [vmem:[%s3326_s27 + $0x30] sm:$0xff] %v208_v6   ;;  %213 = vst [vmem:[%s3326_s27 + $0x38] sm:$0xff] %v212_v7   ;;  %v220_v9 = vld [vmem:[%s3321_s26 + $0x48] sm:$0xff]   ;;  %v224_v10 = vld [vmem:[%s3321_s26 + $0x50] sm:$0xff]  }
  0x16   : > { %217 = vst [vmem:[%s3326_s27 + $0x40] sm:$0xff] %v216_v8   ;;  %v228_v11 = vld [vmem:[%s3321_s26 + $0x58] sm:$0xff]   ;;  %221 = vst [vmem:[%s3326_s27 + $0x48] sm:$0xff] %v220_v9   ;;  %v232_v12 = vld [vmem:[%s3321_s26 + $0x60] sm:$0xff]  }
  0x17   : > { %225 = vst [vmem:[%s3326_s27 + $0x50] sm:$0xff] %v224_v10   ;;  %229 = vst [vmem:[%s3326_s27 + $0x58] sm:$0xff] %v228_v11   ;;  %v236_v13 = vld [vmem:[%s3321_s26 + $0x68] sm:$0xff]   ;;  %v240_v14 = vld [vmem:[%s3321_s26 + $0x70] sm:$0xff]  }
  0x18   : > { %233 = vst [vmem:[%s3326_s27 + $0x60] sm:$0xff] %v232_v12   ;;  %237 = vst [vmem:[%s3326_s27 + $0x68] sm:$0xff] %v236_v13   ;;  %v244_v15 = vld [vmem:[%s3321_s26 + $0x78] sm:$0xff]   ;;  %v248_v16 = vld [vmem:[%s3321_s26 + $0x100] sm:$0xff]  }
  0x19   : > { %241 = vst [vmem:[%s3326_s27 + $0x70] sm:$0xff] %v240_v14   ;;  %v252_v17 = vld [vmem:[%s3321_s26 + $0x108] sm:$0xff]   ;;  %245 = vst [vmem:[%s3326_s27 + $0x78] sm:$0xff] %v244_v15   ;;  %v256_v18 = vld [vmem:[%s3321_s26 + $0x110] sm:$0xff]  }
  0x1a   : > { %249 = vst [vmem:[%s3326_s27 + $0x80] sm:$0xff] %v248_v16   ;;  %253 = vst [vmem:[%s3326_s27 + $0x88] sm:$0xff] %v252_v17   ;;  %v260_v19 = vld [vmem:[%s3321_s26 + $0x118] sm:$0xff]   ;;  %v264_v20 = vld [vmem:[%s3321_s26 + $0x120] sm:$0xff]  }
  0x1b   : > { %257 = vst [vmem:[%s3326_s27 + $0x90] sm:$0xff] %v256_v18   ;;  %261 = vst [vmem:[%s3326_s27 + $0x98] sm:$0xff] %v260_v19   ;;  %v268_v21 = vld [vmem:[%s3321_s26 + $0x128] sm:$0xff]   ;;  %v272_v22 = vld [vmem:[%s3321_s26 + $0x130] sm:$0xff]  }
  0x1c   : > { %265 = vst [vmem:[%s3326_s27 + $0xa0] sm:$0xff] %v264_v20   ;;  %v276_v23 = vld [vmem:[%s3321_s26 + $0x138] sm:$0xff]   ;;  %269 = vst [vmem:[%s3326_s27 + $0xa8] sm:$0xff] %v268_v21   ;;  %v280_v24 = vld [vmem:[%s3321_s26 + $0x140] sm:$0xff]  }
  0x1d   : > { %273 = vst [vmem:[%s3326_s27 + $0xb0] sm:$0xff] %v272_v22   ;;  %277 = vst [vmem:[%s3326_s27 + $0xb8] sm:$0xff] %v276_v23   ;;  %v284_v25 = vld [vmem:[%s3321_s26 + $0x148] sm:$0xff]   ;;  %v288_v26 = vld [vmem:[%s3321_s26 + $0x150] sm:$0xff]  }
  0x1e   : > { %281 = vst [vmem:[%s3326_s27 + $0xc0] sm:$0xff] %v280_v24   ;;  %285 = vst [vmem:[%s3326_s27 + $0xc8] sm:$0xff] %v284_v25   ;;  %v292_v27 = vld [vmem:[%s3321_s26 + $0x158] sm:$0xff]   ;;  %v296_v28 = vld [vmem:[%s3321_s26 + $0x160] sm:$0xff]  }
  0x1f   : > { %289 = vst [vmem:[%s3326_s27 + $0xd0] sm:$0xff] %v288_v26   ;;  %v300_v29 = vld [vmem:[%s3321_s26 + $0x168] sm:$0xff]   ;;  %293 = vst [vmem:[%s3326_s27 + $0xd8] sm:$0xff] %v292_v27   ;;  %v304_v30 = vld [vmem:[%s3321_s26 + $0x170] sm:$0xff]  }
  0x20   : > { %297 = vst [vmem:[%s3326_s27 + $0xe0] sm:$0xff] %v296_v28   ;;  %301 = vst [vmem:[%s3326_s27 + $0xe8] sm:$0xff] %v300_v29   ;;  %v308_v31 = vld [vmem:[%s3321_s26 + $0x178] sm:$0xff]   ;;  %v312_v32 = vld [vmem:[%s3321_s26 + $0x200] sm:$0xff]  }
  0x21   : > { %305 = vst [vmem:[%s3326_s27 + $0xf0] sm:$0xff] %v304_v30   ;;  %309 = vst [vmem:[%s3326_s27 + $0xf8] sm:$0xff] %v308_v31   ;;  %v316_v33 = vld [vmem:[%s3321_s26 + $0x208] sm:$0xff]   ;;  %v320_v34 = vld [vmem:[%s3321_s26 + $0x210] sm:$0xff]  }
  0x22   : > { %313 = vst [vmem:[%s3326_s27 + $0x100] sm:$0xff] %v312_v32   ;;  %v324_v35 = vld [vmem:[%s3321_s26 + $0x218] sm:$0xff]   ;;  %317 = vst [vmem:[%s3326_s27 + $0x108] sm:$0xff] %v316_v33   ;;  %v328_v36 = vld [vmem:[%s3321_s26 + $0x220] sm:$0xff]  }
  0x23   : > { %321 = vst [vmem:[%s3326_s27 + $0x110] sm:$0xff] %v320_v34   ;;  %325 = vst [vmem:[%s3326_s27 + $0x118] sm:$0xff] %v324_v35   ;;  %v332_v37 = vld [vmem:[%s3321_s26 + $0x228] sm:$0xff]   ;;  %v336_v38 = vld [vmem:[%s3321_s26 + $0x230] sm:$0xff]  }
  0x24   : > { %329 = vst [vmem:[%s3326_s27 + $0x120] sm:$0xff] %v328_v36   ;;  %333 = vst [vmem:[%s3326_s27 + $0x128] sm:$0xff] %v332_v37   ;;  %v340_v39 = vld [vmem:[%s3321_s26 + $0x238] sm:$0xff]   ;;  %v344_v40 = vld [vmem:[%s3321_s26 + $0x240] sm:$0xff]  }
  0x25   : > { %337 = vst [vmem:[%s3326_s27 + $0x130] sm:$0xff] %v336_v38   ;;  %v348_v41 = vld [vmem:[%s3321_s26 + $0x248] sm:$0xff]   ;;  %341 = vst [vmem:[%s3326_s27 + $0x138] sm:$0xff] %v340_v39   ;;  %v352_v42 = vld [vmem:[%s3321_s26 + $0x250] sm:$0xff]  }
  0x26   : > { %345 = vst [vmem:[%s3326_s27 + $0x140] sm:$0xff] %v344_v40   ;;  %349 = vst [vmem:[%s3326_s27 + $0x148] sm:$0xff] %v348_v41   ;;  %v356_v43 = vld [vmem:[%s3321_s26 + $0x258] sm:$0xff]   ;;  %v360_v44 = vld [vmem:[%s3321_s26 + $0x260] sm:$0xff]  }
  0x27   : > { %353 = vst [vmem:[%s3326_s27 + $0x150] sm:$0xff] %v352_v42   ;;  %357 = vst [vmem:[%s3326_s27 + $0x158] sm:$0xff] %v356_v43   ;;  %v364_v45 = vld [vmem:[%s3321_s26 + $0x268] sm:$0xff]   ;;  %v368_v46 = vld [vmem:[%s3321_s26 + $0x270] sm:$0xff]  }
  0x28   : > { %361 = vst [vmem:[%s3326_s27 + $0x160] sm:$0xff] %v360_v44   ;;  %v372_v47 = vld [vmem:[%s3321_s26 + $0x278] sm:$0xff]   ;;  %365 = vst [vmem:[%s3326_s27 + $0x168] sm:$0xff] %v364_v45   ;;  %v376_v48 = vld [vmem:[%s3321_s26 + $0x300] sm:$0xff]  }
  0x29   : > { %369 = vst [vmem:[%s3326_s27 + $0x170] sm:$0xff] %v368_v46   ;;  %373 = vst [vmem:[%s3326_s27 + $0x178] sm:$0xff] %v372_v47   ;;  %v380_v49 = vld [vmem:[%s3321_s26 + $0x308] sm:$0xff]   ;;  %v384_v50 = vld [vmem:[%s3321_s26 + $0x310] sm:$0xff]  }
  0x2a   : > { %377 = vst [vmem:[%s3326_s27 + $0x180] sm:$0xff] %v376_v48   ;;  %381 = vst [vmem:[%s3326_s27 + $0x188] sm:$0xff] %v380_v49   ;;  %v388_v51 = vld [vmem:[%s3321_s26 + $0x318] sm:$0xff]   ;;  %v392_v52 = vld [vmem:[%s3321_s26 + $0x320] sm:$0xff]  }
  0x2b   : > { %385 = vst [vmem:[%s3326_s27 + $0x190] sm:$0xff] %v384_v50   ;;  %v396_v53 = vld [vmem:[%s3321_s26 + $0x328] sm:$0xff]   ;;  %389 = vst [vmem:[%s3326_s27 + $0x198] sm:$0xff] %v388_v51   ;;  %v400_v54 = vld [vmem:[%s3321_s26 + $0x330] sm:$0xff]  }
  0x2c   : > { %393 = vst [vmem:[%s3326_s27 + $0x1a0] sm:$0xff] %v392_v52   ;;  %397 = vst [vmem:[%s3326_s27 + $0x1a8] sm:$0xff] %v396_v53   ;;  %v404_v55 = vld [vmem:[%s3321_s26 + $0x338] sm:$0xff]   ;;  %v408_v56 = vld [vmem:[%s3321_s26 + $0x340] sm:$0xff]  }
  0x2d   : > { %401 = vst [vmem:[%s3326_s27 + $0x1b0] sm:$0xff] %v400_v54   ;;  %405 = vst [vmem:[%s3326_s27 + $0x1b8] sm:$0xff] %v404_v55   ;;  %v412_v57 = vld [vmem:[%s3321_s26 + $0x348] sm:$0xff]   ;;  %v416_v58 = vld [vmem:[%s3321_s26 + $0x350] sm:$0xff]  }
  0x2e   : > { %409 = vst [vmem:[%s3326_s27 + $0x1c0] sm:$0xff] %v408_v56   ;;  %v420_v59 = vld [vmem:[%s3321_s26 + $0x358] sm:$0xff]   ;;  %413 = vst [vmem:[%s3326_s27 + $0x1c8] sm:$0xff] %v412_v57   ;;  %v424_v60 = vld [vmem:[%s3321_s26 + $0x360] sm:$0xff]  }
  0x2f   : > { %417 = vst [vmem:[%s3326_s27 + $0x1d0] sm:$0xff] %v416_v58   ;;  %421 = vst [vmem:[%s3326_s27 + $0x1d8] sm:$0xff] %v420_v59   ;;  %v428_v61 = vld [vmem:[%s3321_s26 + $0x368] sm:$0xff]   ;;  %v432_v62 = vld [vmem:[%s3321_s26 + $0x370] sm:$0xff]  }
  0x30   : > { %425 = vst [vmem:[%s3326_s27 + $0x1e0] sm:$0xff] %v424_v60   ;;  %429 = vst [vmem:[%s3326_s27 + $0x1e8] sm:$0xff] %v428_v61   ;;  %v436_v63 = vld [vmem:[%s3321_s26 + $0x378] sm:$0xff]  }
  0x31   : > { %433 = vst [vmem:[%s3326_s27 + $0x1f0] sm:$0xff] %v432_v62   ;;  %437 = vst [vmem:[%s3326_s27 + $0x1f8] sm:$0xff] %v436_v63  }
  0x32 PF: > { %p2554_p6 = scmp.ge.s32.totalorder %s3255_s16, 1  ;;  %p717_p7 = scmp.lt.s32.totalorder %s3255_s16, 3 }
  0x34   : > { %p718_p8 = pnand %p2554_p6, %p717_p7 }
  0x36   : > { %721 = sbr.rel (%p718_p8) target bundleno = 428 (0x1ac), region = 69 }
  0x3d   : > { %v3148_v0 = vld [vmem:[%s4012_s1] sm:$0xff]   ;;  %v3149_v1 = vld [vmem:[%s4012_s1 + $0x8] sm:$0xff]   ;;  %vm975_vm0 = vcmask 1044480   ;;  %v3150_v2 = vld [vmem:[%s4012_s1 + $0x10] sm:$0xff]   ;;  %s724_s7 = sand.u32 1, %s3239_s12   ;;  %vm976_vm1 = vcmask 1045504  }
  0x3e   : > { %2939 = vmatprep.subr.bf16.mxu0 %v3148_v0  ;;  %2981 = vmatprep.subr.bf16.mxu1 %v3148_v0  ;;  %v3257_v3 = vmov 65535   ;;  %s2555_s8 = sshll.u32 %s724_s7, 9  ;;  %v3151_v5 = vld [vmem:[%s4012_s1 + $0x18] sm:$0xff]   ;;  %v3152_v6 = vld [vmem:[%s4012_s1 + $0x20] sm:$0x3f]   ;;  %vm926_vm2 = vcmask 613376  }
  0x3f   : > { %2940 = vmatpush3.bf16.msra.mxu0 %v3148_v0  ;;  %2982 = vmatpush3.bf16.msra.mxu1 %v3148_v0  ;;  %v977_v4 = vsel %vm975_vm0, 4294967295, %v3257_v3  ;;  %s3471_s19 = scalar_lea.vmem [#allocation2], %s2555_s8  ;;  %s2556_s12 = sshll.u32 %s3247_s14, 5  ;;  %vm2404_vm3 = vcmask 257024  }
  0x40   : > { %2941 = vmatprep.subr.bf16.mxu0 %v3149_v1  ;;  %2983 = vmatprep.subr.bf16.mxu1 %v3149_v1  ;;  %v3153_v7 = vld [vmem:[%s3471_s19] sm:$0xff]   ;;  %v978_v8 = vsel %vm976_vm1, %v977_v4, 0  ;;  %v3155_v11 = vld [vmem:[%s3471_s19 + $0x8] sm:$0xff]   ;;  %v3157_v13 = vld [vmem:[%s3471_s19 + $0x10] sm:$0xff]   ;;  %p766_p9 = scmp.lt.s32.totalorder %s2556_s12, 63 }
  0x41   : > { %v3154_v9 = vld [vmem:[%s3471_s19 + $0x80] sm:$0xff]   ;;  %2949 = vmatprep.mubr.msk.bf16.mxu0 %vm926_vm2, %v3153_v7  ;;  %v980_v10 = vand.u32 %v3152_v6, %v978_v8  ;;  %v3156_v12 = vld [vmem:[%s3471_s19 + $0x88] sm:$0xff]   ;;  %v3158_v14 = vld [vmem:[%s3471_s19 + $0x90] sm:$0xff]  }
  0x42   : > { %2991 = vmatprep.mubr.msk.bf16.mxu1 %vm926_vm2, %v3154_v9  ;;  %v3159_v15 = vld [vmem:[%s3471_s19 + $0x18] sm:$0xff]   ;;  %v3161_v17 = vld [vmem:[%s3471_s19 + $0x20] sm:$0xff]   ;;  %v3163_v19 = vld [vmem:[%s3471_s19 + $0x28] sm:$0xff]   ;;  %s4105_s12 = smov (!%p766_p9, %s2556_s12), 63 }
  0x43   : > { %2942 = vmatpush3.bf16.msra.mxu0 %v3149_v1  ;;  %2984 = vmatpush3.bf16.msra.mxu1 %v3149_v1  ;;  %v3160_v16 = vld [vmem:[%s3471_s19 + $0x98] sm:$0xff]   ;;  %v3162_v18 = vld [vmem:[%s3471_s19 + $0xa0] sm:$0xff]   ;;  %v3164_v20 = vld [vmem:[%s3471_s19 + $0xa8] sm:$0xff]   ;;  %s2557_s14 = sshll.u32 %s4105_s12, 2 }
  0x44   : > { %2943 = vmatprep.subr.bf16.mxu0 %v3150_v2  ;;  %2985 = vmatprep.subr.bf16.mxu1 %v3150_v2  ;;  %v3165_v21 = vld [vmem:[%s3471_s19 + $0x30] sm:$0xff]   ;;  %v3167_v23 = vld [vmem:[%s3471_s19 + $0x38] sm:$0xff]   ;;  %v3169_v25 = vld [vmem:[%s3471_s19 + $0x40] sm:$0xff]   ;;  %s3817_s25 = scalar_lea.vmem %s4014_s3, %s2557_s14 }
  0x45   : > { %v3166_v22 = vld [vmem:[%s3471_s19 + $0xb0] sm:$0xff]   ;;  %v3168_v24 = vld [vmem:[%s3471_s19 + $0xb8] sm:$0xff]   ;;  %v3170_v26 = vld [vmem:[%s3471_s19 + $0xc0] sm:$0xff]  }
  0x46   : > { %v3171_v27 = vld [vmem:[%s3471_s19 + $0x48] sm:$0xff]   ;;  %v3173_v29 = vld [vmem:[%s3471_s19 + $0x50] sm:$0xff]   ;;  %v3175_v31 = vld [vmem:[%s3471_s19 + $0x58] sm:$0xff]  }
  0x47   : > { %2944 = vmatpush3.bf16.msra.mxu0 %v3150_v2  ;;  %2986 = vmatpush3.bf16.msra.mxu1 %v3150_v2  ;;  %v3172_v28 = vld [vmem:[%s3471_s19 + $0xc8] sm:$0xff]   ;;  %v3174_v30 = vld [vmem:[%s3471_s19 + $0xd0] sm:$0xff]   ;;  %v3176_v32 = vld [vmem:[%s3471_s19 + $0xd8] sm:$0xff]  }
  0x48   : > { %2945 = vmatprep.subr.bf16.mxu0 %v3151_v5  ;;  %2987 = vmatprep.subr.bf16.mxu1 %v3151_v5  ;;  %v3177_v33 = vld [vmem:[%s3471_s19 + $0x60] sm:$0xff]   ;;  %v3179_v35 = vld [vmem:[%s3471_s19 + $0x68] sm:$0xff]   ;;  %v3181_v37 = vld [vmem:[%s3471_s19 + $0x70] sm:$0xff]  }
  0x49   : > { %v3178_v34 = vld [vmem:[%s3471_s19 + $0xe0] sm:$0xff]   ;;  %v3180_v36 = vld [vmem:[%s3471_s19 + $0xe8] sm:$0xff]   ;;  %v3182_v38 = vld [vmem:[%s3471_s19 + $0xf0] sm:$0xff]  }
  0x4a   : > { %v3183_v39 = vld [vmem:[%s3471_s19 + $0x78] sm:$0xff]   ;;  %v3185_v41 = vld [vmem:[%s3471_s19 + $0x100] sm:$0xff]   ;;  %v3187_v43 = vld [vmem:[%s3471_s19 + $0x108] sm:$0xff]  }
  0x4b   : > { %2946 = vmatpush3.bf16.msra.mxu0 %v3151_v5  ;;  %2988 = vmatpush3.bf16.msra.mxu1 %v3151_v5  ;;  %v3184_v40 = vld [vmem:[%s3471_s19 + $0xf8] sm:$0xff]   ;;  %v3186_v42 = vld [vmem:[%s3471_s19 + $0x180] sm:$0xff]   ;;  %v3188_v44 = vld [vmem:[%s3471_s19 + $0x188] sm:$0xff]  }
  0x4c   : > { %2947 = vmatprep.subr.bf16.mxu0 %v980_v10  ;;  %2989 = vmatprep.subr.bf16.mxu1 %v980_v10  ;;  %v3189_v45 = vld [vmem:[%s3471_s19 + $0x110] sm:$0xff]   ;;  %v3191_v47 = vld [vmem:[%s3471_s19 + $0x118] sm:$0xff]   ;;  %v3193_v49 = vld [vmem:[%s3471_s19 + $0x120] sm:$0xff]  }
  0x4d   : > { %v3190_v46 = vld [vmem:[%s3471_s19 + $0x190] sm:$0xff]   ;;  %v3192_v48 = vld [vmem:[%s3471_s19 + $0x198] sm:$0xff]   ;;  %v3194_v50 = vld [vmem:[%s3471_s19 + $0x1a0] sm:$0xff]  }
  0x4e   : > { %v3195_v51 = vld [vmem:[%s3471_s19 + $0x128] sm:$0xff]   ;;  %v3197_v53 = vld [vmem:[%s3471_s19 + $0x130] sm:$0xff]   ;;  %v3199_v55 = vld [vmem:[%s3471_s19 + $0x138] sm:$0xff]  }
  0x4f   : > { %2948 = vmatpush3.bf16.msra.mxu0 %v980_v10  ;;  %2990 = vmatpush3.bf16.msra.mxu1 %v980_v10  ;;  %v3196_v52 = vld [vmem:[%s3471_s19 + $0x1a8] sm:$0xff]   ;;  %v3198_v54 = vld [vmem:[%s3471_s19 + $0x1b0] sm:$0xff]   ;;  %v3200_v56 = vld [vmem:[%s3471_s19 + $0x1b8] sm:$0xff]  }
  0x50   : > { %3023 = vmatprep.subr.bf16.mxu0 %v3148_v0  ;;  %3065 = vmatprep.subr.bf16.mxu1 %v3148_v0  ;;  %v3201_v57 = vld [vmem:[%s3471_s19 + $0x140] sm:$0xff]   ;;  %v3203_v59 = vld [vmem:[%s3471_s19 + $0x148] sm:$0xff]   ;;  %v3205_v61 = vld [vmem:[%s3471_s19 + $0x150] sm:$0xff]  }
  0x51   : > { %v3202_v58 = vld [vmem:[%s3471_s19 + $0x1c0] sm:$0xff]   ;;  %v3204_v60 = vld [vmem:[%s3471_s19 + $0x1c8] sm:$0xff]   ;;  %v3206_v62 = vld [vmem:[%s3471_s19 + $0x1d0] sm:$0xff]  }
  0x52   : > { %2950 = vmatmul.mubr.msk.bf16.vlgmr.msra.gmra.mrb[0].mxu0 %vm926_vm2, %v3155_v11  ;;  %2992 = vmatmul.mubr.msk.bf16.vlgmr.msra.gmra.mrb[0].mxu1 %vm926_vm2, %v3156_v12  ;;  %v3207_v63 = vld [vmem:[%s3471_s19 + $0x158] sm:$0xff]   ;;  %v3211_v3 = vld [vmem:[%s3471_s19 + $0x168] sm:$0xff]   ;;  %v3214_v6 = vld [vmem:[%s3471_s19 + $0x1f0] sm:$0xff]  }
  0x53   : > { %3024 = vmatpush3.bf16.msra.mxu0 %v3148_v0  ;;  %3066 = vmatpush3.bf16.msra.mxu1 %v3148_v0  ;;  %v3208_v0 = vld [vmem:[%s3471_s19 + $0x1d8] sm:$0xff]   ;;  %v3212_v4 = vld [vmem:[%s3471_s19 + $0x1e8] sm:$0xff]  }
  0x54   : > { %2953 = vmatprep.mubr.msk.bf16.mxu0 %vm926_vm2, %v3157_v13  ;;  %2995 = vmatprep.mubr.msk.bf16.mxu1 %vm926_vm2, %v3158_v14  ;;  %v3215_v7 = vld [vmem:[%s3471_s19 + $0x178] sm:$0xff]  }
  0x55   : > { %3025 = vmatprep.subr.bf16.mxu0 %v3149_v1  ;;  %3067 = vmatprep.subr.bf16.mxu1 %v3149_v1  ;;  %v3216_v8 = vld [vmem:[%s3471_s19 + $0x1f8] sm:$0xff]  }
  0x57   : > { %3026 = vmatpush3.bf16.msra.mxu0 %v3149_v1  ;;  %3068 = vmatpush3.bf16.msra.mxu1 %v3149_v1  ;;  %v3209_v1 = vld [vmem:[%s3471_s19 + $0x160] sm:$0xff]  }
  0x58   : > { %3027 = vmatprep.subr.bf16.mxu0 %v3150_v2  ;;  %3069 = vmatprep.subr.bf16.mxu1 %v3150_v2 }
  0x5a   : > { %2954 = vmatmul.mubr.msk.bf16.gmra.mrb[4].mxu0 %vm926_vm2, %v3159_v15  ;;  %2996 = vmatmul.mubr.msk.bf16.gmra.mrb[4].mxu1 %vm926_vm2, %v3160_v16 }
  0x5b   : > { %2957 = vmatprep.mubr.msk.bf16.mxu0 %vm926_vm2, %v3161_v17  ;;  %2999 = vmatprep.mubr.msk.bf16.mxu1 %vm926_vm2, %v3162_v18 }
  0x5c   : > { %3028 = vmatpush3.bf16.msra.mxu0 %v3150_v2  ;;  %3070 = vmatpush3.bf16.msra.mxu1 %v3150_v2  ;;  %v3210_v2 = vld [vmem:[%s3471_s19 + $0x1e0] sm:$0xff]  }
  0x5d   : > { %3029 = vmatprep.subr.bf16.mxu0 %v3151_v5  ;;  %3071 = vmatprep.subr.bf16.mxu1 %v3151_v5 }
  0x60   : > { %3030 = vmatpush3.bf16.msra.mxu0 %v3151_v5  ;;  %3072 = vmatpush3.bf16.msra.mxu1 %v3151_v5  ;;  %v3213_v5 = vld [vmem:[%s3471_s19 + $0x170] sm:$0xff]  }
  0x61   : > { %3031 = vmatprep.subr.bf16.mxu0 %v980_v10  ;;  %3073 = vmatprep.subr.bf16.mxu1 %v980_v10 }
  0x62   : > { %2958 = vmatmul.mubr.msk.bf16.gmra.mrb[8].mxu0 %vm926_vm2, %v3163_v19  ;;  %3000 = vmatmul.mubr.msk.bf16.gmra.mrb[8].mxu1 %vm926_vm2, %v3164_v20 }
  0x63   : > { %2961 = vmatprep.mubr.msk.bf16.mxu0 %vm926_vm2, %v3165_v21  ;;  %3003 = vmatprep.mubr.msk.bf16.mxu1 %vm926_vm2, %v3166_v22 }
  0x64   : > { %3032 = vmatpush3.bf16.msra.mxu0 %v980_v10  ;;  %3074 = vmatpush3.bf16.msra.mxu1 %v980_v10 }
  0x6a   : > { %2962 = vmatmul.mubr.msk.bf16.gmra.mrb[12].mxu0 %vm926_vm2, %v3167_v23  ;;  %3004 = vmatmul.mubr.msk.bf16.gmra.mrb[12].mxu1 %vm926_vm2, %v3168_v24 }
  0x6b   : > { %2965 = vmatprep.mubr.msk.bf16.mxu0 %vm926_vm2, %v3169_v25  ;;  %3007 = vmatprep.mubr.msk.bf16.mxu1 %vm926_vm2, %v3170_v26 }
  0x72   : > { %2966 = vmatmul.mubr.msk.bf16.gmra.mrb[16].mxu0 %vm926_vm2, %v3171_v27  ;;  %3008 = vmatmul.mubr.msk.bf16.gmra.mrb[16].mxu1 %vm926_vm2, %v3172_v28 }
  0x73   : > { %2969 = vmatprep.mubr.msk.bf16.mxu0 %vm926_vm2, %v3173_v29  ;;  %3011 = vmatprep.mubr.msk.bf16.mxu1 %vm926_vm2, %v3174_v30 }
  0x7a   : > { %2970 = vmatmul.mubr.msk.bf16.gmra.mrb[20].mxu0 %vm926_vm2, %v3175_v31  ;;  %3012 = vmatmul.mubr.msk.bf16.gmra.mrb[20].mxu1 %vm926_vm2, %v3176_v32 }
  0x7b   : > { %2973 = vmatprep.mubr.msk.bf16.mxu0 %vm926_vm2, %v3177_v33  ;;  %3015 = vmatprep.mubr.msk.bf16.mxu1 %vm926_vm2, %v3178_v34 }
  0x82   : > { %2974 = vmatmul.mubr.msk.bf16.gmra.mrb[24].mxu0 %vm926_vm2, %v3179_v35  ;;  %3016 = vmatmul.mubr.msk.bf16.gmra.mrb[24].mxu1 %vm926_vm2, %v3180_v36 }
  0x83   : > { %2977 = vmatprep.mubr.msk.bf16.mxu0 %vm926_vm2, %v3181_v37  ;;  %3019 = vmatprep.mubr.msk.bf16.mxu1 %vm926_vm2, %v3182_v38 }
  0x8a   : > { %2978 = vmatmul.mubr.msk.bf16.gmra.mrb[28].mxu0 %vm926_vm2, %v3183_v39  ;;  %3020 = vmatmul.mubr.msk.bf16.gmra.mrb[28].mxu1 %vm926_vm2, %v3184_v40 }
  0x8b   : > { %3033 = vmatprep.mubr.msk.bf16.mxu0 %vm926_vm2, %v3185_v41  ;;  %3075 = vmatprep.mubr.msk.bf16.mxu1 %vm926_vm2, %v3186_v42 }
  0x92   : > { %3034 = vmatmul.mubr.msk.bf16.vlgmr.msra.gmra.mrb[32].mxu0 %vm926_vm2, %v3187_v43  ;;  %3076 = vmatmul.mubr.msk.bf16.vlgmr.msra.gmra.mrb[32].mxu1 %vm926_vm2, %v3188_v44 }
  0x93   : > { %3037 = vmatprep.mubr.msk.bf16.mxu0 %vm926_vm2, %v3189_v45  ;;  %3079 = vmatprep.mubr.msk.bf16.mxu1 %vm926_vm2, %v3190_v46 }
  0x9a   : > { %3038 = vmatmul.mubr.msk.bf16.gmra.mrb[36].mxu0 %vm926_vm2, %v3191_v47  ;;  %3080 = vmatmul.mubr.msk.bf16.gmra.mrb[36].mxu1 %vm926_vm2, %v3192_v48 }
  0x9b   : > { %3041 = vmatprep.mubr.msk.bf16.mxu0 %vm926_vm2, %v3193_v49  ;;  %3083 = vmatprep.mubr.msk.bf16.mxu1 %vm926_vm2, %v3194_v50 }
  0xa2   : > { %3042 = vmatmul.mubr.msk.bf16.gmra.mrb[40].mxu0 %vm926_vm2, %v3195_v51  ;;  %3084 = vmatmul.mubr.msk.bf16.gmra.mrb[40].mxu1 %vm926_vm2, %v3196_v52 }
  0xa3   : > { %3045 = vmatprep.mubr.msk.bf16.mxu0 %vm926_vm2, %v3197_v53  ;;  %3087 = vmatprep.mubr.msk.bf16.mxu1 %vm926_vm2, %v3198_v54 }
  0xaa   : > { %3046 = vmatmul.mubr.msk.bf16.gmra.mrb[44].mxu0 %vm926_vm2, %v3199_v55  ;;  %3088 = vmatmul.mubr.msk.bf16.gmra.mrb[44].mxu1 %vm926_vm2, %v3200_v56 }
  0xab   : > { %3049 = vmatprep.mubr.msk.bf16.mxu0 %vm926_vm2, %v3201_v57  ;;  %3091 = vmatprep.mubr.msk.bf16.mxu1 %vm926_vm2, %v3202_v58 }
  0xb2   : > { %3050 = vmatmul.mubr.msk.bf16.gmra.mrb[48].mxu0 %vm926_vm2, %v3203_v59  ;;  %3092 = vmatmul.mubr.msk.bf16.gmra.mrb[48].mxu1 %vm926_vm2, %v3204_v60 }
  0xb3   : > { %3053 = vmatprep.mubr.msk.bf16.mxu0 %vm926_vm2, %v3205_v61  ;;  %3095 = vmatprep.mubr.msk.bf16.mxu1 %vm926_vm2, %v3206_v62 }
  0xba   : > { %3054 = vmatmul.mubr.msk.bf16.gmra.mrb[52].mxu0 %vm926_vm2, %v3207_v63  ;;  %3096 = vmatmul.mubr.msk.bf16.gmra.mrb[52].mxu1 %vm926_vm2, %v3208_v0 }
  0xbb   : > { %3057 = vmatprep.mubr.msk.bf16.mxu0 %vm926_vm2, %v3209_v1  ;;  %3099 = vmatprep.mubr.msk.bf16.mxu1 %vm926_vm2, %v3210_v2 }
  0xc2   : > { %3058 = vmatmul.mubr.msk.bf16.gmra.mrb[56].mxu0 %vm926_vm2, %v3211_v3  ;;  %3100 = vmatmul.mubr.msk.bf16.gmra.mrb[56].mxu1 %vm926_vm2, %v3212_v4 }
  0xc3   : > { %3061 = vmatprep.mubr.msk.bf16.mxu0 %vm926_vm2, %v3213_v5  ;;  %3103 = vmatprep.mubr.msk.bf16.mxu1 %vm926_vm2, %v3214_v6 }
  0xca   : > { %3062 = vmatmul.mubr.msk.bf16.gmra.mrb[60].mxu0 %vm926_vm2, %v3215_v7  ;;  %3104 = vmatmul.mubr.msk.bf16.gmra.mrb[60].mxu1 %vm926_vm2, %v3216_v8 }
 0x125   : > { %v3601_v9 = vpop.f32.mrb[0].mxu0  ;;  %v3603_v10 = vpop.f32.mrb[0].mxu1 }
 0x126   : > { %v3607_v12 = vpop.f32.mrb[1].mxu0  ;;  %v3609_v13 = vpop.f32.mrb[1].mxu1 }
 0x127   : > { %v3613_v15 = vpop.f32.mrb[2].mxu0  ;;  %v3615_v16 = vpop.f32.mrb[2].mxu1 }
 0x128   : > { %v3619_v18 = vpop.f32.mrb[3].mxu0  ;;  %v3621_v19 = vpop.f32.mrb[3].mxu1 }
 0x12d   : > { %v3625_v21 = vpop.f32.mrb[4].mxu0  ;;  %v3627_v22 = vpop.f32.mrb[4].mxu1 }
 0x12e   : > { %v3631_v24 = vpop.f32.mrb[5].mxu0  ;;  %v3633_v25 = vpop.f32.mrb[5].mxu1 }
 0x12f   : > { %v3637_v27 = vpop.f32.mrb[6].mxu0  ;;  %v3639_v28 = vpop.f32.mrb[6].mxu1 }
 0x130   : > { %v3643_v30 = vpop.f32.mrb[7].mxu0  ;;  %v3645_v31 = vpop.f32.mrb[7].mxu1 }
 0x135   : > { %v3649_v33 = vpop.f32.mrb[8].mxu0  ;;  %v3651_v34 = vpop.f32.mrb[8].mxu1 }
 0x136   : > { %v3655_v36 = vpop.f32.mrb[9].mxu0  ;;  %v3657_v37 = vpop.f32.mrb[9].mxu1 }
 0x137   : > { %v3661_v39 = vpop.f32.mrb[10].mxu0  ;;  %v3663_v40 = vpop.f32.mrb[10].mxu1 }
 0x138   : > { %v3667_v42 = vpop.f32.mrb[11].mxu0  ;;  %v3669_v43 = vpop.f32.mrb[11].mxu1 }
 0x13d   : > { %v3673_v45 = vpop.f32.mrb[12].mxu0  ;;  %v3675_v46 = vpop.f32.mrb[12].mxu1 }
 0x13e   : > { %v3679_v48 = vpop.f32.mrb[13].mxu0  ;;  %v3681_v49 = vpop.f32.mrb[13].mxu1 }
 0x13f   : > { %v3685_v51 = vpop.f32.mrb[14].mxu0  ;;  %v3687_v52 = vpop.f32.mrb[14].mxu1 }
 0x140   : > { %v3691_v54 = vpop.f32.mrb[15].mxu0  ;;  %v3693_v55 = vpop.f32.mrb[15].mxu1 }
 0x145   : > { %v3697_v57 = vpop.f32.mrb[16].mxu0  ;;  %v3699_v58 = vpop.f32.mrb[16].mxu1 }
 0x146   : > { %v3703_v60 = vpop.f32.mrb[17].mxu0  ;;  %v3705_v61 = vpop.f32.mrb[17].mxu1 }
 0x147   : > { %v3709_v63 = vpop.f32.mrb[18].mxu0  ;;  %v3711_v0 = vpop.f32.mrb[18].mxu1 }
 0x148   : > { %v3715_v2 = vpop.f32.mrb[19].mxu0  ;;  %v3717_v3 = vpop.f32.mrb[19].mxu1 }
 0x14d   : > { %v3721_v5 = vpop.f32.mrb[20].mxu0  ;;  %v3723_v6 = vpop.f32.mrb[20].mxu1 }
 0x14e   : > { %v3727_v8 = vpop.f32.mrb[21].mxu0  ;;  %v3729_v62 = vpop.f32.mrb[21].mxu1 }
 0x14f   : > { %v3733_v59 = vpop.f32.mrb[22].mxu0  ;;  %v3735_v56 = vpop.f32.mrb[22].mxu1 }
 0x150   : > { %v3739_v53 = vpop.f32.mrb[23].mxu0  ;;  %v3741_v50 = vpop.f32.mrb[23].mxu1 }
 0x151   : > { %4032 = vst [vmem:[#allocation3_spill] sm:$0xff] %v3741_v50 }
 0x155   : > { %v3745_v47 = vpop.f32.mrb[24].mxu0  ;;  %v3747_v44 = vpop.f32.mrb[24].mxu1 }
 0x156   : > { %4033 = vst [vmem:[#allocation4_spill] sm:$0xff] %v3745_v47  ;;  %4034 = vst [vmem:[#allocation5_spill] sm:$0xff] %v3747_v44  ;;  %v3751_v41 = vpop.f32.mrb[25].mxu0  ;;  %v3753_v38 = vpop.f32.mrb[25].mxu1 }
 0x157   : > { %4035 = vst [vmem:[#allocation6_spill] sm:$0xff] %v3751_v41  ;;  %4036 = vst [vmem:[#allocation7_spill] sm:$0xff] %v3753_v38  ;;  %v3757_v35 = vpop.f32.mrb[26].mxu0  ;;  %v3759_v32 = vpop.f32.mrb[26].mxu1  ;;  %v4049_v38 = vmax.f32 %v3601_v9, %v3603_v10  ;;  %v4052_v9 = vmax.f32 %v3619_v18, %v3621_v19 }
 0x158   : > { %4037 = vst [vmem:[#allocation8_spill] sm:$0xff] %v3757_v35  ;;  %4038 = vst [vmem:[#allocation9_spill] sm:$0xff] %v3759_v32  ;;  %v3763_v29 = vpop.f32.mrb[27].mxu0  ;;  %v3765_v26 = vpop.f32.mrb[27].mxu1  ;;  %v3797_v35 = vld [vmem:[%s4013_s2] ss:$0 sm:$0xff] }
 0x159   : > { %4039 = vst [vmem:[#allocation10_spill] sm:$0xff] %v3763_v29  ;;  %4040 = vst [vmem:[#allocation11_spill] sm:$0xff] %v3765_v26 }
 0x15d   : > { %v3769_v23 = vpop.f32.mrb[28].mxu0  ;;  %v3771_v20 = vpop.f32.mrb[28].mxu1 }
 0x15e   : > { %4041 = vst [vmem:[#allocation12_spill] sm:$0xff] %v3769_v23  ;;  %4042 = vst [vmem:[#allocation13_spill] sm:$0xff] %v3771_v20  ;;  %v3775_v17 = vpop.f32.mrb[29].mxu0  ;;  %v3777_v14 = vpop.f32.mrb[29].mxu1 }
 0x15f   : > { %4043 = vst [vmem:[#allocation14_spill] sm:$0xff] %v3775_v17  ;;  %4044 = vst [vmem:[#allocation15_spill] sm:$0xff] %v3777_v14  ;;  %v3781_v11 = vpop.f32.mrb[30].mxu0  ;;  %v3783_v32 = vpop.f32.mrb[30].mxu1 }
 0x160   : > { %4045 = vst [vmem:[#allocation16_spill] sm:$0xff] %v3781_v11  ;;  %4046 = vst [vmem:[#allocation17_spill] sm:$0xff] %v3783_v32  ;;  %v3788_v26 = vpop.f32.mrb[31].mxu0  ;;  %v3790_v29 = vpop.f32.mrb[31].mxu1 }
 0x161   : > { %4047 = vst [vmem:[#allocation18_spill] sm:$0xff] %v3788_v26  ;;  %4048 = vst [vmem:[#allocation19_spill] sm:$0xff] %v3790_v29 }
 0x165   : > { %v3035_v20 = vpop.f32.mrb[32].mxu0  ;;  %v3077_v23 = vpop.f32.mrb[32].mxu1 }
 0x166   : > { %v2143_v7 = vmax.f32 %v3035_v20, %v3077_v23  ;;  %v1660_v14 = vpop.f32.mrb[33].mxu0  ;;  %v1982_v17 = vpop.f32.mrb[33].mxu1  ;;  %v4050_v20 = vmax.f32 %v3607_v12, %v3609_v13 }
 0x167   : > { %v2141_v1 = vmax.f32 %v1660_v14, %v1982_v17  ;;  %v3036_v32 = vpop.f32.mrb[34].mxu0  ;;  %v3078_v11 = vpop.f32.mrb[34].mxu1  ;;  %v4051_v14 = vmax.f32 %v3613_v15, %v3615_v16 }
 0x168   : > { %v2175_v41 = vmax.f32 %v4049_v38, %v2143_v7  ;;  %v2144_v4 = vmax.f32 %v3036_v32, %v3078_v11  ;;  %v1663_v29 = vpop.f32.mrb[35].mxu0  ;;  %v1985_v26 = vpop.f32.mrb[35].mxu1  ;;  %v4053_v7 = vmax.f32 %v3625_v21, %v3627_v22 }
 0x169   : > { %v2173_v23 = vmax.f32 %v4050_v20, %v2141_v1  ;;  %v2142_v44 = vmax.f32 %v1663_v29, %v1985_v26 }
 0x16a   : > { %v2214_v47 = vadd.f32 %v3797_v35, %v2175_v41  ;;  %v2176_v17 = vmax.f32 %v4051_v14, %v2144_v4 }
 0x16b   : > { %v2212_v50 = vadd.f32 %v3797_v35, %v2173_v23  ;;  %v2174_v10 = vmax.f32 %v4052_v9, %v2142_v44 }
 0x16c   : > { %v2246_v11 = vmax.f32 %v2214_v47, 0.0  ;;  %v2215_v32 = vadd.f32 %v3797_v35, %v2176_v17 }
 0x16d   : > { %v2244_v12 = vmax.f32 %v2212_v50, 0.0  ;;  %v2213_v13 = vadd.f32 %v3797_v35, %v2174_v10  ;;  %v3039_v15 = vpop.f32.mrb[36].mxu0  ;;  %v3081_v16 = vpop.f32.mrb[36].mxu1  ;;  %v4054_v10 = vmax.f32 %v3631_v24, %v3633_v25 }
 0x16e   : > { %v2825_v26 = vpack.c.bf16 %v2246_v11, %v2246_v11  ;;  %v2247_v29 = vmax.f32 %v2215_v32, 0.0  ;;  %v2147_v18 = vmax.f32 %v3039_v15, %v3081_v16  ;;  %v1676_v19 = vpop.f32.mrb[37].mxu0  ;;  %v1998_v38 = vpop.f32.mrb[37].mxu1  ;;  %v4056_v15 = vmax.f32 %v3643_v30, %v3645_v31 }
 0x16f   : > { %v2823_v41 = vpack.c.bf16 %v2244_v12, %v2244_v12  ;;  %v2245_v44 = vmax.f32 %v2213_v13, 0.0  ;;  %v2145_v47 = vmax.f32 %v1676_v19, %v1998_v38  ;;  %v3040_v1 = vpop.f32.mrb[38].mxu0  ;;  %v3082_v4 = vpop.f32.mrb[38].mxu1  ;;  %v4055_v13 = vmax.f32 %v3637_v27, %v3639_v28 }
 0x170   : > { %2407 = vst.msk [vmem:[%s3817_s25 + $0x8] sm:$0xf] %vm2404_vm3, %v2825_v26  ;;  %v2826_v50 = vpack.c.bf16 %v2247_v29, %v2247_v29  ;;  %v2179_v20 = vmax.f32 %v4053_v7, %v2147_v18  ;;  %v2148_v23 = vmax.f32 %v3040_v1, %v3082_v4  ;;  %v1679_v14 = vpop.f32.mrb[39].mxu0  ;;  %v2001_v17 = vpop.f32.mrb[39].mxu1  ;;  %v4057_v7 = vmax.f32 %v3649_v33, %v3651_v34 }
 0x171   : > { %2405 = vst.msk [vmem:[%s3817_s25] sm:$0xf] %vm2404_vm3, %v2823_v41  ;;  %v2824_v9 = vpack.c.bf16 %v2245_v44, %v2245_v44  ;;  %v2177_v11 = vmax.f32 %v4054_v10, %v2145_v47  ;;  %v2146_v32 = vmax.f32 %v1679_v14, %v2001_v17  ;;  %v4058_v10 = vmax.f32 %v3655_v36, %v3657_v37 }
 0x172   : > { %2408 = vst.msk [vmem:[%s3817_s25 + $0xc] sm:$0xf] %vm2404_vm3, %v2826_v50  ;;  %v2218_v12 = vadd.f32 %v3797_v35, %v2179_v20  ;;  %v2180_v21 = vmax.f32 %v4055_v13, %v2148_v23  ;;  %v4059_v13 = vmax.f32 %v3661_v39, %v3663_v40 }
 0x173   : > { %2406 = vst.msk [vmem:[%s3817_s25 + $0x4] sm:$0xf] %vm2404_vm3, %v2824_v9  ;;  %v2216_v22 = vadd.f32 %v3797_v35, %v2177_v11  ;;  %v2178_v16 = vmax.f32 %v4056_v15, %v2146_v32 }
 0x174   : > { %v2250_v26 = vmax.f32 %v2218_v12, 0.0  ;;  %v2219_v24 = vadd.f32 %v3797_v35, %v2180_v21  ;;  %v4060_v21 = vmax.f32 %v3667_v42, %v3669_v43 }
 0x175   : > { %v2248_v25 = vmax.f32 %v2216_v22, 0.0  ;;  %v2217_v29 = vadd.f32 %v3797_v35, %v2178_v16  ;;  %v3043_v18 = vpop.f32.mrb[40].mxu0  ;;  %v3085_v19 = vpop.f32.mrb[40].mxu1 }
 0x176   : > { %v2829_v38 = vpack.c.bf16 %v2250_v26, %v2250_v26  ;;  %v2251_v27 = vmax.f32 %v2219_v24, 0.0  ;;  %v2151_v28 = vmax.f32 %v3043_v18, %v3085_v19  ;;  %v1692_v41 = vpop.f32.mrb[41].mxu0  ;;  %v2014_v44 = vpop.f32.mrb[41].mxu1 }
 0x177   : > { %v2827_v47 = vpack.c.bf16 %v2248_v25, %v2248_v25  ;;  %v2249_v1 = vmax.f32 %v2217_v29, 0.0  ;;  %v2149_v30 = vmax.f32 %v1692_v41, %v2014_v44  ;;  %v3044_v31 = vpop.f32.mrb[42].mxu0  ;;  %v3086_v4 = vpop.f32.mrb[42].mxu1  ;;  %v4061_v41 = vmax.f32 %v3673_v45, %v3675_v46 }
 0x178   : > { %2411 = vst.msk [vmem:[%s3817_s25 + $0x18] sm:$0xf] %vm2404_vm3, %v2829_v38  ;;  %v2830_v50 = vpack.c.bf16 %v2251_v27, %v2251_v27  ;;  %v2183_v20 = vmax.f32 %v4057_v7, %v2151_v28  ;;  %v2152_v23 = vmax.f32 %v3044_v31, %v3086_v4  ;;  %v1695_v14 = vpop.f32.mrb[43].mxu0  ;;  %v2017_v17 = vpop.f32.mrb[43].mxu1  ;;  %v4062_v4 = vmax.f32 %v3679_v48, %v3681_v49 }
 0x179   : > { %2409 = vst.msk [vmem:[%s3817_s25 + $0x10] sm:$0xf] %vm2404_vm3, %v2827_v47  ;;  %v2828_v9 = vpack.c.bf16 %v2249_v1, %v2249_v1  ;;  %v2181_v11 = vmax.f32 %v4058_v10, %v2149_v30  ;;  %v2150_v32 = vmax.f32 %v1695_v14, %v2017_v17  ;;  %v4064_v14 = vmax.f32 %v3691_v54, %v3693_v55 }
 0x17a   : > { %2412 = vst.msk [vmem:[%s3817_s25 + $0x1c] sm:$0xf] %vm2404_vm3, %v2830_v50  ;;  %v2222_v12 = vadd.f32 %v3797_v35, %v2183_v20  ;;  %v2184_v33 = vmax.f32 %v4059_v13, %v2152_v23  ;;  %v4063_v23 = vmax.f32 %v3685_v51, %v3687_v52 }
 0x17b   : > { %2410 = vst.msk [vmem:[%s3817_s25 + $0x14] sm:$0xf] %vm2404_vm3, %v2828_v9  ;;  %v2220_v34 = vadd.f32 %v3797_v35, %v2181_v11  ;;  %v2182_v22 = vmax.f32 %v4060_v21, %v2150_v32 }
 0x17c   : > { %v2254_v15 = vmax.f32 %v2222_v12, 0.0  ;;  %v2223_v36 = vadd.f32 %v3797_v35, %v2184_v33 }
 0x17d   : > { %v2252_v37 = vmax.f32 %v2220_v34, 0.0  ;;  %v2221_v16 = vadd.f32 %v3797_v35, %v2182_v22  ;;  %v3047_v26 = vpop.f32.mrb[44].mxu0  ;;  %v3089_v24 = vpop.f32.mrb[44].mxu1 }
 0x17e   : > { %v2833_v25 = vpack.c.bf16 %v2254_v15, %v2254_v15  ;;  %v2255_v39 = vmax.f32 %v2223_v36, 0.0  ;;  %v2155_v40 = vmax.f32 %v3047_v26, %v3089_v24  ;;  %v1708_v29 = vpop.f32.mrb[45].mxu0  ;;  %v2030_v18 = vpop.f32.mrb[45].mxu1  ;;  %v4065_v36 = vmax.f32 %v3697_v57, %v3699_v58 }
 0x17f   : > { %v2831_v19 = vpack.c.bf16 %v2252_v37, %v2252_v37  ;;  %v2253_v38 = vmax.f32 %v2221_v16, 0.0  ;;  %v2153_v42 = vmax.f32 %v1708_v29, %v2030_v18  ;;  %v3048_v43 = vpop.f32.mrb[46].mxu0  ;;  %v3090_v27 = vpop.f32.mrb[46].mxu1 }
 0x180   : > { %2415 = vst.msk [vmem:[%s3817_s25 + $0x28] sm:$0xf] %vm2404_vm3, %v2833_v25  ;;  %v2834_v28 = vpack.c.bf16 %v2255_v39, %v2255_v39  ;;  %v2187_v44 = vmax.f32 %v4061_v41, %v2155_v40  ;;  %v2156_v47 = vmax.f32 %v3048_v43, %v3090_v27  ;;  %v1711_v1 = vpop.f32.mrb[47].mxu0  ;;  %v2033_v30 = vpop.f32.mrb[47].mxu1  ;;  %v4066_v39 = vmax.f32 %v3703_v60, %v3705_v61 }
 0x181   : > { %2413 = vst.msk [vmem:[%s3817_s25 + $0x20] sm:$0xf] %vm2404_vm3, %v2831_v19  ;;  %v2832_v31 = vpack.c.bf16 %v2253_v38, %v2253_v38  ;;  %v2185_v50 = vmax.f32 %v4062_v4, %v2153_v42  ;;  %v2154_v7 = vmax.f32 %v1711_v1, %v2033_v30  ;;  %v4067_v19 = vmax.f32 %v3709_v63, %v3711_v0 }
 0x182   : > { %2416 = vst.msk [vmem:[%s3817_s25 + $0x2c] sm:$0xf] %vm2404_vm3, %v2834_v28  ;;  %v2226_v20 = vadd.f32 %v3797_v35, %v2187_v44  ;;  %v2188_v45 = vmax.f32 %v4063_v23, %v2156_v47  ;;  %v4068_v38 = vmax.f32 %v3715_v2, %v3717_v3 }
 0x183   : > { %2414 = vst.msk [vmem:[%s3817_s25 + $0x24] sm:$0xf] %vm2404_vm3, %v2832_v31  ;;  %v2224_v46 = vadd.f32 %v3797_v35, %v2185_v50  ;;  %v2186_v17 = vmax.f32 %v4064_v14, %v2154_v7  ;;  %v4069_v7 = vmax.f32 %v3721_v5, %v3723_v6 }
 0x184   : > { %v2258_v9 = vmax.f32 %v2226_v20, 0.0  ;;  %v2227_v48 = vadd.f32 %v3797_v35, %v2188_v45 }
 0x185   : > { %v2256_v49 = vmax.f32 %v2224_v46, 0.0  ;;  %v2225_v10 = vadd.f32 %v3797_v35, %v2186_v17  ;;  %v3051_v11 = vpop.f32.mrb[48].mxu0  ;;  %v3093_v32 = vpop.f32.mrb[48].mxu1  ;;  %v4070_v17 = vmax.f32 %v3727_v8, %v3729_v62 }
 0x186   : > { %v2837_v12 = vpack.c.bf16 %v2258_v9, %v2258_v9  ;;  %v2259_v51 = vmax.f32 %v2227_v48, 0.0  ;;  %v2159_v52 = vmax.f32 %v3051_v11, %v3093_v32  ;;  %v1724_v13 = vpop.f32.mrb[49].mxu0  ;;  %v2046_v33 = vpop.f32.mrb[49].mxu1  ;;  %v4072_v11 = vld [vmem:[#allocation3_spill] sm:$0xff] }
 0x187   : > { %v2835_v34 = vpack.c.bf16 %v2256_v49, %v2256_v49  ;;  %v2257_v21 = vmax.f32 %v2225_v10, 0.0  ;;  %v2157_v54 = vmax.f32 %v1724_v13, %v2046_v33  ;;  %v3052_v55 = vpop.f32.mrb[50].mxu0  ;;  %v3094_v22 = vpop.f32.mrb[50].mxu1  ;;  %v4071_v10 = vmax.f32 %v3733_v59, %v3735_v56 }
 0x188   : > { %2419 = vst.msk [vmem:[%s3817_s25 + $0x38] sm:$0xf] %vm2404_vm3, %v2837_v12  ;;  %v2838_v15 = vpack.c.bf16 %v2259_v51, %v2259_v51  ;;  %v2191_v37 = vmax.f32 %v4065_v36, %v2159_v52  ;;  %v2160_v16 = vmax.f32 %v3052_v55, %v3094_v22  ;;  %v1727_v26 = vpop.f32.mrb[51].mxu0  ;;  %v2049_v24 = vpop.f32.mrb[51].mxu1  ;;  %v4073_v32 = vmax.f32 %v3739_v53, %v4072_v11 }
 0x189   : > { %2417 = vst.msk [vmem:[%s3817_s25 + $0x30] sm:$0xf] %vm2404_vm3, %v2835_v34  ;;  %v2836_v25 = vpack.c.bf16 %v2257_v21, %v2257_v21  ;;  %v2189_v40 = vmax.f32 %v4066_v39, %v2157_v54  ;;  %v2158_v29 = vmax.f32 %v1727_v26, %v2049_v24  ;;  %v4075_v26 = vld [vmem:[#allocation5_spill] sm:$0xff] }
 0x18a   : > { %2420 = vst.msk [vmem:[%s3817_s25 + $0x3c] sm:$0xf] %vm2404_vm3, %v2838_v15  ;;  %v2230_v18 = vadd.f32 %v3797_v35, %v2191_v37  ;;  %v2192_v57 = vmax.f32 %v4067_v19, %v2160_v16  ;;  %v4074_v16 = vld [vmem:[#allocation4_spill] sm:$0xff]  ;;  %v4077_v19 = vld [vmem:[#allocation6_spill] sm:$0xff] }
 0x18b   : > { %2418 = vst.msk [vmem:[%s3817_s25 + $0x34] sm:$0xf] %vm2404_vm3, %v2836_v25  ;;  %v2228_v58 = vadd.f32 %v3797_v35, %v2189_v40  ;;  %v2190_v42 = vmax.f32 %v4068_v38, %v2158_v29  ;;  %v4076_v24 = vmax.f32 %v4074_v16, %v4075_v26 }
 0x18c   : > { %v2262_v43 = vmax.f32 %v2230_v18, 0.0  ;;  %v2231_v60 = vadd.f32 %v3797_v35, %v2192_v57  ;;  %v4078_v57 = vld [vmem:[#allocation7_spill] sm:$0xff] }
 0x18d   : > { %v2260_v61 = vmax.f32 %v2228_v58, 0.0  ;;  %v2229_v27 = vadd.f32 %v3797_v35, %v2190_v42  ;;  %v3055_v28 = vpop.f32.mrb[52].mxu0  ;;  %v3097_v41 = vpop.f32.mrb[52].mxu1  ;;  %v4079_v58 = vmax.f32 %v4077_v19, %v4078_v57 }
 0x18e   : > { %v2841_v44 = vpack.c.bf16 %v2262_v43, %v2262_v43  ;;  %v2263_v63 = vmax.f32 %v2231_v60, 0.0  ;;  %v2163_v0 = vmax.f32 %v3055_v28, %v3097_v41  ;;  %v1740_v47 = vpop.f32.mrb[53].mxu0  ;;  %v2062_v1 = vpop.f32.mrb[53].mxu1  ;;  %v4080_v60 = vld [vmem:[#allocation8_spill] sm:$0xff] }
 0x18f   : > { %v2839_v30 = vpack.c.bf16 %v2260_v61, %v2260_v61  ;;  %v2261_v31 = vmax.f32 %v2229_v27, 0.0  ;;  %v2161_v2 = vmax.f32 %v1740_v47, %v2062_v1  ;;  %v3056_v3 = vpop.f32.mrb[54].mxu0  ;;  %v3098_v4 = vpop.f32.mrb[54].mxu1  ;;  %v4081_v61 = vld [vmem:[#allocation9_spill] sm:$0xff] }
 0x190   : > { %2423 = vst.msk [vmem:[%s3817_s25 + $0x48] sm:$0xf] %vm2404_vm3, %v2841_v44  ;;  %v2842_v50 = vpack.c.bf16 %v2263_v63, %v2263_v63  ;;  %v2195_v20 = vmax.f32 %v4069_v7, %v2163_v0  ;;  %v2164_v23 = vmax.f32 %v3056_v3, %v3098_v4  ;;  %v1743_v45 = vpop.f32.mrb[55].mxu0  ;;  %v2065_v46 = vpop.f32.mrb[55].mxu1  ;;  %v4082_v27 = vmax.f32 %v4080_v60, %v4081_v61  ;;  %v4083_v44 = vld [vmem:[#allocation10_spill] sm:$0xff]  ;;  %v4084_v63 = vld [vmem:[#allocation11_spill] sm:$0xff] }
 0x191   : > { %2421 = vst.msk [vmem:[%s3817_s25 + $0x40] sm:$0xf] %vm2404_vm3, %v2839_v30  ;;  %v2840_v14 = vpack.c.bf16 %v2261_v31, %v2261_v31  ;;  %v2193_v9 = vmax.f32 %v4070_v17, %v2161_v2  ;;  %v2162_v48 = vmax.f32 %v1743_v45, %v2065_v46  ;;  %v4085_v0 = vmax.f32 %v4083_v44, %v4084_v63 }
 0x192   : > { %2424 = vst.msk [vmem:[%s3817_s25 + $0x4c] sm:$0xf] %vm2404_vm3, %v2842_v50  ;;  %v2234_v49 = vadd.f32 %v3797_v35, %v2195_v20  ;;  %v2196_v5 = vmax.f32 %v4071_v10, %v2164_v23  ;;  %v4086_v10 = vld [vmem:[#allocation12_spill] sm:$0xff] }
 0x193   : > { %2422 = vst.msk [vmem:[%s3817_s25 + $0x44] sm:$0xf] %vm2404_vm3, %v2840_v14  ;;  %v2232_v6 = vadd.f32 %v3797_v35, %v2193_v9  ;;  %v2194_v12 = vmax.f32 %v4073_v32, %v2162_v48 }
 0x194   : > { %v2266_v51 = vmax.f32 %v2234_v49, 0.0  ;;  %v2235_v62 = vadd.f32 %v3797_v35, %v2196_v5  ;;  %v4087_v5 = vld [vmem:[#allocation13_spill] sm:$0xff] }
 0x195   : > { %v2264_v8 = vmax.f32 %v2232_v6, 0.0  ;;  %v2233_v52 = vadd.f32 %v3797_v35, %v2194_v12  ;;  %v3059_v13 = vpop.f32.mrb[56].mxu0  ;;  %v3101_v33 = vpop.f32.mrb[56].mxu1  ;;  %v4088_v6 = vmax.f32 %v4086_v10, %v4087_v5 }
 0x196   : > { %v2845_v34 = vpack.c.bf16 %v2266_v51, %v2266_v51  ;;  %v2267_v56 = vmax.f32 %v2235_v62, 0.0  ;;  %v2167_v59 = vmax.f32 %v3059_v13, %v3101_v33  ;;  %v1756_v21 = vpop.f32.mrb[57].mxu0  ;;  %v2078_v54 = vpop.f32.mrb[57].mxu1 }
 0x197   : > { %v2843_v55 = vpack.c.bf16 %v2264_v8, %v2264_v8  ;;  %v2265_v22 = vmax.f32 %v2233_v52, 0.0  ;;  %v2165_v53 = vmax.f32 %v1756_v21, %v2078_v54  ;;  %v3060_v15 = vpop.f32.mrb[58].mxu0  ;;  %v3102_v36 = vpop.f32.mrb[58].mxu1  ;;  %v4089_v8 = vld [vmem:[#allocation14_spill] sm:$0xff]  ;;  %v4090_v52 = vld [vmem:[#allocation15_spill] sm:$0xff]  ;;  %v4093_v21 = vld [vmem:[#allocation17_spill] sm:$0xff] }
 0x198   : > { %2427 = vst.msk [vmem:[%s3817_s25 + $0x58] sm:$0xf] %vm2404_vm3, %v2845_v34  ;;  %v2846_v37 = vpack.c.bf16 %v2267_v56, %v2267_v56  ;;  %v2199_v25 = vmax.f32 %v4076_v24, %v2167_v59  ;;  %v2168_v39 = vmax.f32 %v3060_v15, %v3102_v36  ;;  %v1759_v40 = vpop.f32.mrb[59].mxu0  ;;  %v2081_v29 = vpop.f32.mrb[59].mxu1  ;;  %v4091_v13 = vmax.f32 %v4089_v8, %v4090_v52  ;;  %v4092_v59 = vld [vmem:[#allocation16_spill] sm:$0xff]  ;;  %v4096_v15 = vld [vmem:[#allocation19_spill] sm:$0xff] }
 0x199   : > { %2425 = vst.msk [vmem:[%s3817_s25 + $0x50] sm:$0xf] %vm2404_vm3, %v2843_v55  ;;  %v2844_v18 = vpack.c.bf16 %v2265_v22, %v2265_v22  ;;  %v2197_v38 = vmax.f32 %v4079_v58, %v2165_v53  ;;  %v2166_v42 = vmax.f32 %v1759_v40, %v2081_v29  ;;  %v4094_v54 = vmax.f32 %v4092_v59, %v4093_v21  ;;  %v4095_v53 = vld [vmem:[#allocation18_spill] sm:$0xff] }
 0x19a   : > { %2428 = vst.msk [vmem:[%s3817_s25 + $0x5c] sm:$0xf] %vm2404_vm3, %v2846_v37  ;;  %v2238_v43 = vadd.f32 %v3797_v35, %v2199_v25  ;;  %v2200_v28 = vmax.f32 %v4082_v27, %v2168_v39  ;;  %v4097_v36 = vmax.f32 %v4095_v53, %v4096_v15 }
 0x19b   : > { %2426 = vst.msk [vmem:[%s3817_s25 + $0x54] sm:$0xf] %vm2404_vm3, %v2844_v18  ;;  %v2236_v41 = vadd.f32 %v3797_v35, %v2197_v38  ;;  %v2198_v47 = vmax.f32 %v4085_v0, %v2166_v42 }
 0x19c   : > { %v2270_v1 = vmax.f32 %v2238_v43, 0.0  ;;  %v2239_v30 = vadd.f32 %v3797_v35, %v2200_v28 }
 0x19d   : > { %v2268_v31 = vmax.f32 %v2236_v41, 0.0  ;;  %v2237_v2 = vadd.f32 %v3797_v35, %v2198_v47  ;;  %v3063_v3 = vpop.f32.mrb[60].mxu0  ;;  %v3105_v4 = vpop.f32.mrb[60].mxu1 }
 0x19e   : > { %v2849_v50 = vpack.c.bf16 %v2270_v1, %v2270_v1  ;;  %v2271_v7 = vmax.f32 %v2239_v30, 0.0  ;;  %v2171_v20 = vmax.f32 %v3063_v3, %v3105_v4  ;;  %v1772_v23 = vpop.f32.mrb[61].mxu0  ;;  %v2094_v45 = vpop.f32.mrb[61].mxu1 }
 0x19f   : > { %v2847_v46 = vpack.c.bf16 %v2268_v31, %v2268_v31  ;;  %v2269_v14 = vmax.f32 %v2237_v2, 0.0  ;;  %v2169_v17 = vmax.f32 %v1772_v23, %v2094_v45  ;;  %v3064_v9 = vpop.f32.mrb[62].mxu0  ;;  %v3106_v48 = vpop.f32.mrb[62].mxu1 }
 0x1a0   : > { %2431 = vst.msk [vmem:[%s3817_s25 + $0x68] sm:$0xf] %vm2404_vm3, %v2849_v50  ;;  %v2850_v49 = vpack.c.bf16 %v2271_v7, %v2271_v7  ;;  %v2203_v11 = vmax.f32 %v4088_v6, %v2171_v20  ;;  %v2172_v32 = vmax.f32 %v3064_v9, %v3106_v48  ;;  %v1775_v12 = vpop.f32.mrb[63].mxu0  ;;  %v2097_v51 = vpop.f32.mrb[63].mxu1 }
 0x1a1   : > { %2429 = vst.msk [vmem:[%s3817_s25 + $0x60] sm:$0xf] %vm2404_vm3, %v2847_v46  ;;  %v2848_v62 = vpack.c.bf16 %v2269_v14, %v2269_v14  ;;  %v2201_v33 = vmax.f32 %v4091_v13, %v2169_v17  ;;  %v2170_v34 = vmax.f32 %v1775_v12, %v2097_v51 }
 0x1a2   : > { %2432 = vst.msk [vmem:[%s3817_s25 + $0x6c] sm:$0xf] %vm2404_vm3, %v2850_v49  ;;  %v2242_v56 = vadd.f32 %v3797_v35, %v2203_v11  ;;  %v2204_v55 = vmax.f32 %v4094_v54, %v2172_v32 }
 0x1a3   : > { %2430 = vst.msk [vmem:[%s3817_s25 + $0x64] sm:$0xf] %vm2404_vm3, %v2848_v62  ;;  %v2240_v22 = vadd.f32 %v3797_v35, %v2201_v33  ;;  %v2202_v37 = vmax.f32 %v4097_v36, %v2170_v34 }
 0x1a4   : > { %v2274_v16 = vmax.f32 %v2242_v56, 0.0  ;;  %v2243_v26 = vadd.f32 %v3797_v35, %v2204_v55 }
 0x1a5   : > { %v2272_v24 = vmax.f32 %v2240_v22, 0.0  ;;  %v2241_v25 = vadd.f32 %v3797_v35, %v2202_v37 }
 0x1a6   : > { %v2853_v39 = vpack.c.bf16 %v2274_v16, %v2274_v16  ;;  %v2275_v40 = vmax.f32 %v2243_v26, 0.0 }
 0x1a7   : > { %v2851_v29 = vpack.c.bf16 %v2272_v24, %v2272_v24  ;;  %v2273_v18 = vmax.f32 %v2241_v25, 0.0 }
 0x1a8   : > { %2435 = vst.msk [vmem:[%s3817_s25 + $0x78] sm:$0xf] %vm2404_vm3, %v2853_v39  ;;  %v2854_v19 = vpack.c.bf16 %v2275_v40, %v2275_v40 }
 0x1a9   : > { %2433 = vst.msk [vmem:[%s3817_s25 + $0x70] sm:$0xf] %vm2404_vm3, %v2851_v29  ;;  %v2852_v57 = vpack.c.bf16 %v2273_v18, %v2273_v18 }
 0x1aa   : > { %2436 = vst.msk [vmem:[%s3817_s25 + $0x7c] sm:$0xf] %vm2404_vm3, %v2854_v19 }
 0x1ab   : > { %2434 = vst.msk [vmem:[%s3817_s25 + $0x74] sm:$0xf] %vm2404_vm3, %v2852_v57 }
 0x1ac PF: > { %s13_s16 = sadd.s32 1, %s3255_s16   ;;  %s4098_s12 = smov %s3243_s13 }
 0x1ad   : > { %p10_p10 = scmp.ge.s32.totalorder %s13_s16, 4   ;;  %s4099_s13 = smov %s3313_s20 }
 0x1ae   : > { %s4100_s14 = smov %s3251_s15  ;;  %s4101_s15 = smov %s4103_s17 }
 0x1af   :  { %12 = sbr.rel (!%p10_p10) target bundleno = 3 (0x3), region = 117 }

// kernel: convnet_forward.5
= control target key start
LH: loop header
LB: loop body
LE: loop exit
PB: predicated region body
PF: predicated region fallthrough
CT: control target
= control target key end

     0   :  { %s4173_s12 = smov 0   ;;  %s4175_s13 = smov 0   ;;  %s5319_s0 = inlined_call_operand.vmem [shape: bf16[4,128,800], index: 0, kind: input, shape index: {}]   ;;  %s5320_s1 = inlined_call_operand.vmem [shape: bf16[800,64], index: 1, kind: input, shape index: {}]   ;;  %s5321_s2 = inlined_call_operand.vmem [shape: f32[1,64], index: 2, kind: input, shape index: {}]   ;;  %s5322_s3 = inlined_call_operand.vmem [shape: bf16[128,64], index: 3, kind: output, shape index: {}]  }
   0x1   :  { %s4177_s14 = smov 0   ;;  %s4179_s15 = smov 0  }
   0x2   :  { %s4181_s16 = smov 0  }
   0x3 LB: > { %s25_s17 = sadd.s32 1, %s4147_s15  ;;  %p39_p1 = scmp.ne.s32.totalorder %s4139_s13, %s4135_s12  ;;  %s4151_s16 = sphi %s4181_s16, %s13_s16   ;;  %s4147_s15 = sphi %s4179_s15, %s5326_s15   ;;  %s4143_s14 = sphi %s4177_s14, %s5325_s14   ;;  %s4139_s13 = sphi %s4175_s13, %s5324_s13   ;;  %s4135_s12 = sphi %s4173_s12, %s5323_s12  }
   0x4   : > { %p27_p0 = scmp.ge.s32.totalorder %s25_s17, 2  ;;  %p40_p2 = scmp.eq.s32.totalorder %s4151_s16, 0 }
   0x5   : > { %s32_s19 = sadd.s32 1, %s4139_s13  ;;  %p2894_p5 = scmp.ge.s32.totalorder %s4151_s16, 2 }
   0x6   : > { %s5328_s17 = smov (%p27_p0, %s25_s17), 0  ;;  %p41_p3 = por %p40_p2, %p39_p1 }
   0x7   : > { %s29_s18 = ssub.s32 %s4147_s15, %s5328_s17  ;;  %158 = sbr.rel (%p2894_p5) target bundleno = 88 (0x58), region = 24 }
   0x8   : > { %p30_p4 = scmp.eq.s32.totalorder %s29_s18, 0 }
   0xa   : > { %s4208_s20 = scalar_select %p30_p4, %s4139_s13, %s32_s19  }
   0xe   : > { %161 = sbr.rel (!%p41_p3) target bundleno = 88 (0x58), region = 28  ;;  %s163_s21 = sand.u32 (%p41_p3), 1, %s4139_s13  }
   0xf   : > { %s3827_s22 = smul.u32 (%p41_p3), 224, %s4147_s15 }
  0x10   : > { %s3826_s23 = smul.u32 (%p41_p3), 896, %s163_s21 }
  0x11   : > { %s4216_s26 = scalar_lea.vmem (%p41_p3), %s5319_s0, %s3827_s22 }
  0x12   : > { %v184_v0 = vld [vmem:[%s4216_s26] sm:$0xff] (%p41_p3)  ;;  %v186_v1 = vld [vmem:[%s4216_s26 + $0x8] sm:$0xff] (%p41_p3)  ;;  %v188_v2 = vld [vmem:[%s4216_s26 + $0x10] sm:$0xff] (%p41_p3)  ;;  %s4221_s27 = scalar_lea.vmem (%p41_p3), [#allocation2], %s3826_s23 }
  0x13   : > { %185 = vst [vmem:[%s4221_s27] sm:$0xff] (%p41_p3), %v184_v0  ;;  %187 = vst [vmem:[%s4221_s27 + $0x8] sm:$0xff] (%p41_p3), %v186_v1  ;;  %v190_v3 = vld [vmem:[%s4216_s26 + $0x1c] sm:$0xff] (%p41_p3)  ;;  %v192_v4 = vld [vmem:[%s4216_s26 + $0x24] sm:$0xff] (%p41_p3) }
  0x14   : > { %189 = vst [vmem:[%s4221_s27 + $0x10] sm:$0xff] (%p41_p3), %v188_v2  ;;  %v194_v5 = vld [vmem:[%s4216_s26 + $0x2c] sm:$0xff] (%p41_p3)  ;;  %191 = vst [vmem:[%s4221_s27 + $0x1c] sm:$0xff] (%p41_p3), %v190_v3  ;;  %v196_v6 = vld [vmem:[%s4216_s26 + $0x38] sm:$0xff] (%p41_p3) }
  0x15   : > { %193 = vst [vmem:[%s4221_s27 + $0x24] sm:$0xff] %v192_v4  ;;  %195 = vst [vmem:[%s4221_s27 + $0x2c] sm:$0xff] %v194_v5  ;;  %v198_v7 = vld [vmem:[%s4216_s26 + $0x40] sm:$0xff]  ;;  %v200_v8 = vld [vmem:[%s4216_s26 + $0x48] sm:$0xff] }
  0x16   : > { %197 = vst [vmem:[%s4221_s27 + $0x38] sm:$0xff] %v196_v6  ;;  %199 = vst [vmem:[%s4221_s27 + $0x40] sm:$0xff] %v198_v7  ;;  %v202_v9 = vld [vmem:[%s4216_s26 + $0x54] sm:$0xff]  ;;  %v204_v10 = vld [vmem:[%s4216_s26 + $0x5c] sm:$0xff] }
  0x17   : > { %201 = vst [vmem:[%s4221_s27 + $0x48] sm:$0xff] %v200_v8  ;;  %v206_v11 = vld [vmem:[%s4216_s26 + $0x64] sm:$0xff]  ;;  %203 = vst [vmem:[%s4221_s27 + $0x54] sm:$0xff] %v202_v9  ;;  %v208_v12 = vld [vmem:[%s4216_s26 + $0x70] sm:$0xff] }
  0x18   : > { %205 = vst [vmem:[%s4221_s27 + $0x5c] sm:$0xff] %v204_v10  ;;  %207 = vst [vmem:[%s4221_s27 + $0x64] sm:$0xff] %v206_v11  ;;  %v210_v13 = vld [vmem:[%s4216_s26 + $0x78] sm:$0xff]  ;;  %v212_v14 = vld [vmem:[%s4216_s26 + $0x80] sm:$0xff] }
  0x19   : > { %209 = vst [vmem:[%s4221_s27 + $0x70] sm:$0xff] %v208_v12  ;;  %211 = vst [vmem:[%s4221_s27 + $0x78] sm:$0xff] %v210_v13  ;;  %v214_v15 = vld [vmem:[%s4216_s26 + $0x8c] sm:$0xff]  ;;  %v216_v16 = vld [vmem:[%s4216_s26 + $0x94] sm:$0xff] }
  0x1a   : > { %213 = vst [vmem:[%s4221_s27 + $0x80] sm:$0xff] %v212_v14  ;;  %v218_v17 = vld [vmem:[%s4216_s26 + $0x9c] sm:$0xff]  ;;  %215 = vst [vmem:[%s4221_s27 + $0x8c] sm:$0xff] %v214_v15  ;;  %v220_v18 = vld [vmem:[%s4216_s26 + $0xa8] sm:$0xff] }
  0x1b   : > { %217 = vst [vmem:[%s4221_s27 + $0x94] sm:$0xff] %v216_v16  ;;  %219 = vst [vmem:[%s4221_s27 + $0x9c] sm:$0xff] %v218_v17  ;;  %v222_v19 = vld [vmem:[%s4216_s26 + $0xb0] sm:$0xff]  ;;  %v224_v20 = vld [vmem:[%s4216_s26 + $0xb8] sm:$0xff] }
  0x1c   : > { %221 = vst [vmem:[%s4221_s27 + $0xa8] sm:$0xff] %v220_v18  ;;  %223 = vst [vmem:[%s4221_s27 + $0xb0] sm:$0xff] %v222_v19  ;;  %v226_v21 = vld [vmem:[%s4216_s26 + $0xc4] sm:$0xff]  ;;  %v228_v22 = vld [vmem:[%s4216_s26 + $0xcc] sm:$0xff] }
  0x1d   : > { %225 = vst [vmem:[%s4221_s27 + $0xb8] sm:$0xff] %v224_v20  ;;  %v230_v23 = vld [vmem:[%s4216_s26 + $0xd4] sm:$0xff]  ;;  %227 = vst [vmem:[%s4221_s27 + $0xc4] sm:$0xff] %v226_v21  ;;  %v232_v24 = vld [vmem:[%s4216_s26 + $0x1c0] sm:$0xff] }
  0x1e   : > { %229 = vst [vmem:[%s4221_s27 + $0xcc] sm:$0xff] %v228_v22  ;;  %231 = vst [vmem:[%s4221_s27 + $0xd4] sm:$0xff] %v230_v23  ;;  %v234_v25 = vld [vmem:[%s4216_s26 + $0x1c8] sm:$0xff]  ;;  %v236_v26 = vld [vmem:[%s4216_s26 + $0x1d0] sm:$0xff] }
  0x1f   : > { %233 = vst [vmem:[%s4221_s27 + $0xe0] sm:$0xff] %v232_v24  ;;  %235 = vst [vmem:[%s4221_s27 + $0xe8] sm:$0xff] %v234_v25  ;;  %v238_v27 = vld [vmem:[%s4216_s26 + $0x1dc] sm:$0xff]  ;;  %v240_v28 = vld [vmem:[%s4216_s26 + $0x1e4] sm:$0xff] }
  0x20   : > { %237 = vst [vmem:[%s4221_s27 + $0xf0] sm:$0xff] %v236_v26  ;;  %v242_v29 = vld [vmem:[%s4216_s26 + $0x1ec] sm:$0xff]  ;;  %239 = vst [vmem:[%s4221_s27 + $0xfc] sm:$0xff] %v238_v27  ;;  %v244_v30 = vld [vmem:[%s4216_s26 + $0x1f8] sm:$0xff] }
  0x21   : > { %241 = vst [vmem:[%s4221_s27 + $0x104] sm:$0xff] %v240_v28  ;;  %243 = vst [vmem:[%s4221_s27 + $0x10c] sm:$0xff] %v242_v29  ;;  %v246_v31 = vld [vmem:[%s4216_s26 + $0x200] sm:$0xff]  ;;  %v248_v32 = vld [vmem:[%s4216_s26 + $0x208] sm:$0xff] }
  0x22   : > { %245 = vst [vmem:[%s4221_s27 + $0x118] sm:$0xff] %v244_v30  ;;  %247 = vst [vmem:[%s4221_s27 + $0x120] sm:$0xff] %v246_v31  ;;  %v250_v33 = vld [vmem:[%s4216_s26 + $0x214] sm:$0xff]  ;;  %v252_v34 = vld [vmem:[%s4216_s26 + $0x21c] sm:$0xff] }
  0x23   : > { %249 = vst [vmem:[%s4221_s27 + $0x128] sm:$0xff] %v248_v32  ;;  %v254_v35 = vld [vmem:[%s4216_s26 + $0x224] sm:$0xff]  ;;  %251 = vst [vmem:[%s4221_s27 + $0x134] sm:$0xff] %v250_v33  ;;  %v256_v36 = vld [vmem:[%s4216_s26 + $0x230] sm:$0xff] }
  0x24   : > { %253 = vst [vmem:[%s4221_s27 + $0x13c] sm:$0xff] %v252_v34  ;;  %255 = vst [vmem:[%s4221_s27 + $0x144] sm:$0xff] %v254_v35  ;;  %v258_v37 = vld [vmem:[%s4216_s26 + $0x238] sm:$0xff]  ;;  %v260_v38 = vld [vmem:[%s4216_s26 + $0x240] sm:$0xff] }
  0x25   : > { %257 = vst [vmem:[%s4221_s27 + $0x150] sm:$0xff] %v256_v36  ;;  %259 = vst [vmem:[%s4221_s27 + $0x158] sm:$0xff] %v258_v37  ;;  %v262_v39 = vld [vmem:[%s4216_s26 + $0x24c] sm:$0xff]  ;;  %v264_v40 = vld [vmem:[%s4216_s26 + $0x254] sm:$0xff] }
  0x26   : > { %261 = vst [vmem:[%s4221_s27 + $0x160] sm:$0xff] %v260_v38  ;;  %v266_v41 = vld [vmem:[%s4216_s26 + $0x25c] sm:$0xff]  ;;  %263 = vst [vmem:[%s4221_s27 + $0x16c] sm:$0xff] %v262_v39  ;;  %v268_v42 = vld [vmem:[%s4216_s26 + $0x268] sm:$0xff] }
  0x27   : > { %265 = vst [vmem:[%s4221_s27 + $0x174] sm:$0xff] %v264_v40  ;;  %267 = vst [vmem:[%s4221_s27 + $0x17c] sm:$0xff] %v266_v41  ;;  %v270_v43 = vld [vmem:[%s4216_s26 + $0x270] sm:$0xff]  ;;  %v272_v44 = vld [vmem:[%s4216_s26 + $0x278] sm:$0xff] }
  0x28   : > { %269 = vst [vmem:[%s4221_s27 + $0x188] sm:$0xff] %v268_v42  ;;  %271 = vst [vmem:[%s4221_s27 + $0x190] sm:$0xff] %v270_v43  ;;  %v274_v45 = vld [vmem:[%s4216_s26 + $0x284] sm:$0xff]  ;;  %v276_v46 = vld [vmem:[%s4216_s26 + $0x28c] sm:$0xff] }
  0x29   : > { %273 = vst [vmem:[%s4221_s27 + $0x198] sm:$0xff] %v272_v44  ;;  %v278_v47 = vld [vmem:[%s4216_s26 + $0x294] sm:$0xff]  ;;  %275 = vst [vmem:[%s4221_s27 + $0x1a4] sm:$0xff] %v274_v45  ;;  %v280_v48 = vld [vmem:[%s4216_s26 + $0x380] sm:$0xff] }
  0x2a   : > { %277 = vst [vmem:[%s4221_s27 + $0x1ac] sm:$0xff] %v276_v46  ;;  %279 = vst [vmem:[%s4221_s27 + $0x1b4] sm:$0xff] %v278_v47  ;;  %v282_v49 = vld [vmem:[%s4216_s26 + $0x388] sm:$0xff]  ;;  %v284_v50 = vld [vmem:[%s4216_s26 + $0x390] sm:$0xff] }
  0x2b   : > { %281 = vst [vmem:[%s4221_s27 + $0x1c0] sm:$0xff] %v280_v48  ;;  %283 = vst [vmem:[%s4221_s27 + $0x1c8] sm:$0xff] %v282_v49  ;;  %v286_v51 = vld [vmem:[%s4216_s26 + $0x39c] sm:$0xff]  ;;  %v288_v52 = vld [vmem:[%s4216_s26 + $0x3a4] sm:$0xff] }
  0x2c   : > { %285 = vst [vmem:[%s4221_s27 + $0x1d0] sm:$0xff] %v284_v50  ;;  %v290_v53 = vld [vmem:[%s4216_s26 + $0x3ac] sm:$0xff]  ;;  %287 = vst [vmem:[%s4221_s27 + $0x1dc] sm:$0xff] %v286_v51  ;;  %v292_v54 = vld [vmem:[%s4216_s26 + $0x3b8] sm:$0xff] }
  0x2d   : > { %289 = vst [vmem:[%s4221_s27 + $0x1e4] sm:$0xff] %v288_v52  ;;  %291 = vst [vmem:[%s4221_s27 + $0x1ec] sm:$0xff] %v290_v53  ;;  %v294_v55 = vld [vmem:[%s4216_s26 + $0x3c0] sm:$0xff]  ;;  %v296_v56 = vld [vmem:[%s4216_s26 + $0x3c8] sm:$0xff] }
  0x2e   : > { %293 = vst [vmem:[%s4221_s27 + $0x1f8] sm:$0xff] %v292_v54  ;;  %295 = vst [vmem:[%s4221_s27 + $0x200] sm:$0xff] %v294_v55  ;;  %v298_v57 = vld [vmem:[%s4216_s26 + $0x3d4] sm:$0xff]  ;;  %v300_v58 = vld [vmem:[%s4216_s26 + $0x3dc] sm:$0xff] }
  0x2f   : > { %297 = vst [vmem:[%s4221_s27 + $0x208] sm:$0xff] %v296_v56  ;;  %v302_v59 = vld [vmem:[%s4216_s26 + $0x3e4] sm:$0xff]  ;;  %299 = vst [vmem:[%s4221_s27 + $0x214] sm:$0xff] %v298_v57  ;;  %v304_v60 = vld [vmem:[%s4216_s26 + $0x3f0] sm:$0xff] }
  0x30   : > { %301 = vst [vmem:[%s4221_s27 + $0x21c] sm:$0xff] %v300_v58  ;;  %303 = vst [vmem:[%s4221_s27 + $0x224] sm:$0xff] %v302_v59  ;;  %v306_v61 = vld [vmem:[%s4216_s26 + $0x3f8] sm:$0xff]  ;;  %v308_v62 = vld [vmem:[%s4216_s26 + $0x400] sm:$0xff] }
  0x31   : > { %305 = vst [vmem:[%s4221_s27 + $0x230] sm:$0xff] %v304_v60  ;;  %307 = vst [vmem:[%s4221_s27 + $0x238] sm:$0xff] %v306_v61  ;;  %v310_v63 = vld [vmem:[%s4216_s26 + $0x40c] sm:$0xff]  ;;  %v312_v0 = vld [vmem:[%s4216_s26 + $0x414] sm:$0xff] }
  0x32   : > { %309 = vst [vmem:[%s4221_s27 + $0x240] sm:$0xff] %v308_v62  ;;  %v314_v1 = vld [vmem:[%s4216_s26 + $0x41c] sm:$0xff]  ;;  %311 = vst [vmem:[%s4221_s27 + $0x24c] sm:$0xff] %v310_v63  ;;  %v316_v2 = vld [vmem:[%s4216_s26 + $0x428] sm:$0xff] }
  0x33   : > { %313 = vst [vmem:[%s4221_s27 + $0x254] sm:$0xff] %v312_v0  ;;  %315 = vst [vmem:[%s4221_s27 + $0x25c] sm:$0xff] %v314_v1  ;;  %v318_v3 = vld [vmem:[%s4216_s26 + $0x430] sm:$0xff]  ;;  %v320_v4 = vld [vmem:[%s4216_s26 + $0x438] sm:$0xff] }
  0x34   : > { %317 = vst [vmem:[%s4221_s27 + $0x268] sm:$0xff] %v316_v2  ;;  %319 = vst [vmem:[%s4221_s27 + $0x270] sm:$0xff] %v318_v3  ;;  %v322_v5 = vld [vmem:[%s4216_s26 + $0x444] sm:$0xff]  ;;  %v324_v6 = vld [vmem:[%s4216_s26 + $0x44c] sm:$0xff] }
  0x35   : > { %321 = vst [vmem:[%s4221_s27 + $0x278] sm:$0xff] %v320_v4  ;;  %v326_v7 = vld [vmem:[%s4216_s26 + $0x454] sm:$0xff]  ;;  %323 = vst [vmem:[%s4221_s27 + $0x284] sm:$0xff] %v322_v5  ;;  %v328_v8 = vld [vmem:[%s4216_s26 + $0x540] sm:$0xff] }
  0x36   : > { %325 = vst [vmem:[%s4221_s27 + $0x28c] sm:$0xff] %v324_v6  ;;  %327 = vst [vmem:[%s4221_s27 + $0x294] sm:$0xff] %v326_v7  ;;  %v330_v9 = vld [vmem:[%s4216_s26 + $0x548] sm:$0xff]  ;;  %v332_v10 = vld [vmem:[%s4216_s26 + $0x550] sm:$0xff] }
  0x37   : > { %329 = vst [vmem:[%s4221_s27 + $0x2a0] sm:$0xff] %v328_v8  ;;  %331 = vst [vmem:[%s4221_s27 + $0x2a8] sm:$0xff] %v330_v9  ;;  %v334_v11 = vld [vmem:[%s4216_s26 + $0x55c] sm:$0xff]  ;;  %v336_v12 = vld [vmem:[%s4216_s26 + $0x564] sm:$0xff] }
  0x38   : > { %333 = vst [vmem:[%s4221_s27 + $0x2b0] sm:$0xff] %v332_v10  ;;  %v338_v13 = vld [vmem:[%s4216_s26 + $0x56c] sm:$0xff]  ;;  %335 = vst [vmem:[%s4221_s27 + $0x2bc] sm:$0xff] %v334_v11  ;;  %v340_v14 = vld [vmem:[%s4216_s26 + $0x578] sm:$0xff] }
  0x39   : > { %337 = vst [vmem:[%s4221_s27 + $0x2c4] sm:$0xff] %v336_v12  ;;  %339 = vst [vmem:[%s4221_s27 + $0x2cc] sm:$0xff] %v338_v13  ;;  %v342_v15 = vld [vmem:[%s4216_s26 + $0x580] sm:$0xff]  ;;  %v344_v16 = vld [vmem:[%s4216_s26 + $0x588] sm:$0xff] }
  0x3a   : > { %341 = vst [vmem:[%s4221_s27 + $0x2d8] sm:$0xff] %v340_v14  ;;  %343 = vst [vmem:[%s4221_s27 + $0x2e0] sm:$0xff] %v342_v15  ;;  %v346_v17 = vld [vmem:[%s4216_s26 + $0x594] sm:$0xff]  ;;  %v348_v18 = vld [vmem:[%s4216_s26 + $0x59c] sm:$0xff] }
  0x3b   : > { %345 = vst [vmem:[%s4221_s27 + $0x2e8] sm:$0xff] %v344_v16  ;;  %v350_v19 = vld [vmem:[%s4216_s26 + $0x5a4] sm:$0xff]  ;;  %347 = vst [vmem:[%s4221_s27 + $0x2f4] sm:$0xff] %v346_v17  ;;  %v352_v20 = vld [vmem:[%s4216_s26 + $0x5b0] sm:$0xff] }
  0x3c   : > { %349 = vst [vmem:[%s4221_s27 + $0x2fc] sm:$0xff] %v348_v18  ;;  %351 = vst [vmem:[%s4221_s27 + $0x304] sm:$0xff] %v350_v19  ;;  %v354_v21 = vld [vmem:[%s4216_s26 + $0x5b8] sm:$0xff]  ;;  %v356_v22 = vld [vmem:[%s4216_s26 + $0x5c0] sm:$0xff] }
  0x3d   : > { %353 = vst [vmem:[%s4221_s27 + $0x310] sm:$0xff] %v352_v20  ;;  %355 = vst [vmem:[%s4221_s27 + $0x318] sm:$0xff] %v354_v21  ;;  %v358_v23 = vld [vmem:[%s4216_s26 + $0x5cc] sm:$0xff]  ;;  %v360_v24 = vld [vmem:[%s4216_s26 + $0x5d4] sm:$0xff] }
  0x3e   : > { %357 = vst [vmem:[%s4221_s27 + $0x320] sm:$0xff] %v356_v22  ;;  %v362_v25 = vld [vmem:[%s4216_s26 + $0x5dc] sm:$0xff]  ;;  %359 = vst [vmem:[%s4221_s27 + $0x32c] sm:$0xff] %v358_v23  ;;  %v364_v26 = vld [vmem:[%s4216_s26 + $0x5e8] sm:$0xff] }
  0x3f   : > { %361 = vst [vmem:[%s4221_s27 + $0x334] sm:$0xff] %v360_v24  ;;  %363 = vst [vmem:[%s4221_s27 + $0x33c] sm:$0xff] %v362_v25  ;;  %v366_v27 = vld [vmem:[%s4216_s26 + $0x5f0] sm:$0xff]  ;;  %v368_v28 = vld [vmem:[%s4216_s26 + $0x5f8] sm:$0xff] }
  0x40   : > { %365 = vst [vmem:[%s4221_s27 + $0x348] sm:$0xff] %v364_v26  ;;  %367 = vst [vmem:[%s4221_s27 + $0x350] sm:$0xff] %v366_v27  ;;  %v370_v29 = vld [vmem:[%s4216_s26 + $0x604] sm:$0xff]  ;;  %v372_v30 = vld [vmem:[%s4216_s26 + $0x60c] sm:$0xff] }
  0x41   : > { %369 = vst [vmem:[%s4221_s27 + $0x358] sm:$0xff] %v368_v28  ;;  %v374_v31 = vld [vmem:[%s4216_s26 + $0x614] sm:$0xff]  ;;  %371 = vst [vmem:[%s4221_s27 + $0x364] sm:$0xff] %v370_v29  ;;  %v2902_v34 = vld [vmem:[%s4216_s26 + $0x50] sm:$0xf] }
  0x42   : > { %373 = vst [vmem:[%s4221_s27 + $0x36c] sm:$0xff] %v372_v30  ;;  %375 = vst [vmem:[%s4221_s27 + $0x374] sm:$0xff] %v374_v31  ;;  %v2898_v32 = vld [vmem:[%s4216_s26 + $0x18] sm:$0xf]  ;;  %v2900_v33 = vld [vmem:[%s4216_s26 + $0x34] sm:$0xf] }
  0x43   : > { %2899 = vst [vmem:[%s4221_s27 + $0x18] sm:$0xf] %v2898_v32  ;;  %2901 = vst [vmem:[%s4221_s27 + $0x34] sm:$0xf] %v2900_v33  ;;  %v2904_v35 = vld [vmem:[%s4216_s26 + $0x6c] sm:$0xf] }
  0x44   : > { %2903 = vst [vmem:[%s4221_s27 + $0x50] sm:$0xf] %v2902_v34  ;;  %v2906_v36 = vld [vmem:[%s4216_s26 + $0x88] sm:$0xf]  ;;  %v2908_v37 = vld [vmem:[%s4216_s26 + $0xa4] sm:$0xf] }
  0x45   : > { %2905 = vst [vmem:[%s4221_s27 + $0x6c] sm:$0xf] %v2904_v35  ;;  %2907 = vst [vmem:[%s4221_s27 + $0x88] sm:$0xf] %v2906_v36  ;;  %v2910_v38 = vld [vmem:[%s4216_s26 + $0xc0] sm:$0xf] }
  0x46   : > { %2909 = vst [vmem:[%s4221_s27 + $0xa4] sm:$0xf] %v2908_v37  ;;  %v2912_v39 = vld [vmem:[%s4216_s26 + $0xdc] sm:$0xf]  ;;  %v2914_v40 = vld [vmem:[%s4216_s26 + $0x1d8] sm:$0xf] }
  0x47   : > { %2911 = vst [vmem:[%s4221_s27 + $0xc0] sm:$0xf] %v2910_v38  ;;  %2913 = vst [vmem:[%s4221_s27 + $0xdc] sm:$0xf] %v2912_v39  ;;  %v2916_v41 = vld [vmem:[%s4216_s26 + $0x1f4] sm:$0xf] }
  0x48   : > { %2915 = vst [vmem:[%s4221_s27 + $0xf8] sm:$0xf] %v2914_v40  ;;  %v2918_v42 = vld [vmem:[%s4216_s26 + $0x210] sm:$0xf]  ;;  %v2920_v43 = vld [vmem:[%s4216_s26 + $0x22c] sm:$0xf] }
  0x49   : > { %2917 = vst [vmem:[%s4221_s27 + $0x114] sm:$0xf] %v2916_v41  ;;  %2919 = vst [vmem:[%s4221_s27 + $0x130] sm:$0xf] %v2918_v42  ;;  %v2922_v44 = vld [vmem:[%s4216_s26 + $0x248] sm:$0xf] }
  0x4a   : > { %2921 = vst [vmem:[%s4221_s27 + $0x14c] sm:$0xf] %v2920_v43  ;;  %v2924_v45 = vld [vmem:[%s4216_s26 + $0x264] sm:$0xf]  ;;  %v2926_v46 = vld [vmem:[%s4216_s26 + $0x280] sm:$0xf] }
  0x4b   : > { %2923 = vst [vmem:[%s4221_s27 + $0x168] sm:$0xf] %v2922_v44  ;;  %2925 = vst [vmem:[%s4221_s27 + $0x184] sm:$0xf] %v2924_v45  ;;  %v2928_v47 = vld [vmem:[%s4216_s26 + $0x29c] sm:$0xf] }
  0x4c   : > { %2927 = vst [vmem:[%s4221_s27 + $0x1a0] sm:$0xf] %v2926_v46  ;;  %v2930_v48 = vld [vmem:[%s4216_s26 + $0x398] sm:$0xf]  ;;  %v2932_v49 = vld [vmem:[%s4216_s26 + $0x3b4] sm:$0xf] }
  0x4d   : > { %2929 = vst [vmem:[%s4221_s27 + $0x1bc] sm:$0xf] %v2928_v47  ;;  %2931 = vst [vmem:[%s4221_s27 + $0x1d8] sm:$0xf] %v2930_v48  ;;  %v2934_v50 = vld [vmem:[%s4216_s26 + $0x3d0] sm:$0xf] }
  0x4e   : > { %2933 = vst [vmem:[%s4221_s27 + $0x1f4] sm:$0xf] %v2932_v49  ;;  %v2936_v51 = vld [vmem:[%s4216_s26 + $0x3ec] sm:$0xf]  ;;  %v2938_v52 = vld [vmem:[%s4216_s26 + $0x408] sm:$0xf] }
  0x4f   : > { %2935 = vst [vmem:[%s4221_s27 + $0x210] sm:$0xf] %v2934_v50  ;;  %2937 = vst [vmem:[%s4221_s27 + $0x22c] sm:$0xf] %v2936_v51  ;;  %v2940_v53 = vld [vmem:[%s4216_s26 + $0x424] sm:$0xf] }
  0x50   : > { %2939 = vst [vmem:[%s4221_s27 + $0x248] sm:$0xf] %v2938_v52  ;;  %v2942_v54 = vld [vmem:[%s4216_s26 + $0x440] sm:$0xf]  ;;  %v2944_v55 = vld [vmem:[%s4216_s26 + $0x45c] sm:$0xf] }
  0x51   : > { %2941 = vst [vmem:[%s4221_s27 + $0x264] sm:$0xf] %v2940_v53  ;;  %2943 = vst [vmem:[%s4221_s27 + $0x280] sm:$0xf] %v2942_v54  ;;  %v2946_v56 = vld [vmem:[%s4216_s26 + $0x558] sm:$0xf] }
  0x52   : > { %2945 = vst [vmem:[%s4221_s27 + $0x29c] sm:$0xf] %v2944_v55  ;;  %v2948_v57 = vld [vmem:[%s4216_s26 + $0x574] sm:$0xf]  ;;  %v2950_v58 = vld [vmem:[%s4216_s26 + $0x590] sm:$0xf] }
  0x53   : > { %2947 = vst [vmem:[%s4221_s27 + $0x2b8] sm:$0xf] %v2946_v56  ;;  %2949 = vst [vmem:[%s4221_s27 + $0x2d4] sm:$0xf] %v2948_v57  ;;  %v2952_v59 = vld [vmem:[%s4216_s26 + $0x5ac] sm:$0xf] }
  0x54   : > { %2951 = vst [vmem:[%s4221_s27 + $0x2f0] sm:$0xf] %v2950_v58  ;;  %v2954_v60 = vld [vmem:[%s4216_s26 + $0x5c8] sm:$0xf]  ;;  %v2956_v61 = vld [vmem:[%s4216_s26 + $0x5e4] sm:$0xf] }
  0x55   : > { %2953 = vst [vmem:[%s4221_s27 + $0x30c] sm:$0xf] %v2952_v59  ;;  %2955 = vst [vmem:[%s4221_s27 + $0x328] sm:$0xf] %v2954_v60  ;;  %v2958_v62 = vld [vmem:[%s4216_s26 + $0x600] sm:$0xf] }
  0x56   : > { %2957 = vst [vmem:[%s4221_s27 + $0x344] sm:$0xf] %v2956_v61  ;;  %v2960_v63 = vld [vmem:[%s4216_s26 + $0x61c] sm:$0xf]  ;;  %2959 = vst [vmem:[%s4221_s27 + $0x360] sm:$0xf] %v2958_v62 }
  0x57   : > { %2961 = vst [vmem:[%s4221_s27 + $0x37c] sm:$0xf] %v2960_v63 }
  0x58 PF: > { %p2962_p6 = scmp.ge.s32.totalorder %s4151_s16, 1  ;;  %p451_p7 = scmp.lt.s32.totalorder %s4151_s16, 3 }
  0x5a   : > { %p452_p8 = pnand %p2962_p6, %p451_p7 }
  0x5b   : > { %v4481_v0 = vld [vmem:[%s5320_s1 + $0x40] sm:$0xff] (!%p452_p8)   ;;  %v4504_v4 = vld [vmem:[%s5320_s1 + $0x48] sm:$0xff] (!%p452_p8)   ;;  %v4528_v8 = vld [vmem:[%s5320_s1 + $0x50] sm:$0xff] (!%p452_p8)   ;;  %s458_s7 = sand.u32 (!%p452_p8), 1, %s4135_s12   ;;  %vm1081_vm0 = vcmask (!%p452_p8), 261120   ;;  %vm2768_vm1 = vcmask (!%p452_p8), 519168  }
  0x5c   : > { %455 = sbr.rel (%p452_p8) target bundleno = 598 (0x256), region = 54  ;;  %v4486_v1 = vld [vmem:[%s5320_s1 + $0xc0] sm:$0xff] (!%p452_p8)   ;;  %3258 = vmatprep.subr.bf16.mxu0 (!%p452_p8), %v4481_v0  ;;  %v4510_v5 = vld [vmem:[%s5320_s1 + $0xc8] sm:$0xff] (!%p452_p8)   ;;  %v4534_v9 = vld [vmem:[%s5320_s1 + $0xd0] sm:$0xff] (!%p452_p8)  }
  0x5d   : > { %v4492_v2 = vld [vmem:[%s5320_s1] sm:$0xff] (!%p452_p8)   ;;  %3298 = vmatprep.subr.bf16.mxu1 (!%p452_p8), %v4486_v1  ;;  %v4516_v6 = vld [vmem:[%s5320_s1 + $0x8] sm:$0xff] (!%p452_p8)   ;;  %v4540_v10 = vld [vmem:[%s5320_s1 + $0x10] sm:$0xff] (!%p452_p8)   ;;  %s3828_s12 = smul.u32 (!%p452_p8), 896, %s458_s7 }
  0x5e   : > { %v4498_v3 = vld [vmem:[%s5320_s1 + $0x80] sm:$0xff] (!%p452_p8)   ;;  %3259 = vmatpush3.bf16.msra.mxu0 (!%p452_p8), %v4492_v2  ;;  %v4522_v7 = vld [vmem:[%s5320_s1 + $0x88] sm:$0xff] (!%p452_p8)   ;;  %v4546_v11 = vld [vmem:[%s5320_s1 + $0x90] sm:$0xff] (!%p452_p8)  }
  0x5f   : > { %3299 = vmatpush3.bf16.msra.mxu1 (!%p452_p8), %v4498_v3  ;;  %3260 = vmatprep.subr.bf16.mxu0 (!%p452_p8), %v4504_v4  ;;  %v4552_v12 = vld [vmem:[%s5320_s1 + $0x58] sm:$0xff] (!%p452_p8)   ;;  %v4576_v16 = vld [vmem:[%s5320_s1 + $0x60] sm:$0xff] (!%p452_p8)   ;;  %v4600_v20 = vld [vmem:[%s5320_s1 + $0x68] sm:$0xff] (!%p452_p8)   ;;  %s4670_s6 = scalar_lea.vmem (!%p452_p8), [#allocation2], %s3828_s12 }
  0x60   : > { %3300 = vmatprep.subr.bf16.mxu1 (!%p452_p8), %v4510_v5  ;;  %v4558_v13 = vld [vmem:[%s5320_s1 + $0xd8] sm:$0xff] (!%p452_p8)   ;;  %v4582_v17 = vld [vmem:[%s5320_s1 + $0xe0] sm:$0xff] (!%p452_p8)   ;;  %v4606_v21 = vld [vmem:[%s5320_s1 + $0xe8] sm:$0xff] (!%p452_p8)  }
  0x61   : > { %v4564_v14 = vld [vmem:[%s5320_s1 + $0x18] sm:$0xff] (!%p452_p8)   ;;  %v4588_v18 = vld [vmem:[%s5320_s1 + $0x20] sm:$0xff] (!%p452_p8)   ;;  %v4612_v22 = vld [vmem:[%s5320_s1 + $0x28] sm:$0xff] (!%p452_p8)  }
  0x62   : > { %3261 = vmatpush3.bf16.msra.mxu0 (!%p452_p8), %v4516_v6  ;;  %v4570_v15 = vld [vmem:[%s5320_s1 + $0x98] sm:$0xff] (!%p452_p8)   ;;  %v4594_v19 = vld [vmem:[%s5320_s1 + $0xa0] sm:$0xff] (!%p452_p8)   ;;  %v4619_v23 = vld [vmem:[%s5320_s1 + $0xa8] sm:$0xff] (!%p452_p8)  }
  0x63   : > { %3301 = vmatpush3.bf16.msra.mxu1 %v4522_v7  ;;  %3262 = vmatprep.subr.bf16.mxu0 %v4528_v8  ;;  %v4625_v24 = vld [vmem:[%s5320_s1 + $0x70] sm:$0xff]   ;;  %v4649_v28 = vld [vmem:[%s5320_s1 + $0x78] sm:$0xff]   ;;  %v3903_v33 = vld [vmem:[%s4670_s6 + $0x4] ss:$28 sps:$4 sm:$0xff]  }
  0x64   : > { %3302 = vmatprep.subr.bf16.mxu1 %v4534_v9  ;;  %v4631_v25 = vld [vmem:[%s5320_s1 + $0xf0] sm:$0xff]   ;;  %v4655_v29 = vld [vmem:[%s5320_s1 + $0xf8] sm:$0xff]   ;;  %v3904_v34 = vld [vmem:[%s4670_s6 + $0x8] ss:$28 sps:$4 sm:$0xff]   ;;  %1126 = vmatprep.mubr.bf16.mxu0 %v3903_v33 }
  0x65   : > { %v4637_v26 = vld [vmem:[%s5320_s1 + $0x30] sm:$0xff]   ;;  %v4661_v30 = vld [vmem:[%s5320_s1 + $0x38] sm:$0xff]   ;;  %v3906_v35 = vld [vmem:[%s4670_s6 + $0xc] ss:$28 sps:$4 sm:$0xff]  }
  0x66   : > { %3263 = vmatpush3.bf16.msra.mxu0 %v4540_v10  ;;  %v4643_v27 = vld [vmem:[%s5320_s1 + $0xb0] sm:$0xff]   ;;  %v4667_v31 = vld [vmem:[%s5320_s1 + $0xb8] sm:$0xff]   ;;  %v4680_v36 = vld [vmem:[%s5320_s1 + $0x140] sm:$0xff]   ;;  %1191 = vmatprep.mubr.bf16.mxu1 %v3906_v35 }
  0x67   : > { %3303 = vmatpush3.bf16.msra.mxu1 %v4546_v11  ;;  %3264 = vmatprep.subr.bf16.mxu0 %v4552_v12  ;;  %v3901_v32 = vld [vmem:[%s4670_s6] ss:$28 sps:$4 sm:$0xff]   ;;  %v4691_v38 = vld [vmem:[%s5320_s1 + $0x148] sm:$0xff]   ;;  %v3916_v43 = vld [vmem:[%s4670_s6 + $0x38] ss:$28 sps:$4 sm:$0xff]  }
  0x68   : > { %3304 = vmatprep.subr.bf16.mxu1 %v4558_v13  ;;  %v4685_v37 = vld [vmem:[%s5320_s1 + $0x100] sm:$0xff]   ;;  %v4697_v39 = vld [vmem:[%s5320_s1 + $0x108] sm:$0xff]   ;;  %v3911_v40 = vld [vmem:[%s4670_s6 + $0x3c] ss:$28 sps:$4 sm:$0xff]  }
  0x69   : > { %v3913_v41 = vld [vmem:[%s4670_s6 + $0x44] ss:$28 sps:$4 sm:$0xff]   ;;  %v4714_v45 = vld [vmem:[%s5320_s1 + $0x150] sm:$0xff]   ;;  %v4726_v47 = vld [vmem:[%s5320_s1 + $0x158] sm:$0xff]  }
  0x6a   : > { %3265 = vmatpush3.bf16.msra.mxu0 %v4564_v14  ;;  %v4705_v42 = vld [vmem:[%s5320_s1 + $0x180] sm:$0xff]   ;;  %v4720_v46 = vld [vmem:[%s5320_s1 + $0x110] sm:$0xff]   ;;  %v4732_v48 = vld [vmem:[%s5320_s1 + $0x118] sm:$0xff]  }
  0x6b   : > { %3305 = vmatpush3.bf16.msra.mxu1 %v4570_v15  ;;  %3266 = vmatprep.subr.bf16.mxu0 %v4576_v16  ;;  %v3917_v44 = vld [vmem:[%s4670_s6 + $0x40] ss:$28 sps:$4 sm:$0xff]   ;;  %v3922_v49 = vld [vmem:[%s4670_s6 + $0x74] ss:$28 sps:$4 sm:$0xff]   ;;  %v4754_v55 = vld [vmem:[%s5320_s1 + $0x168] sm:$0xff]  }
  0x6c   : > { %3306 = vmatprep.subr.bf16.mxu1 %v4582_v17  ;;  %v3924_v50 = vld [vmem:[%s4670_s6 + $0x7c] ss:$28 sps:$4 sm:$0xff]   ;;  %v3926_v51 = vld [vmem:[%s4670_s6 + $0x70] ss:$28 sps:$4 sm:$0xff]   ;;  %v4742_v53 = vld [vmem:[%s5320_s1 + $0x160] sm:$0xff]  }
  0x6d   : > { %v3927_v52 = vld [vmem:[%s4670_s6 + $0x78] ss:$28 sps:$4 sm:$0xff]   ;;  %v4748_v54 = vld [vmem:[%s5320_s1 + $0x120] sm:$0xff]   ;;  %v4759_v56 = vld [vmem:[%s5320_s1 + $0x128] sm:$0xff]  }
  0x6e   : > { %3267 = vmatpush3.bf16.msra.mxu0 %v4588_v18  ;;  %v3932_v57 = vld [vmem:[%s4670_s6 + $0xac] ss:$28 sps:$4 sm:$0xff]   ;;  %v3934_v58 = vld [vmem:[%s4670_s6 + $0xb4] ss:$28 sps:$4 sm:$0xff]   ;;  %v4795_v33 = vld [vmem:[%s5320_s1 + $0x138] sm:$0xff]  }
  0x6f   : > { %3307 = vmatpush3.bf16.msra.mxu1 %v4594_v19  ;;  %3268 = vmatprep.subr.bf16.mxu0 %v4600_v20  ;;  %v4768_v59 = vld [vmem:[%s5320_s1 + $0x188] sm:$0xff]   ;;  %v4776_v62 = vld [vmem:[%s5320_s1 + $0x170] sm:$0xff]  }
  0x70   : > { %3308 = vmatprep.subr.bf16.mxu1 %v4606_v21  ;;  %v3937_v60 = vld [vmem:[%s4670_s6 + $0xa8] ss:$28 sps:$4 sm:$0xff]   ;;  %v3938_v61 = vld [vmem:[%s4670_s6 + $0xb0] ss:$28 sps:$4 sm:$0xff]   ;;  %v3946_v35 = vld [vmem:[%s4670_s6 + $0x18] ss:$28 sps:$4 sm:$0xff]  }
  0x71   : > { %v4783_v63 = vld [vmem:[%s5320_s1 + $0x130] sm:$0xff]  }
  0x72   : > { %3269 = vmatpush3.bf16.msra.mxu0 %v4612_v22 }
  0x73   : > { %3309 = vmatpush3.bf16.msra.mxu1 %v4619_v23  ;;  %3270 = vmatprep.subr.bf16.mxu0 %v4625_v24 }
  0x74   : > { %3310 = vmatprep.subr.bf16.mxu1 %v4631_v25 }
  0x76   : > { %3271 = vmatpush3.bf16.msra.mxu0 %v4637_v26 }
  0x77   : > { %3311 = vmatpush3.bf16.msra.mxu1 %v4643_v27  ;;  %3272 = vmatprep.subr.bf16.mxu0 %v4649_v28 }
  0x78   : > { %3312 = vmatprep.subr.bf16.mxu1 %v4655_v29 }
  0x7a   : > { %3273 = vmatpush3.bf16.msra.mxu0 %v4661_v30 }
  0x7b   : > { %3313 = vmatpush3.bf16.msra.mxu1 %v4667_v31  ;;  %3338 = vmatprep.subr.bf16.mxu0 %v4680_v36 }
  0x7c   : > { %3762 = vmatprep.subr.bf16.mxu1 %v4705_v42 }
  0x7d   : > { %1127 = vmatmul.mubr.bf16.vlgmr.msra.gmra.mrb[0].mxu0 %v3901_v32  ;;  %v4789_v32 = vld [vmem:[%s5320_s1 + $0x178] sm:$0xff]  }
  0x7e   : > { %1192 = vmatmul.mubr.bf16.vlgmr.msra.gmra.mrb[0].mxu1 %v3904_v34  ;;  %3339 = vmatpush3.bf16.msra.mxu0 %v4685_v37  ;;  %v3945_v34 = vld [vmem:[%s4670_s6 + $0x14] ss:$28 sps:$4 sm:$0xff]  }
  0x7f   : > { %3340 = vmatprep.subr.bf16.mxu0 %v4691_v38  ;;  %1134 = vmatprep.mubr.bf16.mxu0 %v3911_v40  ;;  %v3943_v40 = vld [vmem:[%s4670_s6 + $0x10] ss:$28 sps:$4 sm:$0xff]  }
  0x80   : > { %1199 = vmatprep.mubr.bf16.mxu1 %v3913_v41  ;;  %3763 = vmatpush3.bf16.msra.mxu1 %v4705_v42  ;;  %v3947_v41 = vld [vmem:[%s4670_s6 + $0x50] ss:$28 sps:$4 sm:$0xff]  }
  0x81   : > { %3764 = vmatprep.subr.bf16.mxu1 %v4768_v59 }
  0x82   : > { %3341 = vmatpush3.bf16.msra.mxu0 %v4697_v39 }
  0x83   : > { %3342 = vmatprep.subr.bf16.mxu0 %v4714_v45 }
  0x84   : > { %3765 = vmatpush3.bf16.msra.mxu1 %v4768_v59 }
  0x85   : > { %1135 = vmatmul.mubr.bf16.gmra.mrb[4].mxu0 %v3916_v43  ;;  %3424 = vmatprep.subr.bf16.mxu1 %v4486_v1  ;;  %v3948_v43 = vld [vmem:[%s4670_s6 + $0x4c] ss:$28 sps:$4 sm:$0xff]  }
  0x86   : > { %1200 = vmatmul.mubr.bf16.gmra.mrb[4].mxu1 %v3917_v44  ;;  %3343 = vmatpush3.bf16.msra.mxu0 %v4720_v46  ;;  %v3954_v44 = vld [vmem:[%s4670_s6 + $0x88] ss:$28 sps:$4 sm:$0xff]  }
  0x87   : > { %3344 = vmatprep.subr.bf16.mxu0 %v4726_v47  ;;  %1142 = vmatprep.mubr.bf16.mxu0 %v3922_v49  ;;  %v3950_v49 = vld [vmem:[%s4670_s6 + $0x48] ss:$28 sps:$4 sm:$0xff]  }
  0x88   : > { %1207 = vmatprep.mubr.bf16.mxu1 %v3924_v50  ;;  %v3955_v50 = vld [vmem:[%s4670_s6 + $0xc0] ss:$28 sps:$4 sm:$0xff]  }
  0x8a   : > { %3345 = vmatpush3.bf16.msra.mxu0 %v4732_v48 }
  0x8b   : > { %3346 = vmatprep.subr.bf16.mxu0 %v4742_v53 }
  0x8d   : > { %1143 = vmatmul.mubr.bf16.gmra.mrb[8].mxu0 %v3926_v51  ;;  %v3951_v51 = vld [vmem:[%s4670_s6 + $0x84] ss:$28 sps:$4 sm:$0xff]  }
  0x8e   : > { %1208 = vmatmul.mubr.bf16.gmra.mrb[8].mxu1 %v3927_v52  ;;  %3347 = vmatpush3.bf16.msra.mxu0 %v4748_v54  ;;  %v3961_v52 = vld [vmem:[%s4670_s6 + $0xec] ss:$28 sps:$4 sm:$0xff]  }
  0x8f   : > { %3348 = vmatprep.subr.bf16.mxu0 %v4754_v55  ;;  %1150 = vmatprep.mubr.bf16.mxu0 %v3932_v57  ;;  %v3953_v57 = vld [vmem:[%s4670_s6 + $0x80] ss:$28 sps:$4 sm:$0xff]  }
  0x90   : > { %1215 = vmatprep.mubr.bf16.mxu1 %v3934_v58  ;;  %v3956_v58 = vld [vmem:[%s4670_s6 + $0xbc] ss:$28 sps:$4 sm:$0xff]  }
  0x92   : > { %3349 = vmatpush3.bf16.msra.mxu0 %v4759_v56 }
  0x93   : > { %3350 = vmatprep.subr.bf16.mxu0 %v4776_v62 }
  0x95   : > { %1151 = vmatmul.mubr.bf16.gmra.mrb[12].mxu0 %v3937_v60  ;;  %v3958_v60 = vld [vmem:[%s4670_s6 + $0xb8] ss:$28 sps:$4 sm:$0xff]  }
  0x96   : > { %1216 = vmatmul.mubr.bf16.gmra.mrb[12].mxu1 %v3938_v61  ;;  %3351 = vmatpush3.bf16.msra.mxu0 %v4783_v63  ;;  %v3964_v61 = vld [vmem:[%s4670_s6 + $0xe4] ss:$28 sps:$4 sm:$0xff]  }
  0x97   : > { %3352 = vmatprep.subr.bf16.mxu0 %v4789_v32  ;;  %1256 = vmatprep.mubr.bf16.mxu0 %v3945_v34  ;;  %v3959_v34 = vld [vmem:[%s4670_s6 + $0xe8] ss:$28 sps:$4 sm:$0xff]  }
  0x98   : > { %3766 = vmatprep.mubr.msk.bf16.mxu1 %vm1081_vm0, %v3946_v35  ;;  %v3962_v35 = vld [vmem:[%s4670_s6 + $0xe0] ss:$28 sps:$4 sm:$0xff]  }
  0x9a   : > { %3353 = vmatpush3.bf16.msra.mxu0 %v4795_v33 }
  0x9b   : > { %3384 = vmatprep.subr.bf16.mxu0 %v4481_v0 }
  0x9d   : > { %1257 = vmatmul.mubr.bf16.vlgmr.msra.gmra.mrb[16].mxu0 %v3943_v40  ;;  %v3965_v40 = vld [vmem:[%s4670_s6 + $0x124] ss:$28 sps:$4 sm:$0xff]  }
  0x9e   : > { %3767 = vmatmul.mubr.msk.bf16.vlgmr.msra.gmra.mrb[16].mxu1 %vm1081_vm0, %v3947_v41  ;;  %3385 = vmatpush3.bf16.msra.mxu0 %v4492_v2  ;;  %v3967_v41 = vld [vmem:[%s4670_s6 + $0x11c] ss:$28 sps:$4 sm:$0xff]  }
  0x9f   : > { %3425 = vmatpush3.bf16.msra.mxu1 %v4498_v3  ;;  %3386 = vmatprep.subr.bf16.mxu0 %v4504_v4 }
  0xa0   : > { %3426 = vmatprep.subr.bf16.mxu1 %v4510_v5  ;;  %1264 = vmatprep.mubr.bf16.mxu0 %v3948_v43  ;;  %v3969_v43 = vld [vmem:[%s4670_s6 + $0x120] ss:$28 sps:$4 sm:$0xff]  }
  0xa1   : > { %3770 = vmatprep.mubr.msk.bf16.mxu1 %vm1081_vm0, %v3954_v44  ;;  %v3970_v44 = vld [vmem:[%s4670_s6 + $0x118] ss:$28 sps:$4 sm:$0xff]  }
  0xa2   : > { %3387 = vmatpush3.bf16.msra.mxu0 %v4516_v6 }
  0xa3   : > { %3427 = vmatpush3.bf16.msra.mxu1 %v4522_v7  ;;  %3388 = vmatprep.subr.bf16.mxu0 %v4528_v8 }
  0xa4   : > { %3428 = vmatprep.subr.bf16.mxu1 %v4534_v9 }
  0xa5   : > { %1265 = vmatmul.mubr.bf16.gmra.mrb[20].mxu0 %v3950_v49  ;;  %v3971_v49 = vld [vmem:[%s4670_s6 + $0x15c] ss:$28 sps:$4 sm:$0xff]  }
  0xa6   : > { %3771 = vmatmul.mubr.msk.bf16.gmra.mrb[20].mxu1 %vm1081_vm0, %v3955_v50  ;;  %3389 = vmatpush3.bf16.msra.mxu0 %v4540_v10  ;;  %v3973_v50 = vld [vmem:[%s4670_s6 + $0x154] ss:$28 sps:$4 sm:$0xff]  }
  0xa7   : > { %3429 = vmatpush3.bf16.msra.mxu1 %v4546_v11  ;;  %3390 = vmatprep.subr.bf16.mxu0 %v4552_v12 }
  0xa8   : > { %3430 = vmatprep.subr.bf16.mxu1 %v4558_v13  ;;  %1272 = vmatprep.mubr.bf16.mxu0 %v3951_v51  ;;  %v3975_v51 = vld [vmem:[%s4670_s6 + $0x158] ss:$28 sps:$4 sm:$0xff]  }
  0xa9   : > { %1636 = vmatprep.mubr.bf16.mxu1 %v3961_v52  ;;  %v3976_v52 = vld [vmem:[%s4670_s6 + $0x150] ss:$28 sps:$4 sm:$0xff]  }
  0xaa   : > { %3391 = vmatpush3.bf16.msra.mxu0 %v4564_v14 }
  0xab   : > { %3431 = vmatpush3.bf16.msra.mxu1 %v4570_v15  ;;  %3392 = vmatprep.subr.bf16.mxu0 %v4576_v16 }
  0xac   : > { %3432 = vmatprep.subr.bf16.mxu1 %v4582_v17 }
  0xad   : > { %1273 = vmatmul.mubr.bf16.gmra.mrb[24].mxu0 %v3953_v57  ;;  %v3977_v57 = vld [vmem:[%s4670_s6 + $0x194] ss:$28 sps:$4 sm:$0xff]  }
  0xae   : > { %3393 = vmatpush3.bf16.msra.mxu0 %v4588_v18  ;;  %1280 = vmatprep.mubr.bf16.mxu0 %v3956_v58  ;;  %v3979_v58 = vld [vmem:[%s4670_s6 + $0x18c] ss:$28 sps:$4 sm:$0xff]  }
  0xaf   : > { %3433 = vmatpush3.bf16.msra.mxu1 %v4594_v19  ;;  %3394 = vmatprep.subr.bf16.mxu0 %v4600_v20 }
  0xb0   : > { %3434 = vmatprep.subr.bf16.mxu1 %v4606_v21 }
  0xb2   : > { %3395 = vmatpush3.bf16.msra.mxu0 %v4612_v22 }
  0xb3   : > { %3435 = vmatpush3.bf16.msra.mxu1 %v4619_v23  ;;  %3396 = vmatprep.subr.bf16.mxu0 %v4625_v24 }
  0xb4   : > { %3436 = vmatprep.subr.bf16.mxu1 %v4631_v25 }
  0xb5   : > { %1281 = vmatmul.mubr.bf16.gmra.mrb[28].mxu0 %v3958_v60  ;;  %v3982_v60 = vld [vmem:[%s4670_s6 + $0x188] ss:$28 sps:$4 sm:$0xff]  }
  0xb6   : > { %3397 = vmatpush3.bf16.msra.mxu0 %v4637_v26  ;;  %1571 = vmatprep.mubr.bf16.mxu0 %v3964_v61  ;;  %v3983_v61 = vld [vmem:[%s4670_s6 + $0xf8] ss:$28 sps:$4 sm:$0xff]  }
  0xb7   : > { %3437 = vmatpush3.bf16.msra.mxu1 %v4643_v27  ;;  %3398 = vmatprep.subr.bf16.mxu0 %v4649_v28 }
  0xb8   : > { %3438 = vmatprep.subr.bf16.mxu1 %v4655_v29 }
  0xba   : > { %3399 = vmatpush3.bf16.msra.mxu0 %v4661_v30 }
  0xbb   : > { %3439 = vmatpush3.bf16.msra.mxu1 %v4667_v31  ;;  %3464 = vmatprep.subr.bf16.mxu0 %v4680_v36 }
  0xbc   : > { %3774 = vmatprep.subr.bf16.mxu1 %v4705_v42 }
  0xbd   : > { %1572 = vmatmul.mubr.bf16.vlgmr.msra.gmra.mrb[32].mxu0 %v3962_v35  ;;  %v3984_v35 = vld [vmem:[%s4670_s6 + $0xf0] ss:$28 sps:$4 sm:$0xff]  }
  0xbe   : > { %1637 = vmatmul.mubr.bf16.vlgmr.msra.gmra.mrb[24].mxu1 %v3959_v34  ;;  %3465 = vmatpush3.bf16.msra.mxu0 %v4685_v37  ;;  %v3986_v34 = vld [vmem:[%s4670_s6 + $0xf4] ss:$28 sps:$4 sm:$0xff]  }
  0xbf   : > { %1644 = vmatprep.mubr.bf16.mxu1 %v3965_v40  ;;  %3466 = vmatprep.subr.bf16.mxu0 %v4691_v38  ;;  %v3987_v40 = vld [vmem:[%s4670_s6 + $0x130] ss:$28 sps:$4 sm:$0xff]  }
  0xc0   : > { %1579 = vmatprep.mubr.bf16.mxu0 %v3967_v41  ;;  %3775 = vmatpush3.bf16.msra.mxu1 %v4705_v42  ;;  %v3988_v41 = vld [vmem:[%s4670_s6 + $0x12c] ss:$28 sps:$4 sm:$0xff]  }
  0xc1   : > { %3776 = vmatprep.subr.bf16.mxu1 %v4768_v59 }
  0xc2   : > { %3467 = vmatpush3.bf16.msra.mxu0 %v4697_v39 }
  0xc3   : > { %3468 = vmatprep.subr.bf16.mxu0 %v4714_v45 }
  0xc4   : > { %3777 = vmatpush3.bf16.msra.mxu1 %v4768_v59 }
  0xc5   : > { %1580 = vmatmul.mubr.bf16.gmra.mrb[36].mxu0 %v3970_v44  ;;  %3550 = vmatprep.subr.bf16.mxu1 %v4486_v1  ;;  %v3981_v1 = vld [vmem:[%s4670_s6 + $0x190] ss:$28 sps:$4 sm:$0xff]   ;;  %v3990_v44 = vld [vmem:[%s4670_s6 + $0x128] ss:$28 sps:$4 sm:$0xff]  }
  0xc6   : > { %1645 = vmatmul.mubr.bf16.gmra.mrb[28].mxu1 %v3969_v43  ;;  %3469 = vmatpush3.bf16.msra.mxu0 %v4720_v46  ;;  %v3994_v43 = vld [vmem:[%s4670_s6 + $0x168] ss:$28 sps:$4 sm:$0xff]  }
  0xc7   : > { %1652 = vmatprep.mubr.bf16.mxu1 %v3971_v49  ;;  %3470 = vmatprep.subr.bf16.mxu0 %v4726_v47  ;;  %v4030_v49 = vld [vmem:[%s4670_s6 + $0x208] ss:$28 sps:$4 sm:$0xff]  }
  0xc8   : > { %1587 = vmatprep.mubr.bf16.mxu0 %v3973_v50  ;;  %v4035_v50 = vld [vmem:[%s4670_s6 + $0x280] ss:$28 sps:$4 sm:$0xff]  }
  0xca   : > { %3471 = vmatpush3.bf16.msra.mxu0 %v4732_v48 }
  0xcb   : > { %3472 = vmatprep.subr.bf16.mxu0 %v4742_v53 }
  0xcd   : > { %1588 = vmatmul.mubr.bf16.gmra.mrb[40].mxu0 %v3976_v52  ;;  %v4086_v52 = vld [vmem:[%s5320_s1 + $0x8] sm:$0xff]  }
  0xce   : > { %1653 = vmatmul.mubr.bf16.gmra.mrb[32].mxu1 %v3975_v51  ;;  %3473 = vmatpush3.bf16.msra.mxu0 %v4748_v54  ;;  %v4085_v51 = vld [vmem:[%s5320_s1 + $0x88] sm:$0xff]  }
  0xcf   : > { %1660 = vmatprep.mubr.bf16.mxu1 %v3977_v57  ;;  %3474 = vmatprep.subr.bf16.mxu0 %v4754_v55  ;;  %v4087_v57 = vld [vmem:[%s5320_s1 + $0xd0] sm:$0xff]  }
  0xd0   : > { %1595 = vmatprep.mubr.bf16.mxu0 %v3979_v58  ;;  %v4088_v58 = vld [vmem:[%s5320_s1 + $0x50] sm:$0xff]  }
  0xd2   : > { %3475 = vmatpush3.bf16.msra.mxu0 %v4759_v56 }
  0xd3   : > { %3476 = vmatprep.subr.bf16.mxu0 %v4776_v62 }
  0xd5   : > { %1596 = vmatmul.mubr.bf16.gmra.mrb[44].mxu0 %v3982_v60  ;;  %v4041_v60 = vld [vmem:[%s4670_s6 + $0x2ac] ss:$28 sps:$4 sm:$0xff]  }
  0xd6   : > { %1661 = vmatmul.mubr.bf16.gmra.mrb[36].mxu1 %v3981_v1  ;;  %3477 = vmatpush3.bf16.msra.mxu0 %v4783_v63  ;;  %v4031_v1 = vld [vmem:[%s4670_s6 + $0x244] ss:$28 sps:$4 sm:$0xff]  }
  0xd7   : > { %3778 = vmatprep.mubr.msk.bf16.mxu1 %vm1081_vm0, %v3983_v61  ;;  %3478 = vmatprep.subr.bf16.mxu0 %v4789_v32  ;;  %v4089_v61 = vld [vmem:[%s5320_s1 + $0x90] sm:$0xff]  }
  0xd8   : > { %1701 = vmatprep.mubr.bf16.mxu0 %v3986_v34  ;;  %v4090_v34 = vld [vmem:[%s5320_s1 + $0x10] sm:$0xff]  }
  0xda   : > { %3479 = vmatpush3.bf16.msra.mxu0 %v4795_v33 }
  0xdb   : > { %3510 = vmatprep.subr.bf16.mxu0 %v4481_v0  ;;  %v3995_v0 = vld [vmem:[%s4670_s6 + $0x1a0] ss:$28 sps:$4 sm:$0xff]  }
  0xdd   : > { %1702 = vmatmul.mubr.bf16.vlgmr.msra.gmra.mrb[48].mxu0 %v3984_v35  ;;  %v4091_v35 = vld [vmem:[%s5320_s1 + $0xd8] sm:$0xff]  }
  0xde   : > { %3779 = vmatmul.mubr.msk.bf16.vlgmr.msra.gmra.mrb[40].mxu1 %vm1081_vm0, %v3987_v40  ;;  %3511 = vmatpush3.bf16.msra.mxu0 %v4492_v2  ;;  %v3991_v2 = vld [vmem:[%s4670_s6 + $0x164] ss:$28 sps:$4 sm:$0xff]   ;;  %v4092_v40 = vld [vmem:[%s5320_s1 + $0x58] sm:$0xff]  }
  0xdf   : > { %3551 = vmatpush3.bf16.msra.mxu1 %v4498_v3  ;;  %3512 = vmatprep.subr.bf16.mxu0 %v4504_v4  ;;  %v4001_v3 = vld [vmem:[%s4670_s6 + $0x1cc] ss:$28 sps:$4 sm:$0xff]   ;;  %v3993_v4 = vld [vmem:[%s4670_s6 + $0x160] ss:$28 sps:$4 sm:$0xff]  }
  0xe0   : > { %3552 = vmatprep.subr.bf16.mxu1 %v4510_v5  ;;  %1709 = vmatprep.mubr.bf16.mxu0 %v3988_v41  ;;  %v3996_v5 = vld [vmem:[%s4670_s6 + $0x19c] ss:$28 sps:$4 sm:$0xff]  }
  0xe1   : > { %3782 = vmatprep.mubr.msk.bf16.mxu1 %vm1081_vm0, %v3994_v43  ;;  %v4033_v41 = vld [vmem:[%s4670_s6 + $0x240] ss:$28 sps:$4 sm:$0xff]  }
  0xe2   : > { %3513 = vmatpush3.bf16.msra.mxu0 %v4516_v6  ;;  %v3998_v6 = vld [vmem:[%s4670_s6 + $0x198] ss:$28 sps:$4 sm:$0xff]  }
  0xe3   : > { %3553 = vmatpush3.bf16.msra.mxu1 %v4522_v7  ;;  %3514 = vmatprep.subr.bf16.mxu0 %v4528_v8  ;;  %v4004_v7 = vld [vmem:[%s4670_s6 + $0x1c4] ss:$28 sps:$4 sm:$0xff]   ;;  %v4093_v43 = vld [vmem:[%s5320_s1 + $0x98] sm:$0xff]  }
  0xe4   : > { %3554 = vmatprep.subr.bf16.mxu1 %v4534_v9  ;;  %v3999_v8 = vld [vmem:[%s4670_s6 + $0x1c8] ss:$28 sps:$4 sm:$0xff]   ;;  %v4002_v9 = vld [vmem:[%s4670_s6 + $0x1c0] ss:$28 sps:$4 sm:$0xff]  }
  0xe5   : > { %1710 = vmatmul.mubr.bf16.gmra.mrb[52].mxu0 %v3990_v44  ;;  %v4094_v44 = vld [vmem:[%s5320_s1 + $0x18] sm:$0xff]  }
  0xe6   : > { %3783 = vmatmul.mubr.msk.bf16.gmra.mrb[44].mxu1 %vm1081_vm0, %v3995_v0  ;;  %3515 = vmatpush3.bf16.msra.mxu0 %v4540_v10  ;;  %v4005_v10 = vld [vmem:[%s4670_s6 + $0x204] ss:$28 sps:$4 sm:$0xff]  }
  0xe7   : > { %3555 = vmatpush3.bf16.msra.mxu1 %v4546_v11  ;;  %3516 = vmatprep.subr.bf16.mxu0 %v4552_v12  ;;  %v4008_v11 = vld [vmem:[%s4670_s6 + $0x1fc] ss:$28 sps:$4 sm:$0xff]   ;;  %v4095_v0 = vld [vmem:[%s5320_s1 + $0xe0] sm:$0xff]  }
  0xe8   : > { %3556 = vmatprep.subr.bf16.mxu1 %v4558_v13  ;;  %1717 = vmatprep.mubr.bf16.mxu0 %v3991_v2  ;;  %v4007_v12 = vld [vmem:[%s4670_s6 + $0x200] ss:$28 sps:$4 sm:$0xff]   ;;  %v4010_v13 = vld [vmem:[%s4670_s6 + $0x1f8] ss:$28 sps:$4 sm:$0xff]  }
  0xe9   : > { %2081 = vmatprep.mubr.bf16.mxu1 %v4001_v3  ;;  %v4096_v2 = vld [vmem:[%s5320_s1 + $0x60] sm:$0xff]   ;;  %v4036_v3 = vld [vmem:[%s4670_s6 + $0x27c] ss:$28 sps:$4 sm:$0xff]  }
  0xea   : > { %3517 = vmatpush3.bf16.msra.mxu0 %v4564_v14  ;;  %v4011_v14 = vld [vmem:[%s4670_s6 + $0x23c] ss:$28 sps:$4 sm:$0xff]  }
  0xeb   : > { %3557 = vmatpush3.bf16.msra.mxu1 %v4570_v15  ;;  %3518 = vmatprep.subr.bf16.mxu0 %v4576_v16  ;;  %v4014_v15 = vld [vmem:[%s4670_s6 + $0x234] ss:$28 sps:$4 sm:$0xff]   ;;  %v4079_v16 = vld [vmem:[%s5320_s1 + $0xc0] sm:$0xff]  }
  0xec   : > { %3558 = vmatprep.subr.bf16.mxu1 %v4582_v17  ;;  %v4013_v17 = vld [vmem:[%s4670_s6 + $0x238] ss:$28 sps:$4 sm:$0xff]  }
  0xed   : > { %1718 = vmatmul.mubr.bf16.gmra.mrb[56].mxu0 %v3993_v4  ;;  %v4097_v4 = vld [vmem:[%s5320_s1 + $0xa0] sm:$0xff]  }
  0xee   : > { %3519 = vmatpush3.bf16.msra.mxu0 %v4588_v18  ;;  %1725 = vmatprep.mubr.bf16.mxu0 %v3996_v5  ;;  %v4016_v18 = vld [vmem:[%s4670_s6 + $0x230] ss:$28 sps:$4 sm:$0xff]   ;;  %v4098_v5 = vld [vmem:[%s5320_s1 + $0x20] sm:$0xff]  }
  0xef   : > { %3559 = vmatpush3.bf16.msra.mxu1 %v4594_v19  ;;  %3520 = vmatprep.subr.bf16.mxu0 %v4600_v20  ;;  %v4017_v19 = vld [vmem:[%s4670_s6 + $0x274] ss:$28 sps:$4 sm:$0xff]   ;;  %v4020_v20 = vld [vmem:[%s4670_s6 + $0x26c] ss:$28 sps:$4 sm:$0xff]  }
  0xf0   : > { %3560 = vmatprep.subr.bf16.mxu1 %v4606_v21  ;;  %v4019_v21 = vld [vmem:[%s4670_s6 + $0x270] ss:$28 sps:$4 sm:$0xff]  }
  0xf2   : > { %3521 = vmatpush3.bf16.msra.mxu0 %v4612_v22  ;;  %v4022_v22 = vld [vmem:[%s4670_s6 + $0x268] ss:$28 sps:$4 sm:$0xff]  }
  0xf3   : > { %3561 = vmatpush3.bf16.msra.mxu1 %v4619_v23  ;;  %3522 = vmatprep.subr.bf16.mxu0 %v4625_v24  ;;  %v4023_v23 = vld [vmem:[%s4670_s6 + $0x1d8] ss:$28 sps:$4 sm:$0xff]  }
  0xf4   : > { %3562 = vmatprep.subr.bf16.mxu1 %v4631_v25  ;;  %v4027_v24 = vld [vmem:[%s4670_s6 + $0x1d4] ss:$28 sps:$4 sm:$0xff]  }
  0xf5   : > { %1726 = vmatmul.mubr.bf16.gmra.mrb[60].mxu0 %v3998_v6  ;;  %v4024_v25 = vld [vmem:[%s4670_s6 + $0x210] ss:$28 sps:$4 sm:$0xff]  }
  0xf6   : > { %3523 = vmatpush3.bf16.msra.mxu0 %v4637_v26  ;;  %2016 = vmatprep.mubr.bf16.mxu0 %v4004_v7  ;;  %v4025_v26 = vld [vmem:[%s4670_s6 + $0x1d0] ss:$28 sps:$4 sm:$0xff]  }
  0xf7   : > { %3563 = vmatpush3.bf16.msra.mxu1 %v4643_v27  ;;  %3524 = vmatprep.subr.bf16.mxu0 %v4649_v28  ;;  %v4080_v27 = vld [vmem:[%s5320_s1 + $0x40] sm:$0xff]   ;;  %v4028_v28 = vld [vmem:[%s4670_s6 + $0x20c] ss:$28 sps:$4 sm:$0xff]  }
  0xf8   : > { %3564 = vmatprep.subr.bf16.mxu1 %v4655_v29  ;;  %v4034_v29 = vld [vmem:[%s4670_s6 + $0x248] ss:$28 sps:$4 sm:$0xff]  }
  0xf9   : > { %v4099_v6 = vld [vmem:[%s5320_s1 + $0xe8] sm:$0xff]  }
  0xfa   : > { %3525 = vmatpush3.bf16.msra.mxu0 %v4661_v30  ;;  %v4081_v30 = vld [vmem:[%s5320_s1 + $0x80] sm:$0xff]   ;;  %v4100_v7 = vld [vmem:[%s5320_s1 + $0x68] sm:$0xff]  }
  0xfb   : > { %3565 = vmatpush3.bf16.msra.mxu1 %v4667_v31  ;;  %3590 = vmatprep.subr.bf16.mxu0 %v4680_v36  ;;  %v4082_v31 = vld [vmem:[%s5320_s1] sm:$0xff]  }
  0xfc   : > { %3786 = vmatprep.subr.bf16.mxu1 %v4705_v42 }
  0xfd   : > { %2017 = vmatmul.mubr.bf16.vlgmr.msra.gmra.mrb[64].mxu0 %v4002_v9  ;;  %v4101_v9 = vld [vmem:[%s5320_s1 + $0xa8] sm:$0xff]  }
  0xfe   : > { %2082 = vmatmul.mubr.bf16.vlgmr.msra.gmra.mrb[48].mxu1 %v3999_v8  ;;  %3591 = vmatpush3.bf16.msra.mxu0 %v4685_v37  ;;  %v4038_v8 = vld [vmem:[%s4670_s6 + $0x278] ss:$28 sps:$4 sm:$0xff]  }
  0xff   : > { %2089 = vmatprep.mubr.bf16.mxu1 %v4005_v10  ;;  %3592 = vmatprep.subr.bf16.mxu0 %v4691_v38  ;;  %v4102_v10 = vld [vmem:[%s5320_s1 + $0x28] sm:$0xff]  }
 0x100   : > { %3787 = vmatpush3.bf16.msra.mxu1 %v4705_v42  ;;  %2024 = vmatprep.mubr.bf16.mxu0 %v4008_v11  ;;  %v4083_v42 = vld [vmem:[%s5320_s1 + $0xc8] sm:$0xff]   ;;  %v4103_v11 = vld [vmem:[%s5320_s1 + $0xf0] sm:$0xff]  }
 0x101   : > { %3788 = vmatprep.subr.bf16.mxu1 %v4768_v59 }
 0x102   : > { %3593 = vmatpush3.bf16.msra.mxu0 %v4697_v39 }
 0x103   : > { %3594 = vmatprep.subr.bf16.mxu0 %v4714_v45 }
 0x104   : > { %3789 = vmatpush3.bf16.msra.mxu1 %v4768_v59  ;;  %v4084_v59 = vld [vmem:[%s5320_s1 + $0x48] sm:$0xff]  }
 0x105   : > { %3676 = vmatprep.subr.bf16.mxu1 %v4079_v16  ;;  %2025 = vmatmul.mubr.bf16.gmra.mrb[68].mxu0 %v4010_v13  ;;  %v4044_v13 = vld [vmem:[%s4670_s6 + $0x2a4] ss:$28 sps:$4 sm:$0xff]   ;;  %v4107_v16 = vld [vmem:[%s5320_s1 + $0xf8] sm:$0xff]  }
 0x106   : > { %2090 = vmatmul.mubr.bf16.gmra.mrb[52].mxu1 %v4007_v12  ;;  %3595 = vmatpush3.bf16.msra.mxu0 %v4720_v46  ;;  %v4104_v12 = vld [vmem:[%s5320_s1 + $0x70] sm:$0xff]  }
 0x107   : > { %2097 = vmatprep.mubr.bf16.mxu1 %v4011_v14  ;;  %3596 = vmatprep.subr.bf16.mxu0 %v4726_v47  ;;  %v4105_v14 = vld [vmem:[%s5320_s1 + $0xb0] sm:$0xff]  }
 0x108   : > { %2032 = vmatprep.mubr.bf16.mxu0 %v4014_v15  ;;  %v4106_v15 = vld [vmem:[%s5320_s1 + $0x30] sm:$0xff]  }
 0x10a   : > { %3597 = vmatpush3.bf16.msra.mxu0 %v4732_v48 }
 0x10b   : > { %3598 = vmatprep.subr.bf16.mxu0 %v4742_v53 }
 0x10d   : > { %2033 = vmatmul.mubr.bf16.gmra.mrb[72].mxu0 %v4016_v18  ;;  %v4039_v18 = vld [vmem:[%s4670_s6 + $0x2a8] ss:$28 sps:$4 sm:$0xff]  }
 0x10e   : > { %2098 = vmatmul.mubr.bf16.gmra.mrb[56].mxu1 %v4013_v17  ;;  %3599 = vmatpush3.bf16.msra.mxu0 %v4748_v54  ;;  %v4108_v17 = vld [vmem:[%s5320_s1 + $0x78] sm:$0xff]  }
 0x10f   : > { %2105 = vmatprep.mubr.bf16.mxu1 %v4017_v19  ;;  %3600 = vmatprep.subr.bf16.mxu0 %v4754_v55  ;;  %v4042_v19 = vld [vmem:[%s4670_s6 + $0x2a0] ss:$28 sps:$4 sm:$0xff]  }
 0x110   : > { %2040 = vmatprep.mubr.bf16.mxu0 %v4020_v20  ;;  %v4109_v20 = vld [vmem:[%s5320_s1 + $0xb8] sm:$0xff]  }
 0x112   : > { %3601 = vmatpush3.bf16.msra.mxu0 %v4759_v56 }
 0x113   : > { %3602 = vmatprep.subr.bf16.mxu0 %v4776_v62 }
 0x115   : > { %2041 = vmatmul.mubr.bf16.gmra.mrb[76].mxu0 %v4022_v22  ;;  %v4045_v22 = vld [vmem:[%s4670_s6 + $0x2e4] ss:$28 sps:$4 sm:$0xff]  }
 0x116   : > { %2106 = vmatmul.mubr.bf16.gmra.mrb[60].mxu1 %v4019_v21  ;;  %3603 = vmatpush3.bf16.msra.mxu0 %v4783_v63  ;;  %v4110_v21 = vld [vmem:[%s5320_s1 + $0x38] sm:$0xff]  }
 0x117   : > { %3790 = vmatprep.mubr.msk.bf16.mxu1 %vm1081_vm0, %v4023_v23  ;;  %3604 = vmatprep.subr.bf16.mxu0 %v4789_v32  ;;  %v4048_v23 = vld [vmem:[%s4670_s6 + $0x2dc] ss:$28 sps:$4 sm:$0xff]  }
 0x118   : > { %2146 = vmatprep.mubr.bf16.mxu0 %v4027_v24  ;;  %v4047_v24 = vld [vmem:[%s4670_s6 + $0x2e0] ss:$28 sps:$4 sm:$0xff]  }
 0x11a   : > { %3605 = vmatpush3.bf16.msra.mxu0 %v4795_v33 }
 0x11b   : > { %3636 = vmatprep.subr.bf16.mxu0 %v4080_v27 }
 0x11d   : > { %2147 = vmatmul.mubr.bf16.vlgmr.msra.gmra.mrb[80].mxu0 %v4025_v26  ;;  %v4060_v26 = vld [vmem:[%s4670_s6 + $0x34c] ss:$28 sps:$4 sm:$0xff]  }
 0x11e   : > { %3791 = vmatmul.mubr.msk.bf16.vlgmr.msra.gmra.mrb[64].mxu1 %vm1081_vm0, %v4024_v25  ;;  %3637 = vmatpush3.bf16.msra.mxu0 %v4082_v31  ;;  %v4050_v25 = vld [vmem:[%s4670_s6 + $0x2d8] ss:$28 sps:$4 sm:$0xff]  }
 0x11f   : > { %3677 = vmatpush3.bf16.msra.mxu1 %v4081_v30  ;;  %3638 = vmatprep.subr.bf16.mxu0 %v4084_v59  ;;  %v4062_v30 = vld [vmem:[%s4670_s6 + $0x348] ss:$28 sps:$4 sm:$0xff]  }
 0x120   : > { %3678 = vmatprep.subr.bf16.mxu1 %v4083_v42  ;;  %2154 = vmatprep.mubr.bf16.mxu0 %v4028_v28 }
 0x121   : > { %3794 = vmatprep.mubr.msk.bf16.mxu1 %vm1081_vm0, %v4034_v29  ;;  %v4059_v29 = vld [vmem:[%s4670_s6 + $0x350] ss:$28 sps:$4 sm:$0xff]  }
 0x122   : > { %3639 = vmatpush3.bf16.msra.mxu0 %v4086_v52  ;;  %v4068_v52 = vld [vmem:[%s4670_s6 + $0x2b4] ss:$28 sps:$4 sm:$0xff]  }
 0x123   : > { %3679 = vmatpush3.bf16.msra.mxu1 %v4085_v51  ;;  %3640 = vmatprep.subr.bf16.mxu0 %v4088_v58  ;;  %v4065_v51 = vld [vmem:[%s4670_s6 + $0x35c] ss:$28 sps:$4 sm:$0xff]  }
 0x124   : > { %3680 = vmatprep.subr.bf16.mxu1 %v4087_v57 }
 0x125   : > { %2155 = vmatmul.mubr.bf16.gmra.mrb[84].mxu0 %v4030_v49 }
 0x126   : > { %3795 = vmatmul.mubr.msk.bf16.gmra.mrb[68].mxu1 %vm1081_vm0, %v4035_v50  ;;  %3641 = vmatpush3.bf16.msra.mxu0 %v4090_v34 }
 0x127   : > { %3681 = vmatpush3.bf16.msra.mxu1 %v4089_v61  ;;  %3642 = vmatprep.subr.bf16.mxu0 %v4092_v40  ;;  %v4063_v61 = vld [vmem:[%s4670_s6 + $0x358] ss:$28 sps:$4 sm:$0xff]  }
 0x128   : > { %3682 = vmatprep.subr.bf16.mxu1 %v4091_v35  ;;  %2162 = vmatprep.mubr.bf16.mxu0 %v4031_v1  ;;  %v4066_v35 = vld [vmem:[%s4670_s6 + $0x2b0] ss:$28 sps:$4 sm:$0xff]  }
 0x129   : > { %2526 = vmatprep.mubr.bf16.mxu1 %v4041_v60 }
 0x12a   : > { %3643 = vmatpush3.bf16.msra.mxu0 %v4094_v44 }
 0x12b   : > { %3683 = vmatpush3.bf16.msra.mxu1 %v4093_v43  ;;  %3644 = vmatprep.subr.bf16.mxu0 %v4096_v2  ;;  %v4069_v43 = vld [vmem:[%s4670_s6 + $0x2b8] ss:$28 sps:$4 sm:$0xff]   ;;  %v4071_v2 = vld [vmem:[%s4670_s6 + $0x2ec] ss:$28 sps:$4 sm:$0xff]  }
 0x12c   : > { %3684 = vmatprep.subr.bf16.mxu1 %v4095_v0 }
 0x12d   : > { %2163 = vmatmul.mubr.bf16.gmra.mrb[88].mxu0 %v4033_v41 }
 0x12e   : > { %3645 = vmatpush3.bf16.msra.mxu0 %v4098_v5  ;;  %2170 = vmatprep.mubr.bf16.mxu0 %v4036_v3 }
 0x12f   : > { %3685 = vmatpush3.bf16.msra.mxu1 %v4097_v4  ;;  %3646 = vmatprep.subr.bf16.mxu0 %v4100_v7 }
 0x130   : > { %3686 = vmatprep.subr.bf16.mxu1 %v4099_v6 }
 0x132   : > { %3647 = vmatpush3.bf16.msra.mxu0 %v4102_v10 }
 0x133   : > { %3687 = vmatpush3.bf16.msra.mxu1 %v4101_v9  ;;  %3648 = vmatprep.subr.bf16.mxu0 %v4104_v12  ;;  %v4070_v12 = vld [vmem:[%s4670_s6 + $0x2f0] ss:$28 sps:$4 sm:$0xff]  }
 0x134   : > { %3688 = vmatprep.subr.bf16.mxu1 %v4103_v11 }
 0x135   : > { %2171 = vmatmul.mubr.bf16.gmra.mrb[92].mxu0 %v4038_v8 }
 0x136   : > { %3649 = vmatpush3.bf16.msra.mxu0 %v4106_v15  ;;  %2461 = vmatprep.mubr.bf16.mxu0 %v4044_v13  ;;  %v4073_v13 = vld [vmem:[%s4670_s6 + $0x2e8] ss:$28 sps:$4 sm:$0xff]  }
 0x137   : > { %3689 = vmatpush3.bf16.msra.mxu1 %v4105_v14  ;;  %3650 = vmatprep.subr.bf16.mxu0 %v4108_v17  ;;  %v4074_v17 = vld [vmem:[%s4670_s6 + $0x328] ss:$28 sps:$4 sm:$0xff]  }
 0x138   : > { %3690 = vmatprep.subr.bf16.mxu1 %v4107_v16 }
 0x13a   : > { %3651 = vmatpush3.bf16.msra.mxu0 %v4110_v21 }
 0x13b   : > { %3691 = vmatpush3.bf16.msra.mxu1 %v4109_v20  ;;  %3716 = vmatprep.subr.bf16.mxu0 %v4680_v36 }
 0x13c   : > { %3810 = vmatprep.subr.bf16.mxu1 %v4680_v36  ;;  %v4051_v36 = vld [vmem:[%s4670_s6 + $0x31c] ss:$28 sps:$4 sm:$0xff]  }
 0x13d   : > { %2462 = vmatmul.mubr.bf16.vlgmr.msra.gmra.mrb[96].mxu0 %v4042_v19 }
 0x13e   : > { %2527 = vmatmul.mubr.bf16.vlgmr.msra.gmra.mrb[72].mxu1 %v4039_v18  ;;  %3717 = vmatpush3.bf16.msra.mxu0 %v4685_v37  ;;  %v4076_v18 = vld [vmem:[%s4670_s6 + $0x324] ss:$28 sps:$4 sm:$0xff]  }
 0x13f   : > { %3818 = vmatpush3.bf16.msra.mxu1 %v4685_v37  ;;  %2534 = vmatprep.mubr.bf16.mxu1 %v4045_v22  ;;  %v4054_v37 = vld [vmem:[%s4670_s6 + $0x314] ss:$28 sps:$4 sm:$0xff]  }
 0x140   : > { %3811 = vmatprep.subr.bf16.mxu1 %v4691_v38  ;;  %3718 = vmatprep.subr.bf16.mxu0 %v4691_v38  ;;  %v4053_v38 = vld [vmem:[%s4670_s6 + $0x318] ss:$28 sps:$4 sm:$0xff]  }
 0x141   : > { %2469 = vmatprep.mubr.bf16.mxu0 %v4048_v23 }
 0x142   : > { %3719 = vmatpush3.bf16.msra.mxu0 %v4697_v39 }
 0x143   : > { %3819 = vmatpush3.bf16.msra.mxu1 %v4697_v39  ;;  %3720 = vmatprep.subr.bf16.mxu0 %v4714_v45  ;;  %v4056_v39 = vld [vmem:[%s4670_s6 + $0x310] ss:$28 sps:$4 sm:$0xff]  }
 0x144   : > { %3812 = vmatprep.subr.bf16.mxu1 %v4714_v45  ;;  %v4057_v45 = vld [vmem:[%s4670_s6 + $0x354] ss:$28 sps:$4 sm:$0xff]  }
 0x145   : > { %2470 = vmatmul.mubr.bf16.gmra.mrb[100].mxu0 %v4050_v25 }
 0x146   : > { %2535 = vmatmul.mubr.bf16.gmra.mrb[76].mxu1 %v4047_v24  ;;  %3721 = vmatpush3.bf16.msra.mxu0 %v4720_v46 }
 0x147   : > { %3820 = vmatpush3.bf16.msra.mxu1 %v4720_v46  ;;  %2542 = vmatprep.mubr.bf16.mxu1 %v4051_v36 }
 0x148   : > { %3813 = vmatprep.subr.bf16.mxu1 %v4726_v47  ;;  %3722 = vmatprep.subr.bf16.mxu0 %v4726_v47 }
 0x149   : > { %2477 = vmatprep.mubr.bf16.mxu0 %v4054_v37 }
 0x14a   : > { %3723 = vmatpush3.bf16.msra.mxu0 %v4732_v48 }
 0x14b   : > { %3821 = vmatpush3.bf16.msra.mxu1 %v4732_v48  ;;  %3724 = vmatprep.subr.bf16.mxu0 %v4742_v53 }
 0x14c   : > { %3814 = vmatprep.subr.bf16.mxu1 %v4742_v53 }
 0x14d   : > { %2478 = vmatmul.mubr.bf16.gmra.mrb[104].mxu0 %v4056_v39 }
 0x14e   : > { %2543 = vmatmul.mubr.bf16.gmra.mrb[80].mxu1 %v4053_v38  ;;  %3725 = vmatpush3.bf16.msra.mxu0 %v4748_v54 }
 0x14f   : > { %3822 = vmatpush3.bf16.msra.mxu1 %v4748_v54  ;;  %2550 = vmatprep.mubr.bf16.mxu1 %v4057_v45  ;;  %v4075_v45 = vld [vmem:[%s4670_s6 + $0x360] ss:$28 sps:$4 sm:$0xff]  }
 0x150   : > { %3815 = vmatprep.subr.bf16.mxu1 %v4754_v55  ;;  %v3274_v46 = vpop.f32.mrb[0].mxu0  ;;  %3726 = vmatprep.subr.bf16.mxu0 %v4754_v55 }
 0x151   : > { %v3314_v47 = vpop.f32.mrb[0].mxu1  ;;  %v3275_v48 = vpop.f32.mrb[1].mxu0  ;;  %2485 = vmatprep.mubr.bf16.mxu0 %v4060_v26  ;;  %v4078_v26 = vld [vmem:[%s4670_s6 + $0x320] ss:$28 sps:$4 sm:$0xff]   ;;  %s2963_s6 = sshll.u32 %s4143_s14, 3 }
 0x152   : > { %v3276_v53 = vadd.f32 %v3275_v48, %v3274_v46  ;;  %v3315_v27 = vpop.f32.mrb[1].mxu1  ;;  %v3277_v28 = vpop.f32.mrb[2].mxu0  ;;  %3727 = vmatpush3.bf16.msra.mxu0 %v4759_v56  ;;  %p500_p9 = scmp.lt.s32.totalorder %s2963_s6, 15 }
 0x153   : > { %3823 = vmatpush3.bf16.msra.mxu1 %v4759_v56  ;;  %v3316_v31 = vadd.f32 %v3315_v27, %v3314_v47  ;;  %v3317_v54 = vpop.f32.mrb[2].mxu1  ;;  %v3278_v42 = vpop.f32.mrb[3].mxu0  ;;  %3728 = vmatprep.subr.bf16.mxu0 %v4776_v62 }
 0x154   : > { %3816 = vmatprep.subr.bf16.mxu1 %v4776_v62  ;;  %v3279_v59 = vadd.f32 %v3278_v42, %v3277_v28  ;;  %v3318_v49 = vpop.f32.mrb[3].mxu1  ;;  %s5330_s6 = smov (!%p500_p9, %s2963_s6), 15 }
 0x155   : > { %v5121_v55 = vadd.f32 %v3316_v31, %v3276_v53  ;;  %v3319_v50 = vadd.f32 %v3318_v49, %v3317_v54  ;;  %2486 = vmatmul.mubr.bf16.gmra.mrb[108].mxu0 %v4062_v30  ;;  %s2964_s18 = sshll.u32 %s5330_s6, 2 }
 0x156   : > { %2551 = vmatmul.mubr.bf16.gmra.mrb[84].mxu1 %v4059_v29  ;;  %3729 = vmatpush3.bf16.msra.mxu0 %v4783_v63  ;;  %s5259_s21 = scalar_lea.vmem %s5322_s3, %s2964_s18 }
 0x157   : > { %v5125_v57 = vadd.f32 %v3319_v50, %v3279_v59  ;;  %3824 = vmatpush3.bf16.msra.mxu1 %v4783_v63  ;;  %3730 = vmatprep.subr.bf16.mxu0 %v4789_v32 }
 0x158   : > { %3817 = vmatprep.subr.bf16.mxu1 %v4789_v32  ;;  %v3280_v56 = vpop.f32.mrb[4].mxu0  ;;  %2615 = vmatprep.mubr.bf16.mxu1 %v4065_v51  ;;  %v4111_v32 = vld [vmem:[%s5320_s1 + $0x180] sm:$0xff]  }
 0x159   : > { %v3320_v62 = vpop.f32.mrb[4].mxu1  ;;  %v3281_v58 = vpop.f32.mrb[5].mxu0  ;;  %2591 = vmatprep.mubr.bf16.mxu0 %v4068_v52 }
 0x15a   : > { %v3282_v1 = vadd.f32 %v3281_v58, %v3280_v56  ;;  %v3321_v60 = vpop.f32.mrb[5].mxu1  ;;  %v3283_v34 = vpop.f32.mrb[6].mxu0  ;;  %3731 = vmatpush3.bf16.msra.mxu0 %v4795_v33 }
 0x15b   : > { %3825 = vmatpush3.bf16.msra.mxu1 %v4795_v33  ;;  %v3322_v40 = vadd.f32 %v3321_v60, %v3320_v62  ;;  %v3323_v63 = vpop.f32.mrb[6].mxu1  ;;  %v3284_v41 = vpop.f32.mrb[7].mxu0  ;;  %v4112_v33 = vld [vmem:[%s5320_s1 + $0x188] sm:$0xff]  }
 0x15c   : > { %3798 = vmatprep.subr.bf16.mxu1 %v4111_v32  ;;  %v3285_v44 = vadd.f32 %v3284_v41, %v3283_v34  ;;  %v3324_v0 = vpop.f32.mrb[7].mxu1 }
 0x15d   : > { %v5140_v3 = vadd.f32 %v3322_v40, %v3282_v1  ;;  %v3325_v4 = vadd.f32 %v3324_v0, %v3323_v63  ;;  %2592 = vmatmul.mubr.bf16.vlgmr.msra.gmra.mrb[112].mxu0 %v4066_v35 }
 0x15e   : > { %2616 = vmatmul.mubr.bf16.vlgmr.msra.gmra.mrb[88].mxu1 %v4063_v61  ;;  %2599 = vmatprep.mubr.bf16.mxu0 %v4071_v2 }
 0x15f   : > { %v5142_v5 = vadd.f32 %v3325_v4, %v3285_v44  ;;  %3799 = vmatpush3.bf16.msra.mxu1 %v4111_v32  ;;  %3802 = vmatprep.mubr.msk.bf16.mxu1 %vm1081_vm0, %v4069_v43 }
 0x160   : > { %3800 = vmatprep.subr.bf16.mxu1 %v4112_v33  ;;  %v3286_v6 = vpop.f32.mrb[8].mxu0 }
 0x161   : > { %v3326_v7 = vpop.f32.mrb[8].mxu1  ;;  %v3287_v8 = vpop.f32.mrb[9].mxu0 }
 0x162   : > { %v3288_v9 = vadd.f32 %v3287_v8, %v3286_v6  ;;  %v3327_v10 = vpop.f32.mrb[9].mxu1  ;;  %v3289_v11 = vpop.f32.mrb[10].mxu0 }
 0x163   : > { %3801 = vmatpush3.bf16.msra.mxu1 %v4112_v33  ;;  %v3328_v14 = vadd.f32 %v3327_v10, %v3326_v7  ;;  %v3329_v15 = vpop.f32.mrb[10].mxu1  ;;  %v3290_v16 = vpop.f32.mrb[11].mxu0 }
 0x164   : > { %v3291_v19 = vadd.f32 %v3290_v16, %v3289_v11  ;;  %v3330_v20 = vpop.f32.mrb[11].mxu1 }
 0x165   : > { %v1210_v21 = vadd.f32 %v3328_v14, %v3288_v9  ;;  %v3331_v22 = vadd.f32 %v3330_v20, %v3329_v15  ;;  %2600 = vmatmul.mubr.bf16.gmra.mrb[116].mxu0 %v4073_v13 }
 0x166   : > { %3803 = vmatmul.mubr.msk.bf16.vlgmr.msra.gmra.mrb[92].mxu1 %vm1081_vm0, %v4070_v12  ;;  %2607 = vmatprep.mubr.bf16.mxu0 %v4076_v18 }
 0x167   : > { %v1213_v23 = vadd.f32 %v3331_v22, %v3291_v19  ;;  %3806 = vmatprep.mubr.msk.bf16.mxu1 %vm1081_vm0, %v4074_v17 }
 0x168   : > { %v3292_v24 = vpop.f32.mrb[12].mxu0 }
 0x169   : > { %v3332_v25 = vpop.f32.mrb[12].mxu1  ;;  %v3293_v36 = vpop.f32.mrb[13].mxu0 }
 0x16a   : > { %v3294_v37 = vadd.f32 %v3293_v36, %v3292_v24  ;;  %v3333_v38 = vpop.f32.mrb[13].mxu1  ;;  %v3295_v39 = vpop.f32.mrb[14].mxu0 }
 0x16b   : > { %v3334_v46 = vadd.f32 %v3333_v38, %v3332_v25  ;;  %v3335_v47 = vpop.f32.mrb[14].mxu1  ;;  %v3296_v48 = vpop.f32.mrb[15].mxu0 }
 0x16c   : > { %v3297_v53 = vadd.f32 %v3296_v48, %v3295_v39  ;;  %v3336_v27 = vpop.f32.mrb[15].mxu1 }
 0x16d   : > { %v1218_v28 = vadd.f32 %v3334_v46, %v3294_v37  ;;  %v3337_v29 = vadd.f32 %v3336_v27, %v3335_v47  ;;  %2608 = vmatmul.mubr.bf16.gmra.mrb[120].mxu0 %v4078_v26 }
 0x16e   : > { %3807 = vmatmul.mubr.msk.bf16.gmra.mrb[96].mxu1 %vm1081_vm0, %v4075_v45 }
 0x16f   : > { %v1221_v30 = vadd.f32 %v3337_v29, %v3297_v53 }
 0x170   : > { %v3354_v31 = vpop.f32.mrb[16].mxu0 }
 0x171   : > { %v3768_v54 = vpop.f32.mrb[16].mxu1  ;;  %v3355_v42 = vpop.f32.mrb[17].mxu0 }
 0x172   : > { %v1323_v59 = vpop.f32.mrb[17].mxu1  ;;  %v3356_v49 = vadd.f32 %v3355_v42, %v3354_v31  ;;  %v3357_v50 = vpop.f32.mrb[18].mxu0 }
 0x173   : > { %v3769_v51 = vpop.f32.mrb[18].mxu1  ;;  %v3358_v52 = vpop.f32.mrb[19].mxu0 }
 0x174   : > { %v1326_v56 = vpop.f32.mrb[19].mxu1  ;;  %v3359_v62 = vadd.f32 %v3358_v52, %v3357_v50  ;;  %v1259_v58 = vadd.f32 %v3356_v49, %v5121_v55 }
 0x176   : > { %v5158_v1 = vadd.f32 %v1323_v59, %v1259_v58  ;;  %v1262_v60 = vadd.f32 %v3359_v62, %v5125_v57 }
 0x178   : > { %v5161_v61 = vadd.f32 %v1326_v56, %v1262_v60  ;;  %v3360_v34 = vpop.f32.mrb[20].mxu0 }
 0x179   : > { %v3772_v35 = vpop.f32.mrb[20].mxu1  ;;  %v3361_v40 = vpop.f32.mrb[21].mxu0 }
 0x17a   : > { %v1339_v63 = vpop.f32.mrb[21].mxu1  ;;  %v3362_v41 = vadd.f32 %v3361_v40, %v3360_v34  ;;  %v3363_v43 = vpop.f32.mrb[22].mxu0 }
 0x17b   : > { %v3773_v32 = vpop.f32.mrb[22].mxu1  ;;  %v3364_v44 = vpop.f32.mrb[23].mxu0 }
 0x17c   : > { %v1342_v0 = vpop.f32.mrb[23].mxu1  ;;  %v1267_v2 = vadd.f32 %v3362_v41, %v5140_v3  ;;  %v3365_v4 = vadd.f32 %v3364_v44, %v3363_v43 }
 0x17e   : > { %v5164_v33 = vadd.f32 %v3768_v54, %v1267_v2  ;;  %v1270_v55 = vadd.f32 %v3365_v4, %v5142_v5 }
 0x180   : > { %v5167_v6 = vadd.f32 %v3769_v51, %v1270_v55  ;;  %v3366_v57 = vpop.f32.mrb[24].mxu0 }
 0x181   : > { %v3367_v7 = vpop.f32.mrb[25].mxu0 }
 0x182   : > { %v3368_v8 = vadd.f32 %v3367_v7, %v3366_v57  ;;  %v3369_v9 = vpop.f32.mrb[26].mxu0 }
 0x183   : > { %v3370_v10 = vpop.f32.mrb[27].mxu0 }
 0x184   : > { %v3371_v11 = vadd.f32 %v3370_v10, %v3369_v9  ;;  %v1275_v12 = vadd.f32 %v3368_v8, %v1210_v21 }
 0x186   : > { %v5169_v13 = vadd.f32 %v1339_v63, %v1275_v12  ;;  %v1278_v14 = vadd.f32 %v3371_v11, %v1213_v23 }
 0x188   : > { %v5171_v15 = vadd.f32 %v1342_v0, %v1278_v14  ;;  %v3372_v3 = vpop.f32.mrb[28].mxu0 }
 0x189   : > { %v3373_v16 = vpop.f32.mrb[29].mxu0 }
 0x18a   : > { %v3374_v17 = vadd.f32 %v3373_v16, %v3372_v3  ;;  %v3375_v18 = vpop.f32.mrb[30].mxu0 }
 0x18b   : > { %v3376_v19 = vpop.f32.mrb[31].mxu0 }
 0x18c   : > { %v1283_v5 = vadd.f32 %v3374_v17, %v1218_v28  ;;  %v3377_v20 = vadd.f32 %v3376_v19, %v3375_v18 }
 0x18e   : > { %v5173_v22 = vadd.f32 %v3772_v35, %v1283_v5  ;;  %v1286_v24 = vadd.f32 %v3377_v20, %v1221_v30 }
 0x190   : > { %v5175_v25 = vadd.f32 %v3773_v32, %v1286_v24  ;;  %v3400_v36 = vpop.f32.mrb[32].mxu0 }
 0x191   : > { %v3440_v37 = vpop.f32.mrb[24].mxu1  ;;  %v3401_v21 = vpop.f32.mrb[33].mxu0 }
 0x192   : > { %v3441_v38 = vpop.f32.mrb[25].mxu1  ;;  %v3402_v39 = vadd.f32 %v3401_v21, %v3400_v36  ;;  %v3403_v45 = vpop.f32.mrb[34].mxu0 }
 0x193   : > { %v3442_v23 = vadd.f32 %v3441_v38, %v3440_v37  ;;  %v3443_v26 = vpop.f32.mrb[26].mxu1  ;;  %v3404_v46 = vpop.f32.mrb[35].mxu0 }
 0x194   : > { %v3444_v47 = vpop.f32.mrb[27].mxu1  ;;  %v3405_v53 = vadd.f32 %v3404_v46, %v3403_v45 }
 0x195   : > { %v1639_v48 = vadd.f32 %v3442_v23, %v3402_v39  ;;  %v3445_v27 = vadd.f32 %v3444_v47, %v3443_v26 }
 0x197   : > { %v1642_v28 = vadd.f32 %v3445_v27, %v3405_v53 }
 0x198   : > { %v3406_v29 = vpop.f32.mrb[36].mxu0 }
 0x199   : > { %v3446_v31 = vpop.f32.mrb[28].mxu1  ;;  %v3407_v54 = vpop.f32.mrb[37].mxu0 }
 0x19a   : > { %v3447_v30 = vpop.f32.mrb[29].mxu1  ;;  %v3408_v42 = vadd.f32 %v3407_v54, %v3406_v29  ;;  %v3409_v49 = vpop.f32.mrb[38].mxu0 }
 0x19b   : > { %v3448_v59 = vadd.f32 %v3447_v30, %v3446_v31  ;;  %v3449_v50 = vpop.f32.mrb[30].mxu1  ;;  %v3410_v51 = vpop.f32.mrb[39].mxu0 }
 0x19c   : > { %v3450_v52 = vpop.f32.mrb[31].mxu1  ;;  %v3411_v62 = vadd.f32 %v3410_v51, %v3409_v49 }
 0x19d   : > { %v1647_v56 = vadd.f32 %v3448_v59, %v3408_v42  ;;  %v3451_v58 = vadd.f32 %v3450_v52, %v3449_v50 }
 0x19f   : > { %v1650_v60 = vadd.f32 %v3451_v58, %v3411_v62 }
 0x1a0   : > { %v3412_v34 = vpop.f32.mrb[40].mxu0 }
 0x1a1   : > { %v3452_v35 = vpop.f32.mrb[32].mxu1  ;;  %v3413_v40 = vpop.f32.mrb[41].mxu0 }
 0x1a2   : > { %v3453_v63 = vpop.f32.mrb[33].mxu1  ;;  %v3414_v41 = vadd.f32 %v3413_v40, %v3412_v34  ;;  %v3415_v32 = vpop.f32.mrb[42].mxu0 }
 0x1a3   : > { %v3454_v43 = vadd.f32 %v3453_v63, %v3452_v35  ;;  %v3455_v44 = vpop.f32.mrb[34].mxu1  ;;  %v3416_v0 = vpop.f32.mrb[43].mxu0 }
 0x1a4   : > { %v3456_v2 = vpop.f32.mrb[35].mxu1  ;;  %v3417_v55 = vadd.f32 %v3416_v0, %v3415_v32 }
 0x1a5   : > { %v1655_v4 = vadd.f32 %v3454_v43, %v3414_v41  ;;  %v3457_v57 = vadd.f32 %v3456_v2, %v3455_v44 }
 0x1a7   : > { %v1658_v7 = vadd.f32 %v3457_v57, %v3417_v55 }
 0x1a8   : > { %v3418_v8 = vpop.f32.mrb[44].mxu0 }
 0x1a9   : > { %v3458_v9 = vpop.f32.mrb[36].mxu1  ;;  %v3419_v10 = vpop.f32.mrb[45].mxu0 }
 0x1aa   : > { %v3459_v11 = vpop.f32.mrb[37].mxu1  ;;  %v3420_v12 = vadd.f32 %v3419_v10, %v3418_v8  ;;  %v3421_v3 = vpop.f32.mrb[46].mxu0 }
 0x1ab   : > { %v3460_v14 = vadd.f32 %v3459_v11, %v3458_v9  ;;  %v3461_v16 = vpop.f32.mrb[38].mxu1  ;;  %v3422_v17 = vpop.f32.mrb[47].mxu0 }
 0x1ac   : > { %v3462_v18 = vpop.f32.mrb[39].mxu1  ;;  %v3423_v5 = vadd.f32 %v3422_v17, %v3421_v3 }
 0x1ad   : > { %v1663_v19 = vadd.f32 %v3460_v14, %v3420_v12  ;;  %v3463_v20 = vadd.f32 %v3462_v18, %v3461_v16 }
 0x1af   : > { %v1666_v24 = vadd.f32 %v3463_v20, %v3423_v5 }
 0x1b0   : > { %v3480_v36 = vpop.f32.mrb[48].mxu0 }
 0x1b1   : > { %v3780_v37 = vpop.f32.mrb[40].mxu1  ;;  %v3481_v21 = vpop.f32.mrb[49].mxu0 }
 0x1b2   : > { %v1768_v38 = vpop.f32.mrb[41].mxu1  ;;  %v3482_v39 = vadd.f32 %v3481_v21, %v3480_v36  ;;  %v3483_v23 = vpop.f32.mrb[50].mxu0 }
 0x1b3   : > { %v3781_v45 = vpop.f32.mrb[42].mxu1  ;;  %v3484_v26 = vpop.f32.mrb[51].mxu0 }
 0x1b4   : > { %v1771_v46 = vpop.f32.mrb[43].mxu1  ;;  %v3485_v47 = vadd.f32 %v3484_v26, %v3483_v23  ;;  %v1704_v53 = vadd.f32 %v3482_v39, %v1639_v48 }
 0x1b6   : > { %v5177_v27 = vadd.f32 %v1768_v38, %v1704_v53  ;;  %v1707_v29 = vadd.f32 %v3485_v47, %v1642_v28 }
 0x1b8   : > { %v2689_v31 = vmax.f32 %v5158_v1, %v5177_v27  ;;  %v5181_v54 = vadd.f32 %v1771_v46, %v1707_v29  ;;  %v3486_v30 = vpop.f32.mrb[52].mxu0 }
 0x1b9   : > { %v3784_v42 = vpop.f32.mrb[44].mxu1  ;;  %v3487_v59 = vpop.f32.mrb[53].mxu0 }
 0x1ba   : > { %v1784_v49 = vpop.f32.mrb[45].mxu1  ;;  %v2690_v50 = vmax.f32 %v5161_v61, %v5181_v54  ;;  %v3488_v51 = vadd.f32 %v3487_v59, %v3486_v30  ;;  %v3489_v52 = vpop.f32.mrb[54].mxu0 }
 0x1bb   : > { %v3785_v62 = vpop.f32.mrb[46].mxu1  ;;  %v3490_v58 = vpop.f32.mrb[55].mxu0 }
 0x1bc   : > { %v1787_v48 = vpop.f32.mrb[47].mxu1  ;;  %v1712_v34 = vadd.f32 %v3488_v51, %v1647_v56  ;;  %v3491_v35 = vadd.f32 %v3490_v58, %v3489_v52 }
 0x1be   : > { %v5185_v28 = vadd.f32 %v3780_v37, %v1712_v34  ;;  %v1715_v40 = vadd.f32 %v3491_v35, %v1650_v60 }
 0x1c0   : > { %v2691_v63 = vmax.f32 %v5164_v33, %v5185_v28  ;;  %v5189_v41 = vadd.f32 %v3781_v45, %v1715_v40  ;;  %v3492_v43 = vpop.f32.mrb[56].mxu0 }
 0x1c1   : > { %v3493_v32 = vpop.f32.mrb[57].mxu0 }
 0x1c2   : > { %v2692_v44 = vmax.f32 %v5167_v6, %v5189_v41  ;;  %v3494_v0 = vadd.f32 %v3493_v32, %v3492_v43  ;;  %v3495_v2 = vpop.f32.mrb[58].mxu0 }
 0x1c3   : > { %v3496_v55 = vpop.f32.mrb[59].mxu0 }
 0x1c4   : > { %v3497_v57 = vadd.f32 %v3496_v55, %v3495_v2  ;;  %v1720_v8 = vadd.f32 %v3494_v0, %v1655_v4 }
 0x1c6   : > { %v5193_v56 = vadd.f32 %v1784_v49, %v1720_v8  ;;  %v1723_v9 = vadd.f32 %v3497_v57, %v1658_v7 }
 0x1c8   : > { %v2693_v60 = vmax.f32 %v5169_v13, %v5193_v56  ;;  %v5197_v10 = vadd.f32 %v1787_v48, %v1723_v9  ;;  %v3498_v11 = vpop.f32.mrb[60].mxu0 }
 0x1c9   : > { %v3499_v12 = vpop.f32.mrb[61].mxu0 }
 0x1ca   : > { %v2694_v14 = vmax.f32 %v5171_v15, %v5197_v10  ;;  %v3500_v3 = vadd.f32 %v3499_v12, %v3498_v11  ;;  %v3501_v16 = vpop.f32.mrb[62].mxu0 }
 0x1cb   : > { %v3502_v17 = vpop.f32.mrb[63].mxu0 }
 0x1cc   : > { %v1728_v18 = vadd.f32 %v3500_v3, %v1663_v19  ;;  %v3503_v5 = vadd.f32 %v3502_v17, %v3501_v16 }
 0x1ce   : > { %v5201_v20 = vadd.f32 %v3784_v42, %v1728_v18  ;;  %v1731_v4 = vadd.f32 %v3503_v5, %v1666_v24 }
 0x1d0   : > { %v5203_v36 = vadd.f32 %v3785_v62, %v1731_v4  ;;  %v3526_v7 = vpop.f32.mrb[64].mxu0  ;;  %v2695_v21 = vmax.f32 %v5173_v22, %v5201_v20 }
 0x1d1   : > { %v3566_v37 = vpop.f32.mrb[48].mxu1  ;;  %v3527_v38 = vpop.f32.mrb[65].mxu0 }
 0x1d2   : > { %v3567_v39 = vpop.f32.mrb[49].mxu1  ;;  %v3528_v23 = vadd.f32 %v3527_v38, %v3526_v7  ;;  %v3529_v26 = vpop.f32.mrb[66].mxu0  ;;  %v2696_v19 = vmax.f32 %v5175_v25, %v5203_v36 }
 0x1d3   : > { %v3568_v45 = vadd.f32 %v3567_v39, %v3566_v37  ;;  %v3569_v46 = vpop.f32.mrb[50].mxu1  ;;  %v3530_v47 = vpop.f32.mrb[67].mxu0 }
 0x1d4   : > { %v3570_v53 = vpop.f32.mrb[51].mxu1  ;;  %v3531_v24 = vadd.f32 %v3530_v47, %v3529_v26 }
 0x1d5   : > { %v2084_v29 = vadd.f32 %v3568_v45, %v3528_v23  ;;  %v3571_v30 = vadd.f32 %v3570_v53, %v3569_v46 }
 0x1d7   : > { %v2087_v42 = vadd.f32 %v3571_v30, %v3531_v24 }
 0x1d8   : > { %v3532_v59 = vpop.f32.mrb[68].mxu0 }
 0x1d9   : > { %v3572_v49 = vpop.f32.mrb[52].mxu1  ;;  %v3533_v51 = vpop.f32.mrb[69].mxu0 }
 0x1da   : > { %v3573_v52 = vpop.f32.mrb[53].mxu1  ;;  %v3534_v62 = vadd.f32 %v3533_v51, %v3532_v59  ;;  %v3535_v48 = vpop.f32.mrb[70].mxu0 }
 0x1db   : > { %v3574_v58 = vadd.f32 %v3573_v52, %v3572_v49  ;;  %v3575_v34 = vpop.f32.mrb[54].mxu1  ;;  %v3536_v35 = vpop.f32.mrb[71].mxu0 }
 0x1dc   : > { %v3576_v40 = vpop.f32.mrb[55].mxu1  ;;  %v3537_v32 = vadd.f32 %v3536_v35, %v3535_v48 }
 0x1dd   : > { %v2092_v43 = vadd.f32 %v3574_v58, %v3534_v62  ;;  %v3577_v0 = vadd.f32 %v3576_v40, %v3575_v34 }
 0x1df   : > { %v2095_v2 = vadd.f32 %v3577_v0, %v3537_v32 }
 0x1e0   : > { %v3538_v55 = vpop.f32.mrb[72].mxu0 }
 0x1e1   : > { %v3578_v57 = vpop.f32.mrb[56].mxu1  ;;  %v3539_v8 = vpop.f32.mrb[73].mxu0 }
 0x1e2   : > { %v3579_v9 = vpop.f32.mrb[57].mxu1  ;;  %v3540_v11 = vadd.f32 %v3539_v8, %v3538_v55  ;;  %v3541_v3 = vpop.f32.mrb[74].mxu0 }
 0x1e3   : > { %v3580_v12 = vadd.f32 %v3579_v9, %v3578_v57  ;;  %v3581_v16 = vpop.f32.mrb[58].mxu1  ;;  %v3542_v17 = vpop.f32.mrb[75].mxu0 }
 0x1e4   : > { %v3582_v18 = vpop.f32.mrb[59].mxu1  ;;  %v3543_v4 = vadd.f32 %v3542_v17, %v3541_v3 }
 0x1e5   : > { %v2100_v5 = vadd.f32 %v3580_v12, %v3540_v11  ;;  %v3583_v7 = vadd.f32 %v3582_v18, %v3581_v16 }
 0x1e7   : > { %v2103_v37 = vadd.f32 %v3583_v7, %v3543_v4 }
 0x1e8   : > { %v3544_v38 = vpop.f32.mrb[76].mxu0 }
 0x1e9   : > { %v3584_v39 = vpop.f32.mrb[60].mxu1  ;;  %v3545_v23 = vpop.f32.mrb[77].mxu0 }
 0x1ea   : > { %v3585_v45 = vpop.f32.mrb[61].mxu1  ;;  %v3546_v26 = vadd.f32 %v3545_v23, %v3544_v38  ;;  %v3547_v47 = vpop.f32.mrb[78].mxu0 }
 0x1eb   : > { %v3586_v46 = vadd.f32 %v3585_v45, %v3584_v39  ;;  %v3587_v53 = vpop.f32.mrb[62].mxu1  ;;  %v3548_v24 = vpop.f32.mrb[79].mxu0 }
 0x1ec   : > { %v3588_v30 = vpop.f32.mrb[63].mxu1  ;;  %v3549_v49 = vadd.f32 %v3548_v24, %v3547_v47 }
 0x1ed   : > { %v2108_v59 = vadd.f32 %v3586_v46, %v3546_v26  ;;  %v3589_v51 = vadd.f32 %v3588_v30, %v3587_v53 }
 0x1ef   : > { %v2111_v52 = vadd.f32 %v3589_v51, %v3549_v49 }
 0x1f0   : > { %v3606_v62 = vpop.f32.mrb[80].mxu0 }
 0x1f1   : > { %v3792_v58 = vpop.f32.mrb[64].mxu1  ;;  %v3607_v48 = vpop.f32.mrb[81].mxu0 }
 0x1f2   : > { %v2213_v34 = vpop.f32.mrb[65].mxu1  ;;  %v3608_v35 = vadd.f32 %v3607_v48, %v3606_v62  ;;  %v3609_v40 = vpop.f32.mrb[82].mxu0 }
 0x1f3   : > { %v3793_v32 = vpop.f32.mrb[66].mxu1  ;;  %v3610_v0 = vpop.f32.mrb[83].mxu0 }
 0x1f4   : > { %v2216_v55 = vpop.f32.mrb[67].mxu1  ;;  %v3611_v57 = vadd.f32 %v3610_v0, %v3609_v40  ;;  %v2149_v8 = vadd.f32 %v3608_v35, %v2084_v29 }
 0x1f6   : > { %v5209_v9 = vadd.f32 %v2213_v34, %v2149_v8  ;;  %v2152_v11 = vadd.f32 %v3611_v57, %v2087_v42 }
 0x1f8   : > { %v5211_v12 = vadd.f32 %v2216_v55, %v2152_v11  ;;  %v3612_v3 = vpop.f32.mrb[84].mxu0 }
 0x1f9   : > { %v3796_v16 = vpop.f32.mrb[68].mxu1  ;;  %v3613_v17 = vpop.f32.mrb[85].mxu0 }
 0x1fa   : > { %v2229_v18 = vpop.f32.mrb[69].mxu1  ;;  %v3614_v4 = vadd.f32 %v3613_v17, %v3612_v3  ;;  %v3615_v7 = vpop.f32.mrb[86].mxu0 }
 0x1fb   : > { %v3797_v38 = vpop.f32.mrb[70].mxu1  ;;  %v3616_v39 = vpop.f32.mrb[87].mxu0 }
 0x1fc   : > { %v2232_v23 = vpop.f32.mrb[71].mxu1  ;;  %v2157_v45 = vadd.f32 %v3614_v4, %v2092_v43  ;;  %v3617_v26 = vadd.f32 %v3616_v39, %v3615_v7 }
 0x1fe   : > { %v5213_v46 = vadd.f32 %v3792_v58, %v2157_v45  ;;  %v2160_v47 = vadd.f32 %v3617_v26, %v2095_v2 }
 0x200   : > { %v5215_v29 = vadd.f32 %v3793_v32, %v2160_v47  ;;  %v3618_v53 = vpop.f32.mrb[88].mxu0 }
 0x201   : > { %v3619_v42 = vpop.f32.mrb[89].mxu0 }
 0x202   : > { %v3620_v24 = vadd.f32 %v3619_v42, %v3618_v53  ;;  %v3621_v30 = vpop.f32.mrb[90].mxu0 }
 0x203   : > { %v3622_v49 = vpop.f32.mrb[91].mxu0 }
 0x204   : > { %v3623_v51 = vadd.f32 %v3622_v49, %v3621_v30  ;;  %v2165_v62 = vadd.f32 %v3620_v24, %v2100_v5 }
 0x206   : > { %v5217_v48 = vadd.f32 %v2229_v18, %v2165_v62  ;;  %v2168_v34 = vadd.f32 %v3623_v51, %v2103_v37 }
 0x208   : > { %v5219_v35 = vadd.f32 %v2232_v23, %v2168_v34  ;;  %v3624_v40 = vpop.f32.mrb[92].mxu0 }
 0x209   : > { %v3625_v43 = vpop.f32.mrb[93].mxu0 }
 0x20a   : > { %v3626_v0 = vadd.f32 %v3625_v43, %v3624_v40  ;;  %v3627_v58 = vpop.f32.mrb[94].mxu0 }
 0x20b   : > { %v3628_v55 = vpop.f32.mrb[95].mxu0 }
 0x20c   : > { %v2173_v2 = vadd.f32 %v3626_v0, %v2108_v59  ;;  %v3629_v32 = vadd.f32 %v3628_v55, %v3627_v58 }
 0x20e   : > { %v2176_v57 = vadd.f32 %v3629_v32, %v2111_v52  ;;  %v5221_v8 = vadd.f32 %v3796_v16, %v2173_v2 }
 0x210   : > { %v3652_v11 = vpop.f32.mrb[96].mxu0  ;;  %v5223_v17 = vadd.f32 %v3797_v38, %v2176_v57 }
 0x211   : > { %v3692_v3 = vpop.f32.mrb[72].mxu1  ;;  %v3653_v5 = vpop.f32.mrb[97].mxu0 }
 0x212   : > { %v3693_v18 = vpop.f32.mrb[73].mxu1  ;;  %v3654_v4 = vadd.f32 %v3653_v5, %v3652_v11  ;;  %v3655_v7 = vpop.f32.mrb[98].mxu0 }
 0x213   : > { %v3694_v37 = vadd.f32 %v3693_v18, %v3692_v3  ;;  %v3695_v39 = vpop.f32.mrb[74].mxu1  ;;  %v3656_v23 = vpop.f32.mrb[99].mxu0 }
 0x214   : > { %v3696_v45 = vpop.f32.mrb[75].mxu1  ;;  %v3657_v47 = vadd.f32 %v3656_v23, %v3655_v7 }
 0x215   : > { %v2529_v26 = vadd.f32 %v3694_v37, %v3654_v4  ;;  %v3697_v53 = vadd.f32 %v3696_v45, %v3695_v39 }
 0x217   : > { %v2532_v59 = vadd.f32 %v3697_v53, %v3657_v47 }
 0x218   : > { %v3658_v42 = vpop.f32.mrb[100].mxu0 }
 0x219   : > { %v3698_v52 = vpop.f32.mrb[76].mxu1  ;;  %v3659_v16 = vpop.f32.mrb[101].mxu0 }
 0x21a   : > { %v3699_v24 = vpop.f32.mrb[77].mxu1  ;;  %v3660_v30 = vadd.f32 %v3659_v16, %v3658_v42  ;;  %v3661_v38 = vpop.f32.mrb[102].mxu0 }
 0x21b   : > { %v3700_v49 = vadd.f32 %v3699_v24, %v3698_v52  ;;  %v3701_v51 = vpop.f32.mrb[78].mxu1  ;;  %v3662_v62 = vpop.f32.mrb[103].mxu0 }
 0x21c   : > { %v3702_v34 = vpop.f32.mrb[79].mxu1  ;;  %v3663_v43 = vadd.f32 %v3662_v62, %v3661_v38 }
 0x21d   : > { %v5225_v40 = vadd.f32 %v3700_v49, %v3660_v30  ;;  %v3703_v0 = vadd.f32 %v3702_v34, %v3701_v51 }
 0x21f   : > { %v5227_v58 = vadd.f32 %v3703_v0, %v3663_v43 }
 0x220   : > { %v3664_v55 = vpop.f32.mrb[104].mxu0 }
 0x221   : > { %v3704_v2 = vpop.f32.mrb[80].mxu1  ;;  %v3665_v32 = vpop.f32.mrb[105].mxu0 }
 0x222   : > { %v3705_v57 = vpop.f32.mrb[81].mxu1  ;;  %v3666_v11 = vadd.f32 %v3665_v32, %v3664_v55  ;;  %v3667_v5 = vpop.f32.mrb[106].mxu0 }
 0x223   : > { %v3706_v3 = vadd.f32 %v3705_v57, %v3704_v2  ;;  %v3707_v18 = vpop.f32.mrb[82].mxu1  ;;  %v3668_v4 = vpop.f32.mrb[107].mxu0 }
 0x224   : > { %v3708_v37 = vpop.f32.mrb[83].mxu1  ;;  %v3669_v39 = vadd.f32 %v3668_v4, %v3667_v5 }
 0x225   : > { %v5229_v7 = vadd.f32 %v3706_v3, %v3666_v11  ;;  %v3709_v23 = vadd.f32 %v3708_v37, %v3707_v18 }
 0x227   : > { %v5231_v45 = vadd.f32 %v3709_v23, %v3669_v39 }
 0x228   : > { %v3670_v47 = vpop.f32.mrb[108].mxu0 }
 0x229   : > { %v3710_v53 = vpop.f32.mrb[84].mxu1  ;;  %v3671_v42 = vpop.f32.mrb[109].mxu0 }
 0x22a   : > { %v3711_v52 = vpop.f32.mrb[85].mxu1  ;;  %v3672_v16 = vadd.f32 %v3671_v42, %v3670_v47  ;;  %v3673_v30 = vpop.f32.mrb[110].mxu0 }
 0x22b   : > { %v3712_v24 = vadd.f32 %v3711_v52, %v3710_v53  ;;  %v3713_v49 = vpop.f32.mrb[86].mxu1  ;;  %v3674_v38 = vpop.f32.mrb[111].mxu0 }
 0x22c   : > { %v3714_v51 = vpop.f32.mrb[87].mxu1  ;;  %v3675_v34 = vadd.f32 %v3674_v38, %v3673_v30 }
 0x22d   : > { %v2553_v62 = vadd.f32 %v3712_v24, %v3672_v16  ;;  %v3715_v43 = vadd.f32 %v3714_v51, %v3713_v49 }
 0x22f   : > { %v2556_v0 = vadd.f32 %v3715_v43, %v3675_v34 }
 0x230   : > { %v3732_v2 = vpop.f32.mrb[112].mxu0 }
 0x231   : > { %v3750_v55 = vpop.f32.mrb[88].mxu1  ;;  %v3733_v57 = vpop.f32.mrb[113].mxu0 }
 0x232   : > { %v3751_v32 = vpop.f32.mrb[89].mxu1  ;;  %v3734_v5 = vadd.f32 %v3733_v57, %v3732_v2  ;;  %v3735_v18 = vpop.f32.mrb[114].mxu0 }
 0x233   : > { %v3752_v11 = vadd.f32 %v3751_v32, %v3750_v55  ;;  %v3753_v3 = vpop.f32.mrb[90].mxu1  ;;  %v3736_v37 = vpop.f32.mrb[115].mxu0 }
 0x234   : > { %v3754_v4 = vpop.f32.mrb[91].mxu1  ;;  %v3737_v23 = vadd.f32 %v3736_v37, %v3735_v18  ;;  %v2594_v47 = vadd.f32 %v3734_v5, %v2529_v26 }
 0x235   : > { %v3755_v39 = vadd.f32 %v3754_v4, %v3753_v3  ;;  %v2618_v53 = vadd.f32 %v3752_v11, %v2553_v62 }
 0x236   : > { %v2597_v42 = vadd.f32 %v3737_v23, %v2532_v59  ;;  %v5239_v59 = vld [vmem:[%s5321_s2] ss:$0 sm:$0xff] }
 0x237   : > { %v2621_v52 = vadd.f32 %v3755_v39, %v2556_v0 }
 0x238   : > { %v3738_v24 = vpop.f32.mrb[116].mxu0 }
 0x239   : > { %v3804_v16 = vpop.f32.mrb[92].mxu1  ;;  %v3739_v49 = vpop.f32.mrb[117].mxu0 }
 0x23a   : > { %v2658_v30 = vpop.f32.mrb[93].mxu1  ;;  %v3740_v34 = vadd.f32 %v3739_v49, %v3738_v24  ;;  %v3741_v43 = vpop.f32.mrb[118].mxu0 }
 0x23b   : > { %v2659_v38 = vadd.f32 %v2658_v30, %v2594_v47  ;;  %v3805_v51 = vpop.f32.mrb[94].mxu1  ;;  %v3742_v2 = vpop.f32.mrb[119].mxu0 }
 0x23c   : > { %v2661_v55 = vpop.f32.mrb[95].mxu1  ;;  %v2602_v26 = vadd.f32 %v3740_v34, %v5225_v40  ;;  %v3743_v62 = vadd.f32 %v3742_v2, %v3741_v43 }
 0x23d   : > { %v2697_v32 = vmax.f32 %v5209_v9, %v2659_v38  ;;  %v2662_v57 = vadd.f32 %v2661_v55, %v2597_v42 }
 0x23e   : > { %v2667_v3 = vadd.f32 %v3804_v16, %v2602_v26  ;;  %v2605_v5 = vadd.f32 %v3743_v62, %v5227_v58 }
 0x23f   : > { %v2705_v0 = vmax.f32 %v2689_v31, %v2697_v32  ;;  %v2698_v11 = vmax.f32 %v5211_v12, %v2662_v57 }
 0x240   : > { %v2699_v18 = vmax.f32 %v5213_v46, %v2667_v3  ;;  %v2670_v4 = vadd.f32 %v3805_v51, %v2605_v5  ;;  %v3744_v39 = vpop.f32.mrb[120].mxu0 }
 0x241   : > { %v2720_v9 = vadd.f32 %v5239_v59, %v2705_v0  ;;  %v2706_v40 = vmax.f32 %v2690_v50, %v2698_v11  ;;  %v3808_v37 = vpop.f32.mrb[96].mxu1  ;;  %v3745_v27 = vpop.f32.mrb[121].mxu0 }
 0x242   : > { %v2683_v23 = vadd.f32 %v3808_v37, %v2618_v53  ;;  %v2674_v1 = vpop.f32.mrb[97].mxu1  ;;  %v2707_v58 = vmax.f32 %v2691_v63, %v2699_v18  ;;  %v2700_v47 = vmax.f32 %v5215_v29, %v2670_v4  ;;  %v3747_v61 = vpop.f32.mrb[122].mxu0  ;;  %v3746_v46 = vadd.f32 %v3745_v27, %v3744_v39 }
 0x243   : > { %v2728_v31 = vmax.f32 %v2720_v9, 0.0  ;;  %v2721_v12 = vadd.f32 %v5239_v59, %v2706_v40  ;;  %v3809_v42 = vpop.f32.mrb[98].mxu1  ;;  %v3748_v53 = vpop.f32.mrb[123].mxu0 }
 0x244   : > { %v2703_v54 = vmax.f32 %v5221_v8, %v2683_v23  ;;  %v2686_v50 = vadd.f32 %v3809_v42, %v2621_v52  ;;  %v2677_v16 = vpop.f32.mrb[99].mxu1  ;;  %v2722_v28 = vadd.f32 %v5239_v59, %v2707_v58  ;;  %v2708_v63 = vmax.f32 %v2692_v44, %v2700_v47 }
 0x245   : > { %v3250_v24 = vpack.c.bf16 %v2728_v31, %v2728_v31  ;;  %v2729_v33 = vmax.f32 %v2721_v12, 0.0  ;;  %v2610_v8 = vadd.f32 %v3746_v46, %v5229_v7  ;;  %v3749_v52 = vadd.f32 %v3748_v53, %v3747_v61 }
 0x246   : > { %v2711_v29 = vmax.f32 %v2695_v21, %v2703_v54  ;;  %v2704_v30 = vmax.f32 %v5223_v17, %v2686_v50  ;;  %v2730_v38 = vmax.f32 %v2722_v28, 0.0  ;;  %v2723_v51 = vadd.f32 %v5239_v59, %v2708_v63 }
 0x247   : > { %2769 = vst.msk [vmem:[%s5259_s21] sm:$0xf] %vm2768_vm1, %v3250_v24  ;;  %v3251_v49 = vpack.c.bf16 %v2729_v33, %v2729_v33  ;;  %v2675_v22 = vadd.f32 %v2674_v1, %v2610_v8  ;;  %v2613_v41 = vadd.f32 %v3749_v52, %v5231_v45 }
 0x248   : > { %v2726_v34 = vadd.f32 %v5239_v59, %v2711_v29  ;;  %v2712_v6 = vmax.f32 %v2696_v19, %v2704_v30  ;;  %v3252_v44 = vpack.c.bf16 %v2730_v38, %v2730_v38  ;;  %v2731_v20 = vmax.f32 %v2723_v51, 0.0 }
 0x249   : > { %2770 = vst.msk [vmem:[%s5259_s21 + $0x4] sm:$0xf] %vm2768_vm1, %v3251_v49  ;;  %v2701_v7 = vmax.f32 %v5217_v48, %v2675_v22  ;;  %v2678_v43 = vadd.f32 %v2677_v16, %v2613_v41 }
 0x24a   : > { %v2734_v21 = vmax.f32 %v2726_v34, 0.0  ;;  %v2727_v17 = vadd.f32 %v5239_v59, %v2712_v6  ;;  %2771 = vst.msk [vmem:[%s5259_s21 + $0x8] sm:$0xf] %vm2768_vm1, %v3252_v44  ;;  %v3253_v25 = vpack.c.bf16 %v2731_v20, %v2731_v20 }
 0x24b   : > { %v2709_v45 = vmax.f32 %v2693_v60, %v2701_v7  ;;  %v2702_v55 = vmax.f32 %v5219_v35, %v2678_v43 }
 0x24c   : > { %v3256_v36 = vpack.c.bf16 %v2734_v21, %v2734_v21  ;;  %v2735_v19 = vmax.f32 %v2727_v17, 0.0  ;;  %2772 = vst.msk [vmem:[%s5259_s21 + $0xc] sm:$0xf] %vm2768_vm1, %v3253_v25 }
 0x24d   : > { %v2724_v48 = vadd.f32 %v5239_v59, %v2709_v45  ;;  %v2710_v32 = vmax.f32 %v2694_v14, %v2702_v55 }
 0x24e   : > { %2775 = vst.msk [vmem:[%s5259_s21 + $0x18] sm:$0xf] %vm2768_vm1, %v3256_v36  ;;  %v3257_v2 = vpack.c.bf16 %v2735_v19, %v2735_v19 }
 0x24f   : > { %v2732_v57 = vmax.f32 %v2724_v48, 0.0  ;;  %v2725_v26 = vadd.f32 %v5239_v59, %v2710_v32 }
 0x250   : > { %2776 = vst.msk [vmem:[%s5259_s21 + $0x1c] sm:$0xf] %vm2768_vm1, %v3257_v2 }
 0x251   : > { %v3254_v13 = vpack.c.bf16 %v2732_v57, %v2732_v57  ;;  %v2733_v56 = vmax.f32 %v2725_v26, 0.0 }
 0x253   : > { %2773 = vst.msk [vmem:[%s5259_s21 + $0x10] sm:$0xf] %vm2768_vm1, %v3254_v13  ;;  %v3255_v60 = vpack.c.bf16 %v2733_v56, %v2733_v56 }
 0x255   : > { %2774 = vst.msk [vmem:[%s5259_s21 + $0x14] sm:$0xf] %vm2768_vm1, %v3255_v60 }
 0x256 PF: > { %s13_s16 = sadd.s32 1, %s4151_s16   ;;  %s5323_s12 = smov %s4139_s13 }
 0x257   : > { %p10_p10 = scmp.ge.s32.totalorder %s13_s16, 4   ;;  %s5324_s13 = smov %s4208_s20 }
 0x258   : > { %s5325_s14 = smov %s4147_s15  ;;  %s5326_s15 = smov %s5328_s17 }
 0x259   :  { %12 = sbr.rel (!%p10_p10) target bundleno = 3 (0x3), region = 108 }

// kernel: convnet_forward.6
= control target key start
LH: loop header
LB: loop body
LE: loop exit
PB: predicated region body
PF: predicated region fallthrough
CT: control target
= control target key end

     0   :  { %s4001_s12 = smov 0   ;;  %s4003_s13 = smov 0   ;;  %s5511_s0 = inlined_call_operand.vmem [shape: bf16[4,32,1600], index: 0, kind: input, shape index: {}]   ;;  %s5512_s1 = inlined_call_operand.vmem [shape: bf16[1600,128], index: 1, kind: input, shape index: {}]   ;;  %s5513_s2 = inlined_call_operand.vmem [shape: f32[1,128], index: 2, kind: input, shape index: {}]   ;;  %s5514_s3 = inlined_call_operand.vmem [shape: bf16[32,128], index: 3, kind: output, shape index: {}]  }
   0x1   :  { %s4005_s14 = smov 0   ;;  %s4007_s15 = smov 0  }
   0x2   :  { %s4009_s16 = smov 0  }
   0x3 LB: > { %s25_s17 = sadd.s32 1, %s3973_s15  ;;  %p39_p1 = scmp.ne.s32.totalorder %s3965_s13, %s3961_s12  ;;  %s3977_s16 = sphi %s4009_s16, %s13_s16   ;;  %s3973_s15 = sphi %s4007_s15, %s5802_s15   ;;  %s3969_s14 = sphi %s4005_s14, %s5801_s14   ;;  %s3965_s13 = sphi %s4003_s13, %s5800_s13   ;;  %s3961_s12 = sphi %s4001_s12, %s5799_s12  }
   0x4   : > { %p27_p0 = scmp.ge.s32.totalorder %s25_s17, 2  ;;  %p40_p2 = scmp.eq.s32.totalorder %s3977_s16, 0 }
   0x5   : > { %s32_s19 = sadd.s32 1, %s3965_s13  ;;  %p2789_p5 = scmp.ge.s32.totalorder %s3977_s16, 2 }
   0x6   : > { %s5804_s17 = smov (%p27_p0, %s25_s17), 0  ;;  %p41_p3 = por %p40_p2, %p39_p1 }
   0x7   : > { %s29_s18 = ssub.s32 %s3973_s15, %s5804_s17  ;;  %158 = sbr.rel (%p2789_p5) target bundleno = 48 (0x30), region = 24 }
   0x8   : > { %p30_p4 = scmp.eq.s32.totalorder %s29_s18, 0 }
   0xa   : > { %s4036_s20 = scalar_select %p30_p4, %s3965_s13, %s32_s19  }
   0xe   : > { %161 = sbr.rel (!%p41_p3) target bundleno = 48 (0x30), region = 28  ;;  %s163_s21 = sand.u32 (%p41_p3), 1, %s3965_s13  }
   0xf   : > { %s3619_s22 = smul.u32 (%p41_p3), 104, %s3973_s15 }
  0x10   : > { %s3618_s23 = smul.u32 (%p41_p3), 416, %s163_s21 }
  0x11   : > { %s4044_s26 = scalar_lea.vmem (%p41_p3), %s5511_s0, %s3619_s22 }
  0x12   : > { %v184_v0 = vld [vmem:[%s4044_s26] sm:$0xff] (%p41_p3)  ;;  %v186_v1 = vld [vmem:[%s4044_s26 + $0x8] sm:$0xff] (%p41_p3)  ;;  %v188_v2 = vld [vmem:[%s4044_s26 + $0x10] sm:$0xff] (%p41_p3)  ;;  %s4049_s27 = scalar_lea.vmem (%p41_p3), [#allocation2], %s3618_s23 }
  0x13   : > { %185 = vst [vmem:[%s4049_s27] sm:$0xff] (%p41_p3), %v184_v0  ;;  %187 = vst [vmem:[%s4049_s27 + $0x8] sm:$0xff] (%p41_p3), %v186_v1  ;;  %v190_v3 = vld [vmem:[%s4044_s26 + $0x18] sm:$0xff] (%p41_p3)  ;;  %v192_v4 = vld [vmem:[%s4044_s26 + $0x20] sm:$0xff] (%p41_p3) }
  0x14   : > { %189 = vst [vmem:[%s4049_s27 + $0x10] sm:$0xff] (%p41_p3), %v188_v2  ;;  %v194_v5 = vld [vmem:[%s4044_s26 + $0x28] sm:$0xff] (%p41_p3)  ;;  %191 = vst [vmem:[%s4049_s27 + $0x18] sm:$0xff] (%p41_p3), %v190_v3  ;;  %v196_v6 = vld [vmem:[%s4044_s26 + $0x34] sm:$0xff] (%p41_p3) }
  0x15   : > { %193 = vst [vmem:[%s4049_s27 + $0x20] sm:$0xff] %v192_v4  ;;  %195 = vst [vmem:[%s4049_s27 + $0x28] sm:$0xff] %v194_v5  ;;  %v198_v7 = vld [vmem:[%s4044_s26 + $0x3c] sm:$0xff]  ;;  %v200_v8 = vld [vmem:[%s4044_s26 + $0x44] sm:$0xff] }
  0x16   : > { %197 = vst [vmem:[%s4049_s27 + $0x34] sm:$0xff] %v196_v6  ;;  %199 = vst [vmem:[%s4049_s27 + $0x3c] sm:$0xff] %v198_v7  ;;  %v202_v9 = vld [vmem:[%s4044_s26 + $0x4c] sm:$0xff]  ;;  %v204_v10 = vld [vmem:[%s4044_s26 + $0x54] sm:$0xff] }
  0x17   : > { %201 = vst [vmem:[%s4049_s27 + $0x44] sm:$0xff] %v200_v8  ;;  %v206_v11 = vld [vmem:[%s4044_s26 + $0x5c] sm:$0xff]  ;;  %203 = vst [vmem:[%s4049_s27 + $0x4c] sm:$0xff] %v202_v9  ;;  %v208_v12 = vld [vmem:[%s4044_s26 + $0xd0] sm:$0xff] }
  0x18   : > { %205 = vst [vmem:[%s4049_s27 + $0x54] sm:$0xff] %v204_v10  ;;  %207 = vst [vmem:[%s4049_s27 + $0x5c] sm:$0xff] %v206_v11  ;;  %v210_v13 = vld [vmem:[%s4044_s26 + $0xd8] sm:$0xff]  ;;  %v212_v14 = vld [vmem:[%s4044_s26 + $0xe0] sm:$0xff] }
  0x19   : > { %209 = vst [vmem:[%s4049_s27 + $0x68] sm:$0xff] %v208_v12  ;;  %211 = vst [vmem:[%s4049_s27 + $0x70] sm:$0xff] %v210_v13  ;;  %v214_v15 = vld [vmem:[%s4044_s26 + $0xe8] sm:$0xff]  ;;  %v216_v16 = vld [vmem:[%s4044_s26 + $0xf0] sm:$0xff] }
  0x1a   : > { %213 = vst [vmem:[%s4049_s27 + $0x78] sm:$0xff] %v212_v14  ;;  %v218_v17 = vld [vmem:[%s4044_s26 + $0xf8] sm:$0xff]  ;;  %215 = vst [vmem:[%s4049_s27 + $0x80] sm:$0xff] %v214_v15  ;;  %v220_v18 = vld [vmem:[%s4044_s26 + $0x104] sm:$0xff] }
  0x1b   : > { %217 = vst [vmem:[%s4049_s27 + $0x88] sm:$0xff] %v216_v16  ;;  %219 = vst [vmem:[%s4049_s27 + $0x90] sm:$0xff] %v218_v17  ;;  %v222_v19 = vld [vmem:[%s4044_s26 + $0x10c] sm:$0xff]  ;;  %v224_v20 = vld [vmem:[%s4044_s26 + $0x114] sm:$0xff] }
  0x1c   : > { %221 = vst [vmem:[%s4049_s27 + $0x9c] sm:$0xff] %v220_v18  ;;  %223 = vst [vmem:[%s4049_s27 + $0xa4] sm:$0xff] %v222_v19  ;;  %v226_v21 = vld [vmem:[%s4044_s26 + $0x11c] sm:$0xff]  ;;  %v228_v22 = vld [vmem:[%s4044_s26 + $0x124] sm:$0xff] }
  0x1d   : > { %225 = vst [vmem:[%s4049_s27 + $0xac] sm:$0xff] %v224_v20  ;;  %v230_v23 = vld [vmem:[%s4044_s26 + $0x12c] sm:$0xff]  ;;  %227 = vst [vmem:[%s4049_s27 + $0xb4] sm:$0xff] %v226_v21  ;;  %v232_v24 = vld [vmem:[%s4044_s26 + $0x1a0] sm:$0xff] }
  0x1e   : > { %229 = vst [vmem:[%s4049_s27 + $0xbc] sm:$0xff] %v228_v22  ;;  %231 = vst [vmem:[%s4049_s27 + $0xc4] sm:$0xff] %v230_v23  ;;  %v234_v25 = vld [vmem:[%s4044_s26 + $0x1a8] sm:$0xff]  ;;  %v236_v26 = vld [vmem:[%s4044_s26 + $0x1b0] sm:$0xff] }
  0x1f   : > { %233 = vst [vmem:[%s4049_s27 + $0xd0] sm:$0xff] %v232_v24  ;;  %235 = vst [vmem:[%s4049_s27 + $0xd8] sm:$0xff] %v234_v25  ;;  %v238_v27 = vld [vmem:[%s4044_s26 + $0x1b8] sm:$0xff]  ;;  %v240_v28 = vld [vmem:[%s4044_s26 + $0x1c0] sm:$0xff] }
  0x20   : > { %237 = vst [vmem:[%s4049_s27 + $0xe0] sm:$0xff] %v236_v26  ;;  %v242_v29 = vld [vmem:[%s4044_s26 + $0x1c8] sm:$0xff]  ;;  %239 = vst [vmem:[%s4049_s27 + $0xe8] sm:$0xff] %v238_v27  ;;  %v244_v30 = vld [vmem:[%s4044_s26 + $0x1d4] sm:$0xff] }
  0x21   : > { %241 = vst [vmem:[%s4049_s27 + $0xf0] sm:$0xff] %v240_v28  ;;  %243 = vst [vmem:[%s4049_s27 + $0xf8] sm:$0xff] %v242_v29  ;;  %v246_v31 = vld [vmem:[%s4044_s26 + $0x1dc] sm:$0xff]  ;;  %v248_v32 = vld [vmem:[%s4044_s26 + $0x1e4] sm:$0xff] }
  0x22   : > { %245 = vst [vmem:[%s4049_s27 + $0x104] sm:$0xff] %v244_v30  ;;  %247 = vst [vmem:[%s4049_s27 + $0x10c] sm:$0xff] %v246_v31  ;;  %v250_v33 = vld [vmem:[%s4044_s26 + $0x1ec] sm:$0xff]  ;;  %v252_v34 = vld [vmem:[%s4044_s26 + $0x1f4] sm:$0xff] }
  0x23   : > { %249 = vst [vmem:[%s4049_s27 + $0x114] sm:$0xff] %v248_v32  ;;  %v254_v35 = vld [vmem:[%s4044_s26 + $0x1fc] sm:$0xff]  ;;  %251 = vst [vmem:[%s4049_s27 + $0x11c] sm:$0xff] %v250_v33  ;;  %v256_v36 = vld [vmem:[%s4044_s26 + $0x270] sm:$0xff] }
  0x24   : > { %253 = vst [vmem:[%s4049_s27 + $0x124] sm:$0xff] %v252_v34  ;;  %255 = vst [vmem:[%s4049_s27 + $0x12c] sm:$0xff] %v254_v35  ;;  %v258_v37 = vld [vmem:[%s4044_s26 + $0x278] sm:$0xff]  ;;  %v260_v38 = vld [vmem:[%s4044_s26 + $0x280] sm:$0xff] }
  0x25   : > { %257 = vst [vmem:[%s4049_s27 + $0x138] sm:$0xff] %v256_v36  ;;  %259 = vst [vmem:[%s4049_s27 + $0x140] sm:$0xff] %v258_v37  ;;  %v262_v39 = vld [vmem:[%s4044_s26 + $0x288] sm:$0xff]  ;;  %v264_v40 = vld [vmem:[%s4044_s26 + $0x290] sm:$0xff] }
  0x26   : > { %261 = vst [vmem:[%s4049_s27 + $0x148] sm:$0xff] %v260_v38  ;;  %v266_v41 = vld [vmem:[%s4044_s26 + $0x298] sm:$0xff]  ;;  %263 = vst [vmem:[%s4049_s27 + $0x150] sm:$0xff] %v262_v39  ;;  %v268_v42 = vld [vmem:[%s4044_s26 + $0x2a4] sm:$0xff] }
  0x27   : > { %265 = vst [vmem:[%s4049_s27 + $0x158] sm:$0xff] %v264_v40  ;;  %267 = vst [vmem:[%s4049_s27 + $0x160] sm:$0xff] %v266_v41  ;;  %v270_v43 = vld [vmem:[%s4044_s26 + $0x2ac] sm:$0xff]  ;;  %v272_v44 = vld [vmem:[%s4044_s26 + $0x2b4] sm:$0xff] }
  0x28   : > { %269 = vst [vmem:[%s4049_s27 + $0x16c] sm:$0xff] %v268_v42  ;;  %271 = vst [vmem:[%s4049_s27 + $0x174] sm:$0xff] %v270_v43  ;;  %v274_v45 = vld [vmem:[%s4044_s26 + $0x2bc] sm:$0xff]  ;;  %v276_v46 = vld [vmem:[%s4044_s26 + $0x2c4] sm:$0xff] }
  0x29   : > { %273 = vst [vmem:[%s4049_s27 + $0x17c] sm:$0xff] %v272_v44  ;;  %v278_v47 = vld [vmem:[%s4044_s26 + $0x2cc] sm:$0xff]  ;;  %275 = vst [vmem:[%s4049_s27 + $0x184] sm:$0xff] %v274_v45  ;;  %v2795_v49 = vld [vmem:[%s4044_s26 + $0x64] sm:$0xf] }
  0x2a   : > { %277 = vst [vmem:[%s4049_s27 + $0x18c] sm:$0xff] %v276_v46  ;;  %279 = vst [vmem:[%s4049_s27 + $0x194] sm:$0xff] %v278_v47  ;;  %v2793_v48 = vld [vmem:[%s4044_s26 + $0x30] sm:$0xf]  ;;  %v2797_v50 = vld [vmem:[%s4044_s26 + $0x100] sm:$0xf] }
  0x2b   : > { %2794 = vst [vmem:[%s4049_s27 + $0x30] sm:$0xf] %v2793_v48  ;;  %2796 = vst [vmem:[%s4049_s27 + $0x64] sm:$0xf] %v2795_v49  ;;  %v2799_v51 = vld [vmem:[%s4044_s26 + $0x134] sm:$0xf] }
  0x2c   : > { %2798 = vst [vmem:[%s4049_s27 + $0x98] sm:$0xf] %v2797_v50  ;;  %v2801_v52 = vld [vmem:[%s4044_s26 + $0x1d0] sm:$0xf]  ;;  %v2803_v53 = vld [vmem:[%s4044_s26 + $0x204] sm:$0xf] }
  0x2d   : > { %2800 = vst [vmem:[%s4049_s27 + $0xcc] sm:$0xf] %v2799_v51  ;;  %2802 = vst [vmem:[%s4049_s27 + $0x100] sm:$0xf] %v2801_v52  ;;  %v2805_v54 = vld [vmem:[%s4044_s26 + $0x2a0] sm:$0xf] }
  0x2e   : > { %2804 = vst [vmem:[%s4049_s27 + $0x134] sm:$0xf] %v2803_v53  ;;  %v2807_v55 = vld [vmem:[%s4044_s26 + $0x2d4] sm:$0xf]  ;;  %2806 = vst [vmem:[%s4049_s27 + $0x168] sm:$0xf] %v2805_v54 }
  0x2f   : > { %2808 = vst [vmem:[%s4049_s27 + $0x19c] sm:$0xf] %v2807_v55 }
  0x30 PF: > { %p2809_p6 = scmp.ge.s32.totalorder %s3977_s16, 1  ;;  %p307_p7 = scmp.lt.s32.totalorder %s3977_s16, 3 }
  0x32   : > { %p308_p8 = pnand %p2809_p6, %p307_p7 }
  0x34   : > { %311 = sbr.rel (%p308_p8) target bundleno = 710 (0x2c6), region = 54 }
  0x3b   : > { %v4165_v56 = vld [vmem:[%s5512_s1 + $0x40] sm:$0xff]   ;;  %v4188_v60 = vld [vmem:[%s5512_s1 + $0x48] sm:$0xff]   ;;  %v4212_v0 = vld [vmem:[%s5512_s1 + $0x50] sm:$0xff]   ;;  %s314_s7 = sand.u32 1, %s3961_s12   ;;  %vm3980_vm0 = vmmov 0   ;;  %vm1244_vm1 = vcmask 523264  }
  0x3c   : > { %v4170_v57 = vld [vmem:[%s5512_s1 + $0xc0] sm:$0xff]   ;;  %3022 = vmatprep.subr.bf16.mxu0 %v4165_v56  ;;  %v4194_v61 = vld [vmem:[%s5512_s1 + $0xc8] sm:$0xff]   ;;  %v4218_v1 = vld [vmem:[%s5512_s1 + $0xd0] sm:$0xff]   ;;  %s3620_s12 = smul.u32 416, %s314_s7 }
  0x3d   : > { %v4176_v58 = vld [vmem:[%s5512_s1] sm:$0xff]   ;;  %3044 = vmatprep.subr.bf16.mxu1 %v4170_v57  ;;  %v4200_v62 = vld [vmem:[%s5512_s1 + $0x8] sm:$0xff]   ;;  %v4224_v2 = vld [vmem:[%s5512_s1 + $0x10] sm:$0xff]  }
  0x3e   : > { %v4182_v59 = vld [vmem:[%s5512_s1 + $0x80] sm:$0xff]   ;;  %3023 = vmatpush3.bf16.msra.mxu0 %v4176_v58  ;;  %v4206_v63 = vld [vmem:[%s5512_s1 + $0x88] sm:$0xff]   ;;  %v4230_v3 = vld [vmem:[%s5512_s1 + $0x90] sm:$0xff]   ;;  %s4354_s6 = scalar_lea.vmem [#allocation2], %s3620_s12 }
  0x3f   : > { %3045 = vmatpush3.bf16.msra.mxu1 %v4182_v59  ;;  %3024 = vmatprep.subr.bf16.mxu0 %v4188_v60  ;;  %v4236_v4 = vld [vmem:[%s5512_s1 + $0x58] sm:$0xff]   ;;  %v4260_v8 = vld [vmem:[%s5512_s1 + $0x60] sm:$0xff]   ;;  %v4284_v12 = vld [vmem:[%s5512_s1 + $0x68] sm:$0xff]  }
  0x40   : > { %3046 = vmatprep.subr.bf16.mxu1 %v4194_v61  ;;  %v4242_v5 = vld [vmem:[%s5512_s1 + $0xd8] sm:$0xff]   ;;  %v4266_v9 = vld [vmem:[%s5512_s1 + $0xe0] sm:$0xff]   ;;  %v4290_v13 = vld [vmem:[%s5512_s1 + $0xe8] sm:$0xff]  }
  0x41   : > { %v4248_v6 = vld [vmem:[%s5512_s1 + $0x18] sm:$0xff]   ;;  %v4272_v10 = vld [vmem:[%s5512_s1 + $0x20] sm:$0xff]   ;;  %v4296_v14 = vld [vmem:[%s5512_s1 + $0x28] sm:$0xff]  }
  0x42   : > { %3025 = vmatpush3.bf16.msra.mxu0 %v4200_v62  ;;  %v4254_v7 = vld [vmem:[%s5512_s1 + $0x98] sm:$0xff]   ;;  %v4278_v11 = vld [vmem:[%s5512_s1 + $0xa0] sm:$0xff]   ;;  %v4303_v15 = vld [vmem:[%s5512_s1 + $0xa8] sm:$0xff]  }
  0x43   : > { %3047 = vmatpush3.bf16.msra.mxu1 %v4206_v63  ;;  %3026 = vmatprep.subr.bf16.mxu0 %v4212_v0  ;;  %v4309_v16 = vld [vmem:[%s5512_s1 + $0x70] sm:$0xff]   ;;  %v4333_v20 = vld [vmem:[%s5512_s1 + $0x78] sm:$0xff]   ;;  %v3700_v27 = vld [vmem:[%s4354_s6 + $0xc] ss:$52 sps:$4 sm:$0xff]  }
  0x44   : > { %3048 = vmatprep.subr.bf16.mxu1 %v4218_v1  ;;  %v4315_v17 = vld [vmem:[%s5512_s1 + $0xf0] sm:$0xff]   ;;  %v4339_v21 = vld [vmem:[%s5512_s1 + $0xf8] sm:$0xff]   ;;  %v4364_v28 = vld [vmem:[%s5512_s1 + $0x140] sm:$0xff]   ;;  %1321 = vmatprep.mubr.bf16.mxu1 %v3700_v27 }
  0x45   : > { %v4321_v18 = vld [vmem:[%s5512_s1 + $0x30] sm:$0xff]   ;;  %v4345_v22 = vld [vmem:[%s5512_s1 + $0x38] sm:$0xff]   ;;  %v4369_v29 = vld [vmem:[%s5512_s1 + $0x1c0] sm:$0xff]  }
  0x46   : > { %3027 = vmatpush3.bf16.msra.mxu0 %v4224_v2  ;;  %v4327_v19 = vld [vmem:[%s5512_s1 + $0xb0] sm:$0xff]   ;;  %v4351_v23 = vld [vmem:[%s5512_s1 + $0xb8] sm:$0xff]   ;;  %v4375_v30 = vld [vmem:[%s5512_s1 + $0x100] sm:$0xff]  }
  0x47   : > { %3049 = vmatpush3.bf16.msra.mxu1 %v4230_v3  ;;  %3028 = vmatprep.subr.bf16.mxu0 %v4236_v4  ;;  %v3695_v24 = vld [vmem:[%s4354_s6] ss:$52 sps:$4 sm:$0xff]   ;;  %v3697_v25 = vld [vmem:[%s4354_s6 + $0x4] ss:$52 sps:$4 sm:$0xff]   ;;  %v3698_v26 = vld [vmem:[%s4354_s6 + $0x8] ss:$52 sps:$4 sm:$0xff]  }
  0x48   : > { %3050 = vmatprep.subr.bf16.mxu1 %v4242_v5  ;;  %1280 = vmatprep.mubr.bf16.mxu0 %v3697_v25  ;;  %v4381_v31 = vld [vmem:[%s5512_s1 + $0x180] sm:$0xff]   ;;  %v4387_v32 = vld [vmem:[%s5512_s1 + $0x148] sm:$0xff]   ;;  %v4411_v36 = vld [vmem:[%s5512_s1 + $0x150] sm:$0xff]  }
  0x49   : > { %v4393_v33 = vld [vmem:[%s5512_s1 + $0x1c8] sm:$0xff]   ;;  %v4417_v37 = vld [vmem:[%s5512_s1 + $0x1d0] sm:$0xff]   ;;  %v4435_v40 = vld [vmem:[%s5512_s1 + $0x158] sm:$0xff]  }
  0x4a   : > { %3029 = vmatpush3.bf16.msra.mxu0 %v4248_v6  ;;  %v4399_v34 = vld [vmem:[%s5512_s1 + $0x108] sm:$0xff]   ;;  %v4423_v38 = vld [vmem:[%s5512_s1 + $0x110] sm:$0xff]   ;;  %v4441_v41 = vld [vmem:[%s5512_s1 + $0x1d8] sm:$0xff]  }
  0x4b   : > { %3051 = vmatpush3.bf16.msra.mxu1 %v4254_v7  ;;  %3030 = vmatprep.subr.bf16.mxu0 %v4260_v8  ;;  %v4405_v35 = vld [vmem:[%s5512_s1 + $0x188] sm:$0xff]   ;;  %v4429_v39 = vld [vmem:[%s5512_s1 + $0x190] sm:$0xff]   ;;  %v4447_v42 = vld [vmem:[%s5512_s1 + $0x118] sm:$0xff]  }
  0x4c   : > { %3052 = vmatprep.subr.bf16.mxu1 %v4266_v9  ;;  %v4453_v43 = vld [vmem:[%s5512_s1 + $0x198] sm:$0xff]   ;;  %v4459_v44 = vld [vmem:[%s5512_s1 + $0x160] sm:$0xff]   ;;  %v4483_v48 = vld [vmem:[%s5512_s1 + $0x168] sm:$0xff]  }
  0x4d   : > { %v4465_v45 = vld [vmem:[%s5512_s1 + $0x1e0] sm:$0xff]   ;;  %v4489_v49 = vld [vmem:[%s5512_s1 + $0x1e8] sm:$0xff]   ;;  %v4507_v52 = vld [vmem:[%s5512_s1 + $0x170] sm:$0xff]  }
  0x4e   : > { %3031 = vmatpush3.bf16.msra.mxu0 %v4272_v10  ;;  %5635 = vst [vmem:[#allocation3_spill] sm:$0xff] %v4465_v45  ;;  %v4471_v46 = vld [vmem:[%s5512_s1 + $0x120] sm:$0xff]   ;;  %5637 = vst [vmem:[#allocation5_spill] sm:$0xff] %v4489_v49  ;;  %v4495_v50 = vld [vmem:[%s5512_s1 + $0x128] sm:$0xff]  }
  0x4f   : > { %3053 = vmatpush3.bf16.msra.mxu1 %v4278_v11  ;;  %3032 = vmatprep.subr.bf16.mxu0 %v4284_v12  ;;  %v4477_v47 = vld [vmem:[%s5512_s1 + $0x1a0] sm:$0xff]   ;;  %v4501_v51 = vld [vmem:[%s5512_s1 + $0x1a8] sm:$0xff]   ;;  %v4513_v53 = vld [vmem:[%s5512_s1 + $0x1f0] sm:$0xff]  }
  0x50   : > { %3054 = vmatprep.subr.bf16.mxu1 %v4290_v13  ;;  %5636 = vst [vmem:[#allocation4_spill] sm:$0xff] %v4477_v47  ;;  %5638 = vst [vmem:[#allocation6_spill] sm:$0xff] %v4501_v51  ;;  %v4519_v54 = vld [vmem:[%s5512_s1 + $0x130] sm:$0xff]   ;;  %v4537_v25 = vld [vmem:[%s5512_s1 + $0x1f8] sm:$0xff]  }
  0x51   : > { %5639 = vst [vmem:[#allocation7_spill] sm:$0xff] %v4513_v53  ;;  %v4525_v55 = vld [vmem:[%s5512_s1 + $0x1b0] sm:$0xff]   ;;  %5641 = vst [vmem:[#allocation9_spill] sm:$0xff] %v4537_v25  ;;  %v4549_v27 = vld [vmem:[%s5512_s1 + $0x1b8] sm:$0xff]  }
  0x52   : > { %3033 = vmatpush3.bf16.msra.mxu0 %v4296_v14  ;;  %5640 = vst [vmem:[#allocation8_spill] sm:$0xff] %v4525_v55  ;;  %5642 = vst [vmem:[#allocation10_spill] sm:$0xff] %v4549_v27 }
  0x53   : > { %3055 = vmatpush3.bf16.msra.mxu1 %v4303_v15  ;;  %3034 = vmatprep.subr.bf16.mxu0 %v4309_v16 }
  0x54   : > { %3056 = vmatprep.subr.bf16.mxu1 %v4315_v17 }
  0x56   : > { %3035 = vmatpush3.bf16.msra.mxu0 %v4321_v18 }
  0x57   : > { %3057 = vmatpush3.bf16.msra.mxu1 %v4327_v19  ;;  %3036 = vmatprep.subr.bf16.mxu0 %v4333_v20 }
  0x58   : > { %3058 = vmatprep.subr.bf16.mxu1 %v4339_v21 }
  0x5a   : > { %3037 = vmatpush3.bf16.msra.mxu0 %v4345_v22 }
  0x5b   : > { %3059 = vmatpush3.bf16.msra.mxu1 %v4351_v23  ;;  %3066 = vmatprep.subr.bf16.mxu0 %v4364_v28 }
  0x5c   : > { %3088 = vmatprep.subr.bf16.mxu1 %v4369_v29 }
  0x5d   : > { %1281 = vmatmul.mubr.bf16.vlgmr.msra.gmra.mrb[0].mxu0 %v3695_v24  ;;  %v4531_v24 = vld [vmem:[%s5512_s1 + $0x178] sm:$0xff]  }
  0x5e   : > { %1322 = vmatmul.mubr.bf16.vlgmr.msra.gmra.mrb[0].mxu1 %v3698_v26  ;;  %3067 = vmatpush3.bf16.msra.mxu0 %v4375_v30  ;;  %v4543_v26 = vld [vmem:[%s5512_s1 + $0x138] sm:$0xff]  }
  0x5f   : > { %3089 = vmatpush3.bf16.msra.mxu1 %v4381_v31  ;;  %3068 = vmatprep.subr.bf16.mxu0 %v4387_v32 }
  0x60   : > { %3090 = vmatprep.subr.bf16.mxu1 %v4393_v33 }
  0x62   : > { %3069 = vmatpush3.bf16.msra.mxu0 %v4399_v34 }
  0x63   : > { %3091 = vmatpush3.bf16.msra.mxu1 %v4405_v35  ;;  %3070 = vmatprep.subr.bf16.mxu0 %v4411_v36 }
  0x64   : > { %3092 = vmatprep.subr.bf16.mxu1 %v4417_v37 }
  0x66   : > { %3071 = vmatpush3.bf16.msra.mxu0 %v4423_v38 }
  0x67   : > { %3093 = vmatpush3.bf16.msra.mxu1 %v4429_v39  ;;  %3072 = vmatprep.subr.bf16.mxu0 %v4435_v40 }
  0x68   : > { %3094 = vmatprep.subr.bf16.mxu1 %v4441_v41 }
  0x6a   : > { %3073 = vmatpush3.bf16.msra.mxu0 %v4447_v42 }
  0x6b   : > { %3095 = vmatpush3.bf16.msra.mxu1 %v4453_v43  ;;  %3074 = vmatprep.subr.bf16.mxu0 %v4459_v44 }
  0x6c   : > { %3096 = vmatprep.subr.bf16.mxu1 %v4465_v45  ;;  %v5593_v45 = vmov 0.0  }
  0x6e   : > { %3075 = vmatpush3.bf16.msra.mxu0 %v4471_v46 }
  0x6f   : > { %3097 = vmatpush3.bf16.msra.mxu1 %v4477_v47  ;;  %3076 = vmatprep.subr.bf16.mxu0 %v4483_v48  ;;  %v4560_v47 = vld [vmem:[%s5512_s1 + $0x240] sm:$0xff]  }
  0x70   : > { %3098 = vmatprep.subr.bf16.mxu1 %v4489_v49  ;;  %v3738_v49 = vld [vmem:[%s4354_s6 + $0x1c] ss:$52 sps:$4 sm:$0xff]   ;;  %5643 = vst [vmem:[#allocation11_spill] sm:$0xff] %v4560_v47 }
  0x71   : > { %1403 = vmatprep.mubr.bf16.mxu1 %v3738_v49  ;;  %v4583_v49 = vld [vmem:[%s5512_s1 + $0x248] sm:$0xff]  }
  0x72   : > { %3077 = vmatpush3.bf16.msra.mxu0 %v4495_v50  ;;  %5647 = vst [vmem:[#allocation15_spill] sm:$0xff] %v4583_v49 }
  0x73   : > { %3099 = vmatpush3.bf16.msra.mxu1 %v4501_v51  ;;  %3078 = vmatprep.subr.bf16.mxu0 %v4507_v52  ;;  %v3736_v51 = vld [vmem:[%s4354_s6 + $0x18] ss:$52 sps:$4 sm:$0xff]  }
  0x74   : > { %3100 = vmatprep.subr.bf16.mxu1 %v4513_v53  ;;  %v3735_v53 = vld [vmem:[%s4354_s6 + $0x14] ss:$52 sps:$4 sm:$0xff]  }
  0x75   : > { %1362 = vmatprep.mubr.bf16.mxu0 %v3735_v53  ;;  %v4571_v53 = vld [vmem:[%s5512_s1 + $0x200] sm:$0xff]  }
  0x76   : > { %3079 = vmatpush3.bf16.msra.mxu0 %v4519_v54  ;;  %5645 = vst [vmem:[#allocation13_spill] sm:$0xff] %v4571_v53 }
  0x77   : > { %3101 = vmatpush3.bf16.msra.mxu1 %v4525_v55  ;;  %3080 = vmatprep.subr.bf16.mxu0 %v4531_v24  ;;  %v3733_v55 = vld [vmem:[%s4354_s6 + $0x10] ss:$52 sps:$4 sm:$0xff]  }
  0x78   : > { %3102 = vmatprep.subr.bf16.mxu1 %v4537_v25  ;;  %v4565_v25 = vld [vmem:[%s5512_s1 + $0x2c0] sm:$0xff]  }
  0x79   : > { %5644 = vst [vmem:[#allocation12_spill] sm:$0xff] %v4565_v25 }
  0x7a   : > { %3081 = vmatpush3.bf16.msra.mxu0 %v4543_v26 }
  0x7b   : > { %3103 = vmatpush3.bf16.msra.mxu1 %v4549_v27  ;;  %3110 = vmatprep.subr.bf16.mxu0 %v4560_v47  ;;  %v4601_v27 = vld [vmem:[%s5512_s1 + $0x288] sm:$0xff]  }
  0x7c   : > { %3132 = vmatprep.subr.bf16.mxu1 %v4565_v25  ;;  %v4595_v25 = vld [vmem:[%s5512_s1 + $0x208] sm:$0xff]   ;;  %5650 = vst [vmem:[#allocation18_spill] sm:$0xff] %v4601_v27 }
  0x7d   : > { %1363 = vmatmul.mubr.bf16.vlgmr.msra.gmra.mrb[4].mxu0 %v3733_v55  ;;  %v4577_v55 = vld [vmem:[%s5512_s1 + $0x280] sm:$0xff]   ;;  %5649 = vst [vmem:[#allocation17_spill] sm:$0xff] %v4595_v25  ;;  %v3774_v47 = vld [vmem:[%s4354_s6 + $0x28] ss:$52 sps:$4 sm:$0xff]  }
  0x7e   : > { %1404 = vmatmul.mubr.bf16.vlgmr.msra.gmra.mrb[4].mxu1 %v3736_v51  ;;  %5646 = vst [vmem:[#allocation14_spill] sm:$0xff] %v4577_v55  ;;  %3111 = vmatpush3.bf16.msra.mxu0 %v4571_v53  ;;  %v4589_v51 = vld [vmem:[%s5512_s1 + $0x2c8] sm:$0xff]   ;;  %v3773_v53 = vld [vmem:[%s4354_s6 + $0x24] ss:$52 sps:$4 sm:$0xff]  }
  0x7f   : > { %3133 = vmatpush3.bf16.msra.mxu1 %v4577_v55  ;;  %5648 = vst [vmem:[#allocation16_spill] sm:$0xff] %v4589_v51  ;;  %3112 = vmatprep.subr.bf16.mxu0 %v4583_v49  ;;  %v4607_v55 = vld [vmem:[%s5512_s1 + $0x250] sm:$0xff]  }
  0x80   : > { %3134 = vmatprep.subr.bf16.mxu1 %v4589_v51  ;;  %5651 = vst [vmem:[#allocation19_spill] sm:$0xff] %v4607_v55  ;;  %v4613_v49 = vld [vmem:[%s5512_s1 + $0x2d0] sm:$0xff]   ;;  %1444 = vmatprep.mubr.bf16.mxu0 %v3773_v53 }
  0x81   : > { %5652 = vst [vmem:[#allocation20_spill] sm:$0xff] %v4613_v49  ;;  %v4619_v51 = vld [vmem:[%s5512_s1 + $0x210] sm:$0xff]  }
  0x82   : > { %3113 = vmatpush3.bf16.msra.mxu0 %v4595_v25  ;;  %5653 = vst [vmem:[#allocation21_spill] sm:$0xff] %v4619_v51  ;;  %v4625_v25 = vld [vmem:[%s5512_s1 + $0x290] sm:$0xff]  }
  0x83   : > { %3135 = vmatpush3.bf16.msra.mxu1 %v4601_v27  ;;  %3114 = vmatprep.subr.bf16.mxu0 %v4607_v55  ;;  %5654 = vst [vmem:[#allocation22_spill] sm:$0xff] %v4625_v25  ;;  %v4631_v27 = vld [vmem:[%s5512_s1 + $0x258] sm:$0xff]  }
  0x84   : > { %3136 = vmatprep.subr.bf16.mxu1 %v4613_v49  ;;  %5655 = vst [vmem:[#allocation23_spill] sm:$0xff] %v4631_v27  ;;  %v4637_v55 = vld [vmem:[%s5512_s1 + $0x2d8] sm:$0xff]  }
  0x85   : > { %5656 = vst [vmem:[#allocation24_spill] sm:$0xff] %v4637_v55  ;;  %v4643_v49 = vld [vmem:[%s5512_s1 + $0x218] sm:$0xff]  }
  0x86   : > { %3115 = vmatpush3.bf16.msra.mxu0 %v4619_v51  ;;  %5657 = vst [vmem:[#allocation25_spill] sm:$0xff] %v4643_v49  ;;  %v4649_v51 = vld [vmem:[%s5512_s1 + $0x298] sm:$0xff]  }
  0x87   : > { %3137 = vmatpush3.bf16.msra.mxu1 %v4625_v25  ;;  %3116 = vmatprep.subr.bf16.mxu0 %v4631_v27  ;;  %5658 = vst [vmem:[#allocation26_spill] sm:$0xff] %v4649_v51  ;;  %v4655_v25 = vld [vmem:[%s5512_s1 + $0x260] sm:$0xff]  }
  0x88   : > { %3138 = vmatprep.subr.bf16.mxu1 %v4637_v55  ;;  %5659 = vst [vmem:[#allocation27_spill] sm:$0xff] %v4655_v25  ;;  %v4661_v27 = vld [vmem:[%s5512_s1 + $0x2e0] sm:$0xff]  }
  0x89   : > { %5660 = vst [vmem:[#allocation28_spill] sm:$0xff] %v4661_v27  ;;  %v4667_v55 = vld [vmem:[%s5512_s1 + $0x220] sm:$0xff]  }
  0x8a   : > { %3117 = vmatpush3.bf16.msra.mxu0 %v4643_v49  ;;  %5661 = vst [vmem:[#allocation29_spill] sm:$0xff] %v4667_v55  ;;  %v4673_v49 = vld [vmem:[%s5512_s1 + $0x2a0] sm:$0xff]  }
  0x8b   : > { %3139 = vmatpush3.bf16.msra.mxu1 %v4649_v51  ;;  %3118 = vmatprep.subr.bf16.mxu0 %v4655_v25  ;;  %5662 = vst [vmem:[#allocation30_spill] sm:$0xff] %v4673_v49  ;;  %v4679_v51 = vld [vmem:[%s5512_s1 + $0x268] sm:$0xff]  }
  0x8c   : > { %3140 = vmatprep.subr.bf16.mxu1 %v4661_v27  ;;  %5663 = vst [vmem:[#allocation31_spill] sm:$0xff] %v4679_v51  ;;  %v4685_v25 = vld [vmem:[%s5512_s1 + $0x2e8] sm:$0xff]  }
  0x8d   : > { %5664 = vst [vmem:[#allocation32_spill] sm:$0xff] %v4685_v25  ;;  %v4691_v27 = vld [vmem:[%s5512_s1 + $0x228] sm:$0xff]  }
  0x8e   : > { %3119 = vmatpush3.bf16.msra.mxu0 %v4667_v55  ;;  %5665 = vst [vmem:[#allocation33_spill] sm:$0xff] %v4691_v27  ;;  %v4697_v55 = vld [vmem:[%s5512_s1 + $0x2a8] sm:$0xff]  }
  0x8f   : > { %3141 = vmatpush3.bf16.msra.mxu1 %v4673_v49  ;;  %3120 = vmatprep.subr.bf16.mxu0 %v4679_v51  ;;  %5666 = vst [vmem:[#allocation34_spill] sm:$0xff] %v4697_v55  ;;  %v4703_v49 = vld [vmem:[%s5512_s1 + $0x270] sm:$0xff]   ;;  %v4733_v51 = vld [vmem:[%s5512_s1 + $0x2f8] sm:$0xff]  }
  0x90   : > { %3142 = vmatprep.subr.bf16.mxu1 %v4685_v25  ;;  %5667 = vst [vmem:[#allocation35_spill] sm:$0xff] %v4703_v49  ;;  %v4709_v25 = vld [vmem:[%s5512_s1 + $0x2f0] sm:$0xff]   ;;  %5672 = vst [vmem:[#allocation40_spill] sm:$0xff] %v4733_v51 }
  0x91   : > { %5668 = vst [vmem:[#allocation36_spill] sm:$0xff] %v4709_v25 }
  0x92   : > { %3121 = vmatpush3.bf16.msra.mxu0 %v4691_v27  ;;  %v4715_v27 = vld [vmem:[%s5512_s1 + $0x230] sm:$0xff]  }
  0x93   : > { %3143 = vmatpush3.bf16.msra.mxu1 %v4697_v55  ;;  %3122 = vmatprep.subr.bf16.mxu0 %v4703_v49  ;;  %5669 = vst [vmem:[#allocation37_spill] sm:$0xff] %v4715_v27  ;;  %v4721_v55 = vld [vmem:[%s5512_s1 + $0x2b0] sm:$0xff]   ;;  %v4727_v49 = vld [vmem:[%s5512_s1 + $0x278] sm:$0xff]  }
  0x94   : > { %3144 = vmatprep.subr.bf16.mxu1 %v4709_v25  ;;  %5670 = vst [vmem:[#allocation38_spill] sm:$0xff] %v4721_v55  ;;  %5671 = vst [vmem:[#allocation39_spill] sm:$0xff] %v4727_v49  ;;  %v4739_v25 = vld [vmem:[%s5512_s1 + $0x238] sm:$0xff]  }
  0x95   : > { %5673 = vst [vmem:[#allocation41_spill] sm:$0xff] %v4739_v25 }
  0x96   : > { %3123 = vmatpush3.bf16.msra.mxu0 %v4715_v27  ;;  %v4745_v27 = vld [vmem:[%s5512_s1 + $0x2b8] sm:$0xff]  }
  0x97   : > { %3145 = vmatpush3.bf16.msra.mxu1 %v4721_v55  ;;  %3124 = vmatprep.subr.bf16.mxu0 %v4727_v49  ;;  %5674 = vst [vmem:[#allocation42_spill] sm:$0xff] %v4745_v27  ;;  %v3771_v55 = vld [vmem:[%s4354_s6 + $0x20] ss:$52 sps:$4 sm:$0xff]  }
  0x98   : > { %3146 = vmatprep.subr.bf16.mxu1 %v4733_v51  ;;  %v3776_v49 = vld [vmem:[%s4354_s6 + $0x2c] ss:$52 sps:$4 sm:$0xff]  }
  0x99   : > { %v4758_v51 = vld [vmem:[%s5512_s1 + $0x300] sm:$0xff]   ;;  %1485 = vmatprep.mubr.bf16.mxu1 %v3776_v49  ;;  %v3794_v49 = vld [vmem:[%s4354_s6 + $0x88] ss:$52 sps:$4 sm:$0xff]  }
  0x9a   : > { %3125 = vmatpush3.bf16.msra.mxu0 %v4739_v25  ;;  %5675 = vst [vmem:[#allocation43_spill] sm:$0xff] %v4758_v51 }
  0x9b   : > { %3147 = vmatpush3.bf16.msra.mxu1 %v4745_v27  ;;  %3570 = vmatprep.subr.bf16.mxu0 %v5593_v45  ;;  %v4764_v27 = vld [vmem:[%s5512_s1 + $0x308] sm:$0xff]   ;;  %v5708_v53 = vld [vmem:[#allocation39_spill] sm:$0xff] }
  0x9c   : > { %3159 = vmatprep.subr.bf16.mxu1 %v4165_v56  ;;  %5676 = vst [vmem:[#allocation44_spill] sm:$0xff] %v4764_v27  ;;  %v4774_v56 = vld [vmem:[%s5512_s1 + $0x310] sm:$0xff]  }
  0x9d   : > { %1445 = vmatmul.mubr.bf16.vlgmr.msra.gmra.mrb[8].mxu0 %v3771_v55  ;;  %5677 = vst [vmem:[#allocation45_spill] sm:$0xff] %v4774_v56  ;;  %v5709_v55 = vld [vmem:[#allocation26_spill] sm:$0xff] }
  0x9e   : > { %1486 = vmatmul.mubr.bf16.vlgmr.msra.gmra.mrb[8].mxu1 %v3774_v47  ;;  %3571 = vmatpush3.bf16.msra.mxu0 %v4758_v51  ;;  %v3784_v47 = vld [vmem:[%s4354_s6 + $0x6c] ss:$52 sps:$4 sm:$0xff]  }
  0x9f   : > { %3160 = vmatpush3.bf16.msra.mxu1 %v4176_v58  ;;  %3572 = vmatprep.subr.bf16.mxu0 %v5593_v45  ;;  %v4785_v58 = vld [vmem:[%s5512_s1 + $0x318] sm:$0xff]  }
  0xa0   : > { %3161 = vmatprep.subr.bf16.mxu1 %v4188_v60  ;;  %3578 = vmatprep.mubr.msk.bf16.mxu0 %vm3980_vm0, %v5593_v45  ;;  %5678 = vst [vmem:[#allocation46_spill] sm:$0xff] %v4785_v58  ;;  %v3781_v60 = vld [vmem:[%s4354_s6 + $0x30] ss:$52 sps:$4 sm:$0xff]  }
  0xa1   : > { %1650 = vmatprep.mubr.bf16.mxu1 %v3784_v47  ;;  %v5710_v47 = vld [vmem:[#allocation28_spill] sm:$0xff] }
  0xa2   : > { %3573 = vmatpush3.bf16.msra.mxu0 %v4764_v27 }
  0xa3   : > { %3162 = vmatpush3.bf16.msra.mxu1 %v4200_v62  ;;  %3574 = vmatprep.subr.bf16.mxu0 %v5593_v45  ;;  %v3787_v62 = vld [vmem:[%s4354_s6 + $0x74] ss:$52 sps:$4 sm:$0xff]  }
  0xa4   : > { %3163 = vmatprep.subr.bf16.mxu1 %v4212_v0  ;;  %v3788_v0 = vld [vmem:[%s4354_s6 + $0x78] ss:$52 sps:$4 sm:$0xff]  }
  0xa6   : > { %3575 = vmatpush3.bf16.msra.mxu0 %v4774_v56 }
  0xa7   : > { %3164 = vmatpush3.bf16.msra.mxu1 %v4224_v2  ;;  %3576 = vmatprep.subr.bf16.mxu0 %v5593_v45  ;;  %v5680_v2 = vld [vmem:[#allocation11_spill] sm:$0xff] }
  0xa8   : > { %3165 = vmatprep.subr.bf16.mxu1 %v4236_v4  ;;  %v5681_v4 = vld [vmem:[#allocation4_spill] sm:$0xff] }
  0xaa   : > { %3577 = vmatpush3.bf16.msra.mxu0 %v4785_v58 }
  0xab   : > { %3166 = vmatpush3.bf16.msra.mxu1 %v4248_v6  ;;  %3181 = vmatprep.subr.bf16.mxu0 %v4170_v57  ;;  %v3782_v57 = vld [vmem:[%s4354_s6 + $0x68] ss:$52 sps:$4 sm:$0xff]   ;;  %v5683_v6 = vld [vmem:[#allocation5_spill] sm:$0xff] }
  0xac   : > { %3167 = vmatprep.subr.bf16.mxu1 %v4260_v8  ;;  %v5685_v8 = vld [vmem:[#allocation6_spill] sm:$0xff] }
  0xad   : > { %3579 = vmatmul.mubr.msk.bf16.vlgmr.msra.gmra.mrb[12].mxu0 %vm1244_vm1, %v3781_v60  ;;  %v5711_v60 = vld [vmem:[#allocation30_spill] sm:$0xff] }
  0xae   : > { %3182 = vmatpush3.bf16.msra.mxu0 %v4182_v59  ;;  %1691 = vmatprep.mubr.bf16.mxu0 %v3787_v62  ;;  %v3790_v59 = vld [vmem:[%s4354_s6 + $0x7c] ss:$52 sps:$4 sm:$0xff]   ;;  %v5712_v62 = vld [vmem:[#allocation32_spill] sm:$0xff] }
  0xaf   : > { %3168 = vmatpush3.bf16.msra.mxu1 %v4272_v10  ;;  %3183 = vmatprep.subr.bf16.mxu0 %v4194_v61  ;;  %v3785_v61 = vld [vmem:[%s4354_s6 + $0x70] ss:$52 sps:$4 sm:$0xff]  }
  0xb0   : > { %3169 = vmatprep.subr.bf16.mxu1 %v4284_v12  ;;  %v5687_v10 = vld [vmem:[#allocation7_spill] sm:$0xff]  ;;  %v5689_v12 = vld [vmem:[#allocation8_spill] sm:$0xff] }
  0xb2   : > { %3184 = vmatpush3.bf16.msra.mxu0 %v4206_v63  ;;  %v3793_v63 = vld [vmem:[%s4354_s6 + $0x84] ss:$52 sps:$4 sm:$0xff]  }
  0xb3   : > { %3170 = vmatpush3.bf16.msra.mxu1 %v4296_v14  ;;  %3185 = vmatprep.subr.bf16.mxu0 %v4218_v1  ;;  %v5679_v1 = vld [vmem:[#allocation3_spill] sm:$0xff]  ;;  %v5691_v14 = vld [vmem:[#allocation9_spill] sm:$0xff] }
  0xb4   : > { %3171 = vmatprep.subr.bf16.mxu1 %v4309_v16  ;;  %v3791_v16 = vld [vmem:[%s4354_s6 + $0x80] ss:$52 sps:$4 sm:$0xff]  }
  0xb6   : > { %3186 = vmatpush3.bf16.msra.mxu0 %v4230_v3  ;;  %v3796_v3 = vld [vmem:[%s4354_s6 + $0x8c] ss:$52 sps:$4 sm:$0xff]  }
  0xb7   : > { %3172 = vmatpush3.bf16.msra.mxu1 %v4321_v18  ;;  %3187 = vmatprep.subr.bf16.mxu0 %v4242_v5  ;;  %v5682_v5 = vld [vmem:[#allocation13_spill] sm:$0xff] }
  0xb8   : > { %3173 = vmatprep.subr.bf16.mxu1 %v4333_v20  ;;  %v3799_v18 = vld [vmem:[%s4354_s6 + $0x94] ss:$52 sps:$4 sm:$0xff]  }
  0xb9   : > { %v5695_v20 = vld [vmem:[#allocation12_spill] sm:$0xff] }
  0xba   : > { %3188 = vmatpush3.bf16.msra.mxu0 %v4254_v7  ;;  %v5684_v7 = vld [vmem:[#allocation15_spill] sm:$0xff] }
  0xbb   : > { %3174 = vmatpush3.bf16.msra.mxu1 %v4345_v22  ;;  %3189 = vmatprep.subr.bf16.mxu0 %v4266_v9  ;;  %v5686_v9 = vld [vmem:[#allocation17_spill] sm:$0xff]  ;;  %v5697_v22 = vld [vmem:[#allocation14_spill] sm:$0xff] }
  0xbc   : > { %3203 = vmatprep.subr.bf16.mxu1 %v4364_v28  ;;  %v5699_v28 = vld [vmem:[#allocation16_spill] sm:$0xff] }
  0xbe   : > { %1651 = vmatmul.mubr.bf16.vlgmr.msra.gmra.mrb[12].mxu1 %v3782_v57  ;;  %3190 = vmatpush3.bf16.msra.mxu0 %v4278_v11  ;;  %v5688_v11 = vld [vmem:[#allocation19_spill] sm:$0xff]  ;;  %v5713_v57 = vld [vmem:[#allocation34_spill] sm:$0xff] }
  0xbf   : > { %3204 = vmatpush3.bf16.msra.mxu1 %v4375_v30  ;;  %3191 = vmatprep.subr.bf16.mxu0 %v4290_v13  ;;  %v5690_v13 = vld [vmem:[#allocation21_spill] sm:$0xff]  ;;  %v5701_v30 = vld [vmem:[#allocation18_spill] sm:$0xff] }
  0xc0   : > { %3205 = vmatprep.subr.bf16.mxu1 %v4387_v32  ;;  %1732 = vmatprep.mubr.bf16.mxu1 %v3790_v59  ;;  %v5703_v32 = vld [vmem:[#allocation20_spill] sm:$0xff] }
  0xc1   : > { %v5714_v59 = vld [vmem:[#allocation36_spill] sm:$0xff] }
  0xc2   : > { %3192 = vmatpush3.bf16.msra.mxu0 %v4303_v15  ;;  %v5692_v15 = vld [vmem:[#allocation23_spill] sm:$0xff] }
  0xc3   : > { %3206 = vmatpush3.bf16.msra.mxu1 %v4399_v34  ;;  %3193 = vmatprep.subr.bf16.mxu0 %v4315_v17  ;;  %v5693_v17 = vld [vmem:[#allocation10_spill] sm:$0xff] }
  0xc4   : > { %3207 = vmatprep.subr.bf16.mxu1 %v4411_v36  ;;  %v5705_v34 = vld [vmem:[#allocation22_spill] sm:$0xff]  ;;  %v5707_v36 = vld [vmem:[#allocation24_spill] sm:$0xff] }
  0xc6   : > { %3194 = vmatpush3.bf16.msra.mxu0 %v4327_v19  ;;  %v5694_v19 = vld [vmem:[#allocation25_spill] sm:$0xff] }
  0xc7   : > { %3208 = vmatpush3.bf16.msra.mxu1 %v4423_v38  ;;  %3195 = vmatprep.subr.bf16.mxu0 %v4339_v21  ;;  %v5696_v21 = vld [vmem:[#allocation27_spill] sm:$0xff] }
  0xc8   : > { %3209 = vmatprep.subr.bf16.mxu1 %v4435_v40 }
  0xca   : > { %3196 = vmatpush3.bf16.msra.mxu0 %v4351_v23  ;;  %v5698_v23 = vld [vmem:[#allocation29_spill] sm:$0xff] }
  0xcb   : > { %3210 = vmatpush3.bf16.msra.mxu1 %v4447_v42  ;;  %3225 = vmatprep.subr.bf16.mxu0 %v4369_v29  ;;  %v5700_v29 = vld [vmem:[#allocation31_spill] sm:$0xff] }
  0xcc   : > { %3211 = vmatprep.subr.bf16.mxu1 %v4459_v44 }
  0xcd   : > { %1692 = vmatmul.mubr.bf16.vlgmr.msra.gmra.mrb[16].mxu0 %v3785_v61  ;;  %v5715_v61 = vld [vmem:[#allocation38_spill] sm:$0xff] }
  0xce   : > { %3226 = vmatpush3.bf16.msra.mxu0 %v4381_v31  ;;  %1773 = vmatprep.mubr.bf16.mxu0 %v3793_v63  ;;  %v5702_v31 = vld [vmem:[#allocation33_spill] sm:$0xff]  ;;  %v5716_v63 = vld [vmem:[#allocation40_spill] sm:$0xff] }
  0xcf   : > { %3212 = vmatpush3.bf16.msra.mxu1 %v4471_v46  ;;  %3227 = vmatprep.subr.bf16.mxu0 %v4393_v33  ;;  %v5704_v33 = vld [vmem:[#allocation35_spill] sm:$0xff] }
  0xd0   : > { %3213 = vmatprep.subr.bf16.mxu1 %v4483_v48 }
  0xd2   : > { %3228 = vmatpush3.bf16.msra.mxu0 %v4405_v35  ;;  %v5706_v35 = vld [vmem:[#allocation37_spill] sm:$0xff] }
  0xd3   : > { %3214 = vmatpush3.bf16.msra.mxu1 %v4495_v50  ;;  %3229 = vmatprep.subr.bf16.mxu0 %v4417_v37 }
  0xd4   : > { %3215 = vmatprep.subr.bf16.mxu1 %v4507_v52 }
  0xd6   : > { %3230 = vmatpush3.bf16.msra.mxu0 %v4429_v39 }
  0xd7   : > { %3216 = vmatpush3.bf16.msra.mxu1 %v4519_v54  ;;  %3231 = vmatprep.subr.bf16.mxu0 %v4441_v41 }
  0xd8   : > { %3217 = vmatprep.subr.bf16.mxu1 %v4531_v24 }
  0xda   : > { %3232 = vmatpush3.bf16.msra.mxu0 %v4453_v43 }
  0xdb   : > { %3218 = vmatpush3.bf16.msra.mxu1 %v4543_v26  ;;  %3233 = vmatprep.subr.bf16.mxu0 %v5679_v1 }
  0xdc   : > { %3247 = vmatprep.subr.bf16.mxu1 %v5680_v2 }
  0xde   : > { %1733 = vmatmul.mubr.bf16.vlgmr.msra.gmra.mrb[16].mxu1 %v3788_v0  ;;  %3234 = vmatpush3.bf16.msra.mxu0 %v5681_v4  ;;  %v3797_v0 = vld [vmem:[%s4354_s6 + $0x90] ss:$52 sps:$4 sm:$0xff]  }
  0xdf   : > { %3248 = vmatpush3.bf16.msra.mxu1 %v5682_v5  ;;  %3235 = vmatprep.subr.bf16.mxu0 %v5683_v6 }
  0xe0   : > { %3249 = vmatprep.subr.bf16.mxu1 %v5684_v7  ;;  %1814 = vmatprep.mubr.bf16.mxu1 %v3796_v3  ;;  %v5717_v3 = vld [vmem:[#allocation42_spill] sm:$0xff] }
  0xe2   : > { %3236 = vmatpush3.bf16.msra.mxu0 %v5685_v8 }
  0xe3   : > { %3250 = vmatpush3.bf16.msra.mxu1 %v5686_v9  ;;  %3237 = vmatprep.subr.bf16.mxu0 %v5687_v10 }
  0xe4   : > { %3251 = vmatprep.subr.bf16.mxu1 %v5688_v11 }
  0xe6   : > { %3238 = vmatpush3.bf16.msra.mxu0 %v5689_v12 }
  0xe7   : > { %3252 = vmatpush3.bf16.msra.mxu1 %v5690_v13  ;;  %3239 = vmatprep.subr.bf16.mxu0 %v5691_v14 }
  0xe8   : > { %3253 = vmatprep.subr.bf16.mxu1 %v5692_v15 }
  0xea   : > { %3240 = vmatpush3.bf16.msra.mxu0 %v5693_v17 }
  0xeb   : > { %3254 = vmatpush3.bf16.msra.mxu1 %v5694_v19  ;;  %3269 = vmatprep.subr.bf16.mxu0 %v5695_v20 }
  0xec   : > { %3255 = vmatprep.subr.bf16.mxu1 %v5696_v21 }
  0xed   : > { %1774 = vmatmul.mubr.bf16.vlgmr.msra.gmra.mrb[20].mxu0 %v3791_v16  ;;  %v3800_v16 = vld [vmem:[%s4354_s6 + $0x98] ss:$52 sps:$4 sm:$0xff]  }
  0xee   : > { %3270 = vmatpush3.bf16.msra.mxu0 %v5697_v22  ;;  %1855 = vmatprep.mubr.bf16.mxu0 %v3799_v18  ;;  %v4907_v18 = vld [vmem:[%s5512_s1 + $0x40] sm:$0xff]  }
  0xef   : > { %3256 = vmatpush3.bf16.msra.mxu1 %v5698_v23  ;;  %3271 = vmatprep.subr.bf16.mxu0 %v5699_v28  ;;  %5718 = vst [vmem:[#allocation3_spill] sm:$0xff] %v4907_v18 }
  0xf0   : > { %3257 = vmatprep.subr.bf16.mxu1 %v5700_v29 }
  0xf2   : > { %3272 = vmatpush3.bf16.msra.mxu0 %v5701_v30 }
  0xf3   : > { %3258 = vmatpush3.bf16.msra.mxu1 %v5702_v31  ;;  %3273 = vmatprep.subr.bf16.mxu0 %v5703_v32 }
  0xf4   : > { %3259 = vmatprep.subr.bf16.mxu1 %v5704_v33 }
  0xf6   : > { %3274 = vmatpush3.bf16.msra.mxu0 %v5705_v34 }
  0xf7   : > { %3260 = vmatpush3.bf16.msra.mxu1 %v5706_v35  ;;  %3275 = vmatprep.subr.bf16.mxu0 %v5707_v36 }
  0xf8   : > { %3261 = vmatprep.subr.bf16.mxu1 %v5708_v53 }
  0xfa   : > { %3276 = vmatpush3.bf16.msra.mxu0 %v5709_v55 }
  0xfb   : > { %3262 = vmatpush3.bf16.msra.mxu1 %v4739_v25  ;;  %3277 = vmatprep.subr.bf16.mxu0 %v5710_v47 }
  0xfc   : > { %3582 = vmatprep.subr.bf16.mxu1 %v5593_v45 }
  0xfe   : > { %1815 = vmatmul.mubr.bf16.vlgmr.msra.gmra.mrb[20].mxu1 %v3794_v49  ;;  %3278 = vmatpush3.bf16.msra.mxu0 %v5711_v60  ;;  %v4913_v49 = vld [vmem:[%s5512_s1 + $0xc0] sm:$0xff]  }
  0xff   : > { %3583 = vmatpush3.bf16.msra.mxu1 %v4758_v51  ;;  %3279 = vmatprep.subr.bf16.mxu0 %v5712_v62  ;;  %5719 = vst [vmem:[#allocation11_spill] sm:$0xff] %v4913_v49 }
 0x100   : > { %3584 = vmatprep.subr.bf16.mxu1 %v5593_v45  ;;  %3590 = vmatprep.mubr.msk.bf16.mxu1 %vm3980_vm0, %v5593_v45 }
 0x102   : > { %3280 = vmatpush3.bf16.msra.mxu0 %v5713_v57 }
 0x103   : > { %3585 = vmatpush3.bf16.msra.mxu1 %v4764_v27  ;;  %3281 = vmatprep.subr.bf16.mxu0 %v5714_v59  ;;  %v4928_v27 = vld [vmem:[%s5512_s1 + $0x80] sm:$0xff]  }
 0x104   : > { %3586 = vmatprep.subr.bf16.mxu1 %v5593_v45  ;;  %5721 = vst [vmem:[#allocation13_spill] sm:$0xff] %v4928_v27 }
 0x106   : > { %3282 = vmatpush3.bf16.msra.mxu0 %v5715_v61 }
 0x107   : > { %3587 = vmatpush3.bf16.msra.mxu1 %v4774_v56  ;;  %3283 = vmatprep.subr.bf16.mxu0 %v5716_v63  ;;  %v3806_v56 = vld [vmem:[%s4354_s6 + $0xdc] ss:$52 sps:$4 sm:$0xff]   ;;  %v3812_v63 = vld [vmem:[%s4354_s6 + $0xec] ss:$52 sps:$4 sm:$0xff]  }
 0x108   : > { %3588 = vmatprep.subr.bf16.mxu1 %v5593_v45  ;;  %v3803_v45 = vld [vmem:[%s4354_s6 + $0xd4] ss:$52 sps:$4 sm:$0xff]  }
 0x10a   : > { %3284 = vmatpush3.bf16.msra.mxu0 %v5717_v3 }
 0x10b   : > { %3589 = vmatpush3.bf16.msra.mxu1 %v4785_v58  ;;  %3296 = vmatprep.subr.bf16.mxu0 %v4907_v18  ;;  %v4922_v58 = vld [vmem:[%s5512_s1] sm:$0xff]  }
 0x10c   : > { %3318 = vmatprep.subr.bf16.mxu1 %v4913_v49  ;;  %5720 = vst [vmem:[#allocation4_spill] sm:$0xff] %v4922_v58  ;;  %v4952_v49 = vld [vmem:[%s5512_s1 + $0x88] sm:$0xff]   ;;  %v3809_v18 = vld [vmem:[%s4354_s6 + $0xe4] ss:$52 sps:$4 sm:$0xff]  }
 0x10d   : > { %1856 = vmatmul.mubr.bf16.vlgmr.msra.gmra.mrb[24].mxu0 %v3797_v0  ;;  %v4934_v0 = vld [vmem:[%s5512_s1 + $0x48] sm:$0xff]   ;;  %5725 = vst [vmem:[#allocation17_spill] sm:$0xff] %v4952_v49 }
 0x10e   : > { %3591 = vmatmul.mubr.msk.bf16.vlgmr.msra.gmra.mrb[24].mxu1 %vm1244_vm1, %v3800_v16  ;;  %3297 = vmatpush3.bf16.msra.mxu0 %v4922_v58  ;;  %5722 = vst [vmem:[#allocation5_spill] sm:$0xff] %v4934_v0  ;;  %v4940_v16 = vld [vmem:[%s5512_s1 + $0xc8] sm:$0xff]  }
 0x10f   : > { %3319 = vmatpush3.bf16.msra.mxu1 %v4928_v27  ;;  %3298 = vmatprep.subr.bf16.mxu0 %v4934_v0  ;;  %5723 = vst [vmem:[#allocation15_spill] sm:$0xff] %v4940_v16  ;;  %v4946_v27 = vld [vmem:[%s5512_s1 + $0x8] sm:$0xff]  }
 0x110   : > { %3320 = vmatprep.subr.bf16.mxu1 %v4940_v16  ;;  %2020 = vmatprep.mubr.bf16.mxu0 %v3803_v45  ;;  %5724 = vst [vmem:[#allocation6_spill] sm:$0xff] %v4946_v27  ;;  %v4958_v16 = vld [vmem:[%s5512_s1 + $0x50] sm:$0xff]  }
 0x111   : > { %2061 = vmatprep.mubr.bf16.mxu1 %v3806_v56  ;;  %5726 = vst [vmem:[#allocation7_spill] sm:$0xff] %v4958_v16  ;;  %v4964_v45 = vld [vmem:[%s5512_s1 + $0xd0] sm:$0xff]  }
 0x112   : > { %3299 = vmatpush3.bf16.msra.mxu0 %v4946_v27  ;;  %5727 = vst [vmem:[#allocation19_spill] sm:$0xff] %v4964_v45  ;;  %v4970_v56 = vld [vmem:[%s5512_s1 + $0x10] sm:$0xff]   ;;  %v3804_v27 = vld [vmem:[%s4354_s6 + $0xd8] ss:$52 sps:$4 sm:$0xff]  }
 0x113   : > { %3321 = vmatpush3.bf16.msra.mxu1 %v4952_v49  ;;  %3300 = vmatprep.subr.bf16.mxu0 %v4958_v16  ;;  %5728 = vst [vmem:[#allocation8_spill] sm:$0xff] %v4970_v56  ;;  %v4976_v49 = vld [vmem:[%s5512_s1 + $0x90] sm:$0xff]   ;;  %v4982_v16 = vld [vmem:[%s5512_s1 + $0x58] sm:$0xff]  }
 0x114   : > { %3322 = vmatprep.subr.bf16.mxu1 %v4964_v45  ;;  %5729 = vst [vmem:[#allocation21_spill] sm:$0xff] %v4976_v49  ;;  %5730 = vst [vmem:[#allocation9_spill] sm:$0xff] %v4982_v16  ;;  %v4988_v45 = vld [vmem:[%s5512_s1 + $0xd8] sm:$0xff]  }
 0x115   : > { %5731 = vst [vmem:[#allocation23_spill] sm:$0xff] %v4988_v45 }
 0x116   : > { %3301 = vmatpush3.bf16.msra.mxu0 %v4970_v56  ;;  %v4994_v56 = vld [vmem:[%s5512_s1 + $0x18] sm:$0xff]  }
 0x117   : > { %3323 = vmatpush3.bf16.msra.mxu1 %v4976_v49  ;;  %3302 = vmatprep.subr.bf16.mxu0 %v4982_v16  ;;  %5732 = vst [vmem:[#allocation10_spill] sm:$0xff] %v4994_v56  ;;  %v5000_v49 = vld [vmem:[%s5512_s1 + $0x98] sm:$0xff]   ;;  %v5006_v16 = vld [vmem:[%s5512_s1 + $0x60] sm:$0xff]  }
 0x118   : > { %3324 = vmatprep.subr.bf16.mxu1 %v4988_v45  ;;  %5733 = vst [vmem:[#allocation25_spill] sm:$0xff] %v5000_v49  ;;  %5734 = vst [vmem:[#allocation12_spill] sm:$0xff] %v5006_v16  ;;  %v5012_v45 = vld [vmem:[%s5512_s1 + $0xe0] sm:$0xff]  }
 0x119   : > { %5735 = vst [vmem:[#allocation27_spill] sm:$0xff] %v5012_v45 }
 0x11a   : > { %3303 = vmatpush3.bf16.msra.mxu0 %v4994_v56  ;;  %v5018_v56 = vld [vmem:[%s5512_s1 + $0x20] sm:$0xff]  }
 0x11b   : > { %3325 = vmatpush3.bf16.msra.mxu1 %v5000_v49  ;;  %3304 = vmatprep.subr.bf16.mxu0 %v5006_v16  ;;  %5736 = vst [vmem:[#allocation14_spill] sm:$0xff] %v5018_v56  ;;  %v5024_v49 = vld [vmem:[%s5512_s1 + $0xa0] sm:$0xff]   ;;  %v5030_v16 = vld [vmem:[%s5512_s1 + $0x68] sm:$0xff]  }
 0x11c   : > { %3326 = vmatprep.subr.bf16.mxu1 %v5012_v45  ;;  %5737 = vst [vmem:[#allocation29_spill] sm:$0xff] %v5024_v49  ;;  %5738 = vst [vmem:[#allocation16_spill] sm:$0xff] %v5030_v16  ;;  %v5036_v45 = vld [vmem:[%s5512_s1 + $0xe8] sm:$0xff]  }
 0x11d   : > { %5739 = vst [vmem:[#allocation31_spill] sm:$0xff] %v5036_v45 }
 0x11e   : > { %3305 = vmatpush3.bf16.msra.mxu0 %v5018_v56  ;;  %v5042_v56 = vld [vmem:[%s5512_s1 + $0x28] sm:$0xff]  }
 0x11f   : > { %3327 = vmatpush3.bf16.msra.mxu1 %v5024_v49  ;;  %3306 = vmatprep.subr.bf16.mxu0 %v5030_v16  ;;  %5740 = vst [vmem:[#allocation18_spill] sm:$0xff] %v5042_v56  ;;  %v5048_v49 = vld [vmem:[%s5512_s1 + $0xa8] sm:$0xff]   ;;  %v5060_v16 = vld [vmem:[%s5512_s1 + $0xf0] sm:$0xff]  }
 0x120   : > { %3328 = vmatprep.subr.bf16.mxu1 %v5036_v45  ;;  %5741 = vst [vmem:[#allocation33_spill] sm:$0xff] %v5048_v49  ;;  %v5054_v45 = vld [vmem:[%s5512_s1 + $0x70] sm:$0xff]   ;;  %5743 = vst [vmem:[#allocation35_spill] sm:$0xff] %v5060_v16 }
 0x121   : > { %5742 = vst [vmem:[#allocation20_spill] sm:$0xff] %v5054_v45 }
 0x122   : > { %3307 = vmatpush3.bf16.msra.mxu0 %v5042_v56  ;;  %v5066_v56 = vld [vmem:[%s5512_s1 + $0x30] sm:$0xff]  }
 0x123   : > { %3329 = vmatpush3.bf16.msra.mxu1 %v5048_v49  ;;  %3308 = vmatprep.subr.bf16.mxu0 %v5054_v45  ;;  %5744 = vst [vmem:[#allocation22_spill] sm:$0xff] %v5066_v56  ;;  %v5072_v49 = vld [vmem:[%s5512_s1 + $0xb0] sm:$0xff]   ;;  %v5078_v45 = vld [vmem:[%s5512_s1 + $0x78] sm:$0xff]  }
 0x124   : > { %3330 = vmatprep.subr.bf16.mxu1 %v5060_v16  ;;  %5745 = vst [vmem:[#allocation24_spill] sm:$0xff] %v5072_v49  ;;  %5746 = vst [vmem:[#allocation26_spill] sm:$0xff] %v5078_v45  ;;  %v5084_v16 = vld [vmem:[%s5512_s1 + $0xf8] sm:$0xff]  }
 0x125   : > { %5747 = vst [vmem:[#allocation28_spill] sm:$0xff] %v5084_v16 }
 0x126   : > { %3309 = vmatpush3.bf16.msra.mxu0 %v5066_v56  ;;  %v3801_v56 = vld [vmem:[%s4354_s6 + $0xd0] ss:$52 sps:$4 sm:$0xff]  }
 0x127   : > { %3331 = vmatpush3.bf16.msra.mxu1 %v5072_v49  ;;  %3310 = vmatprep.subr.bf16.mxu0 %v5078_v45  ;;  %v5091_v49 = vld [vmem:[%s5512_s1 + $0x38] sm:$0xff]  }
 0x128   : > { %3332 = vmatprep.subr.bf16.mxu1 %v5084_v16  ;;  %5748 = vst [vmem:[#allocation30_spill] sm:$0xff] %v5091_v49  ;;  %v5098_v45 = vld [vmem:[%s5512_s1 + $0xb8] sm:$0xff]   ;;  %v5104_v16 = vld [vmem:[%s5512_s1 + $0x140] sm:$0xff]  }
 0x129   : > { %5749 = vst [vmem:[#allocation32_spill] sm:$0xff] %v5098_v45  ;;  %5750 = vst [vmem:[#allocation34_spill] sm:$0xff] %v5104_v16 }
 0x12a   : > { %3311 = vmatpush3.bf16.msra.mxu0 %v5091_v49  ;;  %v5110_v49 = vld [vmem:[%s5512_s1 + $0x1c0] sm:$0xff]  }
 0x12b   : > { %3333 = vmatpush3.bf16.msra.mxu1 %v5098_v45  ;;  %3340 = vmatprep.subr.bf16.mxu0 %v5104_v16  ;;  %5751 = vst [vmem:[#allocation36_spill] sm:$0xff] %v5110_v49  ;;  %v5118_v16 = vld [vmem:[%s5512_s1 + $0x100] sm:$0xff]  }
 0x12c   : > { %3362 = vmatprep.subr.bf16.mxu1 %v5110_v49  ;;  %v5124_v49 = vld [vmem:[%s5512_s1 + $0x180] sm:$0xff]  }
 0x12d   : > { %2021 = vmatmul.mubr.bf16.vlgmr.msra.gmra.mrb[28].mxu0 %v3801_v56  ;;  %5752 = vst [vmem:[#allocation47_spill] sm:$0xff] %v5124_v49 }
 0x12e   : > { %2062 = vmatmul.mubr.bf16.vlgmr.msra.gmra.mrb[28].mxu1 %v3804_v27  ;;  %3341 = vmatpush3.bf16.msra.mxu0 %v5118_v16  ;;  %v5130_v27 = vld [vmem:[%s5512_s1 + $0x148] sm:$0xff]  }
 0x12f   : > { %3363 = vmatpush3.bf16.msra.mxu1 %v5124_v49  ;;  %3342 = vmatprep.subr.bf16.mxu0 %v5130_v27  ;;  %v5142_v49 = vld [vmem:[%s5512_s1 + $0x108] sm:$0xff]  }
 0x130   : > { %v3038_v0 = vpop.f32.mrb[0].mxu0  ;;  %2102 = vmatprep.mubr.bf16.mxu0 %v3809_v18  ;;  %2143 = vmatprep.mubr.bf16.mxu1 %v3812_v63  ;;  %v5767_v18 = vld [vmem:[#allocation45_spill] sm:$0xff] }
 0x131   : > { %v3060_v58 = vpop.f32.mrb[0].mxu1  ;;  %v3039_v51 = vpop.f32.mrb[1].mxu0 }
 0x132   : > { %v3040_v45 = vadd.f32 %v3039_v51, %v3038_v0  ;;  %v3061_v3 = vpop.f32.mrb[1].mxu1  ;;  %v3041_v25 = vpop.f32.mrb[2].mxu0  ;;  %3343 = vmatpush3.bf16.msra.mxu0 %v5142_v49 }
 0x133   : > { %v3062_v53 = vadd.f32 %v3061_v3, %v3060_v58  ;;  %v3063_v61 = vpop.f32.mrb[2].mxu1  ;;  %v3042_v35 = vpop.f32.mrb[3].mxu0  ;;  %v5136_v58 = vld [vmem:[%s5512_s1 + $0x1c8] sm:$0xff]  }
 0x134   : > { %v3043_v51 = vadd.f32 %v3042_v35, %v3041_v25  ;;  %v3064_v0 = vpop.f32.mrb[3].mxu1  ;;  %3364 = vmatprep.subr.bf16.mxu1 %v5136_v58  ;;  %v5148_v35 = vld [vmem:[%s5512_s1 + $0x188] sm:$0xff]  }
 0x135   : > { %v1324_v56 = vadd.f32 %v3062_v53, %v3040_v45  ;;  %v3065_v3 = vadd.f32 %v3064_v0, %v3063_v61  ;;  %3365 = vmatpush3.bf16.msra.mxu1 %v5148_v35  ;;  %v5154_v53 = vld [vmem:[%s5512_s1 + $0x150] sm:$0xff]  }
 0x136   : > { %3344 = vmatprep.subr.bf16.mxu0 %v5154_v53  ;;  %3366 = vmatprep.subr.bf16.mxu1 %v4417_v37  ;;  %v3807_v37 = vld [vmem:[%s4354_s6 + $0xe0] ss:$52 sps:$4 sm:$0xff]  }
 0x137   : > { %v1327_v25 = vadd.f32 %v3065_v3, %v3043_v51  ;;  %3345 = vmatpush3.bf16.msra.mxu0 %v4423_v38  ;;  %v3810_v38 = vld [vmem:[%s4354_s6 + $0xe8] ss:$52 sps:$4 sm:$0xff]   ;;  %v5769_v0 = vld [vmem:[#allocation9_spill] sm:$0xff] }
 0x138   : > { %3346 = vmatprep.subr.bf16.mxu0 %v4435_v40  ;;  %v5768_v51 = vld [vmem:[#allocation8_spill] sm:$0xff]  ;;  %v3819_v3 = vld [vmem:[%s4354_s6 + $0x100] ss:$52 sps:$4 sm:$0xff]  }
 0x139   : > { %3367 = vmatpush3.bf16.msra.mxu1 %v4429_v39  ;;  %v3815_v39 = vld [vmem:[%s4354_s6 + $0xf4] ss:$52 sps:$4 sm:$0xff]  }
 0x13a   : > { %3368 = vmatprep.subr.bf16.mxu1 %v4441_v41  ;;  %v3818_v41 = vld [vmem:[%s4354_s6 + $0xfc] ss:$52 sps:$4 sm:$0xff]  }
 0x13b   : > { %3347 = vmatpush3.bf16.msra.mxu0 %v4447_v42 }
 0x13c   : > { %3348 = vmatprep.subr.bf16.mxu0 %v4459_v44 }
 0x13d   : > { %3369 = vmatpush3.bf16.msra.mxu1 %v4453_v43 }
 0x13e   : > { %3370 = vmatprep.subr.bf16.mxu1 %v5679_v1 }
 0x13f   : > { %3349 = vmatpush3.bf16.msra.mxu0 %v4471_v46 }
 0x140   : > { %3350 = vmatprep.subr.bf16.mxu0 %v4483_v48 }
 0x141   : > { %3371 = vmatpush3.bf16.msra.mxu1 %v5681_v4 }
 0x142   : > { %3372 = vmatprep.subr.bf16.mxu1 %v5683_v6 }
 0x143   : > { %3351 = vmatpush3.bf16.msra.mxu0 %v4495_v50 }
 0x144   : > { %3352 = vmatprep.subr.bf16.mxu0 %v4507_v52 }
 0x145   : > { %3373 = vmatpush3.bf16.msra.mxu1 %v5685_v8  ;;  %v5754_v8 = vld [vmem:[#allocation38_spill] sm:$0xff] }
 0x146   : > { %3374 = vmatprep.subr.bf16.mxu1 %v5687_v10  ;;  %v5756_v10 = vld [vmem:[#allocation40_spill] sm:$0xff] }
 0x147   : > { %3353 = vmatpush3.bf16.msra.mxu0 %v4519_v54 }
 0x148   : > { %3354 = vmatprep.subr.bf16.mxu0 %v4531_v24 }
 0x149   : > { %3375 = vmatpush3.bf16.msra.mxu1 %v5689_v12  ;;  %v5757_v12 = vld [vmem:[#allocation41_spill] sm:$0xff] }
 0x14a   : > { %3376 = vmatprep.subr.bf16.mxu1 %v5691_v14  ;;  %v5758_v14 = vld [vmem:[#allocation42_spill] sm:$0xff] }
 0x14b   : > { %3355 = vmatpush3.bf16.msra.mxu0 %v4543_v26 }
 0x14c   : > { %3384 = vmatprep.subr.bf16.mxu0 %v5680_v2 }
 0x14d   : > { %3377 = vmatpush3.bf16.msra.mxu1 %v5693_v17  ;;  %v5760_v17 = vld [vmem:[#allocation3_spill] sm:$0xff] }
 0x14e   : > { %3406 = vmatprep.subr.bf16.mxu1 %v5695_v20  ;;  %2103 = vmatmul.mubr.bf16.vlgmr.msra.gmra.mrb[32].mxu0 %v3807_v37  ;;  %v5761_v20 = vld [vmem:[#allocation43_spill] sm:$0xff] }
 0x14f   : > { %3385 = vmatpush3.bf16.msra.mxu0 %v5682_v5  ;;  %2184 = vmatprep.mubr.bf16.mxu0 %v3815_v39  ;;  %v3825_v37 = vld [vmem:[%s4354_s6 + $0x144] ss:$52 sps:$4 sm:$0xff]  }
 0x150   : > { %v3082_v40 = vpop.f32.mrb[4].mxu0  ;;  %2144 = vmatmul.mubr.bf16.vlgmr.msra.gmra.mrb[32].mxu1 %v3810_v38  ;;  %3386 = vmatprep.subr.bf16.mxu0 %v5684_v7  ;;  %v5753_v7 = vld [vmem:[#allocation37_spill] sm:$0xff]  ;;  %v5771_v38 = vld [vmem:[#allocation10_spill] sm:$0xff]  ;;  %v5772_v39 = vld [vmem:[#allocation11_spill] sm:$0xff] }
 0x151   : > { %v3083_v42 = vpop.f32.mrb[5].mxu0  ;;  %3407 = vmatpush3.bf16.msra.mxu1 %v5697_v22  ;;  %v3104_v46 = vpop.f32.mrb[4].mxu1  ;;  %2225 = vmatprep.mubr.bf16.mxu1 %v3818_v41  ;;  %v5774_v41 = vld [vmem:[#allocation13_spill] sm:$0xff] }
 0x152   : > { %v3084_v43 = vadd.f32 %v3083_v42, %v3082_v40  ;;  %v3085_v44 = vpop.f32.mrb[6].mxu0  ;;  %3408 = vmatprep.subr.bf16.mxu1 %v5699_v28  ;;  %v3105_v50 = vpop.f32.mrb[5].mxu1  ;;  %v5773_v40 = vld [vmem:[#allocation12_spill] sm:$0xff]  ;;  %v5775_v42 = vld [vmem:[#allocation14_spill] sm:$0xff] }
 0x153   : > { %v3086_v48 = vpop.f32.mrb[7].mxu0  ;;  %v3106_v24 = vadd.f32 %v3105_v50, %v3104_v46  ;;  %v3107_v26 = vpop.f32.mrb[6].mxu1  ;;  %3387 = vmatpush3.bf16.msra.mxu0 %v5686_v9  ;;  %v5755_v9 = vld [vmem:[#allocation39_spill] sm:$0xff]  ;;  %v5777_v46 = vld [vmem:[#allocation16_spill] sm:$0xff] }
 0x154   : > { %v1365_v52 = vadd.f32 %v3084_v43, %v1324_v56  ;;  %v3087_v54 = vadd.f32 %v3086_v48, %v3085_v44  ;;  %v3108_v1 = vpop.f32.mrb[7].mxu1  ;;  %3388 = vmatprep.subr.bf16.mxu0 %v5688_v11  ;;  %v3813_v11 = vld [vmem:[%s4354_s6 + $0xf0] ss:$52 sps:$4 sm:$0xff]  }
 0x155   : > { %3409 = vmatpush3.bf16.msra.mxu1 %v5701_v30  ;;  %v3109_v5 = vadd.f32 %v3108_v1, %v3107_v26  ;;  %v5776_v43 = vld [vmem:[#allocation15_spill] sm:$0xff]  ;;  %v5779_v26 = vld [vmem:[#allocation18_spill] sm:$0xff] }
 0x156   : > { %v1368_v2 = vadd.f32 %v3087_v54, %v1327_v25  ;;  %v1406_v4 = vadd.f32 %v3106_v24, %v1365_v52  ;;  %3410 = vmatprep.subr.bf16.mxu1 %v5703_v32  ;;  %v5764_v32 = vld [vmem:[#allocation44_spill] sm:$0xff]  ;;  %v5770_v25 = vld [vmem:[#allocation46_spill] sm:$0xff]  ;;  %v5778_v54 = vld [vmem:[#allocation17_spill] sm:$0xff] }
 0x157   : > { %3389 = vmatpush3.bf16.msra.mxu0 %v5690_v13  ;;  %v3816_v13 = vld [vmem:[%s4354_s6 + $0xf8] ss:$52 sps:$4 sm:$0xff]  }
 0x158   : > { %v1409_v6 = vadd.f32 %v3109_v5, %v1368_v2  ;;  %3390 = vmatprep.subr.bf16.mxu0 %v5692_v15  ;;  %v5759_v15 = vmov 0.0   ;;  %v5780_v2 = vld [vmem:[#allocation19_spill] sm:$0xff]  ;;  %v5782_v5 = vld [vmem:[#allocation21_spill] sm:$0xff] }
 0x159   : > { %3411 = vmatpush3.bf16.msra.mxu1 %v5705_v34  ;;  %v5765_v34 = vld [vmem:[#allocation6_spill] sm:$0xff] }
 0x15a   : > { %3412 = vmatprep.subr.bf16.mxu1 %v5707_v36 }
 0x15b   : > { %3391 = vmatpush3.bf16.msra.mxu0 %v5694_v19  ;;  %v3822_v19 = vld [vmem:[%s4354_s6 + $0x13c] ss:$52 sps:$4 sm:$0xff]  }
 0x15c   : > { %3392 = vmatprep.subr.bf16.mxu0 %v5696_v21  ;;  %v5762_v21 = vld [vmem:[#allocation4_spill] sm:$0xff] }
 0x15d   : > { %3413 = vmatpush3.bf16.msra.mxu1 %v5709_v55 }
 0x15e   : > { %3414 = vmatprep.subr.bf16.mxu1 %v5710_v47 }
 0x15f   : > { %3393 = vmatpush3.bf16.msra.mxu0 %v5698_v23  ;;  %v5763_v23 = vld [vmem:[#allocation5_spill] sm:$0xff] }
 0x160   : > { %3394 = vmatprep.subr.bf16.mxu0 %v5700_v29 }
 0x161   : > { %3415 = vmatpush3.bf16.msra.mxu1 %v5711_v60 }
 0x162   : > { %3416 = vmatprep.subr.bf16.mxu1 %v5712_v62 }
 0x163   : > { %3395 = vmatpush3.bf16.msra.mxu0 %v5702_v31 }
 0x164   : > { %3396 = vmatprep.subr.bf16.mxu0 %v5704_v33 }
 0x165   : > { %3417 = vmatpush3.bf16.msra.mxu1 %v5713_v57 }
 0x166   : > { %3418 = vmatprep.subr.bf16.mxu1 %v5714_v59  ;;  %v5766_v59 = vld [vmem:[#allocation7_spill] sm:$0xff] }
 0x167   : > { %3397 = vmatpush3.bf16.msra.mxu0 %v5753_v7  ;;  %v5784_v7 = vld [vmem:[#allocation23_spill] sm:$0xff] }
 0x168   : > { %3398 = vmatprep.subr.bf16.mxu0 %v5755_v9  ;;  %v5786_v9 = vld [vmem:[#allocation25_spill] sm:$0xff] }
 0x169   : > { %3419 = vmatpush3.bf16.msra.mxu1 %v5754_v8  ;;  %v5785_v8 = vld [vmem:[#allocation26_spill] sm:$0xff] }
 0x16a   : > { %3420 = vmatprep.subr.bf16.mxu1 %v5756_v10  ;;  %v3820_v10 = vld [vmem:[%s4354_s6 + $0x138] ss:$52 sps:$4 sm:$0xff]  }
 0x16b   : > { %3399 = vmatpush3.bf16.msra.mxu0 %v5757_v12  ;;  %v5788_v12 = vld [vmem:[#allocation27_spill] sm:$0xff] }
 0x16c   : > { %3594 = vmatprep.subr.bf16.mxu0 %v5759_v15 }
 0x16d   : > { %3421 = vmatpush3.bf16.msra.mxu1 %v5758_v14  ;;  %v3828_v14 = vld [vmem:[%s4354_s6 + $0x14c] ss:$52 sps:$4 sm:$0xff]  }
 0x16e   : > { %3433 = vmatprep.subr.bf16.mxu1 %v5760_v17  ;;  %2185 = vmatmul.mubr.bf16.vlgmr.msra.gmra.mrb[36].mxu0 %v3813_v11  ;;  %v5787_v11 = vld [vmem:[#allocation30_spill] sm:$0xff]  ;;  %v5790_v17 = vld [vmem:[#allocation29_spill] sm:$0xff] }
 0x16f   : > { %3595 = vmatpush3.bf16.msra.mxu0 %v5761_v20  ;;  %3602 = vmatprep.mubr.msk.bf16.mxu0 %vm3980_vm0, %v5759_v15 }
 0x170   : > { %2226 = vmatmul.mubr.bf16.vlgmr.msra.gmra.mrb[36].mxu1 %v3816_v13  ;;  %3596 = vmatprep.subr.bf16.mxu0 %v5759_v15  ;;  %v3126_v22 = vpop.f32.mrb[8].mxu0  ;;  %v5789_v13 = vld [vmem:[#allocation34_spill] sm:$0xff] }
 0x171   : > { %3434 = vmatpush3.bf16.msra.mxu1 %v5762_v21  ;;  %v3127_v28 = vpop.f32.mrb[9].mxu0  ;;  %v3148_v29 = vpop.f32.mrb[8].mxu1  ;;  %2390 = vmatprep.mubr.bf16.mxu1 %v3822_v19  ;;  %v5791_v19 = vld [vmem:[#allocation31_spill] sm:$0xff]  ;;  %v5792_v21 = vld [vmem:[#allocation33_spill] sm:$0xff] }
 0x172   : > { %3435 = vmatprep.subr.bf16.mxu1 %v5763_v23  ;;  %v3128_v30 = vadd.f32 %v3127_v28, %v3126_v22  ;;  %v3129_v31 = vpop.f32.mrb[10].mxu0  ;;  %v3149_v33 = vpop.f32.mrb[9].mxu1 }
 0x173   : > { %3597 = vmatpush3.bf16.msra.mxu0 %v5764_v32  ;;  %v3130_v36 = vpop.f32.mrb[11].mxu0  ;;  %v3150_v55 = vadd.f32 %v3149_v33, %v3148_v29  ;;  %v3151_v47 = vpop.f32.mrb[10].mxu1  ;;  %v5793_v29 = vld [vmem:[#allocation35_spill] sm:$0xff]  ;;  %v5795_v32 = vld [vmem:[#allocation28_spill] sm:$0xff] }
 0x174   : > { %3598 = vmatprep.subr.bf16.mxu0 %v5759_v15  ;;  %v1447_v60 = vadd.f32 %v3128_v30, %v1406_v4  ;;  %v3131_v62 = vadd.f32 %v3130_v36, %v3129_v31  ;;  %v3152_v57 = vpop.f32.mrb[11].mxu1  ;;  %v5781_v4 = vld [vmem:[#allocation20_spill] sm:$0xff]  ;;  %v3823_v33 = vld [vmem:[%s4354_s6 + $0x140] ss:$52 sps:$4 sm:$0xff]   ;;  %v3882_v36 = vld [vmem:[%s5512_s1 + $0x118] sm:$0xff]  }
 0x175   : > { %3436 = vmatpush3.bf16.msra.mxu1 %v5765_v34  ;;  %v3153_v61 = vadd.f32 %v3152_v57, %v3151_v47  ;;  %v5794_v31 = vld [vmem:[#allocation24_spill] sm:$0xff]  ;;  %v3883_v47 = vld [vmem:[%s5512_s1 + $0x160] sm:$0xff]  }
 0x176   : > { %3437 = vmatprep.subr.bf16.mxu1 %v5766_v59  ;;  %v1450_v63 = vadd.f32 %v3131_v62, %v1409_v6  ;;  %v1488_v45 = vadd.f32 %v3150_v55, %v1447_v60  ;;  %v5783_v6 = vld [vmem:[#allocation22_spill] sm:$0xff]  ;;  %v5796_v34 = vld [vmem:[#allocation32_spill] sm:$0xff]  ;;  %v5798_v60 = vld [vmem:[#allocation47_spill] sm:$0xff] }
 0x177   : > { %3599 = vmatpush3.bf16.msra.mxu0 %v5767_v18  ;;  %v5797_v55 = vld [vmem:[#allocation36_spill] sm:$0xff]  ;;  %v3884_v62 = vld [vmem:[%s5512_s1 + $0x120] sm:$0xff]  }
 0x178   : > { %3600 = vmatprep.subr.bf16.mxu0 %v5759_v15  ;;  %v1491_v56 = vadd.f32 %v3153_v61, %v1450_v63  ;;  %v3885_v59 = vld [vmem:[%s5512_s1 + $0x168] sm:$0xff]  }
 0x179   : > { %3438 = vmatpush3.bf16.msra.mxu1 %v5768_v51 }
 0x17a   : > { %3439 = vmatprep.subr.bf16.mxu1 %v5769_v0 }
 0x17b   : > { %3601 = vmatpush3.bf16.msra.mxu0 %v5770_v25  ;;  %v3889_v25 = vld [vmem:[%s5512_s1 + $0x190] sm:$0xff]  }
 0x17c   : > { %3455 = vmatprep.subr.bf16.mxu0 %v5772_v39  ;;  %v3892_v39 = vld [vmem:[%s5512_s1 + $0x178] sm:$0xff]  }
 0x17d   : > { %3440 = vmatpush3.bf16.msra.mxu1 %v5771_v38  ;;  %v3891_v38 = vld [vmem:[%s5512_s1 + $0x1d8] sm:$0xff]  }
 0x17e   : > { %3441 = vmatprep.subr.bf16.mxu1 %v5773_v40  ;;  %3603 = vmatmul.mubr.msk.bf16.vlgmr.msra.gmra.mrb[40].mxu0 %vm1244_vm1, %v3819_v3  ;;  %v3888_v3 = vld [vmem:[%s5512_s1 + $0x170] sm:$0xff]   ;;  %v3893_v40 = vld [vmem:[%s5512_s1 + $0x198] sm:$0xff]  }
 0x17f   : > { %3456 = vmatpush3.bf16.msra.mxu0 %v5774_v41  ;;  %2431 = vmatprep.mubr.bf16.mxu0 %v3825_v37  ;;  %v3890_v37 = vld [vmem:[%s5512_s1 + $0x130] sm:$0xff]   ;;  %v3826_v41 = vld [vmem:[%s4354_s6 + $0x148] ss:$52 sps:$4 sm:$0xff]  }
 0x180   : > { %3457 = vmatprep.subr.bf16.mxu0 %v5776_v43  ;;  %v1528_v44 = vpop.f32.mrb[12].mxu0  ;;  %v3895_v43 = vld [vmem:[%s5512_s1 + $0x1e0] sm:$0xff]  }
 0x181   : > { %3442 = vmatpush3.bf16.msra.mxu1 %v5775_v42  ;;  %v5246_v48 = vadd.f32 %v1528_v44, %v1488_v45  ;;  %v3580_v50 = vpop.f32.mrb[13].mxu0  ;;  %v3886_v45 = vld [vmem:[%s5512_s1 + $0x128] sm:$0xff]   ;;  %v3894_v42 = vld [vmem:[%s5512_s1 + $0x138] sm:$0xff]   ;;  %v3896_v44 = vld [vmem:[%s5512_s1 + $0x240] sm:$0xff]  }
 0x182   : > { %3443 = vmatprep.subr.bf16.mxu1 %v5777_v46  ;;  %v1531_v52 = vpop.f32.mrb[14].mxu0  ;;  %v3834_v46 = vld [vmem:[%s4354_s6 + $0x15c] ss:$52 sps:$4 sm:$0xff]   ;;  %v3897_v50 = vld [vmem:[%s5512_s1 + $0x1a0] sm:$0xff]  }
 0x183   : > { %3458 = vmatpush3.bf16.msra.mxu0 %v5778_v54  ;;  %v5249_v24 = vadd.f32 %v1531_v52, %v1491_v56  ;;  %v3581_v1 = vpop.f32.mrb[15].mxu0  ;;  %v3898_v52 = vld [vmem:[%s5512_s1 + $0x200] sm:$0xff]   ;;  %v3899_v54 = vld [vmem:[%s5512_s1 + $0x1e8] sm:$0xff]  }
 0x184   : > { %3459 = vmatprep.subr.bf16.mxu0 %v5780_v2 }
 0x185   : > { %3444 = vmatpush3.bf16.msra.mxu1 %v5779_v26  ;;  %v3900_v26 = vld [vmem:[%s5512_s1 + $0x248] sm:$0xff]  }
 0x186   : > { %3445 = vmatprep.subr.bf16.mxu1 %v5781_v4  ;;  %v3901_v4 = vld [vmem:[%s5512_s1 + $0x1a8] sm:$0xff]  }
 0x187   : > { %3460 = vmatpush3.bf16.msra.mxu0 %v5782_v5 }
 0x188   : > { %3461 = vmatprep.subr.bf16.mxu0 %v5784_v7  ;;  %v3902_v7 = vld [vmem:[%s5512_s1 + $0x208] sm:$0xff]  }
 0x189   : > { %3446 = vmatpush3.bf16.msra.mxu1 %v5783_v6 }
 0x18a   : > { %3447 = vmatprep.subr.bf16.mxu1 %v5785_v8  ;;  %v3903_v8 = vld [vmem:[%s5512_s1 + $0x1f0] sm:$0xff]  }
 0x18b   : > { %3462 = vmatpush3.bf16.msra.mxu0 %v5786_v9 }
 0x18c   : > { %3463 = vmatprep.subr.bf16.mxu0 %v5788_v12 }
 0x18d   : > { %3448 = vmatpush3.bf16.msra.mxu1 %v5787_v11 }
 0x18e   : > { %3477 = vmatprep.subr.bf16.mxu1 %v5789_v13  ;;  %v3905_v13 = vld [vmem:[%s5512_s1 + $0x1b0] sm:$0xff]  }
 0x18f   : > { %3464 = vmatpush3.bf16.msra.mxu0 %v5790_v17  ;;  %v3906_v17 = vld [vmem:[%s5512_s1 + $0x210] sm:$0xff]  }
 0x190   : > { %2391 = vmatmul.mubr.bf16.vlgmr.msra.gmra.mrb[40].mxu1 %v3820_v10  ;;  %3465 = vmatprep.subr.bf16.mxu0 %v5791_v19  ;;  %v3904_v10 = vld [vmem:[%s5512_s1 + $0x250] sm:$0xff]   ;;  %v3907_v19 = vld [vmem:[%s5512_s1 + $0x1f8] sm:$0xff]  }
 0x191   : > { %3478 = vmatpush3.bf16.msra.mxu1 %v5118_v16  ;;  %2472 = vmatprep.mubr.bf16.mxu1 %v3828_v14  ;;  %v3175_v20 = vpop.f32.mrb[12].mxu1 }
 0x192   : > { %3479 = vmatprep.subr.bf16.mxu1 %v5130_v27  ;;  %v3176_v22 = vpop.f32.mrb[13].mxu1  ;;  %v3880_v27 = vld [vmem:[%s5512_s1 + $0x110] sm:$0xff]  }
 0x193   : > { %3466 = vmatpush3.bf16.msra.mxu0 %v5792_v21  ;;  %v3177_v23 = vadd.f32 %v3176_v22, %v3175_v20  ;;  %v3178_v28 = vpop.f32.mrb[14].mxu1  ;;  %v3908_v20 = vld [vmem:[%s5512_s1 + $0x258] sm:$0xff]   ;;  %v3829_v21 = vld [vmem:[%s4354_s6 + $0x150] ss:$52 sps:$4 sm:$0xff]  }
 0x194   : > { %3467 = vmatprep.subr.bf16.mxu0 %v5793_v29  ;;  %v3179_v16 = vpop.f32.mrb[15].mxu1  ;;  %v3909_v22 = vld [vmem:[%s5512_s1 + $0x1b8] sm:$0xff]   ;;  %v3911_v29 = vld [vmem:[%s5512_s1 + $0x2c0] sm:$0xff]  }
 0x195   : > { %3480 = vmatpush3.bf16.msra.mxu1 %v5142_v49  ;;  %v3180_v30 = vadd.f32 %v3179_v16, %v3178_v28  ;;  %v3881_v49 = vld [vmem:[%s5512_s1 + $0x158] sm:$0xff]   ;;  %v3912_v16 = vld [vmem:[%s5512_s1 + $0x260] sm:$0xff]  }
 0x196   : > { %3481 = vmatprep.subr.bf16.mxu1 %v5154_v53  ;;  %v3831_v53 = vld [vmem:[%s4354_s6 + $0x154] ss:$52 sps:$4 sm:$0xff]   ;;  %v3910_v28 = vld [vmem:[%s5512_s1 + $0x218] sm:$0xff]  }
 0x197   : > { %3468 = vmatpush3.bf16.msra.mxu0 %v5794_v31  ;;  %v3914_v31 = vld [vmem:[%s5512_s1 + $0x220] sm:$0xff]  }
 0x198   : > { %3469 = vmatprep.subr.bf16.mxu0 %v5795_v32 }
 0x199   : > { %3482 = vmatpush3.bf16.msra.mxu1 %v3880_v27  ;;  %v3915_v27 = vld [vmem:[%s5512_s1 + $0x2c8] sm:$0xff]  }
 0x19a   : > { %3483 = vmatprep.subr.bf16.mxu1 %v3881_v49  ;;  %v3916_v49 = vld [vmem:[%s5512_s1 + $0x268] sm:$0xff]  }
 0x19b   : > { %3470 = vmatpush3.bf16.msra.mxu0 %v5796_v34 }
 0x19c   : > { %3499 = vmatprep.subr.bf16.mxu0 %v5797_v55  ;;  %v3918_v55 = vld [vmem:[%s5512_s1 + $0x228] sm:$0xff]  }
 0x19d   : > { %3484 = vmatpush3.bf16.msra.mxu1 %v3882_v36  ;;  %v3917_v36 = vld [vmem:[%s5512_s1 + $0x288] sm:$0xff]  }
 0x19e   : > { %3485 = vmatprep.subr.bf16.mxu1 %v3883_v47  ;;  %2432 = vmatmul.mubr.bf16.vlgmr.msra.gmra.mrb[44].mxu0 %v3823_v33 }
 0x19f   : > { %3500 = vmatpush3.bf16.msra.mxu0 %v5798_v60  ;;  %2513 = vmatprep.mubr.bf16.mxu0 %v3831_v53  ;;  %v3919_v60 = vld [vmem:[%s5512_s1 + $0x2d0] sm:$0xff]  }
 0x1a0   : > { %3501 = vmatprep.subr.bf16.mxu0 %v5136_v58  ;;  %v3197_v57 = vpop.f32.mrb[16].mxu0  ;;  %v3887_v58 = vld [vmem:[%s5512_s1 + $0x1d0] sm:$0xff]  }
 0x1a1   : > { %3486 = vmatpush3.bf16.msra.mxu1 %v3884_v62  ;;  %v3198_v61 = vpop.f32.mrb[17].mxu0 }
 0x1a2   : > { %3487 = vmatprep.subr.bf16.mxu1 %v3885_v59  ;;  %v3199_v63 = vadd.f32 %v3198_v61, %v3197_v57  ;;  %v3200_v18 = vpop.f32.mrb[18].mxu0  ;;  %v3920_v59 = vld [vmem:[%s5512_s1 + $0x270] sm:$0xff]  }
 0x1a3   : > { %3502 = vmatpush3.bf16.msra.mxu0 %v5148_v35  ;;  %v3201_v51 = vpop.f32.mrb[19].mxu0 }
 0x1a4   : > { %3503 = vmatprep.subr.bf16.mxu0 %v3887_v58  ;;  %v1694_v0 = vadd.f32 %v3199_v63, %v3177_v23  ;;  %v3202_v56 = vadd.f32 %v3201_v51, %v3200_v18  ;;  %v3837_v23 = vld [vmem:[%s4354_s6 + $0x164] ss:$52 sps:$4 sm:$0xff]   ;;  %v3921_v63 = vld [vmem:[%s5512_s1 + $0x290] sm:$0xff]  }
 0x1a5   : > { %3488 = vmatpush3.bf16.msra.mxu1 %v3886_v45  ;;  %v3922_v18 = vld [vmem:[%s5512_s1 + $0x230] sm:$0xff]   ;;  %v3923_v45 = vld [vmem:[%s5512_s1 + $0x2d8] sm:$0xff]  }
 0x1a6   : > { %3489 = vmatprep.subr.bf16.mxu1 %v3888_v3  ;;  %v1697_v35 = vadd.f32 %v3202_v56, %v3180_v30  ;;  %v3913_v30 = vld [vmem:[%s5512_s1 + $0x280] sm:$0xff]   ;;  %v3924_v51 = vld [vmem:[%s5512_s1 + $0x278] sm:$0xff]  }
 0x1a7   : > { %3504 = vmatpush3.bf16.msra.mxu0 %v3889_v25  ;;  %v3925_v58 = vld [vmem:[%s5512_s1 + $0x298] sm:$0xff]   ;;  %v3927_v3 = vld [vmem:[%s5512_s1 + $0x2e0] sm:$0xff]  }
 0x1a8   : > { %3505 = vmatprep.subr.bf16.mxu0 %v3891_v38  ;;  %v3926_v56 = vld [vmem:[%s5512_s1 + $0x238] sm:$0xff]   ;;  %v3929_v25 = vld [vmem:[%s5512_s1 + $0x300] sm:$0xff]  }
 0x1a9   : > { %3490 = vmatpush3.bf16.msra.mxu1 %v3890_v37  ;;  %v3930_v37 = vld [vmem:[%s5512_s1 + $0x2e8] sm:$0xff]  }
 0x1aa   : > { %3491 = vmatprep.subr.bf16.mxu1 %v3892_v39 }
 0x1ab   : > { %3506 = vmatpush3.bf16.msra.mxu0 %v3893_v40  ;;  %v3931_v40 = vld [vmem:[%s5512_s1 + $0x2a8] sm:$0xff]  }
 0x1ac   : > { %3507 = vmatprep.subr.bf16.mxu0 %v3895_v43  ;;  %v3932_v43 = vld [vmem:[%s5512_s1 + $0x308] sm:$0xff]  }
 0x1ad   : > { %3492 = vmatpush3.bf16.msra.mxu1 %v3894_v42 }
 0x1ae   : > { %3521 = vmatprep.subr.bf16.mxu1 %v3896_v44  ;;  %v3933_v44 = vld [vmem:[%s5512_s1 + $0x2f0] sm:$0xff]  }
 0x1af   : > { %3508 = vmatpush3.bf16.msra.mxu0 %v3897_v50 }
 0x1b0   : > { %2473 = vmatmul.mubr.bf16.vlgmr.msra.gmra.mrb[44].mxu1 %v3826_v41  ;;  %3509 = vmatprep.subr.bf16.mxu0 %v3899_v54  ;;  %v3934_v54 = vld [vmem:[%s5512_s1 + $0x2b0] sm:$0xff]  }
 0x1b1   : > { %3522 = vmatpush3.bf16.msra.mxu1 %v3898_v52  ;;  %2554 = vmatprep.mubr.bf16.mxu1 %v3834_v46  ;;  %v3219_v1 = vpop.f32.mrb[16].mxu1 }
 0x1b2   : > { %3523 = vmatprep.subr.bf16.mxu1 %v3900_v26  ;;  %v3220_v2 = vpop.f32.mrb[17].mxu1 }
 0x1b3   : > { %3510 = vmatpush3.bf16.msra.mxu0 %v3901_v4  ;;  %v3221_v5 = vadd.f32 %v3220_v2, %v3219_v1  ;;  %v3222_v6 = vpop.f32.mrb[18].mxu1  ;;  %v3935_v1 = vld [vmem:[%s5512_s1 + $0x310] sm:$0xff]   ;;  %v3936_v2 = vld [vmem:[%s5512_s1 + $0x2f8] sm:$0xff]  }
 0x1b4   : > { %3511 = vmatprep.subr.bf16.mxu0 %v3903_v8  ;;  %v3223_v9 = vpop.f32.mrb[19].mxu1  ;;  %v3835_v4 = vld [vmem:[%s4354_s6 + $0x160] ss:$52 sps:$4 sm:$0xff]  }
 0x1b5   : > { %3524 = vmatpush3.bf16.msra.mxu1 %v3902_v7  ;;  %v1735_v11 = vadd.f32 %v3221_v5, %v1694_v0  ;;  %v3224_v12 = vadd.f32 %v3223_v9, %v3222_v6  ;;  %v3832_v0 = vld [vmem:[%s4354_s6 + $0x158] ss:$52 sps:$4 sm:$0xff]   ;;  %v3838_v6 = vld [vmem:[%s4354_s6 + $0x168] ss:$52 sps:$4 sm:$0xff]   ;;  %s2810_s6 = sshll.u32 %s3969_s14, 1 }
 0x1b6   : > { %3525 = vmatprep.subr.bf16.mxu1 %v3904_v10  ;;  %v3937_v5 = vld [vmem:[%s5512_s1 + $0x2b8] sm:$0xff]   ;;  %p356_p9 = scmp.lt.s32.totalorder %s2810_s6, 3 }
 0x1b7   : > { %3512 = vmatpush3.bf16.msra.mxu0 %v3905_v13  ;;  %v1738_v14 = vadd.f32 %v3224_v12, %v1697_v35  ;;  %v3928_v35 = vld [vmem:[%s5512_s1 + $0x2a0] sm:$0xff]   ;;  %v3938_v7 = vld [vmem:[%s5512_s1 + $0x318] sm:$0xff]  }
 0x1b8   : > { %3513 = vmatprep.subr.bf16.mxu0 %v3907_v19  ;;  %s5806_s6 = smov (!%p356_p9, %s2810_s6), 3 }
 0x1b9   : > { %3526 = vmatpush3.bf16.msra.mxu1 %v3906_v17  ;;  %s2811_s14 = sshll.u32 %s5806_s6, 2 }
 0x1ba   : > { %3527 = vmatprep.subr.bf16.mxu1 %v3908_v20  ;;  %s362_s7 = scalar_lea.vmem %s5514_s3, %s2811_s14 }
 0x1bb   : > { %3514 = vmatpush3.bf16.msra.mxu0 %v3909_v22 }
 0x1bc   : > { %3543 = vmatprep.subr.bf16.mxu0 %v3911_v29 }
 0x1bd   : > { %3528 = vmatpush3.bf16.msra.mxu1 %v3910_v28 }
 0x1be   : > { %3529 = vmatprep.subr.bf16.mxu1 %v3912_v16  ;;  %2514 = vmatmul.mubr.bf16.vlgmr.msra.gmra.mrb[48].mxu0 %v3829_v21 }
 0x1bf   : > { %3544 = vmatpush3.bf16.msra.mxu0 %v3913_v30  ;;  %2595 = vmatprep.mubr.bf16.mxu0 %v3837_v23 }
 0x1c0   : > { %3545 = vmatprep.subr.bf16.mxu0 %v3915_v27  ;;  %v3241_v32 = vpop.f32.mrb[20].mxu0 }
 0x1c1   : > { %3530 = vmatpush3.bf16.msra.mxu1 %v3914_v31  ;;  %v3242_v33 = vpop.f32.mrb[21].mxu0 }
 0x1c2   : > { %3531 = vmatprep.subr.bf16.mxu1 %v3916_v49  ;;  %v3243_v34 = vadd.f32 %v3242_v33, %v3241_v32  ;;  %v3244_v53 = vpop.f32.mrb[22].mxu0 }
 0x1c3   : > { %3546 = vmatpush3.bf16.msra.mxu0 %v3917_v36  ;;  %v3245_v47 = vpop.f32.mrb[23].mxu0 }
 0x1c4   : > { %3547 = vmatprep.subr.bf16.mxu0 %v3919_v60  ;;  %v1776_v62 = vadd.f32 %v3243_v34, %v1735_v11  ;;  %v3246_v57 = vadd.f32 %v3245_v47, %v3244_v53 }
 0x1c5   : > { %3532 = vmatpush3.bf16.msra.mxu1 %v3918_v55 }
 0x1c6   : > { %3533 = vmatprep.subr.bf16.mxu1 %v3920_v59  ;;  %v1779_v61 = vadd.f32 %v3246_v57, %v1738_v14 }
 0x1c7   : > { %3548 = vmatpush3.bf16.msra.mxu0 %v3921_v63 }
 0x1c8   : > { %3549 = vmatprep.subr.bf16.mxu0 %v3923_v45 }
 0x1c9   : > { %3534 = vmatpush3.bf16.msra.mxu1 %v3922_v18 }
 0x1ca   : > { %3535 = vmatprep.subr.bf16.mxu1 %v3924_v51 }
 0x1cb   : > { %3550 = vmatpush3.bf16.msra.mxu0 %v3925_v58 }
 0x1cc   : > { %3551 = vmatprep.subr.bf16.mxu0 %v3927_v3 }
 0x1cd   : > { %3536 = vmatpush3.bf16.msra.mxu1 %v3926_v56 }
 0x1ce   : > { %3606 = vmatprep.subr.bf16.mxu1 %v5759_v15 }
 0x1cf   : > { %3552 = vmatpush3.bf16.msra.mxu0 %v3928_v35 }
 0x1d0   : > { %2555 = vmatmul.mubr.bf16.vlgmr.msra.gmra.mrb[48].mxu1 %v3832_v0  ;;  %3553 = vmatprep.subr.bf16.mxu0 %v3930_v37 }
 0x1d1   : > { %3607 = vmatpush3.bf16.msra.mxu1 %v3929_v25  ;;  %3614 = vmatprep.mubr.msk.bf16.mxu1 %vm3980_vm0, %v5759_v15  ;;  %v3263_v38 = vpop.f32.mrb[20].mxu1 }
 0x1d2   : > { %3608 = vmatprep.subr.bf16.mxu1 %v5759_v15  ;;  %v3264_v39 = vpop.f32.mrb[21].mxu1 }
 0x1d3   : > { %3554 = vmatpush3.bf16.msra.mxu0 %v3931_v40  ;;  %v3265_v41 = vadd.f32 %v3264_v39, %v3263_v38  ;;  %v3266_v42 = vpop.f32.mrb[22].mxu1 }
 0x1d4   : > { %3555 = vmatprep.subr.bf16.mxu0 %v3933_v44  ;;  %v3267_v46 = vpop.f32.mrb[23].mxu1 }
 0x1d5   : > { %3609 = vmatpush3.bf16.msra.mxu1 %v3932_v43  ;;  %v1817_v50 = vadd.f32 %v3265_v41, %v1776_v62  ;;  %v3268_v52 = vadd.f32 %v3267_v46, %v3266_v42 }
 0x1d6   : > { %3610 = vmatprep.subr.bf16.mxu1 %v5759_v15 }
 0x1d7   : > { %3556 = vmatpush3.bf16.msra.mxu0 %v3934_v54  ;;  %v1820_v26 = vadd.f32 %v3268_v52, %v1779_v61 }
 0x1d8   : > { %3557 = vmatprep.subr.bf16.mxu0 %v3936_v2 }
 0x1d9   : > { %3611 = vmatpush3.bf16.msra.mxu1 %v3935_v1 }
 0x1da   : > { %3612 = vmatprep.subr.bf16.mxu1 %v5759_v15 }
 0x1db   : > { %3558 = vmatpush3.bf16.msra.mxu0 %v3937_v5 }
 0x1dd   : > { %3613 = vmatpush3.bf16.msra.mxu1 %v3938_v7 }
 0x1de   : > { %2596 = vmatmul.mubr.bf16.vlgmr.msra.gmra.mrb[52].mxu0 %v3835_v4 }
 0x1e0   : > { %3615 = vmatmul.mubr.msk.bf16.vlgmr.msra.gmra.mrb[52].mxu1 %vm1244_vm1, %v3838_v6  ;;  %v3285_v8 = vpop.f32.mrb[24].mxu0 }
 0x1e1   : > { %v3286_v9 = vpop.f32.mrb[25].mxu0  ;;  %v1898_v10 = vpop.f32.mrb[24].mxu1 }
 0x1e2   : > { %v3287_v11 = vadd.f32 %v3286_v9, %v3285_v8  ;;  %v3288_v15 = vpop.f32.mrb[26].mxu0  ;;  %v3592_v12 = vpop.f32.mrb[25].mxu1 }
 0x1e3   : > { %v3289_v13 = vpop.f32.mrb[27].mxu0  ;;  %v1901_v14 = vpop.f32.mrb[26].mxu1 }
 0x1e4   : > { %v3290_v17 = vadd.f32 %v3289_v13, %v3288_v15  ;;  %v1858_v19 = vadd.f32 %v3287_v11, %v1817_v50  ;;  %v3593_v20 = vpop.f32.mrb[27].mxu1 }
 0x1e6   : > { %v5472_v21 = vadd.f32 %v1898_v10, %v1858_v19  ;;  %v1861_v22 = vadd.f32 %v3290_v17, %v1820_v26 }
 0x1e8   : > { %v2645_v23 = vmax.f32 %v5246_v48, %v5472_v21  ;;  %v5476_v28 = vadd.f32 %v1901_v14, %v1861_v22 }
 0x1ea   : > { %v2646_v29 = vmax.f32 %v5249_v24, %v5476_v28 }
 0x200   : > { %v3312_v16 = vpop.f32.mrb[28].mxu0 }
 0x201   : > { %v3334_v30 = vpop.f32.mrb[28].mxu1  ;;  %v3313_v31 = vpop.f32.mrb[29].mxu0 }
 0x202   : > { %v3314_v27 = vadd.f32 %v3313_v31, %v3312_v16  ;;  %v3335_v32 = vpop.f32.mrb[29].mxu1  ;;  %v3315_v49 = vpop.f32.mrb[30].mxu0 }
 0x203   : > { %v3336_v33 = vadd.f32 %v3335_v32, %v3334_v30  ;;  %v3337_v34 = vpop.f32.mrb[30].mxu1  ;;  %v3316_v53 = vpop.f32.mrb[31].mxu0 }
 0x204   : > { %v3317_v36 = vadd.f32 %v3316_v53, %v3315_v49  ;;  %v3338_v55 = vpop.f32.mrb[31].mxu1 }
 0x205   : > { %v2064_v47 = vadd.f32 %v3336_v33, %v3314_v27  ;;  %v3339_v60 = vadd.f32 %v3338_v55, %v3337_v34 }
 0x207   : > { %v2067_v62 = vadd.f32 %v3339_v60, %v3317_v36 }
 0x221   : > { %v3356_v57 = vpop.f32.mrb[32].mxu0 }
 0x222   : > { %v3357_v59 = vpop.f32.mrb[33].mxu0 }
 0x223   : > { %v3378_v61 = vpop.f32.mrb[32].mxu1  ;;  %v3358_v63 = vadd.f32 %v3357_v59, %v3356_v57  ;;  %v3359_v18 = vpop.f32.mrb[34].mxu0 }
 0x224   : > { %v3379_v45 = vpop.f32.mrb[33].mxu1  ;;  %v3360_v51 = vpop.f32.mrb[35].mxu0 }
 0x225   : > { %v3380_v58 = vadd.f32 %v3379_v45, %v3378_v61  ;;  %v3381_v0 = vpop.f32.mrb[34].mxu1  ;;  %v2105_v56 = vadd.f32 %v3358_v63, %v2064_v47  ;;  %v3361_v3 = vadd.f32 %v3360_v51, %v3359_v18 }
 0x226   : > { %v3382_v35 = vpop.f32.mrb[35].mxu1 }
 0x227   : > { %v3383_v25 = vadd.f32 %v3382_v35, %v3381_v0  ;;  %v2108_v37 = vadd.f32 %v3361_v3, %v2067_v62  ;;  %v2146_v38 = vadd.f32 %v3380_v58, %v2105_v56 }
 0x229   : > { %v2149_v39 = vadd.f32 %v3383_v25, %v2108_v37 }
 0x241   : > { %v3400_v40 = vpop.f32.mrb[36].mxu0 }
 0x242   : > { %v3401_v41 = vpop.f32.mrb[37].mxu0 }
 0x243   : > { %v3422_v42 = vpop.f32.mrb[36].mxu1  ;;  %v3402_v43 = vadd.f32 %v3401_v41, %v3400_v40  ;;  %v3403_v44 = vpop.f32.mrb[38].mxu0 }
 0x244   : > { %v3423_v46 = vpop.f32.mrb[37].mxu1  ;;  %v3404_v50 = vpop.f32.mrb[39].mxu0 }
 0x245   : > { %v3424_v52 = vadd.f32 %v3423_v46, %v3422_v42  ;;  %v3425_v54 = vpop.f32.mrb[38].mxu1  ;;  %v2187_v26 = vadd.f32 %v3402_v43, %v2146_v38  ;;  %v3405_v1 = vadd.f32 %v3404_v50, %v3403_v44 }
 0x246   : > { %v3426_v2 = vpop.f32.mrb[39].mxu1 }
 0x247   : > { %v3427_v4 = vadd.f32 %v3426_v2, %v3425_v54  ;;  %v2190_v5 = vadd.f32 %v3405_v1, %v2149_v39  ;;  %v2228_v6 = vadd.f32 %v3424_v52, %v2187_v26 }
 0x249   : > { %v2231_v7 = vadd.f32 %v3427_v4, %v2190_v5 }
 0x251   : > { %v2268_v8 = vpop.f32.mrb[40].mxu0 }
 0x252   : > { %v2269_v9 = vadd.f32 %v2268_v8, %v2228_v6  ;;  %v3604_v10 = vpop.f32.mrb[41].mxu0 }
 0x253   : > { %v2271_v11 = vpop.f32.mrb[42].mxu0  ;;  %v3010_v10 = vld [vmem:[%s5513_s2] ss:$0 sm:$0xff] }
 0x254   : > { %v5480_v15 = vadd.f32 %v2271_v11, %v2231_v7  ;;  %v3605_v12 = vpop.f32.mrb[43].mxu0 }
 0x263   : > { %v3449_v13 = vpop.f32.mrb[40].mxu1 }
 0x264   : > { %v3450_v14 = vpop.f32.mrb[41].mxu1 }
 0x265   : > { %v3451_v17 = vadd.f32 %v3450_v14, %v3449_v13  ;;  %v3452_v19 = vpop.f32.mrb[42].mxu1 }
 0x266   : > { %v3453_v20 = vpop.f32.mrb[43].mxu1 }
 0x267   : > { %v3454_v22 = vadd.f32 %v3453_v20, %v3452_v19 }
 0x271   : > { %v3471_v16 = vpop.f32.mrb[44].mxu0 }
 0x272   : > { %v3472_v30 = vpop.f32.mrb[45].mxu0 }
 0x273   : > { %v3473_v31 = vadd.f32 %v3472_v30, %v3471_v16  ;;  %v3474_v27 = vpop.f32.mrb[46].mxu0 }
 0x274   : > { %v3475_v32 = vpop.f32.mrb[47].mxu0 }
 0x275   : > { %v2434_v49 = vadd.f32 %v3473_v31, %v3451_v17  ;;  %v3476_v33 = vadd.f32 %v3475_v32, %v3474_v27 }
 0x277   : > { %v2437_v34 = vadd.f32 %v3476_v33, %v3454_v22 }
 0x283   : > { %v3493_v53 = vpop.f32.mrb[44].mxu1 }
 0x284   : > { %v3494_v36 = vpop.f32.mrb[45].mxu1 }
 0x285   : > { %v3495_v55 = vadd.f32 %v3494_v36, %v3493_v53  ;;  %v3496_v47 = vpop.f32.mrb[46].mxu1 }
 0x286   : > { %v3497_v60 = vpop.f32.mrb[47].mxu1 }
 0x287   : > { %v2475_v62 = vadd.f32 %v3495_v55, %v2434_v49  ;;  %v3498_v57 = vadd.f32 %v3497_v60, %v3496_v47 }
 0x289   : > { %v2478_v59 = vadd.f32 %v3498_v57, %v2437_v34 }
 0x291   : > { %v3515_v61 = vpop.f32.mrb[48].mxu0 }
 0x292   : > { %v3516_v63 = vpop.f32.mrb[49].mxu0 }
 0x293   : > { %v3517_v18 = vadd.f32 %v3516_v63, %v3515_v61  ;;  %v3518_v45 = vpop.f32.mrb[50].mxu0 }
 0x294   : > { %v3519_v51 = vpop.f32.mrb[51].mxu0 }
 0x295   : > { %v2516_v58 = vadd.f32 %v3517_v18, %v2475_v62  ;;  %v3520_v0 = vadd.f32 %v3519_v51, %v3518_v45 }
 0x297   : > { %v2519_v56 = vadd.f32 %v3520_v0, %v2478_v59 }
 0x2a3   : > { %v3537_v3 = vpop.f32.mrb[48].mxu1 }
 0x2a4   : > { %v3538_v35 = vpop.f32.mrb[49].mxu1 }
 0x2a5   : > { %v3539_v25 = vadd.f32 %v3538_v35, %v3537_v3  ;;  %v3540_v37 = vpop.f32.mrb[50].mxu1 }
 0x2a6   : > { %v3541_v38 = vpop.f32.mrb[51].mxu1 }
 0x2a7   : > { %v2557_v39 = vadd.f32 %v3539_v25, %v2516_v58  ;;  %v3542_v40 = vadd.f32 %v3541_v38, %v3540_v37 }
 0x2a9   : > { %v2560_v41 = vadd.f32 %v3542_v40, %v2519_v56 }
 0x2b1   : > { %v3559_v42 = vpop.f32.mrb[52].mxu0 }
 0x2b2   : > { %v3560_v43 = vpop.f32.mrb[53].mxu0 }
 0x2b3   : > { %v2638_v44 = vpop.f32.mrb[52].mxu1  ;;  %v3561_v46 = vadd.f32 %v3560_v43, %v3559_v42  ;;  %v3562_v50 = vpop.f32.mrb[54].mxu0 }
 0x2b4   : > { %v3616_v52 = vpop.f32.mrb[53].mxu1  ;;  %v3563_v54 = vpop.f32.mrb[55].mxu0 }
 0x2b5   : > { %v2641_v26 = vpop.f32.mrb[54].mxu1  ;;  %v2598_v1 = vadd.f32 %v3561_v46, %v2557_v39  ;;  %v3564_v2 = vadd.f32 %v3563_v54, %v3562_v50 }
 0x2b6   : > { %v3617_v4 = vpop.f32.mrb[55].mxu1 }
 0x2b7   : > { %v2639_v5 = vadd.f32 %v2638_v44, %v2598_v1  ;;  %v2601_v6 = vadd.f32 %v3564_v2, %v2560_v41 }
 0x2b9   : > { %v2647_v7 = vmax.f32 %v2269_v9, %v2639_v5  ;;  %v2642_v8 = vadd.f32 %v2641_v26, %v2601_v6 }
 0x2bb   : > { %v2649_v11 = vmax.f32 %v2645_v23, %v2647_v7  ;;  %v2648_v12 = vmax.f32 %v5480_v15, %v2642_v8 }
 0x2bd   : > { %v2658_v13 = vadd.f32 %v3010_v10, %v2649_v11  ;;  %v2650_v14 = vmax.f32 %v2646_v29, %v2648_v12 }
 0x2bf   : > { %v2659_v17 = vadd.f32 %v3010_v10, %v2650_v14  ;;  %v2660_v9 = vmax.f32 %v2658_v13, 0.0 }
 0x2c1   : > { %v2661_v19 = vmax.f32 %v2659_v17, 0.0 }
 0x2c3   : > { %v3020_v20 = vpack.c.bf16 %v2661_v19, %v2660_v9 }
 0x2c5   : > { %3021 = vst [vmem:[%s362_s7] sm:$0xff] %v3020_v20  }
 0x2c6 PF: > { %s13_s16 = sadd.s32 1, %s3977_s16   ;;  %s5799_s12 = smov %s3965_s13 }
 0x2c7   : > { %p10_p10 = scmp.ge.s32.totalorder %s13_s16, 4   ;;  %s5800_s13 = smov %s4036_s20 }
 0x2c8   : > { %s5801_s14 = smov %s3973_s15  ;;  %s5802_s15 = smov %s5804_s17 }
 0x2c9   :  { %12 = sbr.rel (!%p10_p10) target bundleno = 3 (0x3), region = 108 }

// kernel: convnet_forward.7
= control target key start
LH: loop header
LB: loop body
LE: loop exit
PB: predicated region body
PF: predicated region fallthrough
CT: control target
= control target key end

     0   :  { %s10971_s0 = inlined_call_operand.vmem [shape: bf16[4,8,3200], index: 0, kind: input, shape index: {}]   ;;  %s10972_s1 = inlined_call_operand.vmem [shape: bf16[3200,256], index: 1, kind: input, shape index: {}]   ;;  %s10973_s2 = inlined_call_operand.vmem [shape: f32[1,256], index: 2, kind: input, shape index: {}]   ;;  %s10974_s3 = inlined_call_operand.vmem [shape: f32[4,256,10], index: 3, kind: input, shape index: {}]   ;;  %s10975_s4 = inlined_call_operand.vmem [shape: f32[1,10], index: 4, kind: input, shape index: {}]   ;;  %s10976_s5 = inlined_call_operand.hbm [shape: f32[2,10], index: 5, kind: output, shape index: {}]  }
   0x1   :  { %v6547_v0 = vld [vmem:[%s10972_s1 + $0x4] ss:$8 sps:$4 sm:$0xff]   ;;  %v6549_v1 = vld [vmem:[%s10972_s1] ss:$8 sps:$4 sm:$0xff]   ;;  %v6550_v2 = vld [vmem:[%s10972_s1 + $0x14] ss:$8 sps:$4 sm:$0xff]  }
   0x2   :  { %2523 = vmatprep.subr.bf16.mxu0 %v6547_v0  ;;  %3158 = vmatprep.subr.bf16.mxu1 %v6547_v0  ;;  %v6552_v3 = vld [vmem:[%s10972_s1 + $0x10] ss:$8 sps:$4 sm:$0xff]   ;;  %v6553_v4 = vld [vmem:[%s10972_s1 + $0x24] ss:$8 sps:$4 sm:$0xff]   ;;  %v6555_v5 = vld [vmem:[%s10972_s1 + $0x20] ss:$8 sps:$4 sm:$0xff]  }
   0x3   :  { %2524 = vmatpush1.bf16.msra.mxu0 %v6549_v1  ;;  %3159 = vmatpush1.bf16.msra.mxu1 %v6549_v1  ;;  %v6556_v6 = vld [vmem:[%s10972_s1 + $0x34] ss:$8 sps:$4 sm:$0xff]   ;;  %v6558_v7 = vld [vmem:[%s10972_s1 + $0x30] ss:$8 sps:$4 sm:$0xff]   ;;  %v6559_v8 = vld [vmem:[%s10972_s1 + $0x44] ss:$8 sps:$4 sm:$0xff]  }
   0x4   :  { %2525 = vmatprep.subr.bf16.mxu0 %v6550_v2  ;;  %3160 = vmatprep.subr.bf16.mxu1 %v6550_v2  ;;  %v6561_v9 = vld [vmem:[%s10972_s1 + $0x40] ss:$8 sps:$4 sm:$0xff]   ;;  %v6562_v10 = vld [vmem:[%s10972_s1 + $0x54] ss:$8 sps:$4 sm:$0xff]   ;;  %v6564_v11 = vld [vmem:[%s10972_s1 + $0x50] ss:$8 sps:$4 sm:$0xff]  }
   0x5   :  { %v6565_v12 = vld [vmem:[%s10972_s1 + $0x64] ss:$8 sps:$4 sm:$0xff]   ;;  %v6567_v16 = vld [vmem:[%s10972_s1 + $0x60] ss:$8 sps:$4 sm:$0xff]   ;;  %v6568_v18 = vld [vmem:[%s10972_s1 + $0x74] ss:$8 sps:$4 sm:$0xff]  }
   0x6   :  { %v7745_v13 = vld [vmem:[%s10971_s0] sm:$0xff]  ;;  %v6570_v19 = vld [vmem:[%s10972_s1 + $0x70] ss:$8 sps:$4 sm:$0xff]   ;;  %v6574_v22 = vld [vmem:[%s10972_s1 + $0x94] ss:$8 sps:$4 sm:$0xff]  }
   0x7   :  { %2526 = vmatpush1.bf16.msra.mxu0 %v6552_v3  ;;  %3161 = vmatpush1.bf16.msra.mxu1 %v6552_v3  ;;  %v5450_v14 = vcombine.high %v7745_v13, %v7745_v13  ;;  %v7752_v15 = vld [vmem:[%s10971_s0 + $0x64] sm:$0xff]  ;;  %v6576_v23 = vld [vmem:[%s10972_s1 + $0x90] ss:$8 sps:$4 sm:$0xff]   ;;  %v6580_v26 = vld [vmem:[%s10972_s1 + $0xb4] ss:$8 sps:$4 sm:$0xff]   ;;  %v5449_v37 = vcombine.low %v7745_v13, %v7745_v13 }
   0x8   :  { %2527 = vmatprep.subr.bf16.mxu0 %v6553_v4  ;;  %3162 = vmatprep.subr.bf16.mxu1 %v6553_v4  ;;  %v5888_v17 = vcombine.high %v7752_v15, %v7752_v15  ;;  %v6571_v20 = vld [vmem:[%s10972_s1 + $0x84] ss:$8 sps:$4 sm:$0xff]   ;;  %v6573_v21 = vld [vmem:[%s10972_s1 + $0x80] ss:$8 sps:$4 sm:$0xff]   ;;  %v6582_v27 = vld [vmem:[%s10972_s1 + $0xb0] ss:$8 sps:$4 sm:$0xff]   ;;  %v5887_v38 = vcombine.low %v7752_v15, %v7752_v15 }
   0x9   :  { %2555 = vmatprep.mubr.bf16.mxu0 %v5450_v14  ;;  %v6577_v24 = vld [vmem:[%s10972_s1 + $0xa4] ss:$8 sps:$4 sm:$0xff]   ;;  %v6579_v25 = vld [vmem:[%s10972_s1 + $0xa0] ss:$8 sps:$4 sm:$0xff]   ;;  %v6586_v30 = vld [vmem:[%s10972_s1 + $0xd4] ss:$8 sps:$4 sm:$0xff]  }
   0xa   :  { %3190 = vmatprep.mubr.bf16.mxu1 %v5888_v17  ;;  %v6583_v28 = vld [vmem:[%s10972_s1 + $0xc4] ss:$8 sps:$4 sm:$0xff]   ;;  %v6585_v29 = vld [vmem:[%s10972_s1 + $0xc0] ss:$8 sps:$4 sm:$0xff]   ;;  %v6588_v31 = vld [vmem:[%s10972_s1 + $0xd0] ss:$8 sps:$4 sm:$0xff]  }
   0xb   :  { %2528 = vmatpush1.bf16.msra.mxu0 %v6555_v5  ;;  %3163 = vmatpush1.bf16.msra.mxu1 %v6555_v5  ;;  %v6589_v32 = vld [vmem:[%s10972_s1 + $0xe4] ss:$8 sps:$4 sm:$0xff]   ;;  %v6591_v33 = vld [vmem:[%s10972_s1 + $0xe0] ss:$8 sps:$4 sm:$0xff]   ;;  %v6592_v34 = vld [vmem:[%s10972_s1 + $0xf4] ss:$8 sps:$4 sm:$0xff]  }
   0xc   :  { %2529 = vmatprep.subr.bf16.mxu0 %v6556_v6  ;;  %3164 = vmatprep.subr.bf16.mxu1 %v6556_v6  ;;  %v6594_v35 = vld [vmem:[%s10972_s1 + $0xf0] ss:$8 sps:$4 sm:$0xff]   ;;  %v6597_v36 = vld [vmem:[%s10972_s1 + $0x104] ss:$8 sps:$4 sm:$0xff]   ;;  %v6601_v41 = vld [vmem:[%s10972_s1 + $0x100] ss:$8 sps:$4 sm:$0xff]  }
   0xd   :  { %v7823_v39 = vld [vmem:[%s10971_s0 + $0x8] sm:$0xff]  ;;  %v6602_v42 = vld [vmem:[%s10972_s1 + $0x114] ss:$8 sps:$4 sm:$0xff]   ;;  %v6604_v45 = vld [vmem:[%s10972_s1 + $0x110] ss:$8 sps:$4 sm:$0xff]  }
   0xe   :  { %v7828_v40 = vld [vmem:[%s10971_s0 + $0x6c] sm:$0xff]  ;;  %v5452_v43 = vcombine.high %v7823_v39, %v7823_v39  ;;  %v6607_v47 = vld [vmem:[%s10972_s1 + $0x120] ss:$8 sps:$4 sm:$0xff]   ;;  %v6608_v48 = vld [vmem:[%s10972_s1 + $0x134] ss:$8 sps:$4 sm:$0xff]   ;;  %v5451_v13 = vcombine.low %v7823_v39, %v7823_v39 }
   0xf   :  { %2530 = vmatpush1.bf16.msra.mxu0 %v6558_v7  ;;  %3165 = vmatpush1.bf16.msra.mxu1 %v6558_v7  ;;  %v5890_v44 = vcombine.high %v7828_v40, %v7828_v40  ;;  %v6605_v46 = vld [vmem:[%s10972_s1 + $0x124] ss:$8 sps:$4 sm:$0xff]   ;;  %v6610_v49 = vld [vmem:[%s10972_s1 + $0x130] ss:$8 sps:$4 sm:$0xff]   ;;  %v6613_v51 = vld [vmem:[%s10972_s1 + $0x140] ss:$8 sps:$4 sm:$0xff]   ;;  %v5889_v14 = vcombine.low %v7828_v40, %v7828_v40 }
  0x10   :  { %2531 = vmatprep.subr.bf16.mxu0 %v6559_v8  ;;  %3166 = vmatprep.subr.bf16.mxu1 %v6559_v8  ;;  %v6611_v50 = vld [vmem:[%s10972_s1 + $0x144] ss:$8 sps:$4 sm:$0xff]   ;;  %v6614_v52 = vld [vmem:[%s10972_s1 + $0x154] ss:$8 sps:$4 sm:$0xff]   ;;  %v6616_v53 = vld [vmem:[%s10972_s1 + $0x150] ss:$8 sps:$4 sm:$0xff]  }
  0x11   :  { %v6617_v54 = vld [vmem:[%s10972_s1 + $0x164] ss:$8 sps:$4 sm:$0xff]   ;;  %v6619_v55 = vld [vmem:[%s10972_s1 + $0x160] ss:$8 sps:$4 sm:$0xff]   ;;  %v6620_v56 = vld [vmem:[%s10972_s1 + $0x174] ss:$8 sps:$4 sm:$0xff]  }
  0x12   :  { %v6622_v57 = vld [vmem:[%s10972_s1 + $0x170] ss:$8 sps:$4 sm:$0xff]   ;;  %v6623_v58 = vld [vmem:[%s10972_s1 + $0x184] ss:$8 sps:$4 sm:$0xff]   ;;  %v6625_v59 = vld [vmem:[%s10972_s1 + $0x180] ss:$8 sps:$4 sm:$0xff]  }
  0x13   :  { %2532 = vmatpush1.bf16.msra.mxu0 %v6561_v9  ;;  %3167 = vmatpush1.bf16.msra.mxu1 %v6561_v9  ;;  %v6626_v60 = vld [vmem:[%s10972_s1 + $0x194] ss:$8 sps:$4 sm:$0xff]   ;;  %v6628_v61 = vld [vmem:[%s10972_s1 + $0x190] ss:$8 sps:$4 sm:$0xff]   ;;  %v6629_v62 = vld [vmem:[%s10972_s1 + $0x1a4] ss:$8 sps:$4 sm:$0xff]  }
  0x14   :  { %2533 = vmatprep.subr.bf16.mxu0 %v6562_v10  ;;  %3168 = vmatprep.subr.bf16.mxu1 %v6562_v10  ;;  %v6631_v63 = vld [vmem:[%s10972_s1 + $0x1a0] ss:$8 sps:$4 sm:$0xff]   ;;  %v6632_v0 = vld [vmem:[%s10972_s1 + $0x1b4] ss:$8 sps:$4 sm:$0xff]   ;;  %v6634_v1 = vld [vmem:[%s10972_s1 + $0x1b0] ss:$8 sps:$4 sm:$0xff]  }
  0x15   :  { %v6635_v2 = vld [vmem:[%s10972_s1 + $0x1c4] ss:$8 sps:$4 sm:$0xff]   ;;  %v6637_v3 = vld [vmem:[%s10972_s1 + $0x1c0] ss:$8 sps:$4 sm:$0xff]   ;;  %v6638_v4 = vld [vmem:[%s10972_s1 + $0x1d4] ss:$8 sps:$4 sm:$0xff]  }
  0x16   :  { %v6640_v5 = vld [vmem:[%s10972_s1 + $0x1d0] ss:$8 sps:$4 sm:$0xff]   ;;  %v6641_v6 = vld [vmem:[%s10972_s1 + $0x1e4] ss:$8 sps:$4 sm:$0xff]   ;;  %v6643_v7 = vld [vmem:[%s10972_s1 + $0x1e0] ss:$8 sps:$4 sm:$0xff]  }
  0x17   :  { %2534 = vmatpush1.bf16.msra.mxu0 %v6564_v11  ;;  %3169 = vmatpush1.bf16.msra.mxu1 %v6564_v11  ;;  %v6644_v8 = vld [vmem:[%s10972_s1 + $0x1f4] ss:$8 sps:$4 sm:$0xff]   ;;  %v6646_v9 = vld [vmem:[%s10972_s1 + $0x1f0] ss:$8 sps:$4 sm:$0xff]   ;;  %v6649_v10 = vld [vmem:[%s10972_s1 + $0x204] ss:$8 sps:$4 sm:$0xff]  }
  0x18   :  { %2535 = vmatprep.subr.bf16.mxu0 %v6565_v12  ;;  %3170 = vmatprep.subr.bf16.mxu1 %v6565_v12  ;;  %v7933_v11 = vld [vmem:[%s10971_s0 + $0x10] sm:$0xff]  ;;  %v6653_v15 = vld [vmem:[%s10972_s1 + $0x200] ss:$8 sps:$4 sm:$0xff]   ;;  %v6687_v40 = vld [vmem:[%s10972_s1 + $0x2c4] ss:$8 sps:$4 sm:$0xff]  }
  0x19   :  { %v7938_v12 = vld [vmem:[%s10971_s0 + $0x74] sm:$0xff]  ;;  %v5454_v17 = vcombine.high %v7933_v11, %v7933_v11 }
  0x1a   :  { %v6686_v39 = vld [vmem:[%s10972_s1 + $0x2b0] ss:$8 sps:$4 sm:$0xff]  }
  0x1b   :  { %2536 = vmatpush1.bf16.msra.mxu0 %v6567_v16  ;;  %3171 = vmatpush1.bf16.msra.mxu1 %v6567_v16  ;;  %v6654_v16 = vld [vmem:[%s10972_s1 + $0x214] ss:$8 sps:$4 sm:$0xff]  }
  0x1c   :  { %2537 = vmatprep.subr.bf16.mxu0 %v6568_v18  ;;  %3172 = vmatprep.subr.bf16.mxu1 %v6568_v18  ;;  %v5892_v18 = vcombine.high %v7938_v12, %v7938_v12 }
  0x1f   :  { %2538 = vmatpush1.bf16.msra.mxu0 %v6570_v19  ;;  %3173 = vmatpush1.bf16.msra.mxu1 %v6570_v19  ;;  %v6656_v19 = vld [vmem:[%s10972_s1 + $0x210] ss:$8 sps:$4 sm:$0xff]  }
  0x20   :  { %2539 = vmatprep.subr.bf16.mxu0 %v6571_v20  ;;  %3174 = vmatprep.subr.bf16.mxu1 %v6571_v20  ;;  %v6657_v20 = vld [vmem:[%s10972_s1 + $0x224] ss:$8 sps:$4 sm:$0xff]  }
  0x23   :  { %2540 = vmatpush1.bf16.msra.mxu0 %v6573_v21  ;;  %3175 = vmatpush1.bf16.msra.mxu1 %v6573_v21  ;;  %v6659_v21 = vld [vmem:[%s10972_s1 + $0x220] ss:$8 sps:$4 sm:$0xff]  }
  0x24   :  { %2541 = vmatprep.subr.bf16.mxu0 %v6574_v22  ;;  %3176 = vmatprep.subr.bf16.mxu1 %v6574_v22  ;;  %v6660_v22 = vld [vmem:[%s10972_s1 + $0x234] ss:$8 sps:$4 sm:$0xff]  }
  0x27   :  { %2542 = vmatpush1.bf16.msra.mxu0 %v6576_v23  ;;  %3177 = vmatpush1.bf16.msra.mxu1 %v6576_v23  ;;  %v6662_v23 = vld [vmem:[%s10972_s1 + $0x230] ss:$8 sps:$4 sm:$0xff]  }
  0x28   :  { %2543 = vmatprep.subr.bf16.mxu0 %v6577_v24  ;;  %3178 = vmatprep.subr.bf16.mxu1 %v6577_v24  ;;  %v6663_v24 = vld [vmem:[%s10972_s1 + $0x244] ss:$8 sps:$4 sm:$0xff]  }
  0x2b   :  { %2544 = vmatpush1.bf16.msra.mxu0 %v6579_v25  ;;  %3179 = vmatpush1.bf16.msra.mxu1 %v6579_v25  ;;  %v6665_v25 = vld [vmem:[%s10972_s1 + $0x240] ss:$8 sps:$4 sm:$0xff]  }
  0x2c   :  { %2545 = vmatprep.subr.bf16.mxu0 %v6580_v26  ;;  %3180 = vmatprep.subr.bf16.mxu1 %v6580_v26  ;;  %v6666_v26 = vld [vmem:[%s10972_s1 + $0x254] ss:$8 sps:$4 sm:$0xff]  }
  0x2f   :  { %2546 = vmatpush1.bf16.msra.mxu0 %v6582_v27  ;;  %3181 = vmatpush1.bf16.msra.mxu1 %v6582_v27  ;;  %v6668_v27 = vld [vmem:[%s10972_s1 + $0x250] ss:$8 sps:$4 sm:$0xff]  }
  0x30   :  { %2547 = vmatprep.subr.bf16.mxu0 %v6583_v28  ;;  %3182 = vmatprep.subr.bf16.mxu1 %v6583_v28  ;;  %v6669_v28 = vld [vmem:[%s10972_s1 + $0x264] ss:$8 sps:$4 sm:$0xff]  }
  0x33   :  { %2548 = vmatpush1.bf16.msra.mxu0 %v6585_v29  ;;  %3183 = vmatpush1.bf16.msra.mxu1 %v6585_v29  ;;  %v6671_v29 = vld [vmem:[%s10972_s1 + $0x260] ss:$8 sps:$4 sm:$0xff]  }
  0x34   :  { %2549 = vmatprep.subr.bf16.mxu0 %v6586_v30  ;;  %3184 = vmatprep.subr.bf16.mxu1 %v6586_v30  ;;  %v6672_v30 = vld [vmem:[%s10972_s1 + $0x274] ss:$8 sps:$4 sm:$0xff]  }
  0x37   :  { %2550 = vmatpush1.bf16.msra.mxu0 %v6588_v31  ;;  %3185 = vmatpush1.bf16.msra.mxu1 %v6588_v31  ;;  %v6674_v31 = vld [vmem:[%s10972_s1 + $0x270] ss:$8 sps:$4 sm:$0xff]  }
  0x38   :  { %2551 = vmatprep.subr.bf16.mxu0 %v6589_v32  ;;  %3186 = vmatprep.subr.bf16.mxu1 %v6589_v32  ;;  %v6675_v32 = vld [vmem:[%s10972_s1 + $0x284] ss:$8 sps:$4 sm:$0xff]  }
  0x3b   :  { %2552 = vmatpush1.bf16.msra.mxu0 %v6591_v33  ;;  %3187 = vmatpush1.bf16.msra.mxu1 %v6591_v33  ;;  %v6677_v33 = vld [vmem:[%s10972_s1 + $0x280] ss:$8 sps:$4 sm:$0xff]  }
  0x3c   :  { %2553 = vmatprep.subr.bf16.mxu0 %v6592_v34  ;;  %3188 = vmatprep.subr.bf16.mxu1 %v6592_v34  ;;  %v6678_v34 = vld [vmem:[%s10972_s1 + $0x294] ss:$8 sps:$4 sm:$0xff]  }
  0x3f   :  { %2554 = vmatpush1.bf16.msra.mxu0 %v6594_v35  ;;  %3189 = vmatpush1.bf16.msra.mxu1 %v6594_v35  ;;  %v6680_v35 = vld [vmem:[%s10972_s1 + $0x290] ss:$8 sps:$4 sm:$0xff]  }
  0x40   :  { %2564 = vmatprep.subr.bf16.mxu0 %v6597_v36  ;;  %3199 = vmatprep.subr.bf16.mxu1 %v6597_v36  ;;  %v6681_v36 = vld [vmem:[%s10972_s1 + $0x2a4] ss:$8 sps:$4 sm:$0xff]  }
  0x42   :  { %2556 = vmatmul.mubr.bf16.vlgmr.msra.gmra.mrb[0].mxu0 %v5449_v37  ;;  %3191 = vmatmul.mubr.bf16.vlgmr.msra.gmra.mrb[0].mxu1 %v5887_v38  ;;  %v6683_v37 = vld [vmem:[%s10972_s1 + $0x2a0] ss:$8 sps:$4 sm:$0xff]   ;;  %v6684_v38 = vld [vmem:[%s10972_s1 + $0x2b4] ss:$8 sps:$4 sm:$0xff]  }
  0x43   :  { %2565 = vmatpush1.bf16.msra.mxu0 %v6601_v41  ;;  %3200 = vmatpush1.bf16.msra.mxu1 %v6601_v41  ;;  %v6689_v41 = vld [vmem:[%s10972_s1 + $0x2c0] ss:$8 sps:$4 sm:$0xff]  }
  0x44   :  { %2566 = vmatprep.subr.bf16.mxu0 %v6602_v42  ;;  %3201 = vmatprep.subr.bf16.mxu1 %v6602_v42  ;;  %v6690_v42 = vld [vmem:[%s10972_s1 + $0x2d4] ss:$8 sps:$4 sm:$0xff]  }
  0x45   :  { %2596 = vmatprep.mubr.bf16.mxu0 %v5452_v43  ;;  %3231 = vmatprep.mubr.bf16.mxu1 %v5890_v44  ;;  %v6692_v43 = vld [vmem:[%s10972_s1 + $0x2d0] ss:$8 sps:$4 sm:$0xff]   ;;  %v6693_v44 = vld [vmem:[%s10972_s1 + $0x2e4] ss:$8 sps:$4 sm:$0xff]  }
  0x47   :  { %2567 = vmatpush1.bf16.msra.mxu0 %v6604_v45  ;;  %3202 = vmatpush1.bf16.msra.mxu1 %v6604_v45  ;;  %v6695_v45 = vld [vmem:[%s10972_s1 + $0x2e0] ss:$8 sps:$4 sm:$0xff]  }
  0x48   :  { %2568 = vmatprep.subr.bf16.mxu0 %v6605_v46  ;;  %3203 = vmatprep.subr.bf16.mxu1 %v6605_v46  ;;  %v6696_v46 = vld [vmem:[%s10972_s1 + $0x2f4] ss:$8 sps:$4 sm:$0xff]  }
  0x4b   :  { %2569 = vmatpush1.bf16.msra.mxu0 %v6607_v47  ;;  %3204 = vmatpush1.bf16.msra.mxu1 %v6607_v47  ;;  %v6698_v47 = vld [vmem:[%s10972_s1 + $0x2f0] ss:$8 sps:$4 sm:$0xff]  }
  0x4c   :  { %2570 = vmatprep.subr.bf16.mxu0 %v6608_v48  ;;  %3205 = vmatprep.subr.bf16.mxu1 %v6608_v48  ;;  %v6701_v48 = vld [vmem:[%s10972_s1 + $0x304] ss:$8 sps:$4 sm:$0xff]  }
  0x4f   :  { %2571 = vmatpush1.bf16.msra.mxu0 %v6610_v49  ;;  %3206 = vmatpush1.bf16.msra.mxu1 %v6610_v49  ;;  %v8047_v49 = vld [vmem:[%s10971_s0 + $0x18] sm:$0xff] }
  0x50   :  { %2572 = vmatprep.subr.bf16.mxu0 %v6611_v50  ;;  %3207 = vmatprep.subr.bf16.mxu1 %v6611_v50  ;;  %v8052_v50 = vld [vmem:[%s10971_s0 + $0x7c] sm:$0xff] }
  0x53   :  { %2573 = vmatpush1.bf16.msra.mxu0 %v6613_v51  ;;  %3208 = vmatpush1.bf16.msra.mxu1 %v6613_v51  ;;  %v5453_v51 = vcombine.low %v7933_v11, %v7933_v11 }
  0x54   :  { %2574 = vmatprep.subr.bf16.mxu0 %v6614_v52  ;;  %3209 = vmatprep.subr.bf16.mxu1 %v6614_v52  ;;  %v5891_v52 = vcombine.low %v7938_v12, %v7938_v12 }
  0x57   :  { %2575 = vmatpush1.bf16.msra.mxu0 %v6616_v53  ;;  %3210 = vmatpush1.bf16.msra.mxu1 %v6616_v53 }
  0x58   :  { %2576 = vmatprep.subr.bf16.mxu0 %v6617_v54  ;;  %3211 = vmatprep.subr.bf16.mxu1 %v6617_v54 }
  0x5b   :  { %2577 = vmatpush1.bf16.msra.mxu0 %v6619_v55  ;;  %3212 = vmatpush1.bf16.msra.mxu1 %v6619_v55 }
  0x5c   :  { %2578 = vmatprep.subr.bf16.mxu0 %v6620_v56  ;;  %3213 = vmatprep.subr.bf16.mxu1 %v6620_v56 }
  0x5f   :  { %2579 = vmatpush1.bf16.msra.mxu0 %v6622_v57  ;;  %3214 = vmatpush1.bf16.msra.mxu1 %v6622_v57 }
  0x60   :  { %2580 = vmatprep.subr.bf16.mxu0 %v6623_v58  ;;  %3215 = vmatprep.subr.bf16.mxu1 %v6623_v58 }
  0x63   :  { %2581 = vmatpush1.bf16.msra.mxu0 %v6625_v59  ;;  %3216 = vmatpush1.bf16.msra.mxu1 %v6625_v59 }
  0x64   :  { %2582 = vmatprep.subr.bf16.mxu0 %v6626_v60  ;;  %3217 = vmatprep.subr.bf16.mxu1 %v6626_v60 }
  0x67   :  { %2583 = vmatpush1.bf16.msra.mxu0 %v6628_v61  ;;  %3218 = vmatpush1.bf16.msra.mxu1 %v6628_v61 }
  0x68   :  { %2584 = vmatprep.subr.bf16.mxu0 %v6629_v62  ;;  %3219 = vmatprep.subr.bf16.mxu1 %v6629_v62 }
  0x6b   :  { %2585 = vmatpush1.bf16.msra.mxu0 %v6631_v63  ;;  %3220 = vmatpush1.bf16.msra.mxu1 %v6631_v63 }
  0x6c   :  { %2586 = vmatprep.subr.bf16.mxu0 %v6632_v0  ;;  %3221 = vmatprep.subr.bf16.mxu1 %v6632_v0 }
  0x6f   :  { %2587 = vmatpush1.bf16.msra.mxu0 %v6634_v1  ;;  %3222 = vmatpush1.bf16.msra.mxu1 %v6634_v1 }
  0x70   :  { %2588 = vmatprep.subr.bf16.mxu0 %v6635_v2  ;;  %3223 = vmatprep.subr.bf16.mxu1 %v6635_v2 }
  0x73   :  { %2589 = vmatpush1.bf16.msra.mxu0 %v6637_v3  ;;  %3224 = vmatpush1.bf16.msra.mxu1 %v6637_v3 }
  0x74   :  { %2590 = vmatprep.subr.bf16.mxu0 %v6638_v4  ;;  %3225 = vmatprep.subr.bf16.mxu1 %v6638_v4 }
  0x77   :  { %2591 = vmatpush1.bf16.msra.mxu0 %v6640_v5  ;;  %3226 = vmatpush1.bf16.msra.mxu1 %v6640_v5 }
  0x78   :  { %2592 = vmatprep.subr.bf16.mxu0 %v6641_v6  ;;  %3227 = vmatprep.subr.bf16.mxu1 %v6641_v6 }
  0x7b   :  { %2593 = vmatpush1.bf16.msra.mxu0 %v6643_v7  ;;  %3228 = vmatpush1.bf16.msra.mxu1 %v6643_v7 }
  0x7c   :  { %2594 = vmatprep.subr.bf16.mxu0 %v6644_v8  ;;  %3229 = vmatprep.subr.bf16.mxu1 %v6644_v8 }
  0x7f   :  { %2595 = vmatpush1.bf16.msra.mxu0 %v6646_v9  ;;  %3230 = vmatpush1.bf16.msra.mxu1 %v6646_v9 }
  0x80   :  { %2605 = vmatprep.subr.bf16.mxu0 %v6649_v10  ;;  %3240 = vmatprep.subr.bf16.mxu1 %v6649_v10 }
  0x82   :  { %2597 = vmatmul.mubr.bf16.vlgmr.msra.gmra.mrb[0].mxu0 %v5451_v13  ;;  %3232 = vmatmul.mubr.bf16.vlgmr.msra.gmra.mrb[0].mxu1 %v5889_v14 }
  0x83   :  { %2606 = vmatpush1.bf16.msra.mxu0 %v6653_v15  ;;  %3241 = vmatpush1.bf16.msra.mxu1 %v6653_v15 }
  0x84   :  { %2607 = vmatprep.subr.bf16.mxu0 %v6654_v16  ;;  %3242 = vmatprep.subr.bf16.mxu1 %v6654_v16 }
  0x85   :  { %2637 = vmatprep.mubr.bf16.mxu0 %v5454_v17  ;;  %3272 = vmatprep.mubr.bf16.mxu1 %v5892_v18 }
  0x87   :  { %2608 = vmatpush1.bf16.msra.mxu0 %v6656_v19  ;;  %3243 = vmatpush1.bf16.msra.mxu1 %v6656_v19 }
  0x88   :  { %2609 = vmatprep.subr.bf16.mxu0 %v6657_v20  ;;  %3244 = vmatprep.subr.bf16.mxu1 %v6657_v20 }
  0x8b   :  { %2610 = vmatpush1.bf16.msra.mxu0 %v6659_v21  ;;  %3245 = vmatpush1.bf16.msra.mxu1 %v6659_v21 }
  0x8c   :  { %2611 = vmatprep.subr.bf16.mxu0 %v6660_v22  ;;  %3246 = vmatprep.subr.bf16.mxu1 %v6660_v22 }
  0x8f   :  { %2612 = vmatpush1.bf16.msra.mxu0 %v6662_v23  ;;  %3247 = vmatpush1.bf16.msra.mxu1 %v6662_v23 }
  0x90   :  { %2613 = vmatprep.subr.bf16.mxu0 %v6663_v24  ;;  %3248 = vmatprep.subr.bf16.mxu1 %v6663_v24 }
  0x93   :  { %2614 = vmatpush1.bf16.msra.mxu0 %v6665_v25  ;;  %3249 = vmatpush1.bf16.msra.mxu1 %v6665_v25 }
  0x94   :  { %2615 = vmatprep.subr.bf16.mxu0 %v6666_v26  ;;  %3250 = vmatprep.subr.bf16.mxu1 %v6666_v26 }
  0x97   :  { %2616 = vmatpush1.bf16.msra.mxu0 %v6668_v27  ;;  %3251 = vmatpush1.bf16.msra.mxu1 %v6668_v27 }
  0x98   :  { %2617 = vmatprep.subr.bf16.mxu0 %v6669_v28  ;;  %3252 = vmatprep.subr.bf16.mxu1 %v6669_v28 }
  0x9b   :  { %2618 = vmatpush1.bf16.msra.mxu0 %v6671_v29  ;;  %3253 = vmatpush1.bf16.msra.mxu1 %v6671_v29 }
  0x9c   :  { %2619 = vmatprep.subr.bf16.mxu0 %v6672_v30  ;;  %3254 = vmatprep.subr.bf16.mxu1 %v6672_v30 }
  0x9f   :  { %2620 = vmatpush1.bf16.msra.mxu0 %v6674_v31  ;;  %3255 = vmatpush1.bf16.msra.mxu1 %v6674_v31 }
  0xa0   :  { %2621 = vmatprep.subr.bf16.mxu0 %v6675_v32  ;;  %3256 = vmatprep.subr.bf16.mxu1 %v6675_v32 }
  0xa3   :  { %2622 = vmatpush1.bf16.msra.mxu0 %v6677_v33  ;;  %3257 = vmatpush1.bf16.msra.mxu1 %v6677_v33 }
  0xa4   :  { %2623 = vmatprep.subr.bf16.mxu0 %v6678_v34  ;;  %3258 = vmatprep.subr.bf16.mxu1 %v6678_v34 }
  0xa7   :  { %2624 = vmatpush1.bf16.msra.mxu0 %v6680_v35  ;;  %3259 = vmatpush1.bf16.msra.mxu1 %v6680_v35 }
  0xa8   :  { %2625 = vmatprep.subr.bf16.mxu0 %v6681_v36  ;;  %3260 = vmatprep.subr.bf16.mxu1 %v6681_v36 }
  0xab   :  { %2626 = vmatpush1.bf16.msra.mxu0 %v6683_v37  ;;  %3261 = vmatpush1.bf16.msra.mxu1 %v6683_v37 }
  0xac   :  { %2627 = vmatprep.subr.bf16.mxu0 %v6684_v38  ;;  %3262 = vmatprep.subr.bf16.mxu1 %v6684_v38 }
  0xaf   :  { %2628 = vmatpush1.bf16.msra.mxu0 %v6686_v39  ;;  %3263 = vmatpush1.bf16.msra.mxu1 %v6686_v39 }
  0xb0   :  { %2629 = vmatprep.subr.bf16.mxu0 %v6687_v40  ;;  %3264 = vmatprep.subr.bf16.mxu1 %v6687_v40 }
  0xb3   :  { %2630 = vmatpush1.bf16.msra.mxu0 %v6689_v41  ;;  %3265 = vmatpush1.bf16.msra.mxu1 %v6689_v41 }
  0xb4   :  { %2631 = vmatprep.subr.bf16.mxu0 %v6690_v42  ;;  %3266 = vmatprep.subr.bf16.mxu1 %v6690_v42 }
  0xb7   :  { %2632 = vmatpush1.bf16.msra.mxu0 %v6692_v43  ;;  %3267 = vmatpush1.bf16.msra.mxu1 %v6692_v43 }
  0xb8   :  { %2633 = vmatprep.subr.bf16.mxu0 %v6693_v44  ;;  %3268 = vmatprep.subr.bf16.mxu1 %v6693_v44 }
  0xbb   :  { %2634 = vmatpush1.bf16.msra.mxu0 %v6695_v45  ;;  %3269 = vmatpush1.bf16.msra.mxu1 %v6695_v45 }
  0xbc   :  { %2635 = vmatprep.subr.bf16.mxu0 %v6696_v46  ;;  %3270 = vmatprep.subr.bf16.mxu1 %v6696_v46 }
  0xbd   :  { %10 = vsyncpa [#allocation4], 0  ;;  %v6705_v53 = vld [vmem:[%s10972_s1 + $0x300] ss:$8 sps:$4 sm:$0xff]   ;;  %v6706_v54 = vld [vmem:[%s10972_s1 + $0x314] ss:$8 sps:$4 sm:$0xff]   ;;  %v5456_v55 = vcombine.high %v8047_v49, %v8047_v49  ;;  %v5894_v56 = vcombine.high %v8052_v50, %v8052_v50  ;;  %v5455_v23 = vcombine.low %v8047_v49, %v8047_v49  ;;  %v5893_v24 = vcombine.low %v8052_v50, %v8052_v50 }
  0xbe   :  { %v6708_v57 = vld [vmem:[%s10972_s1 + $0x310] ss:$8 sps:$4 sm:$0xff]   ;;  %v6709_v58 = vld [vmem:[%s10972_s1 + $0x324] ss:$8 sps:$4 sm:$0xff]   ;;  %v6711_v59 = vld [vmem:[%s10972_s1 + $0x320] ss:$8 sps:$4 sm:$0xff]  }
  0xbf   :  { %2636 = vmatpush1.bf16.msra.mxu0 %v6698_v47  ;;  %3271 = vmatpush1.bf16.msra.mxu1 %v6698_v47  ;;  %v6712_v60 = vld [vmem:[%s10972_s1 + $0x334] ss:$8 sps:$4 sm:$0xff]   ;;  %v6714_v61 = vld [vmem:[%s10972_s1 + $0x330] ss:$8 sps:$4 sm:$0xff]   ;;  %v6715_v62 = vld [vmem:[%s10972_s1 + $0x344] ss:$8 sps:$4 sm:$0xff]  }
  0xc0   :  { %2646 = vmatprep.subr.bf16.mxu0 %v6701_v48  ;;  %3281 = vmatprep.subr.bf16.mxu1 %v6701_v48  ;;  %v6717_v63 = vld [vmem:[%s10972_s1 + $0x340] ss:$8 sps:$4 sm:$0xff]   ;;  %v6718_v0 = vld [vmem:[%s10972_s1 + $0x354] ss:$8 sps:$4 sm:$0xff]   ;;  %v6720_v1 = vld [vmem:[%s10972_s1 + $0x350] ss:$8 sps:$4 sm:$0xff]  }
  0xc1   :  { %v6721_v2 = vld [vmem:[%s10972_s1 + $0x364] ss:$8 sps:$4 sm:$0xff]   ;;  %v6723_v3 = vld [vmem:[%s10972_s1 + $0x360] ss:$8 sps:$4 sm:$0xff]   ;;  %v6724_v4 = vld [vmem:[%s10972_s1 + $0x374] ss:$8 sps:$4 sm:$0xff]  }
  0xc2   :  { %2638 = vmatmul.mubr.bf16.vlgmr.msra.gmra.mrb[0].mxu0 %v5453_v51  ;;  %3273 = vmatmul.mubr.bf16.vlgmr.msra.gmra.mrb[0].mxu1 %v5891_v52  ;;  %v6726_v5 = vld [vmem:[%s10972_s1 + $0x370] ss:$8 sps:$4 sm:$0xff]   ;;  %v6727_v6 = vld [vmem:[%s10972_s1 + $0x384] ss:$8 sps:$4 sm:$0xff]   ;;  %v6729_v7 = vld [vmem:[%s10972_s1 + $0x380] ss:$8 sps:$4 sm:$0xff]  }
  0xc3   :  { %2647 = vmatpush1.bf16.msra.mxu0 %v6705_v53  ;;  %3282 = vmatpush1.bf16.msra.mxu1 %v6705_v53  ;;  %v6730_v8 = vld [vmem:[%s10972_s1 + $0x394] ss:$8 sps:$4 sm:$0xff]   ;;  %v6732_v9 = vld [vmem:[%s10972_s1 + $0x390] ss:$8 sps:$4 sm:$0xff]   ;;  %v6733_v10 = vld [vmem:[%s10972_s1 + $0x3a4] ss:$8 sps:$4 sm:$0xff]  }
  0xc4   :  { %2648 = vmatprep.subr.bf16.mxu0 %v6706_v54  ;;  %3283 = vmatprep.subr.bf16.mxu1 %v6706_v54  ;;  %v6735_v11 = vld [vmem:[%s10972_s1 + $0x3a0] ss:$8 sps:$4 sm:$0xff]   ;;  %v6736_v12 = vld [vmem:[%s10972_s1 + $0x3b4] ss:$8 sps:$4 sm:$0xff]   ;;  %v6738_v13 = vld [vmem:[%s10972_s1 + $0x3b0] ss:$8 sps:$4 sm:$0xff]  }
  0xc5   :  { %2678 = vmatprep.mubr.bf16.mxu0 %v5456_v55  ;;  %3313 = vmatprep.mubr.bf16.mxu1 %v5894_v56  ;;  %v6739_v14 = vld [vmem:[%s10972_s1 + $0x3c4] ss:$8 sps:$4 sm:$0xff]   ;;  %v6741_v15 = vld [vmem:[%s10972_s1 + $0x3c0] ss:$8 sps:$4 sm:$0xff]   ;;  %v6742_v16 = vld [vmem:[%s10972_s1 + $0x3d4] ss:$8 sps:$4 sm:$0xff]  }
  0xc6   :  { %v6744_v17 = vld [vmem:[%s10972_s1 + $0x3d0] ss:$8 sps:$4 sm:$0xff]   ;;  %v6745_v18 = vld [vmem:[%s10972_s1 + $0x3e4] ss:$8 sps:$4 sm:$0xff]   ;;  %v6747_v19 = vld [vmem:[%s10972_s1 + $0x3e0] ss:$8 sps:$4 sm:$0xff]  }
  0xc7   :  { %2649 = vmatpush1.bf16.msra.mxu0 %v6708_v57  ;;  %3284 = vmatpush1.bf16.msra.mxu1 %v6708_v57  ;;  %v6748_v20 = vld [vmem:[%s10972_s1 + $0x3f4] ss:$8 sps:$4 sm:$0xff]   ;;  %v6750_v21 = vld [vmem:[%s10972_s1 + $0x3f0] ss:$8 sps:$4 sm:$0xff]   ;;  %v6753_v22 = vld [vmem:[%s10972_s1 + $0x404] ss:$8 sps:$4 sm:$0xff]  }
  0xc8   :  { %2650 = vmatprep.subr.bf16.mxu0 %v6709_v58  ;;  %3285 = vmatprep.subr.bf16.mxu1 %v6709_v58  ;;  %v8165_v25 = vld [vmem:[%s10971_s0 + $0x20] sm:$0xff]  ;;  %v6758_v28 = vld [vmem:[%s10972_s1 + $0x414] ss:$8 sps:$4 sm:$0xff]   ;;  %v6760_v31 = vld [vmem:[%s10972_s1 + $0x410] ss:$8 sps:$4 sm:$0xff]   ;;  %vm5433_vm0 = vcmask 74752  }
  0xc9   :  { %v8170_v26 = vld [vmem:[%s10971_s0 + $0x84] sm:$0xff]  ;;  %v5458_v29 = vcombine.high %v8165_v25, %v8165_v25  ;;  %v6764_v34 = vld [vmem:[%s10972_s1 + $0x434] ss:$8 sps:$4 sm:$0xff]   ;;  %v6766_v35 = vld [vmem:[%s10972_s1 + $0x430] ss:$8 sps:$4 sm:$0xff]  }
  0xca   :  { %v6757_v27 = vld [vmem:[%s10972_s1 + $0x400] ss:$8 sps:$4 sm:$0xff]   ;;  %v5896_v30 = vcombine.high %v8170_v26, %v8170_v26  ;;  %v6761_v32 = vld [vmem:[%s10972_s1 + $0x424] ss:$8 sps:$4 sm:$0xff]   ;;  %v6770_v38 = vld [vmem:[%s10972_s1 + $0x454] ss:$8 sps:$4 sm:$0xff]  }
  0xcb   :  { %2651 = vmatpush1.bf16.msra.mxu0 %v6711_v59  ;;  %3286 = vmatpush1.bf16.msra.mxu1 %v6711_v59  ;;  %v6763_v33 = vld [vmem:[%s10972_s1 + $0x420] ss:$8 sps:$4 sm:$0xff]   ;;  %v6767_v36 = vld [vmem:[%s10972_s1 + $0x444] ss:$8 sps:$4 sm:$0xff]   ;;  %v6772_v39 = vld [vmem:[%s10972_s1 + $0x450] ss:$8 sps:$4 sm:$0xff]  }
  0xcc   :  { %2652 = vmatprep.subr.bf16.mxu0 %v6712_v60  ;;  %3287 = vmatprep.subr.bf16.mxu1 %v6712_v60  ;;  %v6769_v37 = vld [vmem:[%s10972_s1 + $0x440] ss:$8 sps:$4 sm:$0xff]   ;;  %v6773_v40 = vld [vmem:[%s10972_s1 + $0x464] ss:$8 sps:$4 sm:$0xff]   ;;  %v6776_v42 = vld [vmem:[%s10972_s1 + $0x474] ss:$8 sps:$4 sm:$0xff]  }
  0xcd   :  { %v6775_v41 = vld [vmem:[%s10972_s1 + $0x460] ss:$8 sps:$4 sm:$0xff]   ;;  %v6778_v43 = vld [vmem:[%s10972_s1 + $0x470] ss:$8 sps:$4 sm:$0xff]   ;;  %v6779_v44 = vld [vmem:[%s10972_s1 + $0x484] ss:$8 sps:$4 sm:$0xff]  }
  0xce   :  { %v6781_v45 = vld [vmem:[%s10972_s1 + $0x480] ss:$8 sps:$4 sm:$0xff]   ;;  %v6782_v46 = vld [vmem:[%s10972_s1 + $0x494] ss:$8 sps:$4 sm:$0xff]   ;;  %v6784_v47 = vld [vmem:[%s10972_s1 + $0x490] ss:$8 sps:$4 sm:$0xff]  }
  0xcf   :  { %2653 = vmatpush1.bf16.msra.mxu0 %v6714_v61  ;;  %3288 = vmatpush1.bf16.msra.mxu1 %v6714_v61  ;;  %v6785_v48 = vld [vmem:[%s10972_s1 + $0x4a4] ss:$8 sps:$4 sm:$0xff]   ;;  %v6787_v49 = vld [vmem:[%s10972_s1 + $0x4a0] ss:$8 sps:$4 sm:$0xff]   ;;  %v6788_v50 = vld [vmem:[%s10972_s1 + $0x4b4] ss:$8 sps:$4 sm:$0xff]   ;;  %v5457_v61 = vcombine.low %v8165_v25, %v8165_v25 }
  0xd0   :  { %2654 = vmatprep.subr.bf16.mxu0 %v6715_v62  ;;  %3289 = vmatprep.subr.bf16.mxu1 %v6715_v62  ;;  %v6790_v51 = vld [vmem:[%s10972_s1 + $0x4b0] ss:$8 sps:$4 sm:$0xff]   ;;  %v6791_v52 = vld [vmem:[%s10972_s1 + $0x4c4] ss:$8 sps:$4 sm:$0xff]   ;;  %v6793_v53 = vld [vmem:[%s10972_s1 + $0x4c0] ss:$8 sps:$4 sm:$0xff]   ;;  %v5895_v62 = vcombine.low %v8170_v26, %v8170_v26 }
  0xd1   :  { %v6794_v54 = vld [vmem:[%s10972_s1 + $0x4d4] ss:$8 sps:$4 sm:$0xff]   ;;  %v6796_v55 = vld [vmem:[%s10972_s1 + $0x4d0] ss:$8 sps:$4 sm:$0xff]   ;;  %v6797_v56 = vld [vmem:[%s10972_s1 + $0x4e4] ss:$8 sps:$4 sm:$0xff]  }
  0xd2   :  { %v6799_v57 = vld [vmem:[%s10972_s1 + $0x4e0] ss:$8 sps:$4 sm:$0xff]   ;;  %v6800_v58 = vld [vmem:[%s10972_s1 + $0x4f4] ss:$8 sps:$4 sm:$0xff]   ;;  %v6802_v59 = vld [vmem:[%s10972_s1 + $0x4f0] ss:$8 sps:$4 sm:$0xff]  }
  0xd3   :  { %2655 = vmatpush1.bf16.msra.mxu0 %v6717_v63  ;;  %3290 = vmatpush1.bf16.msra.mxu1 %v6717_v63  ;;  %v6805_v60 = vld [vmem:[%s10972_s1 + $0x504] ss:$8 sps:$4 sm:$0xff]   ;;  %v6842_v25 = vld [vmem:[%s10972_s1 + $0x5b0] ss:$8 sps:$4 sm:$0xff]  }
  0xd4   :  { %2656 = vmatprep.subr.bf16.mxu0 %v6718_v0  ;;  %3291 = vmatprep.subr.bf16.mxu1 %v6718_v0  ;;  %v8279_v63 = vld [vmem:[%s10971_s0 + $0x28] sm:$0xff] }
  0xd5   :  { %v8284_v0 = vld [vmem:[%s10971_s0 + $0x8c] sm:$0xff] }
  0xd6   :  { %v6843_v26 = vld [vmem:[%s10972_s1 + $0x5c4] ss:$8 sps:$4 sm:$0xff]  }
  0xd7   :  { %2657 = vmatpush1.bf16.msra.mxu0 %v6720_v1  ;;  %3292 = vmatpush1.bf16.msra.mxu1 %v6720_v1  ;;  %v6809_v1 = vld [vmem:[%s10972_s1 + $0x500] ss:$8 sps:$4 sm:$0xff]  }
  0xd8   :  { %2658 = vmatprep.subr.bf16.mxu0 %v6721_v2  ;;  %3293 = vmatprep.subr.bf16.mxu1 %v6721_v2  ;;  %v6810_v2 = vld [vmem:[%s10972_s1 + $0x514] ss:$8 sps:$4 sm:$0xff]  }
  0xdb   :  { %2659 = vmatpush1.bf16.msra.mxu0 %v6723_v3  ;;  %3294 = vmatpush1.bf16.msra.mxu1 %v6723_v3  ;;  %v5460_v3 = vcombine.high %v8279_v63, %v8279_v63 }
  0xdc   :  { %2660 = vmatprep.subr.bf16.mxu0 %v6724_v4  ;;  %3295 = vmatprep.subr.bf16.mxu1 %v6724_v4  ;;  %v5898_v4 = vcombine.high %v8284_v0, %v8284_v0 }
  0xdf   :  { %2661 = vmatpush1.bf16.msra.mxu0 %v6726_v5  ;;  %3296 = vmatpush1.bf16.msra.mxu1 %v6726_v5  ;;  %v6812_v5 = vld [vmem:[%s10972_s1 + $0x510] ss:$8 sps:$4 sm:$0xff]  }
  0xe0   :  { %2662 = vmatprep.subr.bf16.mxu0 %v6727_v6  ;;  %3297 = vmatprep.subr.bf16.mxu1 %v6727_v6  ;;  %v6813_v6 = vld [vmem:[%s10972_s1 + $0x524] ss:$8 sps:$4 sm:$0xff]  }
  0xe3   :  { %2663 = vmatpush1.bf16.msra.mxu0 %v6729_v7  ;;  %3298 = vmatpush1.bf16.msra.mxu1 %v6729_v7  ;;  %v6815_v7 = vld [vmem:[%s10972_s1 + $0x520] ss:$8 sps:$4 sm:$0xff]  }
  0xe4   :  { %2664 = vmatprep.subr.bf16.mxu0 %v6730_v8  ;;  %3299 = vmatprep.subr.bf16.mxu1 %v6730_v8  ;;  %v6816_v8 = vld [vmem:[%s10972_s1 + $0x534] ss:$8 sps:$4 sm:$0xff]  }
  0xe7   :  { %2665 = vmatpush1.bf16.msra.mxu0 %v6732_v9  ;;  %3300 = vmatpush1.bf16.msra.mxu1 %v6732_v9  ;;  %v6818_v9 = vld [vmem:[%s10972_s1 + $0x530] ss:$8 sps:$4 sm:$0xff]  }
  0xe8   :  { %2666 = vmatprep.subr.bf16.mxu0 %v6733_v10  ;;  %3301 = vmatprep.subr.bf16.mxu1 %v6733_v10  ;;  %v6819_v10 = vld [vmem:[%s10972_s1 + $0x544] ss:$8 sps:$4 sm:$0xff]  }
  0xeb   :  { %2667 = vmatpush1.bf16.msra.mxu0 %v6735_v11  ;;  %3302 = vmatpush1.bf16.msra.mxu1 %v6735_v11  ;;  %v6821_v11 = vld [vmem:[%s10972_s1 + $0x540] ss:$8 sps:$4 sm:$0xff]  }
  0xec   :  { %2668 = vmatprep.subr.bf16.mxu0 %v6736_v12  ;;  %3303 = vmatprep.subr.bf16.mxu1 %v6736_v12  ;;  %v6822_v12 = vld [vmem:[%s10972_s1 + $0x554] ss:$8 sps:$4 sm:$0xff]  }
  0xef   :  { %2669 = vmatpush1.bf16.msra.mxu0 %v6738_v13  ;;  %3304 = vmatpush1.bf16.msra.mxu1 %v6738_v13  ;;  %v6824_v13 = vld [vmem:[%s10972_s1 + $0x550] ss:$8 sps:$4 sm:$0xff]  }
  0xf0   :  { %2670 = vmatprep.subr.bf16.mxu0 %v6739_v14  ;;  %3305 = vmatprep.subr.bf16.mxu1 %v6739_v14  ;;  %v6825_v14 = vld [vmem:[%s10972_s1 + $0x564] ss:$8 sps:$4 sm:$0xff]  }
  0xf3   :  { %2671 = vmatpush1.bf16.msra.mxu0 %v6741_v15  ;;  %3306 = vmatpush1.bf16.msra.mxu1 %v6741_v15  ;;  %v6827_v15 = vld [vmem:[%s10972_s1 + $0x560] ss:$8 sps:$4 sm:$0xff]  }
  0xf4   :  { %2672 = vmatprep.subr.bf16.mxu0 %v6742_v16  ;;  %3307 = vmatprep.subr.bf16.mxu1 %v6742_v16  ;;  %v6828_v16 = vld [vmem:[%s10972_s1 + $0x574] ss:$8 sps:$4 sm:$0xff]  }
  0xf7   :  { %2673 = vmatpush1.bf16.msra.mxu0 %v6744_v17  ;;  %3308 = vmatpush1.bf16.msra.mxu1 %v6744_v17  ;;  %v6830_v17 = vld [vmem:[%s10972_s1 + $0x570] ss:$8 sps:$4 sm:$0xff]  }
  0xf8   :  { %2674 = vmatprep.subr.bf16.mxu0 %v6745_v18  ;;  %3309 = vmatprep.subr.bf16.mxu1 %v6745_v18  ;;  %v6831_v18 = vld [vmem:[%s10972_s1 + $0x584] ss:$8 sps:$4 sm:$0xff]  }
  0xfb   :  { %2675 = vmatpush1.bf16.msra.mxu0 %v6747_v19  ;;  %3310 = vmatpush1.bf16.msra.mxu1 %v6747_v19  ;;  %v6833_v19 = vld [vmem:[%s10972_s1 + $0x580] ss:$8 sps:$4 sm:$0xff]  }
  0xfc   :  { %2676 = vmatprep.subr.bf16.mxu0 %v6748_v20  ;;  %3311 = vmatprep.subr.bf16.mxu1 %v6748_v20  ;;  %v6834_v20 = vld [vmem:[%s10972_s1 + $0x594] ss:$8 sps:$4 sm:$0xff]  }
  0xff   :  { %2677 = vmatpush1.bf16.msra.mxu0 %v6750_v21  ;;  %3312 = vmatpush1.bf16.msra.mxu1 %v6750_v21  ;;  %v6836_v21 = vld [vmem:[%s10972_s1 + $0x590] ss:$8 sps:$4 sm:$0xff]  }
 0x100   :  { %2687 = vmatprep.subr.bf16.mxu0 %v6753_v22  ;;  %3322 = vmatprep.subr.bf16.mxu1 %v6753_v22  ;;  %v6837_v22 = vld [vmem:[%s10972_s1 + $0x5a4] ss:$8 sps:$4 sm:$0xff]  }
 0x102   :  { %2679 = vmatmul.mubr.bf16.vlgmr.msra.gmra.mrb[0].mxu0 %v5455_v23  ;;  %3314 = vmatmul.mubr.bf16.vlgmr.msra.gmra.mrb[0].mxu1 %v5893_v24  ;;  %v6839_v23 = vld [vmem:[%s10972_s1 + $0x5a0] ss:$8 sps:$4 sm:$0xff]   ;;  %v6840_v24 = vld [vmem:[%s10972_s1 + $0x5b4] ss:$8 sps:$4 sm:$0xff]  }
 0x103   :  { %2688 = vmatpush1.bf16.msra.mxu0 %v6757_v27  ;;  %3323 = vmatpush1.bf16.msra.mxu1 %v6757_v27  ;;  %v6845_v27 = vld [vmem:[%s10972_s1 + $0x5c0] ss:$8 sps:$4 sm:$0xff]  }
 0x104   :  { %2689 = vmatprep.subr.bf16.mxu0 %v6758_v28  ;;  %3324 = vmatprep.subr.bf16.mxu1 %v6758_v28  ;;  %v6846_v28 = vld [vmem:[%s10972_s1 + $0x5d4] ss:$8 sps:$4 sm:$0xff]  }
 0x105   :  { %2719 = vmatprep.mubr.bf16.mxu0 %v5458_v29  ;;  %3354 = vmatprep.mubr.bf16.mxu1 %v5896_v30  ;;  %v6848_v29 = vld [vmem:[%s10972_s1 + $0x5d0] ss:$8 sps:$4 sm:$0xff]   ;;  %v6849_v30 = vld [vmem:[%s10972_s1 + $0x5e4] ss:$8 sps:$4 sm:$0xff]  }
 0x107   :  { %2690 = vmatpush1.bf16.msra.mxu0 %v6760_v31  ;;  %3325 = vmatpush1.bf16.msra.mxu1 %v6760_v31  ;;  %v6851_v31 = vld [vmem:[%s10972_s1 + $0x5e0] ss:$8 sps:$4 sm:$0xff]  }
 0x108   :  { %2691 = vmatprep.subr.bf16.mxu0 %v6761_v32  ;;  %3326 = vmatprep.subr.bf16.mxu1 %v6761_v32  ;;  %v6852_v32 = vld [vmem:[%s10972_s1 + $0x5f4] ss:$8 sps:$4 sm:$0xff]  }
 0x10b   :  { %2692 = vmatpush1.bf16.msra.mxu0 %v6763_v33  ;;  %3327 = vmatpush1.bf16.msra.mxu1 %v6763_v33  ;;  %v6854_v33 = vld [vmem:[%s10972_s1 + $0x5f0] ss:$8 sps:$4 sm:$0xff]  }
 0x10c   :  { %2693 = vmatprep.subr.bf16.mxu0 %v6764_v34  ;;  %3328 = vmatprep.subr.bf16.mxu1 %v6764_v34  ;;  %v6857_v34 = vld [vmem:[%s10972_s1 + $0x604] ss:$8 sps:$4 sm:$0xff]  }
 0x10f   :  { %2694 = vmatpush1.bf16.msra.mxu0 %v6766_v35  ;;  %3329 = vmatpush1.bf16.msra.mxu1 %v6766_v35  ;;  %v5459_v35 = vcombine.low %v8279_v63, %v8279_v63  ;;  %v6894_v63 = vld [vmem:[%s10972_s1 + $0x6b0] ss:$8 sps:$4 sm:$0xff]  }
 0x110   :  { %2695 = vmatprep.subr.bf16.mxu0 %v6767_v36  ;;  %3330 = vmatprep.subr.bf16.mxu1 %v6767_v36  ;;  %v5897_v36 = vcombine.low %v8284_v0, %v8284_v0  ;;  %v6895_v0 = vld [vmem:[%s10972_s1 + $0x6c4] ss:$8 sps:$4 sm:$0xff]  }
 0x113   :  { %2696 = vmatpush1.bf16.msra.mxu0 %v6769_v37  ;;  %3331 = vmatpush1.bf16.msra.mxu1 %v6769_v37  ;;  %v8393_v37 = vld [vmem:[%s10971_s0 + $0x30] sm:$0xff] }
 0x114   :  { %2697 = vmatprep.subr.bf16.mxu0 %v6770_v38  ;;  %3332 = vmatprep.subr.bf16.mxu1 %v6770_v38  ;;  %v8398_v38 = vld [vmem:[%s10971_s0 + $0x94] sm:$0xff] }
 0x117   :  { %2698 = vmatpush1.bf16.msra.mxu0 %v6772_v39  ;;  %3333 = vmatpush1.bf16.msra.mxu1 %v6772_v39  ;;  %v6861_v39 = vld [vmem:[%s10972_s1 + $0x600] ss:$8 sps:$4 sm:$0xff]  }
 0x118   :  { %2699 = vmatprep.subr.bf16.mxu0 %v6773_v40  ;;  %3334 = vmatprep.subr.bf16.mxu1 %v6773_v40  ;;  %v6862_v40 = vld [vmem:[%s10972_s1 + $0x614] ss:$8 sps:$4 sm:$0xff]  }
 0x11b   :  { %2700 = vmatpush1.bf16.msra.mxu0 %v6775_v41  ;;  %3335 = vmatpush1.bf16.msra.mxu1 %v6775_v41  ;;  %v5462_v41 = vcombine.high %v8393_v37, %v8393_v37 }
 0x11c   :  { %2701 = vmatprep.subr.bf16.mxu0 %v6776_v42  ;;  %3336 = vmatprep.subr.bf16.mxu1 %v6776_v42  ;;  %v5900_v42 = vcombine.high %v8398_v38, %v8398_v38 }
 0x11f   :  { %2702 = vmatpush1.bf16.msra.mxu0 %v6778_v43  ;;  %3337 = vmatpush1.bf16.msra.mxu1 %v6778_v43  ;;  %v6864_v43 = vld [vmem:[%s10972_s1 + $0x610] ss:$8 sps:$4 sm:$0xff]  }
 0x120   :  { %2703 = vmatprep.subr.bf16.mxu0 %v6779_v44  ;;  %3338 = vmatprep.subr.bf16.mxu1 %v6779_v44  ;;  %v6865_v44 = vld [vmem:[%s10972_s1 + $0x624] ss:$8 sps:$4 sm:$0xff]  }
 0x123   :  { %2704 = vmatpush1.bf16.msra.mxu0 %v6781_v45  ;;  %3339 = vmatpush1.bf16.msra.mxu1 %v6781_v45  ;;  %v6867_v45 = vld [vmem:[%s10972_s1 + $0x620] ss:$8 sps:$4 sm:$0xff]  }
 0x124   :  { %2705 = vmatprep.subr.bf16.mxu0 %v6782_v46  ;;  %3340 = vmatprep.subr.bf16.mxu1 %v6782_v46  ;;  %v6868_v46 = vld [vmem:[%s10972_s1 + $0x634] ss:$8 sps:$4 sm:$0xff]  }
 0x127   :  { %2706 = vmatpush1.bf16.msra.mxu0 %v6784_v47  ;;  %3341 = vmatpush1.bf16.msra.mxu1 %v6784_v47  ;;  %v6870_v47 = vld [vmem:[%s10972_s1 + $0x630] ss:$8 sps:$4 sm:$0xff]  }
 0x128   :  { %2707 = vmatprep.subr.bf16.mxu0 %v6785_v48  ;;  %3342 = vmatprep.subr.bf16.mxu1 %v6785_v48  ;;  %v6871_v48 = vld [vmem:[%s10972_s1 + $0x644] ss:$8 sps:$4 sm:$0xff]  }
 0x12b   :  { %2708 = vmatpush1.bf16.msra.mxu0 %v6787_v49  ;;  %3343 = vmatpush1.bf16.msra.mxu1 %v6787_v49  ;;  %v6873_v49 = vld [vmem:[%s10972_s1 + $0x640] ss:$8 sps:$4 sm:$0xff]  }
 0x12c   :  { %2709 = vmatprep.subr.bf16.mxu0 %v6788_v50  ;;  %3344 = vmatprep.subr.bf16.mxu1 %v6788_v50  ;;  %v6874_v50 = vld [vmem:[%s10972_s1 + $0x654] ss:$8 sps:$4 sm:$0xff]  }
 0x12f   :  { %2710 = vmatpush1.bf16.msra.mxu0 %v6790_v51  ;;  %3345 = vmatpush1.bf16.msra.mxu1 %v6790_v51  ;;  %v6876_v51 = vld [vmem:[%s10972_s1 + $0x650] ss:$8 sps:$4 sm:$0xff]  }
 0x130   :  { %2711 = vmatprep.subr.bf16.mxu0 %v6791_v52  ;;  %3346 = vmatprep.subr.bf16.mxu1 %v6791_v52  ;;  %v6877_v52 = vld [vmem:[%s10972_s1 + $0x664] ss:$8 sps:$4 sm:$0xff]  }
 0x133   :  { %2712 = vmatpush1.bf16.msra.mxu0 %v6793_v53  ;;  %3347 = vmatpush1.bf16.msra.mxu1 %v6793_v53  ;;  %v6879_v53 = vld [vmem:[%s10972_s1 + $0x660] ss:$8 sps:$4 sm:$0xff]  }
 0x134   :  { %2713 = vmatprep.subr.bf16.mxu0 %v6794_v54  ;;  %3348 = vmatprep.subr.bf16.mxu1 %v6794_v54  ;;  %v6880_v54 = vld [vmem:[%s10972_s1 + $0x674] ss:$8 sps:$4 sm:$0xff]  }
 0x137   :  { %2714 = vmatpush1.bf16.msra.mxu0 %v6796_v55  ;;  %3349 = vmatpush1.bf16.msra.mxu1 %v6796_v55  ;;  %v6882_v55 = vld [vmem:[%s10972_s1 + $0x670] ss:$8 sps:$4 sm:$0xff]  }
 0x138   :  { %2715 = vmatprep.subr.bf16.mxu0 %v6797_v56  ;;  %3350 = vmatprep.subr.bf16.mxu1 %v6797_v56  ;;  %v6883_v56 = vld [vmem:[%s10972_s1 + $0x684] ss:$8 sps:$4 sm:$0xff]  }
 0x13b   :  { %2716 = vmatpush1.bf16.msra.mxu0 %v6799_v57  ;;  %3351 = vmatpush1.bf16.msra.mxu1 %v6799_v57  ;;  %v6885_v57 = vld [vmem:[%s10972_s1 + $0x680] ss:$8 sps:$4 sm:$0xff]  }
 0x13c   :  { %2717 = vmatprep.subr.bf16.mxu0 %v6800_v58  ;;  %3352 = vmatprep.subr.bf16.mxu1 %v6800_v58  ;;  %v6886_v58 = vld [vmem:[%s10972_s1 + $0x694] ss:$8 sps:$4 sm:$0xff]  }
 0x13f   :  { %2718 = vmatpush1.bf16.msra.mxu0 %v6802_v59  ;;  %3353 = vmatpush1.bf16.msra.mxu1 %v6802_v59  ;;  %v6888_v59 = vld [vmem:[%s10972_s1 + $0x690] ss:$8 sps:$4 sm:$0xff]  }
 0x140   :  { %2728 = vmatprep.subr.bf16.mxu0 %v6805_v60  ;;  %3363 = vmatprep.subr.bf16.mxu1 %v6805_v60  ;;  %v6889_v60 = vld [vmem:[%s10972_s1 + $0x6a4] ss:$8 sps:$4 sm:$0xff]  }
 0x142   :  { %2720 = vmatmul.mubr.bf16.vlgmr.msra.gmra.mrb[0].mxu0 %v5457_v61  ;;  %3355 = vmatmul.mubr.bf16.vlgmr.msra.gmra.mrb[0].mxu1 %v5895_v62  ;;  %v6891_v61 = vld [vmem:[%s10972_s1 + $0x6a0] ss:$8 sps:$4 sm:$0xff]   ;;  %v6892_v62 = vld [vmem:[%s10972_s1 + $0x6b4] ss:$8 sps:$4 sm:$0xff]  }
 0x143   :  { %2729 = vmatpush1.bf16.msra.mxu0 %v6809_v1  ;;  %3364 = vmatpush1.bf16.msra.mxu1 %v6809_v1  ;;  %v6897_v1 = vld [vmem:[%s10972_s1 + $0x6c0] ss:$8 sps:$4 sm:$0xff]  }
 0x144   :  { %2730 = vmatprep.subr.bf16.mxu0 %v6810_v2  ;;  %3365 = vmatprep.subr.bf16.mxu1 %v6810_v2  ;;  %v6898_v2 = vld [vmem:[%s10972_s1 + $0x6d4] ss:$8 sps:$4 sm:$0xff]  }
 0x145   :  { %2760 = vmatprep.mubr.bf16.mxu0 %v5460_v3  ;;  %3395 = vmatprep.mubr.bf16.mxu1 %v5898_v4  ;;  %v6900_v3 = vld [vmem:[%s10972_s1 + $0x6d0] ss:$8 sps:$4 sm:$0xff]   ;;  %v6901_v4 = vld [vmem:[%s10972_s1 + $0x6e4] ss:$8 sps:$4 sm:$0xff]  }
 0x147   :  { %2731 = vmatpush1.bf16.msra.mxu0 %v6812_v5  ;;  %3366 = vmatpush1.bf16.msra.mxu1 %v6812_v5  ;;  %v6903_v5 = vld [vmem:[%s10972_s1 + $0x6e0] ss:$8 sps:$4 sm:$0xff]  }
 0x148   :  { %2732 = vmatprep.subr.bf16.mxu0 %v6813_v6  ;;  %3367 = vmatprep.subr.bf16.mxu1 %v6813_v6  ;;  %v6904_v6 = vld [vmem:[%s10972_s1 + $0x6f4] ss:$8 sps:$4 sm:$0xff]  }
 0x14b   :  { %2733 = vmatpush1.bf16.msra.mxu0 %v6815_v7  ;;  %3368 = vmatpush1.bf16.msra.mxu1 %v6815_v7  ;;  %v6906_v7 = vld [vmem:[%s10972_s1 + $0x6f0] ss:$8 sps:$4 sm:$0xff]  }
 0x14c   :  { %2734 = vmatprep.subr.bf16.mxu0 %v6816_v8  ;;  %3369 = vmatprep.subr.bf16.mxu1 %v6816_v8  ;;  %v6909_v8 = vld [vmem:[%s10972_s1 + $0x704] ss:$8 sps:$4 sm:$0xff]  }
 0x14f   :  { %2735 = vmatpush1.bf16.msra.mxu0 %v6818_v9  ;;  %3370 = vmatpush1.bf16.msra.mxu1 %v6818_v9  ;;  %v5461_v9 = vcombine.low %v8393_v37, %v8393_v37  ;;  %v6946_v37 = vld [vmem:[%s10972_s1 + $0x7b0] ss:$8 sps:$4 sm:$0xff]  }
 0x150   :  { %2736 = vmatprep.subr.bf16.mxu0 %v6819_v10  ;;  %3371 = vmatprep.subr.bf16.mxu1 %v6819_v10  ;;  %v5899_v10 = vcombine.low %v8398_v38, %v8398_v38  ;;  %v6947_v38 = vld [vmem:[%s10972_s1 + $0x7c4] ss:$8 sps:$4 sm:$0xff]  }
 0x153   :  { %2737 = vmatpush1.bf16.msra.mxu0 %v6821_v11  ;;  %3372 = vmatpush1.bf16.msra.mxu1 %v6821_v11  ;;  %v8507_v11 = vld [vmem:[%s10971_s0 + $0x38] sm:$0xff] }
 0x154   :  { %2738 = vmatprep.subr.bf16.mxu0 %v6822_v12  ;;  %3373 = vmatprep.subr.bf16.mxu1 %v6822_v12  ;;  %v8512_v12 = vld [vmem:[%s10971_s0 + $0x9c] sm:$0xff] }
 0x157   :  { %2739 = vmatpush1.bf16.msra.mxu0 %v6824_v13  ;;  %3374 = vmatpush1.bf16.msra.mxu1 %v6824_v13  ;;  %v6913_v13 = vld [vmem:[%s10972_s1 + $0x700] ss:$8 sps:$4 sm:$0xff]  }
 0x158   :  { %2740 = vmatprep.subr.bf16.mxu0 %v6825_v14  ;;  %3375 = vmatprep.subr.bf16.mxu1 %v6825_v14  ;;  %v6914_v14 = vld [vmem:[%s10972_s1 + $0x714] ss:$8 sps:$4 sm:$0xff]  }
 0x15b   :  { %2741 = vmatpush1.bf16.msra.mxu0 %v6827_v15  ;;  %3376 = vmatpush1.bf16.msra.mxu1 %v6827_v15  ;;  %v5464_v15 = vcombine.high %v8507_v11, %v8507_v11 }
 0x15c   :  { %2742 = vmatprep.subr.bf16.mxu0 %v6828_v16  ;;  %3377 = vmatprep.subr.bf16.mxu1 %v6828_v16  ;;  %v5902_v16 = vcombine.high %v8512_v12, %v8512_v12 }
 0x15f   :  { %2743 = vmatpush1.bf16.msra.mxu0 %v6830_v17  ;;  %3378 = vmatpush1.bf16.msra.mxu1 %v6830_v17  ;;  %v6916_v17 = vld [vmem:[%s10972_s1 + $0x710] ss:$8 sps:$4 sm:$0xff]  }
 0x160   :  { %2744 = vmatprep.subr.bf16.mxu0 %v6831_v18  ;;  %3379 = vmatprep.subr.bf16.mxu1 %v6831_v18  ;;  %v6917_v18 = vld [vmem:[%s10972_s1 + $0x724] ss:$8 sps:$4 sm:$0xff]  }
 0x163   :  { %2745 = vmatpush1.bf16.msra.mxu0 %v6833_v19  ;;  %3380 = vmatpush1.bf16.msra.mxu1 %v6833_v19  ;;  %v6919_v19 = vld [vmem:[%s10972_s1 + $0x720] ss:$8 sps:$4 sm:$0xff]  }
 0x164   :  { %2746 = vmatprep.subr.bf16.mxu0 %v6834_v20  ;;  %3381 = vmatprep.subr.bf16.mxu1 %v6834_v20  ;;  %v6920_v20 = vld [vmem:[%s10972_s1 + $0x734] ss:$8 sps:$4 sm:$0xff]  }
 0x167   :  { %2747 = vmatpush1.bf16.msra.mxu0 %v6836_v21  ;;  %3382 = vmatpush1.bf16.msra.mxu1 %v6836_v21  ;;  %v6922_v21 = vld [vmem:[%s10972_s1 + $0x730] ss:$8 sps:$4 sm:$0xff]  }
 0x168   :  { %2748 = vmatprep.subr.bf16.mxu0 %v6837_v22  ;;  %3383 = vmatprep.subr.bf16.mxu1 %v6837_v22  ;;  %v6923_v22 = vld [vmem:[%s10972_s1 + $0x744] ss:$8 sps:$4 sm:$0xff]  }
 0x16b   :  { %2749 = vmatpush1.bf16.msra.mxu0 %v6839_v23  ;;  %3384 = vmatpush1.bf16.msra.mxu1 %v6839_v23  ;;  %v6925_v23 = vld [vmem:[%s10972_s1 + $0x740] ss:$8 sps:$4 sm:$0xff]  }
 0x16c   :  { %2750 = vmatprep.subr.bf16.mxu0 %v6840_v24  ;;  %3385 = vmatprep.subr.bf16.mxu1 %v6840_v24  ;;  %v6926_v24 = vld [vmem:[%s10972_s1 + $0x754] ss:$8 sps:$4 sm:$0xff]  }
 0x16f   :  { %2751 = vmatpush1.bf16.msra.mxu0 %v6842_v25  ;;  %3386 = vmatpush1.bf16.msra.mxu1 %v6842_v25  ;;  %v6928_v25 = vld [vmem:[%s10972_s1 + $0x750] ss:$8 sps:$4 sm:$0xff]  }
 0x170   :  { %2752 = vmatprep.subr.bf16.mxu0 %v6843_v26  ;;  %3387 = vmatprep.subr.bf16.mxu1 %v6843_v26  ;;  %v6929_v26 = vld [vmem:[%s10972_s1 + $0x764] ss:$8 sps:$4 sm:$0xff]  }
 0x173   :  { %2753 = vmatpush1.bf16.msra.mxu0 %v6845_v27  ;;  %3388 = vmatpush1.bf16.msra.mxu1 %v6845_v27  ;;  %v6931_v27 = vld [vmem:[%s10972_s1 + $0x760] ss:$8 sps:$4 sm:$0xff]  }
 0x174   :  { %2754 = vmatprep.subr.bf16.mxu0 %v6846_v28  ;;  %3389 = vmatprep.subr.bf16.mxu1 %v6846_v28  ;;  %v6932_v28 = vld [vmem:[%s10972_s1 + $0x774] ss:$8 sps:$4 sm:$0xff]  }
 0x177   :  { %2755 = vmatpush1.bf16.msra.mxu0 %v6848_v29  ;;  %3390 = vmatpush1.bf16.msra.mxu1 %v6848_v29  ;;  %v6934_v29 = vld [vmem:[%s10972_s1 + $0x770] ss:$8 sps:$4 sm:$0xff]  }
 0x178   :  { %2756 = vmatprep.subr.bf16.mxu0 %v6849_v30  ;;  %3391 = vmatprep.subr.bf16.mxu1 %v6849_v30  ;;  %v6935_v30 = vld [vmem:[%s10972_s1 + $0x784] ss:$8 sps:$4 sm:$0xff]  }
 0x17b   :  { %2757 = vmatpush1.bf16.msra.mxu0 %v6851_v31  ;;  %3392 = vmatpush1.bf16.msra.mxu1 %v6851_v31  ;;  %v6937_v31 = vld [vmem:[%s10972_s1 + $0x780] ss:$8 sps:$4 sm:$0xff]  }
 0x17c   :  { %2758 = vmatprep.subr.bf16.mxu0 %v6852_v32  ;;  %3393 = vmatprep.subr.bf16.mxu1 %v6852_v32  ;;  %v6938_v32 = vld [vmem:[%s10972_s1 + $0x794] ss:$8 sps:$4 sm:$0xff]  }
 0x17f   :  { %2759 = vmatpush1.bf16.msra.mxu0 %v6854_v33  ;;  %3394 = vmatpush1.bf16.msra.mxu1 %v6854_v33  ;;  %v6940_v33 = vld [vmem:[%s10972_s1 + $0x790] ss:$8 sps:$4 sm:$0xff]  }
 0x180   :  { %2769 = vmatprep.subr.bf16.mxu0 %v6857_v34  ;;  %3404 = vmatprep.subr.bf16.mxu1 %v6857_v34  ;;  %v6941_v34 = vld [vmem:[%s10972_s1 + $0x7a4] ss:$8 sps:$4 sm:$0xff]  }
 0x182   :  { %2761 = vmatmul.mubr.bf16.vlgmr.msra.gmra.mrb[0].mxu0 %v5459_v35  ;;  %3396 = vmatmul.mubr.bf16.vlgmr.msra.gmra.mrb[0].mxu1 %v5897_v36  ;;  %v6943_v35 = vld [vmem:[%s10972_s1 + $0x7a0] ss:$8 sps:$4 sm:$0xff]   ;;  %v6944_v36 = vld [vmem:[%s10972_s1 + $0x7b4] ss:$8 sps:$4 sm:$0xff]  }
 0x183   :  { %2770 = vmatpush1.bf16.msra.mxu0 %v6861_v39  ;;  %3405 = vmatpush1.bf16.msra.mxu1 %v6861_v39  ;;  %v6949_v39 = vld [vmem:[%s10972_s1 + $0x7c0] ss:$8 sps:$4 sm:$0xff]  }
 0x184   :  { %2771 = vmatprep.subr.bf16.mxu0 %v6862_v40  ;;  %3406 = vmatprep.subr.bf16.mxu1 %v6862_v40  ;;  %v6950_v40 = vld [vmem:[%s10972_s1 + $0x7d4] ss:$8 sps:$4 sm:$0xff]  }
 0x185   :  { %2801 = vmatprep.mubr.bf16.mxu0 %v5462_v41  ;;  %3436 = vmatprep.mubr.bf16.mxu1 %v5900_v42  ;;  %v6952_v41 = vld [vmem:[%s10972_s1 + $0x7d0] ss:$8 sps:$4 sm:$0xff]   ;;  %v6953_v42 = vld [vmem:[%s10972_s1 + $0x7e4] ss:$8 sps:$4 sm:$0xff]  }
 0x187   :  { %2772 = vmatpush1.bf16.msra.mxu0 %v6864_v43  ;;  %3407 = vmatpush1.bf16.msra.mxu1 %v6864_v43  ;;  %v6955_v43 = vld [vmem:[%s10972_s1 + $0x7e0] ss:$8 sps:$4 sm:$0xff]  }
 0x188   :  { %2773 = vmatprep.subr.bf16.mxu0 %v6865_v44  ;;  %3408 = vmatprep.subr.bf16.mxu1 %v6865_v44  ;;  %v6956_v44 = vld [vmem:[%s10972_s1 + $0x7f4] ss:$8 sps:$4 sm:$0xff]  }
 0x18b   :  { %2774 = vmatpush1.bf16.msra.mxu0 %v6867_v45  ;;  %3409 = vmatpush1.bf16.msra.mxu1 %v6867_v45  ;;  %v6958_v45 = vld [vmem:[%s10972_s1 + $0x7f0] ss:$8 sps:$4 sm:$0xff]  }
 0x18c   :  { %2775 = vmatprep.subr.bf16.mxu0 %v6868_v46  ;;  %3410 = vmatprep.subr.bf16.mxu1 %v6868_v46  ;;  %v6961_v46 = vld [vmem:[%s10972_s1 + $0x804] ss:$8 sps:$4 sm:$0xff]  }
 0x18f   :  { %2776 = vmatpush1.bf16.msra.mxu0 %v6870_v47  ;;  %3411 = vmatpush1.bf16.msra.mxu1 %v6870_v47  ;;  %v5463_v47 = vcombine.low %v8507_v11, %v8507_v11  ;;  %v6998_v11 = vld [vmem:[%s10972_s1 + $0x8b0] ss:$8 sps:$4 sm:$0xff]  }
 0x190   :  { %2777 = vmatprep.subr.bf16.mxu0 %v6871_v48  ;;  %3412 = vmatprep.subr.bf16.mxu1 %v6871_v48  ;;  %v5901_v48 = vcombine.low %v8512_v12, %v8512_v12  ;;  %v6999_v12 = vld [vmem:[%s10972_s1 + $0x8c4] ss:$8 sps:$4 sm:$0xff]  }
 0x193   :  { %2778 = vmatpush1.bf16.msra.mxu0 %v6873_v49  ;;  %3413 = vmatpush1.bf16.msra.mxu1 %v6873_v49  ;;  %v8621_v49 = vld [vmem:[%s10971_s0 + $0x40] sm:$0xff] }
 0x194   :  { %2779 = vmatprep.subr.bf16.mxu0 %v6874_v50  ;;  %3414 = vmatprep.subr.bf16.mxu1 %v6874_v50  ;;  %v8626_v50 = vld [vmem:[%s10971_s0 + $0xa4] sm:$0xff] }
 0x197   :  { %2780 = vmatpush1.bf16.msra.mxu0 %v6876_v51  ;;  %3415 = vmatpush1.bf16.msra.mxu1 %v6876_v51  ;;  %v6965_v51 = vld [vmem:[%s10972_s1 + $0x800] ss:$8 sps:$4 sm:$0xff]  }
 0x198   :  { %2781 = vmatprep.subr.bf16.mxu0 %v6877_v52  ;;  %3416 = vmatprep.subr.bf16.mxu1 %v6877_v52  ;;  %v6966_v52 = vld [vmem:[%s10972_s1 + $0x814] ss:$8 sps:$4 sm:$0xff]  }
 0x19b   :  { %2782 = vmatpush1.bf16.msra.mxu0 %v6879_v53  ;;  %3417 = vmatpush1.bf16.msra.mxu1 %v6879_v53  ;;  %v5466_v53 = vcombine.high %v8621_v49, %v8621_v49 }
 0x19c   :  { %2783 = vmatprep.subr.bf16.mxu0 %v6880_v54  ;;  %3418 = vmatprep.subr.bf16.mxu1 %v6880_v54  ;;  %v5904_v54 = vcombine.high %v8626_v50, %v8626_v50 }
 0x19f   :  { %2784 = vmatpush1.bf16.msra.mxu0 %v6882_v55  ;;  %3419 = vmatpush1.bf16.msra.mxu1 %v6882_v55  ;;  %v6968_v55 = vld [vmem:[%s10972_s1 + $0x810] ss:$8 sps:$4 sm:$0xff]  }
 0x1a0   :  { %2785 = vmatprep.subr.bf16.mxu0 %v6883_v56  ;;  %3420 = vmatprep.subr.bf16.mxu1 %v6883_v56  ;;  %v6969_v56 = vld [vmem:[%s10972_s1 + $0x824] ss:$8 sps:$4 sm:$0xff]  }
 0x1a3   :  { %2786 = vmatpush1.bf16.msra.mxu0 %v6885_v57  ;;  %3421 = vmatpush1.bf16.msra.mxu1 %v6885_v57  ;;  %v6971_v57 = vld [vmem:[%s10972_s1 + $0x820] ss:$8 sps:$4 sm:$0xff]  }
 0x1a4   :  { %2787 = vmatprep.subr.bf16.mxu0 %v6886_v58  ;;  %3422 = vmatprep.subr.bf16.mxu1 %v6886_v58  ;;  %v6972_v58 = vld [vmem:[%s10972_s1 + $0x834] ss:$8 sps:$4 sm:$0xff]  }
 0x1a7   :  { %2788 = vmatpush1.bf16.msra.mxu0 %v6888_v59  ;;  %3423 = vmatpush1.bf16.msra.mxu1 %v6888_v59  ;;  %v6974_v59 = vld [vmem:[%s10972_s1 + $0x830] ss:$8 sps:$4 sm:$0xff]  }
 0x1a8   :  { %2789 = vmatprep.subr.bf16.mxu0 %v6889_v60  ;;  %3424 = vmatprep.subr.bf16.mxu1 %v6889_v60  ;;  %v6975_v60 = vld [vmem:[%s10972_s1 + $0x844] ss:$8 sps:$4 sm:$0xff]  }
 0x1ab   :  { %2790 = vmatpush1.bf16.msra.mxu0 %v6891_v61  ;;  %3425 = vmatpush1.bf16.msra.mxu1 %v6891_v61  ;;  %v6977_v61 = vld [vmem:[%s10972_s1 + $0x840] ss:$8 sps:$4 sm:$0xff]  }
 0x1ac   :  { %2791 = vmatprep.subr.bf16.mxu0 %v6892_v62  ;;  %3426 = vmatprep.subr.bf16.mxu1 %v6892_v62  ;;  %v6978_v62 = vld [vmem:[%s10972_s1 + $0x854] ss:$8 sps:$4 sm:$0xff]  }
 0x1af   :  { %2792 = vmatpush1.bf16.msra.mxu0 %v6894_v63  ;;  %3427 = vmatpush1.bf16.msra.mxu1 %v6894_v63  ;;  %v6980_v63 = vld [vmem:[%s10972_s1 + $0x850] ss:$8 sps:$4 sm:$0xff]  }
 0x1b0   :  { %2793 = vmatprep.subr.bf16.mxu0 %v6895_v0  ;;  %3428 = vmatprep.subr.bf16.mxu1 %v6895_v0  ;;  %v6981_v0 = vld [vmem:[%s10972_s1 + $0x864] ss:$8 sps:$4 sm:$0xff]  }
 0x1b3   :  { %2794 = vmatpush1.bf16.msra.mxu0 %v6897_v1  ;;  %3429 = vmatpush1.bf16.msra.mxu1 %v6897_v1  ;;  %v6983_v1 = vld [vmem:[%s10972_s1 + $0x860] ss:$8 sps:$4 sm:$0xff]  }
 0x1b4   :  { %2795 = vmatprep.subr.bf16.mxu0 %v6898_v2  ;;  %3430 = vmatprep.subr.bf16.mxu1 %v6898_v2  ;;  %v6984_v2 = vld [vmem:[%s10972_s1 + $0x874] ss:$8 sps:$4 sm:$0xff]  }
 0x1b7   :  { %2796 = vmatpush1.bf16.msra.mxu0 %v6900_v3  ;;  %3431 = vmatpush1.bf16.msra.mxu1 %v6900_v3  ;;  %v6986_v3 = vld [vmem:[%s10972_s1 + $0x870] ss:$8 sps:$4 sm:$0xff]  }
 0x1b8   :  { %2797 = vmatprep.subr.bf16.mxu0 %v6901_v4  ;;  %3432 = vmatprep.subr.bf16.mxu1 %v6901_v4  ;;  %v6987_v4 = vld [vmem:[%s10972_s1 + $0x884] ss:$8 sps:$4 sm:$0xff]  }
 0x1bb   :  { %2798 = vmatpush1.bf16.msra.mxu0 %v6903_v5  ;;  %3433 = vmatpush1.bf16.msra.mxu1 %v6903_v5  ;;  %v6989_v5 = vld [vmem:[%s10972_s1 + $0x880] ss:$8 sps:$4 sm:$0xff]  }
 0x1bc   :  { %2799 = vmatprep.subr.bf16.mxu0 %v6904_v6  ;;  %3434 = vmatprep.subr.bf16.mxu1 %v6904_v6  ;;  %v6990_v6 = vld [vmem:[%s10972_s1 + $0x894] ss:$8 sps:$4 sm:$0xff]  }
 0x1bf   :  { %2800 = vmatpush1.bf16.msra.mxu0 %v6906_v7  ;;  %3435 = vmatpush1.bf16.msra.mxu1 %v6906_v7  ;;  %v6992_v7 = vld [vmem:[%s10972_s1 + $0x890] ss:$8 sps:$4 sm:$0xff]  }
 0x1c0   :  { %2810 = vmatprep.subr.bf16.mxu0 %v6909_v8  ;;  %3445 = vmatprep.subr.bf16.mxu1 %v6909_v8  ;;  %v6993_v8 = vld [vmem:[%s10972_s1 + $0x8a4] ss:$8 sps:$4 sm:$0xff]  }
 0x1c2   :  { %2802 = vmatmul.mubr.bf16.vlgmr.msra.gmra.mrb[0].mxu0 %v5461_v9  ;;  %3437 = vmatmul.mubr.bf16.vlgmr.msra.gmra.mrb[0].mxu1 %v5899_v10  ;;  %v6995_v9 = vld [vmem:[%s10972_s1 + $0x8a0] ss:$8 sps:$4 sm:$0xff]   ;;  %v6996_v10 = vld [vmem:[%s10972_s1 + $0x8b4] ss:$8 sps:$4 sm:$0xff]  }
 0x1c3   :  { %2811 = vmatpush1.bf16.msra.mxu0 %v6913_v13  ;;  %3446 = vmatpush1.bf16.msra.mxu1 %v6913_v13  ;;  %v7001_v13 = vld [vmem:[%s10972_s1 + $0x8c0] ss:$8 sps:$4 sm:$0xff]  }
 0x1c4   :  { %2812 = vmatprep.subr.bf16.mxu0 %v6914_v14  ;;  %3447 = vmatprep.subr.bf16.mxu1 %v6914_v14  ;;  %v7002_v14 = vld [vmem:[%s10972_s1 + $0x8d4] ss:$8 sps:$4 sm:$0xff]  }
 0x1c5   :  { %2842 = vmatprep.mubr.bf16.mxu0 %v5464_v15  ;;  %3477 = vmatprep.mubr.bf16.mxu1 %v5902_v16  ;;  %v7004_v15 = vld [vmem:[%s10972_s1 + $0x8d0] ss:$8 sps:$4 sm:$0xff]   ;;  %v7005_v16 = vld [vmem:[%s10972_s1 + $0x8e4] ss:$8 sps:$4 sm:$0xff]  }
 0x1c7   :  { %2813 = vmatpush1.bf16.msra.mxu0 %v6916_v17  ;;  %3448 = vmatpush1.bf16.msra.mxu1 %v6916_v17  ;;  %v7007_v17 = vld [vmem:[%s10972_s1 + $0x8e0] ss:$8 sps:$4 sm:$0xff]  }
 0x1c8   :  { %2814 = vmatprep.subr.bf16.mxu0 %v6917_v18  ;;  %3449 = vmatprep.subr.bf16.mxu1 %v6917_v18  ;;  %v7008_v18 = vld [vmem:[%s10972_s1 + $0x8f4] ss:$8 sps:$4 sm:$0xff]  }
 0x1cb   :  { %2815 = vmatpush1.bf16.msra.mxu0 %v6919_v19  ;;  %3450 = vmatpush1.bf16.msra.mxu1 %v6919_v19  ;;  %v7010_v19 = vld [vmem:[%s10972_s1 + $0x8f0] ss:$8 sps:$4 sm:$0xff]  }
 0x1cc   :  { %2816 = vmatprep.subr.bf16.mxu0 %v6920_v20  ;;  %3451 = vmatprep.subr.bf16.mxu1 %v6920_v20  ;;  %v7013_v20 = vld [vmem:[%s10972_s1 + $0x904] ss:$8 sps:$4 sm:$0xff]  }
 0x1cf   :  { %2817 = vmatpush1.bf16.msra.mxu0 %v6922_v21  ;;  %3452 = vmatpush1.bf16.msra.mxu1 %v6922_v21  ;;  %v5465_v21 = vcombine.low %v8621_v49, %v8621_v49  ;;  %v7050_v49 = vld [vmem:[%s10972_s1 + $0x9b0] ss:$8 sps:$4 sm:$0xff]  }
 0x1d0   :  { %2818 = vmatprep.subr.bf16.mxu0 %v6923_v22  ;;  %3453 = vmatprep.subr.bf16.mxu1 %v6923_v22  ;;  %v5903_v22 = vcombine.low %v8626_v50, %v8626_v50  ;;  %v7051_v50 = vld [vmem:[%s10972_s1 + $0x9c4] ss:$8 sps:$4 sm:$0xff]  }
 0x1d3   :  { %2819 = vmatpush1.bf16.msra.mxu0 %v6925_v23  ;;  %3454 = vmatpush1.bf16.msra.mxu1 %v6925_v23  ;;  %v8735_v23 = vld [vmem:[%s10971_s0 + $0x48] sm:$0xff] }
 0x1d4   :  { %2820 = vmatprep.subr.bf16.mxu0 %v6926_v24  ;;  %3455 = vmatprep.subr.bf16.mxu1 %v6926_v24  ;;  %v8740_v24 = vld [vmem:[%s10971_s0 + $0xac] sm:$0xff] }
 0x1d7   :  { %2821 = vmatpush1.bf16.msra.mxu0 %v6928_v25  ;;  %3456 = vmatpush1.bf16.msra.mxu1 %v6928_v25  ;;  %v7017_v25 = vld [vmem:[%s10972_s1 + $0x900] ss:$8 sps:$4 sm:$0xff]  }
 0x1d8   :  { %2822 = vmatprep.subr.bf16.mxu0 %v6929_v26  ;;  %3457 = vmatprep.subr.bf16.mxu1 %v6929_v26  ;;  %v7018_v26 = vld [vmem:[%s10972_s1 + $0x914] ss:$8 sps:$4 sm:$0xff]  }
 0x1db   :  { %2823 = vmatpush1.bf16.msra.mxu0 %v6931_v27  ;;  %3458 = vmatpush1.bf16.msra.mxu1 %v6931_v27  ;;  %v5468_v27 = vcombine.high %v8735_v23, %v8735_v23 }
 0x1dc   :  { %2824 = vmatprep.subr.bf16.mxu0 %v6932_v28  ;;  %3459 = vmatprep.subr.bf16.mxu1 %v6932_v28  ;;  %v5906_v28 = vcombine.high %v8740_v24, %v8740_v24 }
 0x1df   :  { %2825 = vmatpush1.bf16.msra.mxu0 %v6934_v29  ;;  %3460 = vmatpush1.bf16.msra.mxu1 %v6934_v29  ;;  %v7020_v29 = vld [vmem:[%s10972_s1 + $0x910] ss:$8 sps:$4 sm:$0xff]  }
 0x1e0   :  { %2826 = vmatprep.subr.bf16.mxu0 %v6935_v30  ;;  %3461 = vmatprep.subr.bf16.mxu1 %v6935_v30  ;;  %v7021_v30 = vld [vmem:[%s10972_s1 + $0x924] ss:$8 sps:$4 sm:$0xff]  }
 0x1e3   :  { %2827 = vmatpush1.bf16.msra.mxu0 %v6937_v31  ;;  %3462 = vmatpush1.bf16.msra.mxu1 %v6937_v31  ;;  %v7023_v31 = vld [vmem:[%s10972_s1 + $0x920] ss:$8 sps:$4 sm:$0xff]  }
 0x1e4   :  { %2828 = vmatprep.subr.bf16.mxu0 %v6938_v32  ;;  %3463 = vmatprep.subr.bf16.mxu1 %v6938_v32  ;;  %v7024_v32 = vld [vmem:[%s10972_s1 + $0x934] ss:$8 sps:$4 sm:$0xff]  }
 0x1e7   :  { %2829 = vmatpush1.bf16.msra.mxu0 %v6940_v33  ;;  %3464 = vmatpush1.bf16.msra.mxu1 %v6940_v33  ;;  %v7026_v33 = vld [vmem:[%s10972_s1 + $0x930] ss:$8 sps:$4 sm:$0xff]  }
 0x1e8   :  { %2830 = vmatprep.subr.bf16.mxu0 %v6941_v34  ;;  %3465 = vmatprep.subr.bf16.mxu1 %v6941_v34  ;;  %v7027_v34 = vld [vmem:[%s10972_s1 + $0x944] ss:$8 sps:$4 sm:$0xff]  }
 0x1eb   :  { %2831 = vmatpush1.bf16.msra.mxu0 %v6943_v35  ;;  %3466 = vmatpush1.bf16.msra.mxu1 %v6943_v35  ;;  %v7029_v35 = vld [vmem:[%s10972_s1 + $0x940] ss:$8 sps:$4 sm:$0xff]  }
 0x1ec   :  { %2832 = vmatprep.subr.bf16.mxu0 %v6944_v36  ;;  %3467 = vmatprep.subr.bf16.mxu1 %v6944_v36  ;;  %v7030_v36 = vld [vmem:[%s10972_s1 + $0x954] ss:$8 sps:$4 sm:$0xff]  }
 0x1ef   :  { %2833 = vmatpush1.bf16.msra.mxu0 %v6946_v37  ;;  %3468 = vmatpush1.bf16.msra.mxu1 %v6946_v37  ;;  %v7032_v37 = vld [vmem:[%s10972_s1 + $0x950] ss:$8 sps:$4 sm:$0xff]  }
 0x1f0   :  { %2834 = vmatprep.subr.bf16.mxu0 %v6947_v38  ;;  %3469 = vmatprep.subr.bf16.mxu1 %v6947_v38  ;;  %v7033_v38 = vld [vmem:[%s10972_s1 + $0x964] ss:$8 sps:$4 sm:$0xff]  }
 0x1f3   :  { %2835 = vmatpush1.bf16.msra.mxu0 %v6949_v39  ;;  %3470 = vmatpush1.bf16.msra.mxu1 %v6949_v39  ;;  %v7035_v39 = vld [vmem:[%s10972_s1 + $0x960] ss:$8 sps:$4 sm:$0xff]  }
 0x1f4   :  { %2836 = vmatprep.subr.bf16.mxu0 %v6950_v40  ;;  %3471 = vmatprep.subr.bf16.mxu1 %v6950_v40  ;;  %v7036_v40 = vld [vmem:[%s10972_s1 + $0x974] ss:$8 sps:$4 sm:$0xff]  }
 0x1f7   :  { %2837 = vmatpush1.bf16.msra.mxu0 %v6952_v41  ;;  %3472 = vmatpush1.bf16.msra.mxu1 %v6952_v41  ;;  %v7038_v41 = vld [vmem:[%s10972_s1 + $0x970] ss:$8 sps:$4 sm:$0xff]  }
 0x1f8   :  { %2838 = vmatprep.subr.bf16.mxu0 %v6953_v42  ;;  %3473 = vmatprep.subr.bf16.mxu1 %v6953_v42  ;;  %v7039_v42 = vld [vmem:[%s10972_s1 + $0x984] ss:$8 sps:$4 sm:$0xff]  }
 0x1fb   :  { %2839 = vmatpush1.bf16.msra.mxu0 %v6955_v43  ;;  %3474 = vmatpush1.bf16.msra.mxu1 %v6955_v43  ;;  %v7041_v43 = vld [vmem:[%s10972_s1 + $0x980] ss:$8 sps:$4 sm:$0xff]  }
 0x1fc   :  { %2840 = vmatprep.subr.bf16.mxu0 %v6956_v44  ;;  %3475 = vmatprep.subr.bf16.mxu1 %v6956_v44  ;;  %v7042_v44 = vld [vmem:[%s10972_s1 + $0x994] ss:$8 sps:$4 sm:$0xff]  }
 0x1ff   :  { %2841 = vmatpush1.bf16.msra.mxu0 %v6958_v45  ;;  %3476 = vmatpush1.bf16.msra.mxu1 %v6958_v45  ;;  %v7044_v45 = vld [vmem:[%s10972_s1 + $0x990] ss:$8 sps:$4 sm:$0xff]  }
 0x200   :  { %2851 = vmatprep.subr.bf16.mxu0 %v6961_v46  ;;  %3486 = vmatprep.subr.bf16.mxu1 %v6961_v46  ;;  %v7045_v46 = vld [vmem:[%s10972_s1 + $0x9a4] ss:$8 sps:$4 sm:$0xff]  }
 0x202   :  { %2843 = vmatmul.mubr.bf16.vlgmr.msra.gmra.mrb[0].mxu0 %v5463_v47  ;;  %3478 = vmatmul.mubr.bf16.vlgmr.msra.gmra.mrb[0].mxu1 %v5901_v48  ;;  %v7047_v47 = vld [vmem:[%s10972_s1 + $0x9a0] ss:$8 sps:$4 sm:$0xff]   ;;  %v7048_v48 = vld [vmem:[%s10972_s1 + $0x9b4] ss:$8 sps:$4 sm:$0xff]  }
 0x203   :  { %2852 = vmatpush1.bf16.msra.mxu0 %v6965_v51  ;;  %3487 = vmatpush1.bf16.msra.mxu1 %v6965_v51  ;;  %v7053_v51 = vld [vmem:[%s10972_s1 + $0x9c0] ss:$8 sps:$4 sm:$0xff]  }
 0x204   :  { %2853 = vmatprep.subr.bf16.mxu0 %v6966_v52  ;;  %3488 = vmatprep.subr.bf16.mxu1 %v6966_v52  ;;  %v7054_v52 = vld [vmem:[%s10972_s1 + $0x9d4] ss:$8 sps:$4 sm:$0xff]  }
 0x205   :  { %2883 = vmatprep.mubr.bf16.mxu0 %v5466_v53  ;;  %3518 = vmatprep.mubr.bf16.mxu1 %v5904_v54  ;;  %v7056_v53 = vld [vmem:[%s10972_s1 + $0x9d0] ss:$8 sps:$4 sm:$0xff]   ;;  %v7057_v54 = vld [vmem:[%s10972_s1 + $0x9e4] ss:$8 sps:$4 sm:$0xff]  }
 0x207   :  { %2854 = vmatpush1.bf16.msra.mxu0 %v6968_v55  ;;  %3489 = vmatpush1.bf16.msra.mxu1 %v6968_v55  ;;  %v7059_v55 = vld [vmem:[%s10972_s1 + $0x9e0] ss:$8 sps:$4 sm:$0xff]  }
 0x208   :  { %2855 = vmatprep.subr.bf16.mxu0 %v6969_v56  ;;  %3490 = vmatprep.subr.bf16.mxu1 %v6969_v56  ;;  %v7060_v56 = vld [vmem:[%s10972_s1 + $0x9f4] ss:$8 sps:$4 sm:$0xff]  }
 0x20b   :  { %2856 = vmatpush1.bf16.msra.mxu0 %v6971_v57  ;;  %3491 = vmatpush1.bf16.msra.mxu1 %v6971_v57  ;;  %v7062_v57 = vld [vmem:[%s10972_s1 + $0x9f0] ss:$8 sps:$4 sm:$0xff]  }
 0x20c   :  { %2857 = vmatprep.subr.bf16.mxu0 %v6972_v58  ;;  %3492 = vmatprep.subr.bf16.mxu1 %v6972_v58  ;;  %v7065_v58 = vld [vmem:[%s10972_s1 + $0xa04] ss:$8 sps:$4 sm:$0xff]  }
 0x20f   :  { %2858 = vmatpush1.bf16.msra.mxu0 %v6974_v59  ;;  %3493 = vmatpush1.bf16.msra.mxu1 %v6974_v59  ;;  %v5467_v59 = vcombine.low %v8735_v23, %v8735_v23  ;;  %v7102_v23 = vld [vmem:[%s10972_s1 + $0xab0] ss:$8 sps:$4 sm:$0xff]  }
 0x210   :  { %2859 = vmatprep.subr.bf16.mxu0 %v6975_v60  ;;  %3494 = vmatprep.subr.bf16.mxu1 %v6975_v60  ;;  %v5905_v60 = vcombine.low %v8740_v24, %v8740_v24  ;;  %v7103_v24 = vld [vmem:[%s10972_s1 + $0xac4] ss:$8 sps:$4 sm:$0xff]  }
 0x213   :  { %2860 = vmatpush1.bf16.msra.mxu0 %v6977_v61  ;;  %3495 = vmatpush1.bf16.msra.mxu1 %v6977_v61  ;;  %v8849_v61 = vld [vmem:[%s10971_s0 + $0x50] sm:$0xff] }
 0x214   :  { %2861 = vmatprep.subr.bf16.mxu0 %v6978_v62  ;;  %3496 = vmatprep.subr.bf16.mxu1 %v6978_v62  ;;  %v8854_v62 = vld [vmem:[%s10971_s0 + $0xb4] sm:$0xff] }
 0x217   :  { %2862 = vmatpush1.bf16.msra.mxu0 %v6980_v63  ;;  %3497 = vmatpush1.bf16.msra.mxu1 %v6980_v63  ;;  %v7069_v63 = vld [vmem:[%s10972_s1 + $0xa00] ss:$8 sps:$4 sm:$0xff]  }
 0x218   :  { %2863 = vmatprep.subr.bf16.mxu0 %v6981_v0  ;;  %3498 = vmatprep.subr.bf16.mxu1 %v6981_v0  ;;  %v7070_v0 = vld [vmem:[%s10972_s1 + $0xa14] ss:$8 sps:$4 sm:$0xff]  }
 0x21b   :  { %2864 = vmatpush1.bf16.msra.mxu0 %v6983_v1  ;;  %3499 = vmatpush1.bf16.msra.mxu1 %v6983_v1  ;;  %v5470_v1 = vcombine.high %v8849_v61, %v8849_v61 }
 0x21c   :  { %2865 = vmatprep.subr.bf16.mxu0 %v6984_v2  ;;  %3500 = vmatprep.subr.bf16.mxu1 %v6984_v2  ;;  %v5908_v2 = vcombine.high %v8854_v62, %v8854_v62 }
 0x21f   :  { %2866 = vmatpush1.bf16.msra.mxu0 %v6986_v3  ;;  %3501 = vmatpush1.bf16.msra.mxu1 %v6986_v3  ;;  %v7072_v3 = vld [vmem:[%s10972_s1 + $0xa10] ss:$8 sps:$4 sm:$0xff]  }
 0x220   :  { %2867 = vmatprep.subr.bf16.mxu0 %v6987_v4  ;;  %3502 = vmatprep.subr.bf16.mxu1 %v6987_v4  ;;  %v7073_v4 = vld [vmem:[%s10972_s1 + $0xa24] ss:$8 sps:$4 sm:$0xff]  }
 0x223   :  { %2868 = vmatpush1.bf16.msra.mxu0 %v6989_v5  ;;  %3503 = vmatpush1.bf16.msra.mxu1 %v6989_v5  ;;  %v7075_v5 = vld [vmem:[%s10972_s1 + $0xa20] ss:$8 sps:$4 sm:$0xff]  }
 0x224   :  { %2869 = vmatprep.subr.bf16.mxu0 %v6990_v6  ;;  %3504 = vmatprep.subr.bf16.mxu1 %v6990_v6  ;;  %v7076_v6 = vld [vmem:[%s10972_s1 + $0xa34] ss:$8 sps:$4 sm:$0xff]  }
 0x227   :  { %2870 = vmatpush1.bf16.msra.mxu0 %v6992_v7  ;;  %3505 = vmatpush1.bf16.msra.mxu1 %v6992_v7  ;;  %v7078_v7 = vld [vmem:[%s10972_s1 + $0xa30] ss:$8 sps:$4 sm:$0xff]  }
 0x228   :  { %2871 = vmatprep.subr.bf16.mxu0 %v6993_v8  ;;  %3506 = vmatprep.subr.bf16.mxu1 %v6993_v8  ;;  %v7079_v8 = vld [vmem:[%s10972_s1 + $0xa44] ss:$8 sps:$4 sm:$0xff]  }
 0x22b   :  { %2872 = vmatpush1.bf16.msra.mxu0 %v6995_v9  ;;  %3507 = vmatpush1.bf16.msra.mxu1 %v6995_v9  ;;  %v7081_v9 = vld [vmem:[%s10972_s1 + $0xa40] ss:$8 sps:$4 sm:$0xff]  }
 0x22c   :  { %2873 = vmatprep.subr.bf16.mxu0 %v6996_v10  ;;  %3508 = vmatprep.subr.bf16.mxu1 %v6996_v10  ;;  %v7082_v10 = vld [vmem:[%s10972_s1 + $0xa54] ss:$8 sps:$4 sm:$0xff]  }
 0x22f   :  { %2874 = vmatpush1.bf16.msra.mxu0 %v6998_v11  ;;  %3509 = vmatpush1.bf16.msra.mxu1 %v6998_v11  ;;  %v7084_v11 = vld [vmem:[%s10972_s1 + $0xa50] ss:$8 sps:$4 sm:$0xff]  }
 0x230   :  { %2875 = vmatprep.subr.bf16.mxu0 %v6999_v12  ;;  %3510 = vmatprep.subr.bf16.mxu1 %v6999_v12  ;;  %v7085_v12 = vld [vmem:[%s10972_s1 + $0xa64] ss:$8 sps:$4 sm:$0xff]  }
 0x233   :  { %2876 = vmatpush1.bf16.msra.mxu0 %v7001_v13  ;;  %3511 = vmatpush1.bf16.msra.mxu1 %v7001_v13  ;;  %v7087_v13 = vld [vmem:[%s10972_s1 + $0xa60] ss:$8 sps:$4 sm:$0xff]  }
 0x234   :  { %2877 = vmatprep.subr.bf16.mxu0 %v7002_v14  ;;  %3512 = vmatprep.subr.bf16.mxu1 %v7002_v14  ;;  %v7088_v14 = vld [vmem:[%s10972_s1 + $0xa74] ss:$8 sps:$4 sm:$0xff]  }
 0x237   :  { %2878 = vmatpush1.bf16.msra.mxu0 %v7004_v15  ;;  %3513 = vmatpush1.bf16.msra.mxu1 %v7004_v15  ;;  %v7090_v15 = vld [vmem:[%s10972_s1 + $0xa70] ss:$8 sps:$4 sm:$0xff]  }
 0x238   :  { %2879 = vmatprep.subr.bf16.mxu0 %v7005_v16  ;;  %3514 = vmatprep.subr.bf16.mxu1 %v7005_v16  ;;  %v7091_v16 = vld [vmem:[%s10972_s1 + $0xa84] ss:$8 sps:$4 sm:$0xff]  }
 0x23b   :  { %2880 = vmatpush1.bf16.msra.mxu0 %v7007_v17  ;;  %3515 = vmatpush1.bf16.msra.mxu1 %v7007_v17  ;;  %v7093_v17 = vld [vmem:[%s10972_s1 + $0xa80] ss:$8 sps:$4 sm:$0xff]  }
 0x23c   :  { %2881 = vmatprep.subr.bf16.mxu0 %v7008_v18  ;;  %3516 = vmatprep.subr.bf16.mxu1 %v7008_v18  ;;  %v7094_v18 = vld [vmem:[%s10972_s1 + $0xa94] ss:$8 sps:$4 sm:$0xff]  }
 0x23f   :  { %2882 = vmatpush1.bf16.msra.mxu0 %v7010_v19  ;;  %3517 = vmatpush1.bf16.msra.mxu1 %v7010_v19  ;;  %v7096_v19 = vld [vmem:[%s10972_s1 + $0xa90] ss:$8 sps:$4 sm:$0xff]  }
 0x240   :  { %2892 = vmatprep.subr.bf16.mxu0 %v7013_v20  ;;  %3527 = vmatprep.subr.bf16.mxu1 %v7013_v20  ;;  %v7097_v20 = vld [vmem:[%s10972_s1 + $0xaa4] ss:$8 sps:$4 sm:$0xff]  }
 0x242   :  { %2884 = vmatmul.mubr.bf16.vlgmr.msra.gmra.mrb[0].mxu0 %v5465_v21  ;;  %3519 = vmatmul.mubr.bf16.vlgmr.msra.gmra.mrb[0].mxu1 %v5903_v22  ;;  %v7099_v21 = vld [vmem:[%s10972_s1 + $0xaa0] ss:$8 sps:$4 sm:$0xff]   ;;  %v7100_v22 = vld [vmem:[%s10972_s1 + $0xab4] ss:$8 sps:$4 sm:$0xff]  }
 0x243   :  { %2893 = vmatpush1.bf16.msra.mxu0 %v7017_v25  ;;  %3528 = vmatpush1.bf16.msra.mxu1 %v7017_v25  ;;  %v7105_v25 = vld [vmem:[%s10972_s1 + $0xac0] ss:$8 sps:$4 sm:$0xff]  }
 0x244   :  { %2894 = vmatprep.subr.bf16.mxu0 %v7018_v26  ;;  %3529 = vmatprep.subr.bf16.mxu1 %v7018_v26  ;;  %v7106_v26 = vld [vmem:[%s10972_s1 + $0xad4] ss:$8 sps:$4 sm:$0xff]  }
 0x245   :  { %2924 = vmatprep.mubr.bf16.mxu0 %v5468_v27  ;;  %3559 = vmatprep.mubr.bf16.mxu1 %v5906_v28  ;;  %v7108_v27 = vld [vmem:[%s10972_s1 + $0xad0] ss:$8 sps:$4 sm:$0xff]   ;;  %v7109_v28 = vld [vmem:[%s10972_s1 + $0xae4] ss:$8 sps:$4 sm:$0xff]  }
 0x247   :  { %2895 = vmatpush1.bf16.msra.mxu0 %v7020_v29  ;;  %3530 = vmatpush1.bf16.msra.mxu1 %v7020_v29  ;;  %v7111_v29 = vld [vmem:[%s10972_s1 + $0xae0] ss:$8 sps:$4 sm:$0xff]  }
 0x248   :  { %2896 = vmatprep.subr.bf16.mxu0 %v7021_v30  ;;  %3531 = vmatprep.subr.bf16.mxu1 %v7021_v30  ;;  %v7112_v30 = vld [vmem:[%s10972_s1 + $0xaf4] ss:$8 sps:$4 sm:$0xff]  }
 0x24b   :  { %2897 = vmatpush1.bf16.msra.mxu0 %v7023_v31  ;;  %3532 = vmatpush1.bf16.msra.mxu1 %v7023_v31  ;;  %v7114_v31 = vld [vmem:[%s10972_s1 + $0xaf0] ss:$8 sps:$4 sm:$0xff]  }
 0x24c   :  { %2898 = vmatprep.subr.bf16.mxu0 %v7024_v32  ;;  %3533 = vmatprep.subr.bf16.mxu1 %v7024_v32  ;;  %v7117_v32 = vld [vmem:[%s10972_s1 + $0xb04] ss:$8 sps:$4 sm:$0xff]  }
 0x24f   :  { %2899 = vmatpush1.bf16.msra.mxu0 %v7026_v33  ;;  %3534 = vmatpush1.bf16.msra.mxu1 %v7026_v33  ;;  %v5469_v33 = vcombine.low %v8849_v61, %v8849_v61  ;;  %v7154_v61 = vld [vmem:[%s10972_s1 + $0xbb0] ss:$8 sps:$4 sm:$0xff]  }
 0x250   :  { %2900 = vmatprep.subr.bf16.mxu0 %v7027_v34  ;;  %3535 = vmatprep.subr.bf16.mxu1 %v7027_v34  ;;  %v5907_v34 = vcombine.low %v8854_v62, %v8854_v62  ;;  %v7155_v62 = vld [vmem:[%s10972_s1 + $0xbc4] ss:$8 sps:$4 sm:$0xff]  }
 0x253   :  { %2901 = vmatpush1.bf16.msra.mxu0 %v7029_v35  ;;  %3536 = vmatpush1.bf16.msra.mxu1 %v7029_v35  ;;  %v8963_v35 = vld [vmem:[%s10971_s0 + $0x58] sm:$0xff] }
 0x254   :  { %2902 = vmatprep.subr.bf16.mxu0 %v7030_v36  ;;  %3537 = vmatprep.subr.bf16.mxu1 %v7030_v36  ;;  %v8968_v36 = vld [vmem:[%s10971_s0 + $0xbc] sm:$0xff] }
 0x257   :  { %2903 = vmatpush1.bf16.msra.mxu0 %v7032_v37  ;;  %3538 = vmatpush1.bf16.msra.mxu1 %v7032_v37  ;;  %v7121_v37 = vld [vmem:[%s10972_s1 + $0xb00] ss:$8 sps:$4 sm:$0xff]  }
 0x258   :  { %2904 = vmatprep.subr.bf16.mxu0 %v7033_v38  ;;  %3539 = vmatprep.subr.bf16.mxu1 %v7033_v38  ;;  %v7122_v38 = vld [vmem:[%s10972_s1 + $0xb14] ss:$8 sps:$4 sm:$0xff]  }
 0x25b   :  { %2905 = vmatpush1.bf16.msra.mxu0 %v7035_v39  ;;  %3540 = vmatpush1.bf16.msra.mxu1 %v7035_v39  ;;  %v5472_v39 = vcombine.high %v8963_v35, %v8963_v35 }
 0x25c   :  { %2906 = vmatprep.subr.bf16.mxu0 %v7036_v40  ;;  %3541 = vmatprep.subr.bf16.mxu1 %v7036_v40  ;;  %v5910_v40 = vcombine.high %v8968_v36, %v8968_v36 }
 0x25f   :  { %2907 = vmatpush1.bf16.msra.mxu0 %v7038_v41  ;;  %3542 = vmatpush1.bf16.msra.mxu1 %v7038_v41  ;;  %v7124_v41 = vld [vmem:[%s10972_s1 + $0xb10] ss:$8 sps:$4 sm:$0xff]  }
 0x260   :  { %2908 = vmatprep.subr.bf16.mxu0 %v7039_v42  ;;  %3543 = vmatprep.subr.bf16.mxu1 %v7039_v42  ;;  %v7125_v42 = vld [vmem:[%s10972_s1 + $0xb24] ss:$8 sps:$4 sm:$0xff]  }
 0x263   :  { %2909 = vmatpush1.bf16.msra.mxu0 %v7041_v43  ;;  %3544 = vmatpush1.bf16.msra.mxu1 %v7041_v43  ;;  %v7127_v43 = vld [vmem:[%s10972_s1 + $0xb20] ss:$8 sps:$4 sm:$0xff]  }
 0x264   :  { %2910 = vmatprep.subr.bf16.mxu0 %v7042_v44  ;;  %3545 = vmatprep.subr.bf16.mxu1 %v7042_v44  ;;  %v7128_v44 = vld [vmem:[%s10972_s1 + $0xb34] ss:$8 sps:$4 sm:$0xff]  }
 0x267   :  { %2911 = vmatpush1.bf16.msra.mxu0 %v7044_v45  ;;  %3546 = vmatpush1.bf16.msra.mxu1 %v7044_v45  ;;  %v7130_v45 = vld [vmem:[%s10972_s1 + $0xb30] ss:$8 sps:$4 sm:$0xff]  }
 0x268   :  { %2912 = vmatprep.subr.bf16.mxu0 %v7045_v46  ;;  %3547 = vmatprep.subr.bf16.mxu1 %v7045_v46  ;;  %v7131_v46 = vld [vmem:[%s10972_s1 + $0xb44] ss:$8 sps:$4 sm:$0xff]  }
 0x26b   :  { %2913 = vmatpush1.bf16.msra.mxu0 %v7047_v47  ;;  %3548 = vmatpush1.bf16.msra.mxu1 %v7047_v47  ;;  %v7133_v47 = vld [vmem:[%s10972_s1 + $0xb40] ss:$8 sps:$4 sm:$0xff]  }
 0x26c   :  { %2914 = vmatprep.subr.bf16.mxu0 %v7048_v48  ;;  %3549 = vmatprep.subr.bf16.mxu1 %v7048_v48  ;;  %v7134_v48 = vld [vmem:[%s10972_s1 + $0xb54] ss:$8 sps:$4 sm:$0xff]  }
 0x26f   :  { %2915 = vmatpush1.bf16.msra.mxu0 %v7050_v49  ;;  %3550 = vmatpush1.bf16.msra.mxu1 %v7050_v49  ;;  %v7136_v49 = vld [vmem:[%s10972_s1 + $0xb50] ss:$8 sps:$4 sm:$0xff]  }
 0x270   :  { %2916 = vmatprep.subr.bf16.mxu0 %v7051_v50  ;;  %3551 = vmatprep.subr.bf16.mxu1 %v7051_v50  ;;  %v7137_v50 = vld [vmem:[%s10972_s1 + $0xb64] ss:$8 sps:$4 sm:$0xff]  }
 0x273   :  { %2917 = vmatpush1.bf16.msra.mxu0 %v7053_v51  ;;  %3552 = vmatpush1.bf16.msra.mxu1 %v7053_v51  ;;  %v7139_v51 = vld [vmem:[%s10972_s1 + $0xb60] ss:$8 sps:$4 sm:$0xff]  }
 0x274   :  { %2918 = vmatprep.subr.bf16.mxu0 %v7054_v52  ;;  %3553 = vmatprep.subr.bf16.mxu1 %v7054_v52  ;;  %v7140_v52 = vld [vmem:[%s10972_s1 + $0xb74] ss:$8 sps:$4 sm:$0xff]  }
 0x277   :  { %2919 = vmatpush1.bf16.msra.mxu0 %v7056_v53  ;;  %3554 = vmatpush1.bf16.msra.mxu1 %v7056_v53  ;;  %v7142_v53 = vld [vmem:[%s10972_s1 + $0xb70] ss:$8 sps:$4 sm:$0xff]  }
 0x278   :  { %2920 = vmatprep.subr.bf16.mxu0 %v7057_v54  ;;  %3555 = vmatprep.subr.bf16.mxu1 %v7057_v54  ;;  %v7143_v54 = vld [vmem:[%s10972_s1 + $0xb84] ss:$8 sps:$4 sm:$0xff]  }
 0x27b   :  { %2921 = vmatpush1.bf16.msra.mxu0 %v7059_v55  ;;  %3556 = vmatpush1.bf16.msra.mxu1 %v7059_v55  ;;  %v7145_v55 = vld [vmem:[%s10972_s1 + $0xb80] ss:$8 sps:$4 sm:$0xff]  }
 0x27c   :  { %2922 = vmatprep.subr.bf16.mxu0 %v7060_v56  ;;  %3557 = vmatprep.subr.bf16.mxu1 %v7060_v56  ;;  %v7146_v56 = vld [vmem:[%s10972_s1 + $0xb94] ss:$8 sps:$4 sm:$0xff]  }
 0x27f   :  { %2923 = vmatpush1.bf16.msra.mxu0 %v7062_v57  ;;  %3558 = vmatpush1.bf16.msra.mxu1 %v7062_v57  ;;  %v7148_v57 = vld [vmem:[%s10972_s1 + $0xb90] ss:$8 sps:$4 sm:$0xff]  }
 0x280   :  { %2933 = vmatprep.subr.bf16.mxu0 %v7065_v58  ;;  %3568 = vmatprep.subr.bf16.mxu1 %v7065_v58  ;;  %v7149_v58 = vld [vmem:[%s10972_s1 + $0xba4] ss:$8 sps:$4 sm:$0xff]  }
 0x282   :  { %2925 = vmatmul.mubr.bf16.vlgmr.msra.gmra.mrb[0].mxu0 %v5467_v59  ;;  %3560 = vmatmul.mubr.bf16.vlgmr.msra.gmra.mrb[0].mxu1 %v5905_v60  ;;  %v7151_v59 = vld [vmem:[%s10972_s1 + $0xba0] ss:$8 sps:$4 sm:$0xff]   ;;  %v7152_v60 = vld [vmem:[%s10972_s1 + $0xbb4] ss:$8 sps:$4 sm:$0xff]  }
 0x283   :  { %2934 = vmatpush1.bf16.msra.mxu0 %v7069_v63  ;;  %3569 = vmatpush1.bf16.msra.mxu1 %v7069_v63  ;;  %v7157_v63 = vld [vmem:[%s10972_s1 + $0xbc0] ss:$8 sps:$4 sm:$0xff]  }
 0x284   :  { %2935 = vmatprep.subr.bf16.mxu0 %v7070_v0  ;;  %3570 = vmatprep.subr.bf16.mxu1 %v7070_v0  ;;  %v7158_v0 = vld [vmem:[%s10972_s1 + $0xbd4] ss:$8 sps:$4 sm:$0xff]  }
 0x285   :  { %2965 = vmatprep.mubr.bf16.mxu0 %v5470_v1  ;;  %3600 = vmatprep.mubr.bf16.mxu1 %v5908_v2  ;;  %v7160_v1 = vld [vmem:[%s10972_s1 + $0xbd0] ss:$8 sps:$4 sm:$0xff]   ;;  %v7161_v2 = vld [vmem:[%s10972_s1 + $0xbe4] ss:$8 sps:$4 sm:$0xff]  }
 0x287   :  { %2936 = vmatpush1.bf16.msra.mxu0 %v7072_v3  ;;  %3571 = vmatpush1.bf16.msra.mxu1 %v7072_v3  ;;  %v7163_v3 = vld [vmem:[%s10972_s1 + $0xbe0] ss:$8 sps:$4 sm:$0xff]  }
 0x288   :  { %2937 = vmatprep.subr.bf16.mxu0 %v7073_v4  ;;  %3572 = vmatprep.subr.bf16.mxu1 %v7073_v4  ;;  %v7164_v4 = vld [vmem:[%s10972_s1 + $0xbf4] ss:$8 sps:$4 sm:$0xff]  }
 0x28b   :  { %2938 = vmatpush1.bf16.msra.mxu0 %v7075_v5  ;;  %3573 = vmatpush1.bf16.msra.mxu1 %v7075_v5  ;;  %v7166_v5 = vld [vmem:[%s10972_s1 + $0xbf0] ss:$8 sps:$4 sm:$0xff]  }
 0x28c   :  { %2939 = vmatprep.subr.bf16.mxu0 %v7076_v6  ;;  %3574 = vmatprep.subr.bf16.mxu1 %v7076_v6  ;;  %v7169_v6 = vld [vmem:[%s10972_s1 + $0xc04] ss:$8 sps:$4 sm:$0xff]  }
 0x28f   :  { %2940 = vmatpush1.bf16.msra.mxu0 %v7078_v7  ;;  %3575 = vmatpush1.bf16.msra.mxu1 %v7078_v7  ;;  %v5471_v7 = vcombine.low %v8963_v35, %v8963_v35  ;;  %v7251_v35 = vld [vmem:[%s10972_s1 + $0x24] ss:$8 sps:$4 sm:$0xff]  }
 0x290   :  { %2941 = vmatprep.subr.bf16.mxu0 %v7079_v8  ;;  %3576 = vmatprep.subr.bf16.mxu1 %v7079_v8  ;;  %v5909_v8 = vcombine.low %v8968_v36, %v8968_v36  ;;  %v7252_v36 = vld [vmem:[%s10972_s1 + $0x20] ss:$8 sps:$4 sm:$0xff]  }
 0x293   :  { %2942 = vmatpush1.bf16.msra.mxu0 %v7081_v9  ;;  %3577 = vmatpush1.bf16.msra.mxu1 %v7081_v9  ;;  %v7173_v9 = vld [vmem:[%s10972_s1 + $0xc00] ss:$8 sps:$4 sm:$0xff]  }
 0x294   :  { %2943 = vmatprep.subr.bf16.mxu0 %v7082_v10  ;;  %3578 = vmatprep.subr.bf16.mxu1 %v7082_v10  ;;  %v7174_v10 = vld [vmem:[%s10972_s1 + $0xc14] ss:$8 sps:$4 sm:$0xff]  }
 0x297   :  { %2944 = vmatpush1.bf16.msra.mxu0 %v7084_v11  ;;  %3579 = vmatpush1.bf16.msra.mxu1 %v7084_v11  ;;  %v7176_v11 = vld [vmem:[%s10972_s1 + $0xc10] ss:$8 sps:$4 sm:$0xff]  }
 0x298   :  { %2945 = vmatprep.subr.bf16.mxu0 %v7085_v12  ;;  %3580 = vmatprep.subr.bf16.mxu1 %v7085_v12  ;;  %v7177_v12 = vld [vmem:[%s10972_s1 + $0xc24] ss:$8 sps:$4 sm:$0xff]  }
 0x29b   :  { %2946 = vmatpush1.bf16.msra.mxu0 %v7087_v13  ;;  %3581 = vmatpush1.bf16.msra.mxu1 %v7087_v13  ;;  %v7671_v13 = vmov 0  }
 0x29c   :  { %2947 = vmatprep.subr.bf16.mxu0 %v7088_v14  ;;  %3582 = vmatprep.subr.bf16.mxu1 %v7088_v14  ;;  %v7179_v14 = vld [vmem:[%s10972_s1 + $0xc20] ss:$8 sps:$4 sm:$0xff]  }
 0x29f   :  { %2948 = vmatpush1.bf16.msra.mxu0 %v7090_v15  ;;  %3583 = vmatpush1.bf16.msra.mxu1 %v7090_v15  ;;  %v7180_v15 = vld [vmem:[%s10972_s1 + $0xc34] ss:$8 sps:$4 sm:$0xff]  }
 0x2a0   :  { %2949 = vmatprep.subr.bf16.mxu0 %v7091_v16  ;;  %3584 = vmatprep.subr.bf16.mxu1 %v7091_v16  ;;  %v7182_v16 = vld [vmem:[%s10972_s1 + $0xc30] ss:$8 sps:$4 sm:$0xff]  }
 0x2a3   :  { %2950 = vmatpush1.bf16.msra.mxu0 %v7093_v17  ;;  %3585 = vmatpush1.bf16.msra.mxu1 %v7093_v17  ;;  %v7183_v17 = vld [vmem:[%s10972_s1 + $0xc44] ss:$8 sps:$4 sm:$0xff]  }
 0x2a4   :  { %2951 = vmatprep.subr.bf16.mxu0 %v7094_v18  ;;  %3586 = vmatprep.subr.bf16.mxu1 %v7094_v18  ;;  %v7185_v18 = vld [vmem:[%s10972_s1 + $0xc40] ss:$8 sps:$4 sm:$0xff]  }
 0x2a7   :  { %2952 = vmatpush1.bf16.msra.mxu0 %v7096_v19  ;;  %3587 = vmatpush1.bf16.msra.mxu1 %v7096_v19  ;;  %v7186_v19 = vld [vmem:[%s10972_s1 + $0xc54] ss:$8 sps:$4 sm:$0xff]  }
 0x2a8   :  { %2953 = vmatprep.subr.bf16.mxu0 %v7097_v20  ;;  %3588 = vmatprep.subr.bf16.mxu1 %v7097_v20  ;;  %v7188_v20 = vld [vmem:[%s10972_s1 + $0xc50] ss:$8 sps:$4 sm:$0xff]  }
 0x2ab   :  { %2954 = vmatpush1.bf16.msra.mxu0 %v7099_v21  ;;  %3589 = vmatpush1.bf16.msra.mxu1 %v7099_v21  ;;  %v7189_v21 = vld [vmem:[%s10972_s1 + $0xc64] ss:$8 sps:$4 sm:$0xff]  }
 0x2ac   :  { %2955 = vmatprep.subr.bf16.mxu0 %v7100_v22  ;;  %3590 = vmatprep.subr.bf16.mxu1 %v7100_v22  ;;  %v7191_v22 = vld [vmem:[%s10972_s1 + $0xc60] ss:$8 sps:$4 sm:$0xff]  }
 0x2af   :  { %2956 = vmatpush1.bf16.msra.mxu0 %v7102_v23  ;;  %3591 = vmatpush1.bf16.msra.mxu1 %v7102_v23  ;;  %v7192_v23 = vld [vmem:[%s10972_s1 + $0xc74] ss:$8 sps:$4 sm:$0xff]  }
 0x2b0   :  { %2957 = vmatprep.subr.bf16.mxu0 %v7103_v24  ;;  %3592 = vmatprep.subr.bf16.mxu1 %v7103_v24  ;;  %v7194_v24 = vld [vmem:[%s10972_s1 + $0xc70] ss:$8 sps:$4 sm:$0xff]  }
 0x2b3   :  { %2958 = vmatpush1.bf16.msra.mxu0 %v7105_v25  ;;  %3593 = vmatpush1.bf16.msra.mxu1 %v7105_v25  ;;  %v7195_v25 = vld [vmem:[%s10971_s0 + $0x60] ss:$0 sps:$4 sm:$0xff]  }
 0x2b4   :  { %2959 = vmatprep.subr.bf16.mxu0 %v7106_v26  ;;  %3594 = vmatprep.subr.bf16.mxu1 %v7106_v26  ;;  %v7196_v26 = vld [vmem:[%s10971_s0 + $0xc4] ss:$0 sps:$4 sm:$0xff]  }
 0x2b7   :  { %2960 = vmatpush1.bf16.msra.mxu0 %v7108_v27  ;;  %3595 = vmatpush1.bf16.msra.mxu1 %v7108_v27  ;;  %v9130_v27 = vld [vmem:[%s10971_s0 + $0xc8] sm:$0xff] }
 0x2b8   :  { %2961 = vmatprep.subr.bf16.mxu0 %v7109_v28  ;;  %3596 = vmatprep.subr.bf16.mxu1 %v7109_v28  ;;  %v9135_v28 = vld [vmem:[%s10971_s0 + $0x12c] sm:$0xff] }
 0x2bb   :  { %2962 = vmatpush1.bf16.msra.mxu0 %v7111_v29  ;;  %3597 = vmatpush1.bf16.msra.mxu1 %v7111_v29  ;;  %v7247_v29 = vld [vmem:[%s10972_s1 + $0x4] ss:$8 sps:$4 sm:$0xff]  }
 0x2bc   :  { %2963 = vmatprep.subr.bf16.mxu0 %v7112_v30  ;;  %3598 = vmatprep.subr.bf16.mxu1 %v7112_v30  ;;  %v5926_v30 = vcombine.high %v9130_v27, %v9130_v27 }
 0x2bf   :  { %2964 = vmatpush1.bf16.msra.mxu0 %v7114_v31  ;;  %3599 = vmatpush1.bf16.msra.mxu1 %v7114_v31  ;;  %v5964_v31 = vcombine.high %v9135_v28, %v9135_v28 }
 0x2c0   :  { %2974 = vmatprep.subr.bf16.mxu0 %v7117_v32  ;;  %3609 = vmatprep.subr.bf16.mxu1 %v7117_v32  ;;  %v7248_v32 = vld [vmem:[%s10972_s1] ss:$8 sps:$4 sm:$0xff]  }
 0x2c2   :  { %2966 = vmatmul.mubr.bf16.vlgmr.msra.gmra.mrb[0].mxu0 %v5469_v33  ;;  %3601 = vmatmul.mubr.bf16.vlgmr.msra.gmra.mrb[0].mxu1 %v5907_v34  ;;  %v7249_v33 = vld [vmem:[%s10972_s1 + $0x14] ss:$8 sps:$4 sm:$0xff]   ;;  %v7250_v34 = vld [vmem:[%s10972_s1 + $0x10] ss:$8 sps:$4 sm:$0xff]  }
 0x2c3   :  { %2975 = vmatpush1.bf16.msra.mxu0 %v7121_v37  ;;  %3610 = vmatpush1.bf16.msra.mxu1 %v7121_v37  ;;  %v7253_v37 = vld [vmem:[%s10972_s1 + $0x34] ss:$8 sps:$4 sm:$0xff]  }
 0x2c4   :  { %2976 = vmatprep.subr.bf16.mxu0 %v7122_v38  ;;  %3611 = vmatprep.subr.bf16.mxu1 %v7122_v38  ;;  %v7254_v38 = vld [vmem:[%s10972_s1 + $0x30] ss:$8 sps:$4 sm:$0xff]  }
 0x2c5   :  { %3006 = vmatprep.mubr.bf16.mxu0 %v5472_v39  ;;  %3641 = vmatprep.mubr.bf16.mxu1 %v5910_v40  ;;  %v7255_v39 = vld [vmem:[%s10972_s1 + $0x44] ss:$8 sps:$4 sm:$0xff]   ;;  %v7256_v40 = vld [vmem:[%s10972_s1 + $0x40] ss:$8 sps:$4 sm:$0xff]  }
 0x2c7   :  { %2977 = vmatpush1.bf16.msra.mxu0 %v7124_v41  ;;  %3612 = vmatpush1.bf16.msra.mxu1 %v7124_v41  ;;  %v7257_v41 = vld [vmem:[%s10972_s1 + $0x54] ss:$8 sps:$4 sm:$0xff]  }
 0x2c8   :  { %2978 = vmatprep.subr.bf16.mxu0 %v7125_v42  ;;  %3613 = vmatprep.subr.bf16.mxu1 %v7125_v42  ;;  %v7258_v42 = vld [vmem:[%s10972_s1 + $0x50] ss:$8 sps:$4 sm:$0xff]  }
 0x2cb   :  { %2979 = vmatpush1.bf16.msra.mxu0 %v7127_v43  ;;  %3614 = vmatpush1.bf16.msra.mxu1 %v7127_v43  ;;  %v7259_v43 = vld [vmem:[%s10972_s1 + $0x64] ss:$8 sps:$4 sm:$0xff]  }
 0x2cc   :  { %2980 = vmatprep.subr.bf16.mxu0 %v7128_v44  ;;  %3615 = vmatprep.subr.bf16.mxu1 %v7128_v44  ;;  %v7260_v44 = vld [vmem:[%s10972_s1 + $0x60] ss:$8 sps:$4 sm:$0xff]  }
 0x2cf   :  { %2981 = vmatpush1.bf16.msra.mxu0 %v7130_v45  ;;  %3616 = vmatpush1.bf16.msra.mxu1 %v7130_v45  ;;  %v7261_v45 = vld [vmem:[%s10972_s1 + $0x74] ss:$8 sps:$4 sm:$0xff]  }
 0x2d0   :  { %2982 = vmatprep.subr.bf16.mxu0 %v7131_v46  ;;  %3617 = vmatprep.subr.bf16.mxu1 %v7131_v46  ;;  %v7262_v46 = vld [vmem:[%s10972_s1 + $0x70] ss:$8 sps:$4 sm:$0xff]  }
 0x2d3   :  { %2983 = vmatpush1.bf16.msra.mxu0 %v7133_v47  ;;  %3618 = vmatpush1.bf16.msra.mxu1 %v7133_v47  ;;  %v7263_v47 = vld [vmem:[%s10972_s1 + $0x84] ss:$8 sps:$4 sm:$0xff]  }
 0x2d4   :  { %2984 = vmatprep.subr.bf16.mxu0 %v7134_v48  ;;  %3619 = vmatprep.subr.bf16.mxu1 %v7134_v48  ;;  %v7264_v48 = vld [vmem:[%s10972_s1 + $0x80] ss:$8 sps:$4 sm:$0xff]  }
 0x2d7   :  { %2985 = vmatpush1.bf16.msra.mxu0 %v7136_v49  ;;  %3620 = vmatpush1.bf16.msra.mxu1 %v7136_v49  ;;  %v7265_v49 = vld [vmem:[%s10972_s1 + $0x94] ss:$8 sps:$4 sm:$0xff]  }
 0x2d8   :  { %2986 = vmatprep.subr.bf16.mxu0 %v7137_v50  ;;  %3621 = vmatprep.subr.bf16.mxu1 %v7137_v50  ;;  %v7266_v50 = vld [vmem:[%s10972_s1 + $0x90] ss:$8 sps:$4 sm:$0xff]  }
 0x2db   :  { %2987 = vmatpush1.bf16.msra.mxu0 %v7139_v51  ;;  %3622 = vmatpush1.bf16.msra.mxu1 %v7139_v51  ;;  %v7267_v51 = vld [vmem:[%s10972_s1 + $0xa4] ss:$8 sps:$4 sm:$0xff]  }
 0x2dc   :  { %2988 = vmatprep.subr.bf16.mxu0 %v7140_v52  ;;  %3623 = vmatprep.subr.bf16.mxu1 %v7140_v52  ;;  %v7268_v52 = vld [vmem:[%s10972_s1 + $0xa0] ss:$8 sps:$4 sm:$0xff]  }
 0x2df   :  { %2989 = vmatpush1.bf16.msra.mxu0 %v7142_v53  ;;  %3624 = vmatpush1.bf16.msra.mxu1 %v7142_v53  ;;  %v7269_v53 = vld [vmem:[%s10972_s1 + $0xb4] ss:$8 sps:$4 sm:$0xff]  }
 0x2e0   :  { %2990 = vmatprep.subr.bf16.mxu0 %v7143_v54  ;;  %3625 = vmatprep.subr.bf16.mxu1 %v7143_v54  ;;  %v7270_v54 = vld [vmem:[%s10972_s1 + $0xb0] ss:$8 sps:$4 sm:$0xff]  }
 0x2e3   :  { %2991 = vmatpush1.bf16.msra.mxu0 %v7145_v55  ;;  %3626 = vmatpush1.bf16.msra.mxu1 %v7145_v55  ;;  %v7271_v55 = vld [vmem:[%s10972_s1 + $0xc4] ss:$8 sps:$4 sm:$0xff]  }
 0x2e4   :  { %2992 = vmatprep.subr.bf16.mxu0 %v7146_v56  ;;  %3627 = vmatprep.subr.bf16.mxu1 %v7146_v56  ;;  %v7272_v56 = vld [vmem:[%s10972_s1 + $0xc0] ss:$8 sps:$4 sm:$0xff]  }
 0x2e7   :  { %2993 = vmatpush1.bf16.msra.mxu0 %v7148_v57  ;;  %3628 = vmatpush1.bf16.msra.mxu1 %v7148_v57  ;;  %v7273_v57 = vld [vmem:[%s10972_s1 + $0xd4] ss:$8 sps:$4 sm:$0xff]  }
 0x2e8   :  { %2994 = vmatprep.subr.bf16.mxu0 %v7149_v58  ;;  %3629 = vmatprep.subr.bf16.mxu1 %v7149_v58  ;;  %v7274_v58 = vld [vmem:[%s10972_s1 + $0xd0] ss:$8 sps:$4 sm:$0xff]  }
 0x2eb   :  { %2995 = vmatpush1.bf16.msra.mxu0 %v7151_v59  ;;  %3630 = vmatpush1.bf16.msra.mxu1 %v7151_v59  ;;  %v7275_v59 = vld [vmem:[%s10972_s1 + $0xe4] ss:$8 sps:$4 sm:$0xff]  }
 0x2ec   :  { %2996 = vmatprep.subr.bf16.mxu0 %v7152_v60  ;;  %3631 = vmatprep.subr.bf16.mxu1 %v7152_v60  ;;  %v7276_v60 = vld [vmem:[%s10972_s1 + $0xe0] ss:$8 sps:$4 sm:$0xff]  }
 0x2ef   :  { %2997 = vmatpush1.bf16.msra.mxu0 %v7154_v61  ;;  %3632 = vmatpush1.bf16.msra.mxu1 %v7154_v61  ;;  %v7277_v61 = vld [vmem:[%s10972_s1 + $0xf4] ss:$8 sps:$4 sm:$0xff]  }
 0x2f0   :  { %2998 = vmatprep.subr.bf16.mxu0 %v7155_v62  ;;  %3633 = vmatprep.subr.bf16.mxu1 %v7155_v62  ;;  %v5925_v62 = vcombine.low %v9130_v27, %v9130_v27  ;;  %v7300_v27 = vld [vmem:[%s10972_s1 + $0x1a0] ss:$8 sps:$4 sm:$0xff]  }
 0x2f3   :  { %2999 = vmatpush1.bf16.msra.mxu0 %v7157_v63  ;;  %3634 = vmatpush1.bf16.msra.mxu1 %v7157_v63  ;;  %v5963_v63 = vcombine.low %v9135_v28, %v9135_v28  ;;  %v7301_v28 = vld [vmem:[%s10972_s1 + $0x1b4] ss:$8 sps:$4 sm:$0xff]  }
 0x2f4   :  { %3000 = vmatprep.subr.bf16.mxu0 %v7158_v0  ;;  %3635 = vmatprep.subr.bf16.mxu1 %v7158_v0  ;;  %v9241_v0 = vld [vmem:[%s10971_s0 + $0xd0] sm:$0xff] }
 0x2f7   :  { %3001 = vmatpush1.bf16.msra.mxu0 %v7160_v1  ;;  %3636 = vmatpush1.bf16.msra.mxu1 %v7160_v1  ;;  %v9246_v1 = vld [vmem:[%s10971_s0 + $0x134] sm:$0xff] }
 0x2f8   :  { %3002 = vmatprep.subr.bf16.mxu0 %v7161_v2  ;;  %3637 = vmatprep.subr.bf16.mxu1 %v7161_v2  ;;  %v7278_v2 = vld [vmem:[%s10972_s1 + $0xf0] ss:$8 sps:$4 sm:$0xff]  }
 0x2fb   :  { %3003 = vmatpush1.bf16.msra.mxu0 %v7163_v3  ;;  %3638 = vmatpush1.bf16.msra.mxu1 %v7163_v3  ;;  %v7279_v3 = vld [vmem:[%s10972_s1 + $0x104] ss:$8 sps:$4 sm:$0xff]  }
 0x2fc   :  { %3004 = vmatprep.subr.bf16.mxu0 %v7164_v4  ;;  %3639 = vmatprep.subr.bf16.mxu1 %v7164_v4  ;;  %v5928_v4 = vcombine.high %v9241_v0, %v9241_v0 }
 0x2ff   :  { %3005 = vmatpush1.bf16.msra.mxu0 %v7166_v5  ;;  %3640 = vmatpush1.bf16.msra.mxu1 %v7166_v5  ;;  %v5966_v5 = vcombine.high %v9246_v1, %v9246_v1 }
 0x300   :  { %3015 = vmatprep.subr.bf16.mxu0 %v7169_v6  ;;  %3650 = vmatprep.subr.bf16.mxu1 %v7169_v6  ;;  %v7280_v6 = vld [vmem:[%s10972_s1 + $0x100] ss:$8 sps:$4 sm:$0xff]  }
 0x302   :  { %3007 = vmatmul.mubr.bf16.vlgmr.msra.gmra.mrb[0].mxu0 %v5471_v7  ;;  %3642 = vmatmul.mubr.bf16.vlgmr.msra.gmra.mrb[0].mxu1 %v5909_v8  ;;  %v7281_v7 = vld [vmem:[%s10972_s1 + $0x114] ss:$8 sps:$4 sm:$0xff]   ;;  %v7282_v8 = vld [vmem:[%s10972_s1 + $0x110] ss:$8 sps:$4 sm:$0xff]  }
 0x303   :  { %3016 = vmatpush1.bf16.msra.mxu0 %v7173_v9  ;;  %3651 = vmatpush1.bf16.msra.mxu1 %v7173_v9  ;;  %v7283_v9 = vld [vmem:[%s10972_s1 + $0x124] ss:$8 sps:$4 sm:$0xff]  }
 0x304   :  { %3017 = vmatprep.subr.bf16.mxu0 %v7174_v10  ;;  %3652 = vmatprep.subr.bf16.mxu1 %v7174_v10  ;;  %v7284_v10 = vld [vmem:[%s10972_s1 + $0x120] ss:$8 sps:$4 sm:$0xff]  }
 0x305   :  { %3047 = vmatprep.mubr.bf16.mxu0 %v7671_v13  ;;  %3682 = vmatprep.mubr.bf16.mxu1 %v7671_v13 }
 0x307   :  { %3018 = vmatpush1.bf16.msra.mxu0 %v7176_v11  ;;  %3653 = vmatpush1.bf16.msra.mxu1 %v7176_v11  ;;  %v7285_v11 = vld [vmem:[%s10972_s1 + $0x134] ss:$8 sps:$4 sm:$0xff]  }
 0x308   :  { %3019 = vmatprep.subr.bf16.mxu0 %v7177_v12  ;;  %3654 = vmatprep.subr.bf16.mxu1 %v7177_v12  ;;  %v7286_v12 = vld [vmem:[%s10972_s1 + $0x130] ss:$8 sps:$4 sm:$0xff]  }
 0x30b   :  { %3020 = vmatpush1.bf16.msra.mxu0 %v7179_v14  ;;  %3655 = vmatpush1.bf16.msra.mxu1 %v7179_v14  ;;  %v7287_v14 = vld [vmem:[%s10972_s1 + $0x144] ss:$8 sps:$4 sm:$0xff]  }
 0x30c   :  { %3021 = vmatprep.subr.bf16.mxu0 %v7180_v15  ;;  %3656 = vmatprep.subr.bf16.mxu1 %v7180_v15  ;;  %v7288_v15 = vld [vmem:[%s10972_s1 + $0x140] ss:$8 sps:$4 sm:$0xff]  }
 0x30f   :  { %3022 = vmatpush1.bf16.msra.mxu0 %v7182_v16  ;;  %3657 = vmatpush1.bf16.msra.mxu1 %v7182_v16  ;;  %v7289_v16 = vld [vmem:[%s10972_s1 + $0x154] ss:$8 sps:$4 sm:$0xff]  }
 0x310   :  { %3023 = vmatprep.subr.bf16.mxu0 %v7183_v17  ;;  %3658 = vmatprep.subr.bf16.mxu1 %v7183_v17  ;;  %v7290_v17 = vld [vmem:[%s10972_s1 + $0x150] ss:$8 sps:$4 sm:$0xff]  }
 0x313   :  { %3024 = vmatpush1.bf16.msra.mxu0 %v7185_v18  ;;  %3659 = vmatpush1.bf16.msra.mxu1 %v7185_v18  ;;  %v7291_v18 = vld [vmem:[%s10972_s1 + $0x164] ss:$8 sps:$4 sm:$0xff]  }
 0x314   :  { %3025 = vmatprep.subr.bf16.mxu0 %v7186_v19  ;;  %3660 = vmatprep.subr.bf16.mxu1 %v7186_v19  ;;  %v7292_v19 = vld [vmem:[%s10972_s1 + $0x160] ss:$8 sps:$4 sm:$0xff]  }
 0x317   :  { %3026 = vmatpush1.bf16.msra.mxu0 %v7188_v20  ;;  %3661 = vmatpush1.bf16.msra.mxu1 %v7188_v20  ;;  %v7293_v20 = vld [vmem:[%s10972_s1 + $0x174] ss:$8 sps:$4 sm:$0xff]  }
 0x318   :  { %3027 = vmatprep.subr.bf16.mxu0 %v7189_v21  ;;  %3662 = vmatprep.subr.bf16.mxu1 %v7189_v21  ;;  %v7294_v21 = vld [vmem:[%s10972_s1 + $0x170] ss:$8 sps:$4 sm:$0xff]  }
 0x31b   :  { %3028 = vmatpush1.bf16.msra.mxu0 %v7191_v22  ;;  %3663 = vmatpush1.bf16.msra.mxu1 %v7191_v22  ;;  %v7295_v22 = vld [vmem:[%s10972_s1 + $0x184] ss:$8 sps:$4 sm:$0xff]  }
 0x31c   :  { %3029 = vmatprep.subr.bf16.mxu0 %v7192_v23  ;;  %3664 = vmatprep.subr.bf16.mxu1 %v7192_v23  ;;  %v7296_v23 = vld [vmem:[%s10972_s1 + $0x180] ss:$8 sps:$4 sm:$0xff]  }
 0x31f   :  { %3030 = vmatpush1.bf16.msra.mxu0 %v7194_v24  ;;  %3665 = vmatpush1.bf16.msra.mxu1 %v7194_v24  ;;  %v7297_v24 = vld [vmem:[%s10972_s1 + $0x194] ss:$8 sps:$4 sm:$0xff]  }
 0x320   :  { %3793 = vmatprep.subr.bf16.mxu0 %v7247_v29  ;;  %4428 = vmatprep.subr.bf16.mxu1 %v7247_v29  ;;  %v7302_v29 = vld [vmem:[%s10972_s1 + $0x1b0] ss:$8 sps:$4 sm:$0xff]  }
 0x322   :  { %3048 = vmatmul.mubr.bf16.vlgmr.msra.gmra.mrb[0].mxu0 %v7195_v25  ;;  %3683 = vmatmul.mubr.bf16.vlgmr.msra.gmra.mrb[0].mxu1 %v7196_v26  ;;  %v7298_v25 = vld [vmem:[%s10972_s1 + $0x190] ss:$8 sps:$4 sm:$0xff]   ;;  %v7299_v26 = vld [vmem:[%s10972_s1 + $0x1a4] ss:$8 sps:$4 sm:$0xff]  }
 0x323   :  { %3794 = vmatpush1.bf16.msra.mxu0 %v7248_v32  ;;  %4429 = vmatpush1.bf16.msra.mxu1 %v7248_v32  ;;  %v7305_v32 = vld [vmem:[%s10972_s1 + $0x1d4] ss:$8 sps:$4 sm:$0xff]  }
 0x324   :  { %3795 = vmatprep.subr.bf16.mxu0 %v7249_v33  ;;  %4430 = vmatprep.subr.bf16.mxu1 %v7249_v33  ;;  %v7306_v33 = vld [vmem:[%s10972_s1 + $0x1d0] ss:$8 sps:$4 sm:$0xff]  }
 0x325   :  { %3825 = vmatprep.mubr.bf16.mxu0 %v5926_v30  ;;  %4460 = vmatprep.mubr.bf16.mxu1 %v5964_v31  ;;  %v7303_v30 = vld [vmem:[%s10972_s1 + $0x1c4] ss:$8 sps:$4 sm:$0xff]   ;;  %v7304_v31 = vld [vmem:[%s10972_s1 + $0x1c0] ss:$8 sps:$4 sm:$0xff]  }
 0x327   :  { %3796 = vmatpush1.bf16.msra.mxu0 %v7250_v34  ;;  %4431 = vmatpush1.bf16.msra.mxu1 %v7250_v34  ;;  %v7307_v34 = vld [vmem:[%s10972_s1 + $0x1e4] ss:$8 sps:$4 sm:$0xff]  }
 0x328   :  { %3797 = vmatprep.subr.bf16.mxu0 %v7251_v35  ;;  %4432 = vmatprep.subr.bf16.mxu1 %v7251_v35  ;;  %v7308_v35 = vld [vmem:[%s10972_s1 + $0x1e0] ss:$8 sps:$4 sm:$0xff]  }
 0x32b   :  { %3798 = vmatpush1.bf16.msra.mxu0 %v7252_v36  ;;  %4433 = vmatpush1.bf16.msra.mxu1 %v7252_v36  ;;  %v7309_v36 = vld [vmem:[%s10972_s1 + $0x1f4] ss:$8 sps:$4 sm:$0xff]  }
 0x32c   :  { %3799 = vmatprep.subr.bf16.mxu0 %v7253_v37  ;;  %4434 = vmatprep.subr.bf16.mxu1 %v7253_v37  ;;  %v5927_v37 = vcombine.low %v9241_v0, %v9241_v0  ;;  %v7331_v0 = vld [vmem:[%s10972_s1 + $0x2a4] ss:$8 sps:$4 sm:$0xff]  }
 0x32f   :  { %3800 = vmatpush1.bf16.msra.mxu0 %v7254_v38  ;;  %4435 = vmatpush1.bf16.msra.mxu1 %v7254_v38  ;;  %v5965_v38 = vcombine.low %v9246_v1, %v9246_v1  ;;  %v7332_v1 = vld [vmem:[%s10972_s1 + $0x2a0] ss:$8 sps:$4 sm:$0xff]  }
 0x330   :  { %3801 = vmatprep.subr.bf16.mxu0 %v7255_v39  ;;  %4436 = vmatprep.subr.bf16.mxu1 %v7255_v39  ;;  %v9355_v39 = vld [vmem:[%s10971_s0 + $0xd8] sm:$0xff] }
 0x333   :  { %3802 = vmatpush1.bf16.msra.mxu0 %v7256_v40  ;;  %4437 = vmatpush1.bf16.msra.mxu1 %v7256_v40  ;;  %v9360_v40 = vld [vmem:[%s10971_s0 + $0x13c] sm:$0xff] }
 0x334   :  { %3803 = vmatprep.subr.bf16.mxu0 %v7257_v41  ;;  %4438 = vmatprep.subr.bf16.mxu1 %v7257_v41  ;;  %v7310_v41 = vld [vmem:[%s10972_s1 + $0x1f0] ss:$8 sps:$4 sm:$0xff]  }
 0x337   :  { %3804 = vmatpush1.bf16.msra.mxu0 %v7258_v42  ;;  %4439 = vmatpush1.bf16.msra.mxu1 %v7258_v42  ;;  %v7311_v42 = vld [vmem:[%s10972_s1 + $0x204] ss:$8 sps:$4 sm:$0xff]  }
 0x338   :  { %3805 = vmatprep.subr.bf16.mxu0 %v7259_v43  ;;  %4440 = vmatprep.subr.bf16.mxu1 %v7259_v43  ;;  %v5930_v43 = vcombine.high %v9355_v39, %v9355_v39 }
 0x33b   :  { %3806 = vmatpush1.bf16.msra.mxu0 %v7260_v44  ;;  %4441 = vmatpush1.bf16.msra.mxu1 %v7260_v44  ;;  %v5968_v44 = vcombine.high %v9360_v40, %v9360_v40 }
 0x33c   :  { %3807 = vmatprep.subr.bf16.mxu0 %v7261_v45  ;;  %4442 = vmatprep.subr.bf16.mxu1 %v7261_v45  ;;  %v7312_v45 = vld [vmem:[%s10972_s1 + $0x200] ss:$8 sps:$4 sm:$0xff]  }
 0x33f   :  { %3808 = vmatpush1.bf16.msra.mxu0 %v7262_v46  ;;  %4443 = vmatpush1.bf16.msra.mxu1 %v7262_v46  ;;  %v7313_v46 = vld [vmem:[%s10972_s1 + $0x214] ss:$8 sps:$4 sm:$0xff]  }
 0x340   :  { %3809 = vmatprep.subr.bf16.mxu0 %v7263_v47  ;;  %4444 = vmatprep.subr.bf16.mxu1 %v7263_v47  ;;  %v7314_v47 = vld [vmem:[%s10972_s1 + $0x210] ss:$8 sps:$4 sm:$0xff]  }
 0x343   :  { %3810 = vmatpush1.bf16.msra.mxu0 %v7264_v48  ;;  %4445 = vmatpush1.bf16.msra.mxu1 %v7264_v48  ;;  %v7315_v48 = vld [vmem:[%s10972_s1 + $0x224] ss:$8 sps:$4 sm:$0xff]  }
 0x344   :  { %3811 = vmatprep.subr.bf16.mxu0 %v7265_v49  ;;  %4446 = vmatprep.subr.bf16.mxu1 %v7265_v49  ;;  %v7316_v49 = vld [vmem:[%s10972_s1 + $0x220] ss:$8 sps:$4 sm:$0xff]  }
 0x347   :  { %3812 = vmatpush1.bf16.msra.mxu0 %v7266_v50  ;;  %4447 = vmatpush1.bf16.msra.mxu1 %v7266_v50  ;;  %v7317_v50 = vld [vmem:[%s10972_s1 + $0x234] ss:$8 sps:$4 sm:$0xff]  }
 0x348   :  { %3813 = vmatprep.subr.bf16.mxu0 %v7267_v51  ;;  %4448 = vmatprep.subr.bf16.mxu1 %v7267_v51  ;;  %v7318_v51 = vld [vmem:[%s10972_s1 + $0x230] ss:$8 sps:$4 sm:$0xff]  }
 0x34b   :  { %3814 = vmatpush1.bf16.msra.mxu0 %v7268_v52  ;;  %4449 = vmatpush1.bf16.msra.mxu1 %v7268_v52  ;;  %v7319_v52 = vld [vmem:[%s10972_s1 + $0x244] ss:$8 sps:$4 sm:$0xff]  }
 0x34c   :  { %3815 = vmatprep.subr.bf16.mxu0 %v7269_v53  ;;  %4450 = vmatprep.subr.bf16.mxu1 %v7269_v53  ;;  %v7320_v53 = vld [vmem:[%s10972_s1 + $0x240] ss:$8 sps:$4 sm:$0xff]  }
 0x34f   :  { %3816 = vmatpush1.bf16.msra.mxu0 %v7270_v54  ;;  %4451 = vmatpush1.bf16.msra.mxu1 %v7270_v54  ;;  %v7321_v54 = vld [vmem:[%s10972_s1 + $0x254] ss:$8 sps:$4 sm:$0xff]  }
 0x350   :  { %3817 = vmatprep.subr.bf16.mxu0 %v7271_v55  ;;  %4452 = vmatprep.subr.bf16.mxu1 %v7271_v55  ;;  %v7322_v55 = vld [vmem:[%s10972_s1 + $0x250] ss:$8 sps:$4 sm:$0xff]  }
 0x353   :  { %3818 = vmatpush1.bf16.msra.mxu0 %v7272_v56  ;;  %4453 = vmatpush1.bf16.msra.mxu1 %v7272_v56  ;;  %v7323_v56 = vld [vmem:[%s10972_s1 + $0x264] ss:$8 sps:$4 sm:$0xff]  }
 0x354   :  { %3819 = vmatprep.subr.bf16.mxu0 %v7273_v57  ;;  %4454 = vmatprep.subr.bf16.mxu1 %v7273_v57  ;;  %v7324_v57 = vld [vmem:[%s10972_s1 + $0x260] ss:$8 sps:$4 sm:$0xff]  }
 0x357   :  { %3820 = vmatpush1.bf16.msra.mxu0 %v7274_v58  ;;  %4455 = vmatpush1.bf16.msra.mxu1 %v7274_v58  ;;  %v7325_v58 = vld [vmem:[%s10972_s1 + $0x274] ss:$8 sps:$4 sm:$0xff]  }
 0x358   :  { %3821 = vmatprep.subr.bf16.mxu0 %v7275_v59  ;;  %4456 = vmatprep.subr.bf16.mxu1 %v7275_v59  ;;  %v7326_v59 = vld [vmem:[%s10972_s1 + $0x270] ss:$8 sps:$4 sm:$0xff]  }
 0x35b   :  { %3822 = vmatpush1.bf16.msra.mxu0 %v7276_v60  ;;  %4457 = vmatpush1.bf16.msra.mxu1 %v7276_v60  ;;  %v7327_v60 = vld [vmem:[%s10972_s1 + $0x284] ss:$8 sps:$4 sm:$0xff]  }
 0x35c   :  { %3823 = vmatprep.subr.bf16.mxu0 %v7277_v61  ;;  %4458 = vmatprep.subr.bf16.mxu1 %v7277_v61  ;;  %v7328_v61 = vld [vmem:[%s10972_s1 + $0x280] ss:$8 sps:$4 sm:$0xff]  }
 0x35f   :  { %3824 = vmatpush1.bf16.msra.mxu0 %v7278_v2  ;;  %4459 = vmatpush1.bf16.msra.mxu1 %v7278_v2  ;;  %v7333_v2 = vld [vmem:[%s10972_s1 + $0x2b4] ss:$8 sps:$4 sm:$0xff]  }
 0x360   :  { %3834 = vmatprep.subr.bf16.mxu0 %v7279_v3  ;;  %4469 = vmatprep.subr.bf16.mxu1 %v7279_v3  ;;  %v7334_v3 = vld [vmem:[%s10972_s1 + $0x2b0] ss:$8 sps:$4 sm:$0xff]  }
 0x362   :  { %3826 = vmatmul.mubr.bf16.vlgmr.msra.gmra.mrb[4].mxu0 %v5925_v62  ;;  %4461 = vmatmul.mubr.bf16.vlgmr.msra.gmra.mrb[4].mxu1 %v5963_v63  ;;  %v7329_v62 = vld [vmem:[%s10972_s1 + $0x294] ss:$8 sps:$4 sm:$0xff]   ;;  %v7330_v63 = vld [vmem:[%s10972_s1 + $0x290] ss:$8 sps:$4 sm:$0xff]  }
 0x363   :  { %3835 = vmatpush1.bf16.msra.mxu0 %v7280_v6  ;;  %4470 = vmatpush1.bf16.msra.mxu1 %v7280_v6  ;;  %v7337_v6 = vld [vmem:[%s10972_s1 + $0x2d4] ss:$8 sps:$4 sm:$0xff]  }
 0x364   :  { %3836 = vmatprep.subr.bf16.mxu0 %v7281_v7  ;;  %4471 = vmatprep.subr.bf16.mxu1 %v7281_v7  ;;  %v7338_v7 = vld [vmem:[%s10972_s1 + $0x2d0] ss:$8 sps:$4 sm:$0xff]  }
 0x365   :  { %3866 = vmatprep.mubr.bf16.mxu0 %v5928_v4  ;;  %4501 = vmatprep.mubr.bf16.mxu1 %v5966_v5  ;;  %v7335_v4 = vld [vmem:[%s10972_s1 + $0x2c4] ss:$8 sps:$4 sm:$0xff]   ;;  %v7336_v5 = vld [vmem:[%s10972_s1 + $0x2c0] ss:$8 sps:$4 sm:$0xff]  }
 0x367   :  { %3837 = vmatpush1.bf16.msra.mxu0 %v7282_v8  ;;  %4472 = vmatpush1.bf16.msra.mxu1 %v7282_v8  ;;  %v7339_v8 = vld [vmem:[%s10972_s1 + $0x2e4] ss:$8 sps:$4 sm:$0xff]  }
 0x368   :  { %3838 = vmatprep.subr.bf16.mxu0 %v7283_v9  ;;  %4473 = vmatprep.subr.bf16.mxu1 %v7283_v9  ;;  %v7340_v9 = vld [vmem:[%s10972_s1 + $0x2e0] ss:$8 sps:$4 sm:$0xff]  }
 0x36b   :  { %3839 = vmatpush1.bf16.msra.mxu0 %v7284_v10  ;;  %4474 = vmatpush1.bf16.msra.mxu1 %v7284_v10  ;;  %v7341_v10 = vld [vmem:[%s10972_s1 + $0x2f4] ss:$8 sps:$4 sm:$0xff]  }
 0x36c   :  { %3840 = vmatprep.subr.bf16.mxu0 %v7285_v11  ;;  %4475 = vmatprep.subr.bf16.mxu1 %v7285_v11  ;;  %v5929_v11 = vcombine.low %v9355_v39, %v9355_v39 }
 0x36f   :  { %3841 = vmatpush1.bf16.msra.mxu0 %v7286_v12  ;;  %4476 = vmatpush1.bf16.msra.mxu1 %v7286_v12  ;;  %v5967_v12 = vcombine.low %v9360_v40, %v9360_v40 }
 0x370   :  { %3842 = vmatprep.subr.bf16.mxu0 %v7287_v14  ;;  %4477 = vmatprep.subr.bf16.mxu1 %v7287_v14  ;;  %v9469_v14 = vld [vmem:[%s10971_s0 + $0xe0] sm:$0xff] }
 0x373   :  { %3843 = vmatpush1.bf16.msra.mxu0 %v7288_v15  ;;  %4478 = vmatpush1.bf16.msra.mxu1 %v7288_v15  ;;  %v9474_v15 = vld [vmem:[%s10971_s0 + $0x144] sm:$0xff] }
 0x374   :  { %3844 = vmatprep.subr.bf16.mxu0 %v7289_v16  ;;  %4479 = vmatprep.subr.bf16.mxu1 %v7289_v16  ;;  %v7342_v16 = vld [vmem:[%s10972_s1 + $0x2f0] ss:$8 sps:$4 sm:$0xff]  }
 0x377   :  { %3845 = vmatpush1.bf16.msra.mxu0 %v7290_v17  ;;  %4480 = vmatpush1.bf16.msra.mxu1 %v7290_v17  ;;  %v7343_v17 = vld [vmem:[%s10972_s1 + $0x304] ss:$8 sps:$4 sm:$0xff]  }
 0x378   :  { %3846 = vmatprep.subr.bf16.mxu0 %v7291_v18  ;;  %4481 = vmatprep.subr.bf16.mxu1 %v7291_v18  ;;  %v5932_v18 = vcombine.high %v9469_v14, %v9469_v14 }
 0x37b   :  { %3847 = vmatpush1.bf16.msra.mxu0 %v7292_v19  ;;  %4482 = vmatpush1.bf16.msra.mxu1 %v7292_v19  ;;  %v5970_v19 = vcombine.high %v9474_v15, %v9474_v15 }
 0x37c   :  { %3848 = vmatprep.subr.bf16.mxu0 %v7293_v20  ;;  %4483 = vmatprep.subr.bf16.mxu1 %v7293_v20  ;;  %v7344_v20 = vld [vmem:[%s10972_s1 + $0x300] ss:$8 sps:$4 sm:$0xff]  }
 0x37f   :  { %3849 = vmatpush1.bf16.msra.mxu0 %v7294_v21  ;;  %4484 = vmatpush1.bf16.msra.mxu1 %v7294_v21  ;;  %v7345_v21 = vld [vmem:[%s10972_s1 + $0x314] ss:$8 sps:$4 sm:$0xff]  }
 0x380   :  { %3850 = vmatprep.subr.bf16.mxu0 %v7295_v22  ;;  %4485 = vmatprep.subr.bf16.mxu1 %v7295_v22  ;;  %v7346_v22 = vld [vmem:[%s10972_s1 + $0x310] ss:$8 sps:$4 sm:$0xff]  }
 0x383   :  { %3851 = vmatpush1.bf16.msra.mxu0 %v7296_v23  ;;  %4486 = vmatpush1.bf16.msra.mxu1 %v7296_v23  ;;  %v7347_v23 = vld [vmem:[%s10972_s1 + $0x324] ss:$8 sps:$4 sm:$0xff]  }
 0x384   :  { %3852 = vmatprep.subr.bf16.mxu0 %v7297_v24  ;;  %4487 = vmatprep.subr.bf16.mxu1 %v7297_v24  ;;  %v7348_v24 = vld [vmem:[%s10972_s1 + $0x320] ss:$8 sps:$4 sm:$0xff]  }
 0x387   :  { %3853 = vmatpush1.bf16.msra.mxu0 %v7298_v25  ;;  %4488 = vmatpush1.bf16.msra.mxu1 %v7298_v25  ;;  %v7349_v25 = vld [vmem:[%s10972_s1 + $0x334] ss:$8 sps:$4 sm:$0xff]  }
 0x388   :  { %3854 = vmatprep.subr.bf16.mxu0 %v7299_v26  ;;  %4489 = vmatprep.subr.bf16.mxu1 %v7299_v26  ;;  %v7350_v26 = vld [vmem:[%s10972_s1 + $0x330] ss:$8 sps:$4 sm:$0xff]  }
 0x38b   :  { %3855 = vmatpush1.bf16.msra.mxu0 %v7300_v27  ;;  %4490 = vmatpush1.bf16.msra.mxu1 %v7300_v27  ;;  %v7351_v27 = vld [vmem:[%s10972_s1 + $0x344] ss:$8 sps:$4 sm:$0xff]  }
 0x38c   :  { %3856 = vmatprep.subr.bf16.mxu0 %v7301_v28  ;;  %4491 = vmatprep.subr.bf16.mxu1 %v7301_v28  ;;  %v7352_v28 = vld [vmem:[%s10972_s1 + $0x340] ss:$8 sps:$4 sm:$0xff]  }
 0x38f   :  { %3857 = vmatpush1.bf16.msra.mxu0 %v7302_v29  ;;  %4492 = vmatpush1.bf16.msra.mxu1 %v7302_v29  ;;  %v7353_v29 = vld [vmem:[%s10972_s1 + $0x354] ss:$8 sps:$4 sm:$0xff]  }
 0x390   :  { %3858 = vmatprep.subr.bf16.mxu0 %v7303_v30  ;;  %4493 = vmatprep.subr.bf16.mxu1 %v7303_v30 }
 0x393   :  { %3859 = vmatpush1.bf16.msra.mxu0 %v7304_v31  ;;  %4494 = vmatpush1.bf16.msra.mxu1 %v7304_v31 }
 0x394   :  { %3860 = vmatprep.subr.bf16.mxu0 %v7305_v32  ;;  %4495 = vmatprep.subr.bf16.mxu1 %v7305_v32 }
 0x397   :  { %3861 = vmatpush1.bf16.msra.mxu0 %v7306_v33  ;;  %4496 = vmatpush1.bf16.msra.mxu1 %v7306_v33 }
 0x398   :  { %3862 = vmatprep.subr.bf16.mxu0 %v7307_v34  ;;  %4497 = vmatprep.subr.bf16.mxu1 %v7307_v34 }
 0x39b   :  { %3863 = vmatpush1.bf16.msra.mxu0 %v7308_v35  ;;  %4498 = vmatpush1.bf16.msra.mxu1 %v7308_v35 }
 0x39c   :  { %3864 = vmatprep.subr.bf16.mxu0 %v7309_v36  ;;  %4499 = vmatprep.subr.bf16.mxu1 %v7309_v36 }
 0x39f   :  { %3865 = vmatpush1.bf16.msra.mxu0 %v7310_v41  ;;  %4500 = vmatpush1.bf16.msra.mxu1 %v7310_v41  ;;  %v7355_v41 = vld [vmem:[%s10972_s1 + $0x364] ss:$8 sps:$4 sm:$0xff]  }
 0x3a0   :  { %3875 = vmatprep.subr.bf16.mxu0 %v7311_v42  ;;  %4510 = vmatprep.subr.bf16.mxu1 %v7311_v42  ;;  %v7356_v42 = vld [vmem:[%s10972_s1 + $0x360] ss:$8 sps:$4 sm:$0xff]  }
 0x3a2   :  { %3867 = vmatmul.mubr.bf16.vlgmr.msra.gmra.mrb[4].mxu0 %v5927_v37  ;;  %4502 = vmatmul.mubr.bf16.vlgmr.msra.gmra.mrb[4].mxu1 %v5965_v38  ;;  %v7354_v38 = vld [vmem:[%s10972_s1 + $0x350] ss:$8 sps:$4 sm:$0xff]  }
 0x3a3   :  { %3876 = vmatpush1.bf16.msra.mxu0 %v7312_v45  ;;  %4511 = vmatpush1.bf16.msra.mxu1 %v7312_v45  ;;  %v7359_v45 = vld [vmem:[%s10972_s1 + $0x384] ss:$8 sps:$4 sm:$0xff]  }
 0x3a4   :  { %3877 = vmatprep.subr.bf16.mxu0 %v7313_v46  ;;  %4512 = vmatprep.subr.bf16.mxu1 %v7313_v46  ;;  %v7360_v46 = vld [vmem:[%s10972_s1 + $0x380] ss:$8 sps:$4 sm:$0xff]  }
 0x3a5   :  { %3907 = vmatprep.mubr.bf16.mxu0 %v5930_v43  ;;  %4542 = vmatprep.mubr.bf16.mxu1 %v5968_v44  ;;  %v7357_v43 = vld [vmem:[%s10972_s1 + $0x374] ss:$8 sps:$4 sm:$0xff]   ;;  %v7358_v44 = vld [vmem:[%s10972_s1 + $0x370] ss:$8 sps:$4 sm:$0xff]  }
 0x3a7   :  { %3878 = vmatpush1.bf16.msra.mxu0 %v7314_v47  ;;  %4513 = vmatpush1.bf16.msra.mxu1 %v7314_v47  ;;  %v7361_v47 = vld [vmem:[%s10972_s1 + $0x394] ss:$8 sps:$4 sm:$0xff]  }
 0x3a8   :  { %3879 = vmatprep.subr.bf16.mxu0 %v7315_v48  ;;  %4514 = vmatprep.subr.bf16.mxu1 %v7315_v48  ;;  %v7362_v48 = vld [vmem:[%s10972_s1 + $0x390] ss:$8 sps:$4 sm:$0xff]  }
 0x3ab   :  { %3880 = vmatpush1.bf16.msra.mxu0 %v7316_v49  ;;  %4515 = vmatpush1.bf16.msra.mxu1 %v7316_v49  ;;  %v7363_v49 = vld [vmem:[%s10972_s1 + $0x3a4] ss:$8 sps:$4 sm:$0xff]  }
 0x3ac   :  { %3881 = vmatprep.subr.bf16.mxu0 %v7317_v50  ;;  %4516 = vmatprep.subr.bf16.mxu1 %v7317_v50  ;;  %v7364_v50 = vld [vmem:[%s10972_s1 + $0x3a0] ss:$8 sps:$4 sm:$0xff]  }
 0x3af   :  { %3882 = vmatpush1.bf16.msra.mxu0 %v7318_v51  ;;  %4517 = vmatpush1.bf16.msra.mxu1 %v7318_v51  ;;  %v7365_v51 = vld [vmem:[%s10972_s1 + $0x3b4] ss:$8 sps:$4 sm:$0xff]  }
 0x3b0   :  { %3883 = vmatprep.subr.bf16.mxu0 %v7319_v52  ;;  %4518 = vmatprep.subr.bf16.mxu1 %v7319_v52  ;;  %v7366_v52 = vld [vmem:[%s10972_s1 + $0x3b0] ss:$8 sps:$4 sm:$0xff]  }
 0x3b3   :  { %3884 = vmatpush1.bf16.msra.mxu0 %v7320_v53  ;;  %4519 = vmatpush1.bf16.msra.mxu1 %v7320_v53  ;;  %v7367_v53 = vld [vmem:[%s10972_s1 + $0x3c4] ss:$8 sps:$4 sm:$0xff]  }
 0x3b4   :  { %3885 = vmatprep.subr.bf16.mxu0 %v7321_v54  ;;  %4520 = vmatprep.subr.bf16.mxu1 %v7321_v54  ;;  %v7368_v54 = vld [vmem:[%s10972_s1 + $0x3c0] ss:$8 sps:$4 sm:$0xff]  }
 0x3b7   :  { %3886 = vmatpush1.bf16.msra.mxu0 %v7322_v55  ;;  %4521 = vmatpush1.bf16.msra.mxu1 %v7322_v55  ;;  %v7369_v55 = vld [vmem:[%s10972_s1 + $0x3d4] ss:$8 sps:$4 sm:$0xff]  }
 0x3b8   :  { %3887 = vmatprep.subr.bf16.mxu0 %v7323_v56  ;;  %4522 = vmatprep.subr.bf16.mxu1 %v7323_v56  ;;  %v7370_v56 = vld [vmem:[%s10972_s1 + $0x3d0] ss:$8 sps:$4 sm:$0xff]  }
 0x3bb   :  { %3888 = vmatpush1.bf16.msra.mxu0 %v7324_v57  ;;  %4523 = vmatpush1.bf16.msra.mxu1 %v7324_v57  ;;  %v7371_v57 = vld [vmem:[%s10972_s1 + $0x3e4] ss:$8 sps:$4 sm:$0xff]  }
 0x3bc   :  { %3889 = vmatprep.subr.bf16.mxu0 %v7325_v58  ;;  %4524 = vmatprep.subr.bf16.mxu1 %v7325_v58  ;;  %v7372_v58 = vld [vmem:[%s10972_s1 + $0x3e0] ss:$8 sps:$4 sm:$0xff]  }
 0x3bf   :  { %3890 = vmatpush1.bf16.msra.mxu0 %v7326_v59  ;;  %4525 = vmatpush1.bf16.msra.mxu1 %v7326_v59  ;;  %v7373_v59 = vld [vmem:[%s10972_s1 + $0x3f4] ss:$8 sps:$4 sm:$0xff]  }
 0x3c0   :  { %3891 = vmatprep.subr.bf16.mxu0 %v7327_v60  ;;  %4526 = vmatprep.subr.bf16.mxu1 %v7327_v60  ;;  %v5931_v60 = vcombine.low %v9469_v14, %v9469_v14  ;;  %v7385_v14 = vld [vmem:[%s10972_s1 + $0x454] ss:$8 sps:$4 sm:$0xff]  }
 0x3c3   :  { %3892 = vmatpush1.bf16.msra.mxu0 %v7328_v61  ;;  %4527 = vmatpush1.bf16.msra.mxu1 %v7328_v61  ;;  %v5969_v61 = vcombine.low %v9474_v15, %v9474_v15  ;;  %v7386_v15 = vld [vmem:[%s10972_s1 + $0x450] ss:$8 sps:$4 sm:$0xff]  }
 0x3c4   :  { %3893 = vmatprep.subr.bf16.mxu0 %v7329_v62  ;;  %4528 = vmatprep.subr.bf16.mxu1 %v7329_v62  ;;  %v9595_v62 = vld [vmem:[%s10971_s0 + $0xe8] sm:$0xff] }
 0x3c7   :  { %3894 = vmatpush1.bf16.msra.mxu0 %v7330_v63  ;;  %4529 = vmatpush1.bf16.msra.mxu1 %v7330_v63  ;;  %v9600_v63 = vld [vmem:[%s10971_s0 + $0x14c] sm:$0xff] }
 0x3c8   :  { %3895 = vmatprep.subr.bf16.mxu0 %v7331_v0  ;;  %4530 = vmatprep.subr.bf16.mxu1 %v7331_v0  ;;  %v7374_v0 = vld [vmem:[%s10972_s1 + $0x3f0] ss:$8 sps:$4 sm:$0xff]  }
 0x3cb   :  { %3896 = vmatpush1.bf16.msra.mxu0 %v7332_v1  ;;  %4531 = vmatpush1.bf16.msra.mxu1 %v7332_v1  ;;  %v7375_v1 = vld [vmem:[%s10972_s1 + $0x404] ss:$8 sps:$4 sm:$0xff]  }
 0x3cc   :  { %3897 = vmatprep.subr.bf16.mxu0 %v7333_v2  ;;  %4532 = vmatprep.subr.bf16.mxu1 %v7333_v2  ;;  %v5934_v2 = vcombine.high %v9595_v62, %v9595_v62 }
 0x3cf   :  { %3898 = vmatpush1.bf16.msra.mxu0 %v7334_v3  ;;  %4533 = vmatpush1.bf16.msra.mxu1 %v7334_v3  ;;  %v5972_v3 = vcombine.high %v9600_v63, %v9600_v63 }
 0x3d0   :  { %3899 = vmatprep.subr.bf16.mxu0 %v7335_v4  ;;  %4534 = vmatprep.subr.bf16.mxu1 %v7335_v4  ;;  %v7376_v4 = vld [vmem:[%s10972_s1 + $0x400] ss:$8 sps:$4 sm:$0xff]  }
 0x3d3   :  { %3900 = vmatpush1.bf16.msra.mxu0 %v7336_v5  ;;  %4535 = vmatpush1.bf16.msra.mxu1 %v7336_v5  ;;  %v7377_v5 = vld [vmem:[%s10972_s1 + $0x414] ss:$8 sps:$4 sm:$0xff]  }
 0x3d4   :  { %3901 = vmatprep.subr.bf16.mxu0 %v7337_v6  ;;  %4536 = vmatprep.subr.bf16.mxu1 %v7337_v6  ;;  %v7378_v6 = vld [vmem:[%s10972_s1 + $0x410] ss:$8 sps:$4 sm:$0xff]  }
 0x3d7   :  { %3902 = vmatpush1.bf16.msra.mxu0 %v7338_v7  ;;  %4537 = vmatpush1.bf16.msra.mxu1 %v7338_v7  ;;  %v7379_v7 = vld [vmem:[%s10972_s1 + $0x424] ss:$8 sps:$4 sm:$0xff]  }
 0x3d8   :  { %3903 = vmatprep.subr.bf16.mxu0 %v7339_v8  ;;  %4538 = vmatprep.subr.bf16.mxu1 %v7339_v8  ;;  %v7380_v8 = vld [vmem:[%s10972_s1 + $0x420] ss:$8 sps:$4 sm:$0xff]  }
 0x3db   :  { %3904 = vmatpush1.bf16.msra.mxu0 %v7340_v9  ;;  %4539 = vmatpush1.bf16.msra.mxu1 %v7340_v9  ;;  %v7381_v9 = vld [vmem:[%s10972_s1 + $0x434] ss:$8 sps:$4 sm:$0xff]  }
 0x3dc   :  { %3905 = vmatprep.subr.bf16.mxu0 %v7341_v10  ;;  %4540 = vmatprep.subr.bf16.mxu1 %v7341_v10  ;;  %v7382_v10 = vld [vmem:[%s10972_s1 + $0x430] ss:$8 sps:$4 sm:$0xff]  }
 0x3df   :  { %3906 = vmatpush1.bf16.msra.mxu0 %v7342_v16  ;;  %4541 = vmatpush1.bf16.msra.mxu1 %v7342_v16  ;;  %v7387_v16 = vld [vmem:[%s10972_s1 + $0x464] ss:$8 sps:$4 sm:$0xff]  }
 0x3e0   :  { %3916 = vmatprep.subr.bf16.mxu0 %v7343_v17  ;;  %4551 = vmatprep.subr.bf16.mxu1 %v7343_v17  ;;  %v7388_v17 = vld [vmem:[%s10972_s1 + $0x460] ss:$8 sps:$4 sm:$0xff]  }
 0x3e2   :  { %3908 = vmatmul.mubr.bf16.vlgmr.msra.gmra.mrb[4].mxu0 %v5929_v11  ;;  %4543 = vmatmul.mubr.bf16.vlgmr.msra.gmra.mrb[4].mxu1 %v5967_v12  ;;  %v7383_v11 = vld [vmem:[%s10972_s1 + $0x444] ss:$8 sps:$4 sm:$0xff]   ;;  %v7384_v12 = vld [vmem:[%s10972_s1 + $0x440] ss:$8 sps:$4 sm:$0xff]  }
 0x3e3   :  { %3917 = vmatpush1.bf16.msra.mxu0 %v7344_v20  ;;  %4552 = vmatpush1.bf16.msra.mxu1 %v7344_v20  ;;  %v7391_v20 = vld [vmem:[%s10972_s1 + $0x484] ss:$8 sps:$4 sm:$0xff]  }
 0x3e4   :  { %3918 = vmatprep.subr.bf16.mxu0 %v7345_v21  ;;  %4553 = vmatprep.subr.bf16.mxu1 %v7345_v21  ;;  %v7392_v21 = vld [vmem:[%s10972_s1 + $0x480] ss:$8 sps:$4 sm:$0xff]  }
 0x3e5   :  { %3948 = vmatprep.mubr.bf16.mxu0 %v5932_v18  ;;  %4583 = vmatprep.mubr.bf16.mxu1 %v5970_v19  ;;  %v7389_v18 = vld [vmem:[%s10972_s1 + $0x474] ss:$8 sps:$4 sm:$0xff]   ;;  %v7390_v19 = vld [vmem:[%s10972_s1 + $0x470] ss:$8 sps:$4 sm:$0xff]  }
 0x3e7   :  { %3919 = vmatpush1.bf16.msra.mxu0 %v7346_v22  ;;  %4554 = vmatpush1.bf16.msra.mxu1 %v7346_v22  ;;  %v7393_v22 = vld [vmem:[%s10972_s1 + $0x494] ss:$8 sps:$4 sm:$0xff]  }
 0x3e8   :  { %3920 = vmatprep.subr.bf16.mxu0 %v7347_v23  ;;  %4555 = vmatprep.subr.bf16.mxu1 %v7347_v23  ;;  %v7394_v23 = vld [vmem:[%s10972_s1 + $0x490] ss:$8 sps:$4 sm:$0xff]  }
 0x3eb   :  { %3921 = vmatpush1.bf16.msra.mxu0 %v7348_v24  ;;  %4556 = vmatpush1.bf16.msra.mxu1 %v7348_v24  ;;  %v7395_v24 = vld [vmem:[%s10972_s1 + $0x4a4] ss:$8 sps:$4 sm:$0xff]  }
 0x3ec   :  { %3922 = vmatprep.subr.bf16.mxu0 %v7349_v25  ;;  %4557 = vmatprep.subr.bf16.mxu1 %v7349_v25  ;;  %v7396_v25 = vld [vmem:[%s10972_s1 + $0x4a0] ss:$8 sps:$4 sm:$0xff]  }
 0x3ef   :  { %3923 = vmatpush1.bf16.msra.mxu0 %v7350_v26  ;;  %4558 = vmatpush1.bf16.msra.mxu1 %v7350_v26  ;;  %v7397_v26 = vld [vmem:[%s10972_s1 + $0x4b4] ss:$8 sps:$4 sm:$0xff]  }
 0x3f0   :  { %3924 = vmatprep.subr.bf16.mxu0 %v7351_v27  ;;  %4559 = vmatprep.subr.bf16.mxu1 %v7351_v27  ;;  %v7398_v27 = vld [vmem:[%s10972_s1 + $0x4b0] ss:$8 sps:$4 sm:$0xff]  }
 0x3f3   :  { %3925 = vmatpush1.bf16.msra.mxu0 %v7352_v28  ;;  %4560 = vmatpush1.bf16.msra.mxu1 %v7352_v28  ;;  %v7399_v28 = vld [vmem:[%s10972_s1 + $0x4c4] ss:$8 sps:$4 sm:$0xff]  }
 0x3f4   :  { %3926 = vmatprep.subr.bf16.mxu0 %v7353_v29  ;;  %4561 = vmatprep.subr.bf16.mxu1 %v7353_v29  ;;  %v7400_v29 = vld [vmem:[%s10972_s1 + $0x4c0] ss:$8 sps:$4 sm:$0xff]  }
 0x3f5   :  { %v9516_v30 = vpop.f32.mrb[0].mxu0  ;;  %v9518_v31 = vpop.f32.mrb[0].mxu1 }
 0x3f6   :  { %v4961_v32 = vmax.f32 %v9516_v30, %v9518_v31  ;;  %v9522_v33 = vpop.f32.mrb[1].mxu0  ;;  %v9524_v34 = vpop.f32.mrb[1].mxu1  ;;  %v6022_v30 = vld [vmem:[%s10974_s3 + $0x208] sm:$0xff]  ;;  %v6053_v31 = vld [vmem:[%s10974_s3 + $0x300] sm:$0xff] }
 0x3f7   :  { %v4962_v35 = vmax.f32 %v9522_v33, %v9524_v34  ;;  %v3053_v36 = vpop.f32.mrb[2].mxu0  ;;  %v3688_v37 = vpop.f32.mrb[2].mxu1  ;;  %3927 = vmatpush1.bf16.msra.mxu0 %v7354_v38  ;;  %4562 = vmatpush1.bf16.msra.mxu1 %v7354_v38  ;;  %v7403_v38 = vld [vmem:[%s10972_s1 + $0x4e4] ss:$8 sps:$4 sm:$0xff]   ;;  %v6039_v33 = vld [vmem:[%s10974_s3 + $0x290] sm:$0xff]  ;;  %v6040_v34 = vld [vmem:[%s10974_s3 + $0x298] sm:$0xff] }
 0x3f8   :  { %v3054_v39 = vpop.f32.mrb[3].mxu0  ;;  %v3689_v40 = vpop.f32.mrb[3].mxu1  ;;  %3928 = vmatprep.subr.bf16.mxu0 %v7355_v41  ;;  %4563 = vmatprep.subr.bf16.mxu1 %v7355_v41  ;;  %v7401_v36 = vld [vmem:[%s10972_s1 + $0x4d4] ss:$8 sps:$4 sm:$0xff]   ;;  %v7402_v37 = vld [vmem:[%s10972_s1 + $0x4d0] ss:$8 sps:$4 sm:$0xff]   ;;  %v5933_v41 = vcombine.low %v9595_v62, %v9595_v62 }
 0x3f9   :  { %v7404_v39 = vld [vmem:[%s10972_s1 + $0x4e0] ss:$8 sps:$4 sm:$0xff]   ;;  %v7405_v40 = vld [vmem:[%s10972_s1 + $0x4f4] ss:$8 sps:$4 sm:$0xff]  }
 0x3fa   :  { %v7421_v62 = vld [vmem:[%s10972_s1 + $0x574] ss:$8 sps:$4 sm:$0xff]  }
 0x3fb   :  { %3929 = vmatpush1.bf16.msra.mxu0 %v7356_v42  ;;  %4564 = vmatpush1.bf16.msra.mxu1 %v7356_v42  ;;  %v5971_v42 = vcombine.low %v9600_v63, %v9600_v63  ;;  %v7422_v63 = vld [vmem:[%s10972_s1 + $0x570] ss:$8 sps:$4 sm:$0xff]  }
 0x3fc   :  { %3930 = vmatprep.subr.bf16.mxu0 %v7357_v43  ;;  %4565 = vmatprep.subr.bf16.mxu1 %v7357_v43  ;;  %v9709_v43 = vld [vmem:[%s10971_s0 + $0xf0] sm:$0xff] }
 0x3ff   :  { %3931 = vmatpush1.bf16.msra.mxu0 %v7358_v44  ;;  %4566 = vmatpush1.bf16.msra.mxu1 %v7358_v44  ;;  %v9714_v44 = vld [vmem:[%s10971_s0 + $0x154] sm:$0xff] }
 0x400   :  { %3932 = vmatprep.subr.bf16.mxu0 %v7359_v45  ;;  %4567 = vmatprep.subr.bf16.mxu1 %v7359_v45  ;;  %v7406_v45 = vld [vmem:[%s10972_s1 + $0x4f0] ss:$8 sps:$4 sm:$0xff]  }
 0x403   :  { %3933 = vmatpush1.bf16.msra.mxu0 %v7360_v46  ;;  %4568 = vmatpush1.bf16.msra.mxu1 %v7360_v46  ;;  %v7407_v46 = vld [vmem:[%s10972_s1 + $0x504] ss:$8 sps:$4 sm:$0xff]  }
 0x404   :  { %3934 = vmatprep.subr.bf16.mxu0 %v7361_v47  ;;  %4569 = vmatprep.subr.bf16.mxu1 %v7361_v47  ;;  %v5936_v47 = vcombine.high %v9709_v43, %v9709_v43 }
 0x407   :  { %3935 = vmatpush1.bf16.msra.mxu0 %v7362_v48  ;;  %4570 = vmatpush1.bf16.msra.mxu1 %v7362_v48  ;;  %v5974_v48 = vcombine.high %v9714_v44, %v9714_v44 }
 0x408   :  { %3936 = vmatprep.subr.bf16.mxu0 %v7363_v49  ;;  %4571 = vmatprep.subr.bf16.mxu1 %v7363_v49  ;;  %v7408_v49 = vld [vmem:[%s10972_s1 + $0x500] ss:$8 sps:$4 sm:$0xff]  }
 0x40b   :  { %3937 = vmatpush1.bf16.msra.mxu0 %v7364_v50  ;;  %4572 = vmatpush1.bf16.msra.mxu1 %v7364_v50  ;;  %v7409_v50 = vld [vmem:[%s10972_s1 + $0x514] ss:$8 sps:$4 sm:$0xff]  }
 0x40c   :  { %3938 = vmatprep.subr.bf16.mxu0 %v7365_v51  ;;  %4573 = vmatprep.subr.bf16.mxu1 %v7365_v51  ;;  %v7410_v51 = vld [vmem:[%s10972_s1 + $0x510] ss:$8 sps:$4 sm:$0xff]  }
 0x40f   :  { %3939 = vmatpush1.bf16.msra.mxu0 %v7366_v52  ;;  %4574 = vmatpush1.bf16.msra.mxu1 %v7366_v52  ;;  %v7411_v52 = vld [vmem:[%s10972_s1 + $0x524] ss:$8 sps:$4 sm:$0xff]  }
 0x410   :  { %3940 = vmatprep.subr.bf16.mxu0 %v7367_v53  ;;  %4575 = vmatprep.subr.bf16.mxu1 %v7367_v53  ;;  %v7412_v53 = vld [vmem:[%s10972_s1 + $0x520] ss:$8 sps:$4 sm:$0xff]  }
 0x413   :  { %3941 = vmatpush1.bf16.msra.mxu0 %v7368_v54  ;;  %4576 = vmatpush1.bf16.msra.mxu1 %v7368_v54  ;;  %v7413_v54 = vld [vmem:[%s10972_s1 + $0x534] ss:$8 sps:$4 sm:$0xff]  }
 0x414   :  { %3942 = vmatprep.subr.bf16.mxu0 %v7369_v55  ;;  %4577 = vmatprep.subr.bf16.mxu1 %v7369_v55  ;;  %v7414_v55 = vld [vmem:[%s10972_s1 + $0x530] ss:$8 sps:$4 sm:$0xff]  }
 0x417   :  { %3943 = vmatpush1.bf16.msra.mxu0 %v7370_v56  ;;  %4578 = vmatpush1.bf16.msra.mxu1 %v7370_v56  ;;  %v7415_v56 = vld [vmem:[%s10972_s1 + $0x544] ss:$8 sps:$4 sm:$0xff]  }
 0x418   :  { %3944 = vmatprep.subr.bf16.mxu0 %v7371_v57  ;;  %4579 = vmatprep.subr.bf16.mxu1 %v7371_v57  ;;  %v7416_v57 = vld [vmem:[%s10972_s1 + $0x540] ss:$8 sps:$4 sm:$0xff]  }
 0x41b   :  { %3945 = vmatpush1.bf16.msra.mxu0 %v7372_v58  ;;  %4580 = vmatpush1.bf16.msra.mxu1 %v7372_v58  ;;  %v7417_v58 = vld [vmem:[%s10972_s1 + $0x554] ss:$8 sps:$4 sm:$0xff]  }
 0x41c   :  { %3946 = vmatprep.subr.bf16.mxu0 %v7373_v59  ;;  %4581 = vmatprep.subr.bf16.mxu1 %v7373_v59  ;;  %v7418_v59 = vld [vmem:[%s10972_s1 + $0x550] ss:$8 sps:$4 sm:$0xff]  }
 0x41f   :  { %3947 = vmatpush1.bf16.msra.mxu0 %v7374_v0  ;;  %4582 = vmatpush1.bf16.msra.mxu1 %v7374_v0  ;;  %v7423_v0 = vld [vmem:[%s10972_s1 + $0x584] ss:$8 sps:$4 sm:$0xff]  }
 0x420   :  { %3957 = vmatprep.subr.bf16.mxu0 %v7375_v1  ;;  %4592 = vmatprep.subr.bf16.mxu1 %v7375_v1  ;;  %v7424_v1 = vld [vmem:[%s10972_s1 + $0x580] ss:$8 sps:$4 sm:$0xff]  }
 0x422   :  { %3949 = vmatmul.mubr.bf16.vlgmr.msra.gmra.mrb[4].mxu0 %v5931_v60  ;;  %4584 = vmatmul.mubr.bf16.vlgmr.msra.gmra.mrb[4].mxu1 %v5969_v61  ;;  %v7419_v60 = vld [vmem:[%s10972_s1 + $0x564] ss:$8 sps:$4 sm:$0xff]   ;;  %v7420_v61 = vld [vmem:[%s10972_s1 + $0x560] ss:$8 sps:$4 sm:$0xff]  }
 0x423   :  { %3958 = vmatpush1.bf16.msra.mxu0 %v7376_v4  ;;  %4593 = vmatpush1.bf16.msra.mxu1 %v7376_v4  ;;  %v7427_v4 = vld [vmem:[%s10972_s1 + $0x5a4] ss:$8 sps:$4 sm:$0xff]  }
 0x424   :  { %3959 = vmatprep.subr.bf16.mxu0 %v7377_v5  ;;  %4594 = vmatprep.subr.bf16.mxu1 %v7377_v5  ;;  %v7428_v5 = vld [vmem:[%s10972_s1 + $0x5a0] ss:$8 sps:$4 sm:$0xff]  }
 0x425   :  { %3989 = vmatprep.mubr.bf16.mxu0 %v5934_v2  ;;  %4624 = vmatprep.mubr.bf16.mxu1 %v5972_v3  ;;  %v7425_v2 = vld [vmem:[%s10972_s1 + $0x594] ss:$8 sps:$4 sm:$0xff]   ;;  %v7426_v3 = vld [vmem:[%s10972_s1 + $0x590] ss:$8 sps:$4 sm:$0xff]  }
 0x427   :  { %3960 = vmatpush1.bf16.msra.mxu0 %v7378_v6  ;;  %4595 = vmatpush1.bf16.msra.mxu1 %v7378_v6  ;;  %v7429_v6 = vld [vmem:[%s10972_s1 + $0x5b4] ss:$8 sps:$4 sm:$0xff]  }
 0x428   :  { %3961 = vmatprep.subr.bf16.mxu0 %v7379_v7  ;;  %4596 = vmatprep.subr.bf16.mxu1 %v7379_v7  ;;  %v7430_v7 = vld [vmem:[%s10972_s1 + $0x5b0] ss:$8 sps:$4 sm:$0xff]  }
 0x42b   :  { %3962 = vmatpush1.bf16.msra.mxu0 %v7380_v8  ;;  %4597 = vmatpush1.bf16.msra.mxu1 %v7380_v8  ;;  %v7431_v8 = vld [vmem:[%s10972_s1 + $0x5c4] ss:$8 sps:$4 sm:$0xff]  }
 0x42c   :  { %3963 = vmatprep.subr.bf16.mxu0 %v7381_v9  ;;  %4598 = vmatprep.subr.bf16.mxu1 %v7381_v9  ;;  %v7432_v9 = vld [vmem:[%s10972_s1 + $0x5c0] ss:$8 sps:$4 sm:$0xff]  }
 0x42f   :  { %3964 = vmatpush1.bf16.msra.mxu0 %v7382_v10  ;;  %4599 = vmatpush1.bf16.msra.mxu1 %v7382_v10  ;;  %v7433_v10 = vld [vmem:[%s10972_s1 + $0x5d4] ss:$8 sps:$4 sm:$0xff]  }
 0x430   :  { %3965 = vmatprep.subr.bf16.mxu0 %v7383_v11  ;;  %4600 = vmatprep.subr.bf16.mxu1 %v7383_v11  ;;  %v7434_v11 = vld [vmem:[%s10972_s1 + $0x5d0] ss:$8 sps:$4 sm:$0xff]  }
 0x433   :  { %3966 = vmatpush1.bf16.msra.mxu0 %v7384_v12  ;;  %4601 = vmatpush1.bf16.msra.mxu1 %v7384_v12  ;;  %v7435_v12 = vld [vmem:[%s10972_s1 + $0x5e4] ss:$8 sps:$4 sm:$0xff]  }
 0x434   :  { %3967 = vmatprep.subr.bf16.mxu0 %v7385_v14  ;;  %4602 = vmatprep.subr.bf16.mxu1 %v7385_v14  ;;  %v7436_v14 = vld [vmem:[%s10972_s1 + $0x5e0] ss:$8 sps:$4 sm:$0xff]  }
 0x437   :  { %3968 = vmatpush1.bf16.msra.mxu0 %v7386_v15  ;;  %4603 = vmatpush1.bf16.msra.mxu1 %v7386_v15  ;;  %v7437_v15 = vld [vmem:[%s10972_s1 + $0x5f4] ss:$8 sps:$4 sm:$0xff]  }
 0x438   :  { %3969 = vmatprep.subr.bf16.mxu0 %v7387_v16  ;;  %4604 = vmatprep.subr.bf16.mxu1 %v7387_v16  ;;  %v5935_v16 = vcombine.low %v9709_v43, %v9709_v43  ;;  %v7453_v43 = vld [vmem:[%s10972_s1 + $0x674] ss:$8 sps:$4 sm:$0xff]  }
 0x43b   :  { %3970 = vmatpush1.bf16.msra.mxu0 %v7388_v17  ;;  %4605 = vmatpush1.bf16.msra.mxu1 %v7388_v17  ;;  %v5973_v17 = vcombine.low %v9714_v44, %v9714_v44  ;;  %v7454_v44 = vld [vmem:[%s10972_s1 + $0x670] ss:$8 sps:$4 sm:$0xff]  }
 0x43c   :  { %3971 = vmatprep.subr.bf16.mxu0 %v7389_v18  ;;  %4606 = vmatprep.subr.bf16.mxu1 %v7389_v18  ;;  %v9823_v18 = vld [vmem:[%s10971_s0 + $0xf8] sm:$0xff] }
 0x43f   :  { %3972 = vmatpush1.bf16.msra.mxu0 %v7390_v19  ;;  %4607 = vmatpush1.bf16.msra.mxu1 %v7390_v19  ;;  %v9828_v19 = vld [vmem:[%s10971_s0 + $0x15c] sm:$0xff] }
 0x440   :  { %3973 = vmatprep.subr.bf16.mxu0 %v7391_v20  ;;  %4608 = vmatprep.subr.bf16.mxu1 %v7391_v20  ;;  %v7438_v20 = vld [vmem:[%s10972_s1 + $0x5f0] ss:$8 sps:$4 sm:$0xff]  }
 0x443   :  { %3974 = vmatpush1.bf16.msra.mxu0 %v7392_v21  ;;  %4609 = vmatpush1.bf16.msra.mxu1 %v7392_v21  ;;  %v7439_v21 = vld [vmem:[%s10972_s1 + $0x604] ss:$8 sps:$4 sm:$0xff]  }
 0x444   :  { %3975 = vmatprep.subr.bf16.mxu0 %v7393_v22  ;;  %4610 = vmatprep.subr.bf16.mxu1 %v7393_v22  ;;  %v5938_v22 = vcombine.high %v9823_v18, %v9823_v18 }
 0x447   :  { %3976 = vmatpush1.bf16.msra.mxu0 %v7394_v23  ;;  %4611 = vmatpush1.bf16.msra.mxu1 %v7394_v23  ;;  %v5976_v23 = vcombine.high %v9828_v19, %v9828_v19 }
 0x448   :  { %3977 = vmatprep.subr.bf16.mxu0 %v7395_v24  ;;  %4612 = vmatprep.subr.bf16.mxu1 %v7395_v24  ;;  %v7440_v24 = vld [vmem:[%s10972_s1 + $0x600] ss:$8 sps:$4 sm:$0xff]  }
 0x44b   :  { %3978 = vmatpush1.bf16.msra.mxu0 %v7396_v25  ;;  %4613 = vmatpush1.bf16.msra.mxu1 %v7396_v25  ;;  %v7441_v25 = vld [vmem:[%s10972_s1 + $0x614] ss:$8 sps:$4 sm:$0xff]  }
 0x44c   :  { %3979 = vmatprep.subr.bf16.mxu0 %v7397_v26  ;;  %4614 = vmatprep.subr.bf16.mxu1 %v7397_v26  ;;  %v7442_v26 = vld [vmem:[%s10972_s1 + $0x610] ss:$8 sps:$4 sm:$0xff]  }
 0x44f   :  { %3980 = vmatpush1.bf16.msra.mxu0 %v7398_v27  ;;  %4615 = vmatpush1.bf16.msra.mxu1 %v7398_v27  ;;  %v7443_v27 = vld [vmem:[%s10972_s1 + $0x624] ss:$8 sps:$4 sm:$0xff]  }
 0x450   :  { %3981 = vmatprep.subr.bf16.mxu0 %v7399_v28  ;;  %4616 = vmatprep.subr.bf16.mxu1 %v7399_v28  ;;  %v7444_v28 = vld [vmem:[%s10972_s1 + $0x620] ss:$8 sps:$4 sm:$0xff]  }
 0x453   :  { %3982 = vmatpush1.bf16.msra.mxu0 %v7400_v29  ;;  %4617 = vmatpush1.bf16.msra.mxu1 %v7400_v29  ;;  %v7445_v29 = vld [vmem:[%s10972_s1 + $0x634] ss:$8 sps:$4 sm:$0xff]  }
 0x454   :  { %3983 = vmatprep.subr.bf16.mxu0 %v7401_v36  ;;  %4618 = vmatprep.subr.bf16.mxu1 %v7401_v36  ;;  %v7446_v36 = vld [vmem:[%s10972_s1 + $0x630] ss:$8 sps:$4 sm:$0xff]  }
 0x457   :  { %3984 = vmatpush1.bf16.msra.mxu0 %v7402_v37  ;;  %4619 = vmatpush1.bf16.msra.mxu1 %v7402_v37  ;;  %v7447_v37 = vld [vmem:[%s10972_s1 + $0x644] ss:$8 sps:$4 sm:$0xff]  }
 0x458   :  { %3985 = vmatprep.subr.bf16.mxu0 %v7403_v38  ;;  %4620 = vmatprep.subr.bf16.mxu1 %v7403_v38  ;;  %v7448_v38 = vld [vmem:[%s10972_s1 + $0x640] ss:$8 sps:$4 sm:$0xff]  }
 0x45b   :  { %3986 = vmatpush1.bf16.msra.mxu0 %v7404_v39  ;;  %4621 = vmatpush1.bf16.msra.mxu1 %v7404_v39  ;;  %v7449_v39 = vld [vmem:[%s10972_s1 + $0x654] ss:$8 sps:$4 sm:$0xff]  }
 0x45c   :  { %3987 = vmatprep.subr.bf16.mxu0 %v7405_v40  ;;  %4622 = vmatprep.subr.bf16.mxu1 %v7405_v40  ;;  %v7450_v40 = vld [vmem:[%s10972_s1 + $0x650] ss:$8 sps:$4 sm:$0xff]  }
 0x45f   :  { %3988 = vmatpush1.bf16.msra.mxu0 %v7406_v45  ;;  %4623 = vmatpush1.bf16.msra.mxu1 %v7406_v45  ;;  %v7455_v45 = vld [vmem:[%s10972_s1 + $0x684] ss:$8 sps:$4 sm:$0xff]  }
 0x460   :  { %3998 = vmatprep.subr.bf16.mxu0 %v7407_v46  ;;  %4633 = vmatprep.subr.bf16.mxu1 %v7407_v46  ;;  %v7456_v46 = vld [vmem:[%s10972_s1 + $0x680] ss:$8 sps:$4 sm:$0xff]  }
 0x462   :  { %3990 = vmatmul.mubr.bf16.vlgmr.msra.gmra.mrb[4].mxu0 %v5933_v41  ;;  %4625 = vmatmul.mubr.bf16.vlgmr.msra.gmra.mrb[4].mxu1 %v5971_v42  ;;  %v7451_v41 = vld [vmem:[%s10972_s1 + $0x664] ss:$8 sps:$4 sm:$0xff]   ;;  %v7452_v42 = vld [vmem:[%s10972_s1 + $0x660] ss:$8 sps:$4 sm:$0xff]  }
 0x463   :  { %3999 = vmatpush1.bf16.msra.mxu0 %v7408_v49  ;;  %4634 = vmatpush1.bf16.msra.mxu1 %v7408_v49  ;;  %v7459_v49 = vld [vmem:[%s10972_s1 + $0x6a4] ss:$8 sps:$4 sm:$0xff]  }
 0x464   :  { %4000 = vmatprep.subr.bf16.mxu0 %v7409_v50  ;;  %4635 = vmatprep.subr.bf16.mxu1 %v7409_v50  ;;  %v7460_v50 = vld [vmem:[%s10972_s1 + $0x6a0] ss:$8 sps:$4 sm:$0xff]  }
 0x465   :  { %4030 = vmatprep.mubr.bf16.mxu0 %v5936_v47  ;;  %4665 = vmatprep.mubr.bf16.mxu1 %v5974_v48  ;;  %v7457_v47 = vld [vmem:[%s10972_s1 + $0x694] ss:$8 sps:$4 sm:$0xff]   ;;  %v7458_v48 = vld [vmem:[%s10972_s1 + $0x690] ss:$8 sps:$4 sm:$0xff]  }
 0x467   :  { %4001 = vmatpush1.bf16.msra.mxu0 %v7410_v51  ;;  %4636 = vmatpush1.bf16.msra.mxu1 %v7410_v51  ;;  %v7461_v51 = vld [vmem:[%s10972_s1 + $0x6b4] ss:$8 sps:$4 sm:$0xff]  }
 0x468   :  { %4002 = vmatprep.subr.bf16.mxu0 %v7411_v52  ;;  %4637 = vmatprep.subr.bf16.mxu1 %v7411_v52  ;;  %v7462_v52 = vld [vmem:[%s10972_s1 + $0x6b0] ss:$8 sps:$4 sm:$0xff]  }
 0x46b   :  { %4003 = vmatpush1.bf16.msra.mxu0 %v7412_v53  ;;  %4638 = vmatpush1.bf16.msra.mxu1 %v7412_v53  ;;  %v7463_v53 = vld [vmem:[%s10972_s1 + $0x6c4] ss:$8 sps:$4 sm:$0xff]  }
 0x46c   :  { %4004 = vmatprep.subr.bf16.mxu0 %v7413_v54  ;;  %4639 = vmatprep.subr.bf16.mxu1 %v7413_v54  ;;  %v7464_v54 = vld [vmem:[%s10972_s1 + $0x6c0] ss:$8 sps:$4 sm:$0xff]  }
 0x46f   :  { %4005 = vmatpush1.bf16.msra.mxu0 %v7414_v55  ;;  %4640 = vmatpush1.bf16.msra.mxu1 %v7414_v55  ;;  %v7465_v55 = vld [vmem:[%s10972_s1 + $0x6d4] ss:$8 sps:$4 sm:$0xff]  }
 0x470   :  { %4006 = vmatprep.subr.bf16.mxu0 %v7415_v56  ;;  %4641 = vmatprep.subr.bf16.mxu1 %v7415_v56  ;;  %v7466_v56 = vld [vmem:[%s10972_s1 + $0x6d0] ss:$8 sps:$4 sm:$0xff]  }
 0x473   :  { %4007 = vmatpush1.bf16.msra.mxu0 %v7416_v57  ;;  %4642 = vmatpush1.bf16.msra.mxu1 %v7416_v57  ;;  %v7467_v57 = vld [vmem:[%s10972_s1 + $0x6e4] ss:$8 sps:$4 sm:$0xff]  }
 0x474   :  { %4008 = vmatprep.subr.bf16.mxu0 %v7417_v58  ;;  %4643 = vmatprep.subr.bf16.mxu1 %v7417_v58  ;;  %v7468_v58 = vld [vmem:[%s10972_s1 + $0x6e0] ss:$8 sps:$4 sm:$0xff]  }
 0x477   :  { %4009 = vmatpush1.bf16.msra.mxu0 %v7418_v59  ;;  %4644 = vmatpush1.bf16.msra.mxu1 %v7418_v59  ;;  %v7469_v59 = vld [vmem:[%s10972_s1 + $0x6f4] ss:$8 sps:$4 sm:$0xff]  }
 0x478   :  { %4010 = vmatprep.subr.bf16.mxu0 %v7419_v60  ;;  %4645 = vmatprep.subr.bf16.mxu1 %v7419_v60  ;;  %v5937_v60 = vcombine.low %v9823_v18, %v9823_v18  ;;  %v7485_v18 = vld [vmem:[%s10972_s1 + $0x774] ss:$8 sps:$4 sm:$0xff]  }
 0x47b   :  { %4011 = vmatpush1.bf16.msra.mxu0 %v7420_v61  ;;  %4646 = vmatpush1.bf16.msra.mxu1 %v7420_v61  ;;  %v5975_v61 = vcombine.low %v9828_v19, %v9828_v19  ;;  %v7486_v19 = vld [vmem:[%s10972_s1 + $0x770] ss:$8 sps:$4 sm:$0xff]  }
 0x47c   :  { %4012 = vmatprep.subr.bf16.mxu0 %v7421_v62  ;;  %4647 = vmatprep.subr.bf16.mxu1 %v7421_v62  ;;  %v9937_v62 = vld [vmem:[%s10971_s0 + $0x100] sm:$0xff] }
 0x47f   :  { %4013 = vmatpush1.bf16.msra.mxu0 %v7422_v63  ;;  %4648 = vmatpush1.bf16.msra.mxu1 %v7422_v63  ;;  %v9942_v63 = vld [vmem:[%s10971_s0 + $0x164] sm:$0xff] }
 0x480   :  { %4014 = vmatprep.subr.bf16.mxu0 %v7423_v0  ;;  %4649 = vmatprep.subr.bf16.mxu1 %v7423_v0  ;;  %v7470_v0 = vld [vmem:[%s10972_s1 + $0x6f0] ss:$8 sps:$4 sm:$0xff]  }
 0x483   :  { %4015 = vmatpush1.bf16.msra.mxu0 %v7424_v1  ;;  %4650 = vmatpush1.bf16.msra.mxu1 %v7424_v1  ;;  %v7471_v1 = vld [vmem:[%s10972_s1 + $0x704] ss:$8 sps:$4 sm:$0xff]  }
 0x484   :  { %4016 = vmatprep.subr.bf16.mxu0 %v7425_v2  ;;  %4651 = vmatprep.subr.bf16.mxu1 %v7425_v2  ;;  %v5940_v2 = vcombine.high %v9937_v62, %v9937_v62 }
 0x487   :  { %4017 = vmatpush1.bf16.msra.mxu0 %v7426_v3  ;;  %4652 = vmatpush1.bf16.msra.mxu1 %v7426_v3  ;;  %v5978_v3 = vcombine.high %v9942_v63, %v9942_v63 }
 0x488   :  { %4018 = vmatprep.subr.bf16.mxu0 %v7427_v4  ;;  %4653 = vmatprep.subr.bf16.mxu1 %v7427_v4  ;;  %v7472_v4 = vld [vmem:[%s10972_s1 + $0x700] ss:$8 sps:$4 sm:$0xff]  }
 0x48b   :  { %4019 = vmatpush1.bf16.msra.mxu0 %v7428_v5  ;;  %4654 = vmatpush1.bf16.msra.mxu1 %v7428_v5  ;;  %v7473_v5 = vld [vmem:[%s10972_s1 + $0x714] ss:$8 sps:$4 sm:$0xff]  }
 0x48c   :  { %4020 = vmatprep.subr.bf16.mxu0 %v7429_v6  ;;  %4655 = vmatprep.subr.bf16.mxu1 %v7429_v6  ;;  %v7474_v6 = vld [vmem:[%s10972_s1 + $0x710] ss:$8 sps:$4 sm:$0xff]  }
 0x48f   :  { %4021 = vmatpush1.bf16.msra.mxu0 %v7430_v7  ;;  %4656 = vmatpush1.bf16.msra.mxu1 %v7430_v7  ;;  %v7475_v7 = vld [vmem:[%s10972_s1 + $0x724] ss:$8 sps:$4 sm:$0xff]  }
 0x490   :  { %4022 = vmatprep.subr.bf16.mxu0 %v7431_v8  ;;  %4657 = vmatprep.subr.bf16.mxu1 %v7431_v8  ;;  %v7476_v8 = vld [vmem:[%s10972_s1 + $0x720] ss:$8 sps:$4 sm:$0xff]  }
 0x493   :  { %4023 = vmatpush1.bf16.msra.mxu0 %v7432_v9  ;;  %4658 = vmatpush1.bf16.msra.mxu1 %v7432_v9  ;;  %v7477_v9 = vld [vmem:[%s10972_s1 + $0x734] ss:$8 sps:$4 sm:$0xff]  }
 0x494   :  { %4024 = vmatprep.subr.bf16.mxu0 %v7433_v10  ;;  %4659 = vmatprep.subr.bf16.mxu1 %v7433_v10  ;;  %v7478_v10 = vld [vmem:[%s10972_s1 + $0x730] ss:$8 sps:$4 sm:$0xff]  }
 0x497   :  { %4025 = vmatpush1.bf16.msra.mxu0 %v7434_v11  ;;  %4660 = vmatpush1.bf16.msra.mxu1 %v7434_v11  ;;  %v7479_v11 = vld [vmem:[%s10972_s1 + $0x744] ss:$8 sps:$4 sm:$0xff]  }
 0x498   :  { %4026 = vmatprep.subr.bf16.mxu0 %v7435_v12  ;;  %4661 = vmatprep.subr.bf16.mxu1 %v7435_v12  ;;  %v7480_v12 = vld [vmem:[%s10972_s1 + $0x740] ss:$8 sps:$4 sm:$0xff]  }
 0x49b   :  { %4027 = vmatpush1.bf16.msra.mxu0 %v7436_v14  ;;  %4662 = vmatpush1.bf16.msra.mxu1 %v7436_v14  ;;  %v7481_v14 = vld [vmem:[%s10972_s1 + $0x754] ss:$8 sps:$4 sm:$0xff]  }
 0x49c   :  { %4028 = vmatprep.subr.bf16.mxu0 %v7437_v15  ;;  %4663 = vmatprep.subr.bf16.mxu1 %v7437_v15  ;;  %v7482_v15 = vld [vmem:[%s10972_s1 + $0x750] ss:$8 sps:$4 sm:$0xff]  }
 0x49f   :  { %4029 = vmatpush1.bf16.msra.mxu0 %v7438_v20  ;;  %4664 = vmatpush1.bf16.msra.mxu1 %v7438_v20  ;;  %v7487_v20 = vld [vmem:[%s10972_s1 + $0x784] ss:$8 sps:$4 sm:$0xff]  }
 0x4a0   :  { %4039 = vmatprep.subr.bf16.mxu0 %v7439_v21  ;;  %4674 = vmatprep.subr.bf16.mxu1 %v7439_v21  ;;  %v7488_v21 = vld [vmem:[%s10972_s1 + $0x780] ss:$8 sps:$4 sm:$0xff]  }
 0x4a2   :  { %4031 = vmatmul.mubr.bf16.vlgmr.msra.gmra.mrb[4].mxu0 %v5935_v16  ;;  %4666 = vmatmul.mubr.bf16.vlgmr.msra.gmra.mrb[4].mxu1 %v5973_v17  ;;  %v7483_v16 = vld [vmem:[%s10972_s1 + $0x764] ss:$8 sps:$4 sm:$0xff]   ;;  %v7484_v17 = vld [vmem:[%s10972_s1 + $0x760] ss:$8 sps:$4 sm:$0xff]  }
 0x4a3   :  { %4040 = vmatpush1.bf16.msra.mxu0 %v7440_v24  ;;  %4675 = vmatpush1.bf16.msra.mxu1 %v7440_v24  ;;  %v7491_v24 = vld [vmem:[%s10972_s1 + $0x7a4] ss:$8 sps:$4 sm:$0xff]  }
 0x4a4   :  { %4041 = vmatprep.subr.bf16.mxu0 %v7441_v25  ;;  %4676 = vmatprep.subr.bf16.mxu1 %v7441_v25  ;;  %v7492_v25 = vld [vmem:[%s10972_s1 + $0x7a0] ss:$8 sps:$4 sm:$0xff]  }
 0x4a5   :  { %4071 = vmatprep.mubr.bf16.mxu0 %v5938_v22  ;;  %4706 = vmatprep.mubr.bf16.mxu1 %v5976_v23  ;;  %v7489_v22 = vld [vmem:[%s10972_s1 + $0x794] ss:$8 sps:$4 sm:$0xff]   ;;  %v7490_v23 = vld [vmem:[%s10972_s1 + $0x790] ss:$8 sps:$4 sm:$0xff]  }
 0x4a7   :  { %4042 = vmatpush1.bf16.msra.mxu0 %v7442_v26  ;;  %4677 = vmatpush1.bf16.msra.mxu1 %v7442_v26  ;;  %v7493_v26 = vld [vmem:[%s10972_s1 + $0x7b4] ss:$8 sps:$4 sm:$0xff]  }
 0x4a8   :  { %4043 = vmatprep.subr.bf16.mxu0 %v7443_v27  ;;  %4678 = vmatprep.subr.bf16.mxu1 %v7443_v27  ;;  %v7494_v27 = vld [vmem:[%s10972_s1 + $0x7b0] ss:$8 sps:$4 sm:$0xff]  }
 0x4ab   :  { %4044 = vmatpush1.bf16.msra.mxu0 %v7444_v28  ;;  %4679 = vmatpush1.bf16.msra.mxu1 %v7444_v28  ;;  %v7495_v28 = vld [vmem:[%s10972_s1 + $0x7c4] ss:$8 sps:$4 sm:$0xff]  }
 0x4ac   :  { %4045 = vmatprep.subr.bf16.mxu0 %v7445_v29  ;;  %4680 = vmatprep.subr.bf16.mxu1 %v7445_v29  ;;  %v7496_v29 = vld [vmem:[%s10972_s1 + $0x7c0] ss:$8 sps:$4 sm:$0xff]  }
 0x4af   :  { %4046 = vmatpush1.bf16.msra.mxu0 %v7446_v36  ;;  %4681 = vmatpush1.bf16.msra.mxu1 %v7446_v36  ;;  %v7497_v36 = vld [vmem:[%s10972_s1 + $0x7d4] ss:$8 sps:$4 sm:$0xff]  }
 0x4b0   :  { %4047 = vmatprep.subr.bf16.mxu0 %v7447_v37  ;;  %4682 = vmatprep.subr.bf16.mxu1 %v7447_v37  ;;  %v7498_v37 = vld [vmem:[%s10972_s1 + $0x7d0] ss:$8 sps:$4 sm:$0xff]  }
 0x4b3   :  { %4048 = vmatpush1.bf16.msra.mxu0 %v7448_v38  ;;  %4683 = vmatpush1.bf16.msra.mxu1 %v7448_v38  ;;  %v7499_v38 = vld [vmem:[%s10972_s1 + $0x7e4] ss:$8 sps:$4 sm:$0xff]  }
 0x4b4   :  { %4049 = vmatprep.subr.bf16.mxu0 %v7449_v39  ;;  %4684 = vmatprep.subr.bf16.mxu1 %v7449_v39  ;;  %v7500_v39 = vld [vmem:[%s10972_s1 + $0x7e0] ss:$8 sps:$4 sm:$0xff]  }
 0x4b7   :  { %4050 = vmatpush1.bf16.msra.mxu0 %v7450_v40  ;;  %4685 = vmatpush1.bf16.msra.mxu1 %v7450_v40  ;;  %v7501_v40 = vld [vmem:[%s10972_s1 + $0x7f4] ss:$8 sps:$4 sm:$0xff]  }
 0x4b8   :  { %4051 = vmatprep.subr.bf16.mxu0 %v7451_v41  ;;  %4686 = vmatprep.subr.bf16.mxu1 %v7451_v41  ;;  %v5939_v41 = vcombine.low %v9937_v62, %v9937_v62  ;;  %v7517_v62 = vld [vmem:[%s10972_s1 + $0x874] ss:$8 sps:$4 sm:$0xff]  }
 0x4bb   :  { %4052 = vmatpush1.bf16.msra.mxu0 %v7452_v42  ;;  %4687 = vmatpush1.bf16.msra.mxu1 %v7452_v42  ;;  %v5977_v42 = vcombine.low %v9942_v63, %v9942_v63  ;;  %v7518_v63 = vld [vmem:[%s10972_s1 + $0x870] ss:$8 sps:$4 sm:$0xff]  }
 0x4bc   :  { %4053 = vmatprep.subr.bf16.mxu0 %v7453_v43  ;;  %4688 = vmatprep.subr.bf16.mxu1 %v7453_v43  ;;  %v10051_v43 = vld [vmem:[%s10971_s0 + $0x108] sm:$0xff] }
 0x4bf   :  { %4054 = vmatpush1.bf16.msra.mxu0 %v7454_v44  ;;  %4689 = vmatpush1.bf16.msra.mxu1 %v7454_v44  ;;  %v10056_v44 = vld [vmem:[%s10971_s0 + $0x16c] sm:$0xff] }
 0x4c0   :  { %4055 = vmatprep.subr.bf16.mxu0 %v7455_v45  ;;  %4690 = vmatprep.subr.bf16.mxu1 %v7455_v45  ;;  %v7502_v45 = vld [vmem:[%s10972_s1 + $0x7f0] ss:$8 sps:$4 sm:$0xff]  }
 0x4c3   :  { %4056 = vmatpush1.bf16.msra.mxu0 %v7456_v46  ;;  %4691 = vmatpush1.bf16.msra.mxu1 %v7456_v46  ;;  %v7503_v46 = vld [vmem:[%s10972_s1 + $0x804] ss:$8 sps:$4 sm:$0xff]  }
 0x4c4   :  { %4057 = vmatprep.subr.bf16.mxu0 %v7457_v47  ;;  %4692 = vmatprep.subr.bf16.mxu1 %v7457_v47  ;;  %v5942_v47 = vcombine.high %v10051_v43, %v10051_v43 }
 0x4c7   :  { %4058 = vmatpush1.bf16.msra.mxu0 %v7458_v48  ;;  %4693 = vmatpush1.bf16.msra.mxu1 %v7458_v48  ;;  %v5980_v48 = vcombine.high %v10056_v44, %v10056_v44 }
 0x4c8   :  { %4059 = vmatprep.subr.bf16.mxu0 %v7459_v49  ;;  %4694 = vmatprep.subr.bf16.mxu1 %v7459_v49  ;;  %v7504_v49 = vld [vmem:[%s10972_s1 + $0x800] ss:$8 sps:$4 sm:$0xff]  }
 0x4cb   :  { %4060 = vmatpush1.bf16.msra.mxu0 %v7460_v50  ;;  %4695 = vmatpush1.bf16.msra.mxu1 %v7460_v50  ;;  %v7505_v50 = vld [vmem:[%s10972_s1 + $0x814] ss:$8 sps:$4 sm:$0xff]  }
 0x4cc   :  { %4061 = vmatprep.subr.bf16.mxu0 %v7461_v51  ;;  %4696 = vmatprep.subr.bf16.mxu1 %v7461_v51  ;;  %v7506_v51 = vld [vmem:[%s10972_s1 + $0x810] ss:$8 sps:$4 sm:$0xff]  }
 0x4cf   :  { %4062 = vmatpush1.bf16.msra.mxu0 %v7462_v52  ;;  %4697 = vmatpush1.bf16.msra.mxu1 %v7462_v52  ;;  %v7507_v52 = vld [vmem:[%s10972_s1 + $0x824] ss:$8 sps:$4 sm:$0xff]  }
 0x4d0   :  { %4063 = vmatprep.subr.bf16.mxu0 %v7463_v53  ;;  %4698 = vmatprep.subr.bf16.mxu1 %v7463_v53  ;;  %v7508_v53 = vld [vmem:[%s10972_s1 + $0x820] ss:$8 sps:$4 sm:$0xff]  }
 0x4d3   :  { %4064 = vmatpush1.bf16.msra.mxu0 %v7464_v54  ;;  %4699 = vmatpush1.bf16.msra.mxu1 %v7464_v54  ;;  %v7509_v54 = vld [vmem:[%s10972_s1 + $0x834] ss:$8 sps:$4 sm:$0xff]  }
 0x4d4   :  { %4065 = vmatprep.subr.bf16.mxu0 %v7465_v55  ;;  %4700 = vmatprep.subr.bf16.mxu1 %v7465_v55  ;;  %v7510_v55 = vld [vmem:[%s10972_s1 + $0x830] ss:$8 sps:$4 sm:$0xff]  }
 0x4d7   :  { %4066 = vmatpush1.bf16.msra.mxu0 %v7466_v56  ;;  %4701 = vmatpush1.bf16.msra.mxu1 %v7466_v56  ;;  %v7511_v56 = vld [vmem:[%s10972_s1 + $0x844] ss:$8 sps:$4 sm:$0xff]  }
 0x4d8   :  { %4067 = vmatprep.subr.bf16.mxu0 %v7467_v57  ;;  %4702 = vmatprep.subr.bf16.mxu1 %v7467_v57  ;;  %v7512_v57 = vld [vmem:[%s10972_s1 + $0x840] ss:$8 sps:$4 sm:$0xff]  }
 0x4db   :  { %4068 = vmatpush1.bf16.msra.mxu0 %v7468_v58  ;;  %4703 = vmatpush1.bf16.msra.mxu1 %v7468_v58  ;;  %v7513_v58 = vld [vmem:[%s10972_s1 + $0x854] ss:$8 sps:$4 sm:$0xff]  }
 0x4dc   :  { %4069 = vmatprep.subr.bf16.mxu0 %v7469_v59  ;;  %4704 = vmatprep.subr.bf16.mxu1 %v7469_v59  ;;  %v7514_v59 = vld [vmem:[%s10972_s1 + $0x850] ss:$8 sps:$4 sm:$0xff]  }
 0x4df   :  { %4070 = vmatpush1.bf16.msra.mxu0 %v7470_v0  ;;  %4705 = vmatpush1.bf16.msra.mxu1 %v7470_v0  ;;  %v7519_v0 = vld [vmem:[%s10972_s1 + $0x884] ss:$8 sps:$4 sm:$0xff]  }
 0x4e0   :  { %4080 = vmatprep.subr.bf16.mxu0 %v7471_v1  ;;  %4715 = vmatprep.subr.bf16.mxu1 %v7471_v1  ;;  %v7520_v1 = vld [vmem:[%s10972_s1 + $0x880] ss:$8 sps:$4 sm:$0xff]  }
 0x4e2   :  { %4072 = vmatmul.mubr.bf16.vlgmr.msra.gmra.mrb[4].mxu0 %v5937_v60  ;;  %4707 = vmatmul.mubr.bf16.vlgmr.msra.gmra.mrb[4].mxu1 %v5975_v61  ;;  %v7515_v60 = vld [vmem:[%s10972_s1 + $0x864] ss:$8 sps:$4 sm:$0xff]   ;;  %v7516_v61 = vld [vmem:[%s10972_s1 + $0x860] ss:$8 sps:$4 sm:$0xff]  }
 0x4e3   :  { %4081 = vmatpush1.bf16.msra.mxu0 %v7472_v4  ;;  %4716 = vmatpush1.bf16.msra.mxu1 %v7472_v4  ;;  %v7523_v4 = vld [vmem:[%s10972_s1 + $0x8a4] ss:$8 sps:$4 sm:$0xff]  }
 0x4e4   :  { %4082 = vmatprep.subr.bf16.mxu0 %v7473_v5  ;;  %4717 = vmatprep.subr.bf16.mxu1 %v7473_v5  ;;  %v7524_v5 = vld [vmem:[%s10972_s1 + $0x8a0] ss:$8 sps:$4 sm:$0xff]  }
 0x4e5   :  { %4112 = vmatprep.mubr.bf16.mxu0 %v5940_v2  ;;  %4747 = vmatprep.mubr.bf16.mxu1 %v5978_v3  ;;  %v7521_v2 = vld [vmem:[%s10972_s1 + $0x894] ss:$8 sps:$4 sm:$0xff]   ;;  %v7522_v3 = vld [vmem:[%s10972_s1 + $0x890] ss:$8 sps:$4 sm:$0xff]  }
 0x4e7   :  { %4083 = vmatpush1.bf16.msra.mxu0 %v7474_v6  ;;  %4718 = vmatpush1.bf16.msra.mxu1 %v7474_v6  ;;  %v7525_v6 = vld [vmem:[%s10972_s1 + $0x8b4] ss:$8 sps:$4 sm:$0xff]  }
 0x4e8   :  { %4084 = vmatprep.subr.bf16.mxu0 %v7475_v7  ;;  %4719 = vmatprep.subr.bf16.mxu1 %v7475_v7  ;;  %v7526_v7 = vld [vmem:[%s10972_s1 + $0x8b0] ss:$8 sps:$4 sm:$0xff]  }
 0x4eb   :  { %4085 = vmatpush1.bf16.msra.mxu0 %v7476_v8  ;;  %4720 = vmatpush1.bf16.msra.mxu1 %v7476_v8  ;;  %v7527_v8 = vld [vmem:[%s10972_s1 + $0x8c4] ss:$8 sps:$4 sm:$0xff]  }
 0x4ec   :  { %4086 = vmatprep.subr.bf16.mxu0 %v7477_v9  ;;  %4721 = vmatprep.subr.bf16.mxu1 %v7477_v9  ;;  %v7528_v9 = vld [vmem:[%s10972_s1 + $0x8c0] ss:$8 sps:$4 sm:$0xff]  }
 0x4ef   :  { %4087 = vmatpush1.bf16.msra.mxu0 %v7478_v10  ;;  %4722 = vmatpush1.bf16.msra.mxu1 %v7478_v10  ;;  %v7529_v10 = vld [vmem:[%s10972_s1 + $0x8d4] ss:$8 sps:$4 sm:$0xff]  }
 0x4f0   :  { %4088 = vmatprep.subr.bf16.mxu0 %v7479_v11  ;;  %4723 = vmatprep.subr.bf16.mxu1 %v7479_v11  ;;  %v7530_v11 = vld [vmem:[%s10972_s1 + $0x8d0] ss:$8 sps:$4 sm:$0xff]  }
 0x4f3   :  { %4089 = vmatpush1.bf16.msra.mxu0 %v7480_v12  ;;  %4724 = vmatpush1.bf16.msra.mxu1 %v7480_v12  ;;  %v7531_v12 = vld [vmem:[%s10972_s1 + $0x8e4] ss:$8 sps:$4 sm:$0xff]  }
 0x4f4   :  { %4090 = vmatprep.subr.bf16.mxu0 %v7481_v14  ;;  %4725 = vmatprep.subr.bf16.mxu1 %v7481_v14  ;;  %v7532_v14 = vld [vmem:[%s10972_s1 + $0x8e0] ss:$8 sps:$4 sm:$0xff]  }
 0x4f7   :  { %4091 = vmatpush1.bf16.msra.mxu0 %v7482_v15  ;;  %4726 = vmatpush1.bf16.msra.mxu1 %v7482_v15  ;;  %v7533_v15 = vld [vmem:[%s10972_s1 + $0x8f4] ss:$8 sps:$4 sm:$0xff]  }
 0x4f8   :  { %4092 = vmatprep.subr.bf16.mxu0 %v7483_v16  ;;  %4727 = vmatprep.subr.bf16.mxu1 %v7483_v16  ;;  %v5941_v16 = vcombine.low %v10051_v43, %v10051_v43  ;;  %v7549_v43 = vld [vmem:[%s10972_s1 + $0x974] ss:$8 sps:$4 sm:$0xff]  }
 0x4fb   :  { %4093 = vmatpush1.bf16.msra.mxu0 %v7484_v17  ;;  %4728 = vmatpush1.bf16.msra.mxu1 %v7484_v17  ;;  %v5979_v17 = vcombine.low %v10056_v44, %v10056_v44  ;;  %v7550_v44 = vld [vmem:[%s10972_s1 + $0x970] ss:$8 sps:$4 sm:$0xff]  }
 0x4fc   :  { %4094 = vmatprep.subr.bf16.mxu0 %v7485_v18  ;;  %4729 = vmatprep.subr.bf16.mxu1 %v7485_v18  ;;  %v10165_v18 = vld [vmem:[%s10971_s0 + $0x110] sm:$0xff] }
 0x4ff   :  { %4095 = vmatpush1.bf16.msra.mxu0 %v7486_v19  ;;  %4730 = vmatpush1.bf16.msra.mxu1 %v7486_v19  ;;  %v10170_v19 = vld [vmem:[%s10971_s0 + $0x174] sm:$0xff] }
 0x500   :  { %4096 = vmatprep.subr.bf16.mxu0 %v7487_v20  ;;  %4731 = vmatprep.subr.bf16.mxu1 %v7487_v20  ;;  %v7534_v20 = vld [vmem:[%s10972_s1 + $0x8f0] ss:$8 sps:$4 sm:$0xff]  }
 0x503   :  { %4097 = vmatpush1.bf16.msra.mxu0 %v7488_v21  ;;  %4732 = vmatpush1.bf16.msra.mxu1 %v7488_v21  ;;  %v7535_v21 = vld [vmem:[%s10972_s1 + $0x904] ss:$8 sps:$4 sm:$0xff]  }
 0x504   :  { %4098 = vmatprep.subr.bf16.mxu0 %v7489_v22  ;;  %4733 = vmatprep.subr.bf16.mxu1 %v7489_v22  ;;  %v5944_v22 = vcombine.high %v10165_v18, %v10165_v18 }
 0x507   :  { %4099 = vmatpush1.bf16.msra.mxu0 %v7490_v23  ;;  %4734 = vmatpush1.bf16.msra.mxu1 %v7490_v23  ;;  %v5982_v23 = vcombine.high %v10170_v19, %v10170_v19 }
 0x508   :  { %4100 = vmatprep.subr.bf16.mxu0 %v7491_v24  ;;  %4735 = vmatprep.subr.bf16.mxu1 %v7491_v24  ;;  %v7536_v24 = vld [vmem:[%s10972_s1 + $0x900] ss:$8 sps:$4 sm:$0xff]  }
 0x50b   :  { %4101 = vmatpush1.bf16.msra.mxu0 %v7492_v25  ;;  %4736 = vmatpush1.bf16.msra.mxu1 %v7492_v25  ;;  %v7537_v25 = vld [vmem:[%s10972_s1 + $0x914] ss:$8 sps:$4 sm:$0xff]  }
 0x50c   :  { %4102 = vmatprep.subr.bf16.mxu0 %v7493_v26  ;;  %4737 = vmatprep.subr.bf16.mxu1 %v7493_v26  ;;  %v7538_v26 = vld [vmem:[%s10972_s1 + $0x910] ss:$8 sps:$4 sm:$0xff]  }
 0x50f   :  { %4103 = vmatpush1.bf16.msra.mxu0 %v7494_v27  ;;  %4738 = vmatpush1.bf16.msra.mxu1 %v7494_v27  ;;  %v7539_v27 = vld [vmem:[%s10972_s1 + $0x924] ss:$8 sps:$4 sm:$0xff]  }
 0x510   :  { %4104 = vmatprep.subr.bf16.mxu0 %v7495_v28  ;;  %4739 = vmatprep.subr.bf16.mxu1 %v7495_v28  ;;  %v7540_v28 = vld [vmem:[%s10972_s1 + $0x920] ss:$8 sps:$4 sm:$0xff]  }
 0x513   :  { %4105 = vmatpush1.bf16.msra.mxu0 %v7496_v29  ;;  %4740 = vmatpush1.bf16.msra.mxu1 %v7496_v29  ;;  %v7541_v29 = vld [vmem:[%s10972_s1 + $0x934] ss:$8 sps:$4 sm:$0xff]  }
 0x514   :  { %4106 = vmatprep.subr.bf16.mxu0 %v7497_v36  ;;  %4741 = vmatprep.subr.bf16.mxu1 %v7497_v36  ;;  %v7542_v36 = vld [vmem:[%s10972_s1 + $0x930] ss:$8 sps:$4 sm:$0xff]  }
 0x517   :  { %4107 = vmatpush1.bf16.msra.mxu0 %v7498_v37  ;;  %4742 = vmatpush1.bf16.msra.mxu1 %v7498_v37  ;;  %v7543_v37 = vld [vmem:[%s10972_s1 + $0x944] ss:$8 sps:$4 sm:$0xff]  }
 0x518   :  { %4108 = vmatprep.subr.bf16.mxu0 %v7499_v38  ;;  %4743 = vmatprep.subr.bf16.mxu1 %v7499_v38  ;;  %v7544_v38 = vld [vmem:[%s10972_s1 + $0x940] ss:$8 sps:$4 sm:$0xff]  }
 0x51b   :  { %4109 = vmatpush1.bf16.msra.mxu0 %v7500_v39  ;;  %4744 = vmatpush1.bf16.msra.mxu1 %v7500_v39  ;;  %v7545_v39 = vld [vmem:[%s10972_s1 + $0x954] ss:$8 sps:$4 sm:$0xff]  }
 0x51c   :  { %4110 = vmatprep.subr.bf16.mxu0 %v7501_v40  ;;  %4745 = vmatprep.subr.bf16.mxu1 %v7501_v40  ;;  %v7546_v40 = vld [vmem:[%s10972_s1 + $0x950] ss:$8 sps:$4 sm:$0xff]  }
 0x51f   :  { %4111 = vmatpush1.bf16.msra.mxu0 %v7502_v45  ;;  %4746 = vmatpush1.bf16.msra.mxu1 %v7502_v45  ;;  %v7551_v45 = vld [vmem:[%s10972_s1 + $0x984] ss:$8 sps:$4 sm:$0xff]  }
 0x520   :  { %4121 = vmatprep.subr.bf16.mxu0 %v7503_v46  ;;  %4756 = vmatprep.subr.bf16.mxu1 %v7503_v46  ;;  %v7552_v46 = vld [vmem:[%s10972_s1 + $0x980] ss:$8 sps:$4 sm:$0xff]  }
 0x522   :  { %4113 = vmatmul.mubr.bf16.vlgmr.msra.gmra.mrb[4].mxu0 %v5939_v41  ;;  %4748 = vmatmul.mubr.bf16.vlgmr.msra.gmra.mrb[4].mxu1 %v5977_v42  ;;  %v7547_v41 = vld [vmem:[%s10972_s1 + $0x964] ss:$8 sps:$4 sm:$0xff]   ;;  %v7548_v42 = vld [vmem:[%s10972_s1 + $0x960] ss:$8 sps:$4 sm:$0xff]  }
 0x523   :  { %4122 = vmatpush1.bf16.msra.mxu0 %v7504_v49  ;;  %4757 = vmatpush1.bf16.msra.mxu1 %v7504_v49  ;;  %v7555_v49 = vld [vmem:[%s10972_s1 + $0x9a4] ss:$8 sps:$4 sm:$0xff]  }
 0x524   :  { %4123 = vmatprep.subr.bf16.mxu0 %v7505_v50  ;;  %4758 = vmatprep.subr.bf16.mxu1 %v7505_v50  ;;  %v7556_v50 = vld [vmem:[%s10972_s1 + $0x9a0] ss:$8 sps:$4 sm:$0xff]  }
 0x525   :  { %4153 = vmatprep.mubr.bf16.mxu0 %v5942_v47  ;;  %4788 = vmatprep.mubr.bf16.mxu1 %v5980_v48  ;;  %v7553_v47 = vld [vmem:[%s10972_s1 + $0x994] ss:$8 sps:$4 sm:$0xff]   ;;  %v7554_v48 = vld [vmem:[%s10972_s1 + $0x990] ss:$8 sps:$4 sm:$0xff]  }
 0x527   :  { %4124 = vmatpush1.bf16.msra.mxu0 %v7506_v51  ;;  %4759 = vmatpush1.bf16.msra.mxu1 %v7506_v51  ;;  %v7557_v51 = vld [vmem:[%s10972_s1 + $0x9b4] ss:$8 sps:$4 sm:$0xff]  }
 0x528   :  { %4125 = vmatprep.subr.bf16.mxu0 %v7507_v52  ;;  %4760 = vmatprep.subr.bf16.mxu1 %v7507_v52  ;;  %v7558_v52 = vld [vmem:[%s10972_s1 + $0x9b0] ss:$8 sps:$4 sm:$0xff]  }
 0x52b   :  { %4126 = vmatpush1.bf16.msra.mxu0 %v7508_v53  ;;  %4761 = vmatpush1.bf16.msra.mxu1 %v7508_v53  ;;  %v7559_v53 = vld [vmem:[%s10972_s1 + $0x9c4] ss:$8 sps:$4 sm:$0xff]  }
 0x52c   :  { %4127 = vmatprep.subr.bf16.mxu0 %v7509_v54  ;;  %4762 = vmatprep.subr.bf16.mxu1 %v7509_v54  ;;  %v7560_v54 = vld [vmem:[%s10972_s1 + $0x9c0] ss:$8 sps:$4 sm:$0xff]  }
 0x52f   :  { %4128 = vmatpush1.bf16.msra.mxu0 %v7510_v55  ;;  %4763 = vmatpush1.bf16.msra.mxu1 %v7510_v55  ;;  %v7561_v55 = vld [vmem:[%s10972_s1 + $0x9d4] ss:$8 sps:$4 sm:$0xff]  }
 0x530   :  { %4129 = vmatprep.subr.bf16.mxu0 %v7511_v56  ;;  %4764 = vmatprep.subr.bf16.mxu1 %v7511_v56  ;;  %v7562_v56 = vld [vmem:[%s10972_s1 + $0x9d0] ss:$8 sps:$4 sm:$0xff]  }
 0x533   :  { %4130 = vmatpush1.bf16.msra.mxu0 %v7512_v57  ;;  %4765 = vmatpush1.bf16.msra.mxu1 %v7512_v57  ;;  %v7563_v57 = vld [vmem:[%s10972_s1 + $0x9e4] ss:$8 sps:$4 sm:$0xff]  }
 0x534   :  { %4131 = vmatprep.subr.bf16.mxu0 %v7513_v58  ;;  %4766 = vmatprep.subr.bf16.mxu1 %v7513_v58  ;;  %v7564_v58 = vld [vmem:[%s10972_s1 + $0x9e0] ss:$8 sps:$4 sm:$0xff]  }
 0x537   :  { %4132 = vmatpush1.bf16.msra.mxu0 %v7514_v59  ;;  %4767 = vmatpush1.bf16.msra.mxu1 %v7514_v59  ;;  %v7565_v59 = vld [vmem:[%s10972_s1 + $0x9f4] ss:$8 sps:$4 sm:$0xff]  }
 0x538   :  { %4133 = vmatprep.subr.bf16.mxu0 %v7515_v60  ;;  %4768 = vmatprep.subr.bf16.mxu1 %v7515_v60  ;;  %v5943_v60 = vcombine.low %v10165_v18, %v10165_v18  ;;  %v7581_v18 = vld [vmem:[%s10972_s1 + $0xa74] ss:$8 sps:$4 sm:$0xff]  }
 0x53b   :  { %4134 = vmatpush1.bf16.msra.mxu0 %v7516_v61  ;;  %4769 = vmatpush1.bf16.msra.mxu1 %v7516_v61  ;;  %v5981_v61 = vcombine.low %v10170_v19, %v10170_v19  ;;  %v7582_v19 = vld [vmem:[%s10972_s1 + $0xa70] ss:$8 sps:$4 sm:$0xff]  }
 0x53c   :  { %4135 = vmatprep.subr.bf16.mxu0 %v7517_v62  ;;  %4770 = vmatprep.subr.bf16.mxu1 %v7517_v62  ;;  %v10279_v62 = vld [vmem:[%s10971_s0 + $0x118] sm:$0xff] }
 0x53f   :  { %4136 = vmatpush1.bf16.msra.mxu0 %v7518_v63  ;;  %4771 = vmatpush1.bf16.msra.mxu1 %v7518_v63  ;;  %v10284_v63 = vld [vmem:[%s10971_s0 + $0x17c] sm:$0xff] }
 0x540   :  { %4137 = vmatprep.subr.bf16.mxu0 %v7519_v0  ;;  %4772 = vmatprep.subr.bf16.mxu1 %v7519_v0  ;;  %v7566_v0 = vld [vmem:[%s10972_s1 + $0x9f0] ss:$8 sps:$4 sm:$0xff]  }
 0x543   :  { %4138 = vmatpush1.bf16.msra.mxu0 %v7520_v1  ;;  %4773 = vmatpush1.bf16.msra.mxu1 %v7520_v1  ;;  %v7567_v1 = vld [vmem:[%s10972_s1 + $0xa04] ss:$8 sps:$4 sm:$0xff]  }
 0x544   :  { %4139 = vmatprep.subr.bf16.mxu0 %v7521_v2  ;;  %4774 = vmatprep.subr.bf16.mxu1 %v7521_v2  ;;  %v5946_v2 = vcombine.high %v10279_v62, %v10279_v62 }
 0x547   :  { %4140 = vmatpush1.bf16.msra.mxu0 %v7522_v3  ;;  %4775 = vmatpush1.bf16.msra.mxu1 %v7522_v3  ;;  %v5984_v3 = vcombine.high %v10284_v63, %v10284_v63 }
 0x548   :  { %4141 = vmatprep.subr.bf16.mxu0 %v7523_v4  ;;  %4776 = vmatprep.subr.bf16.mxu1 %v7523_v4  ;;  %v7568_v4 = vld [vmem:[%s10972_s1 + $0xa00] ss:$8 sps:$4 sm:$0xff]  }
 0x54b   :  { %4142 = vmatpush1.bf16.msra.mxu0 %v7524_v5  ;;  %4777 = vmatpush1.bf16.msra.mxu1 %v7524_v5  ;;  %v7569_v5 = vld [vmem:[%s10972_s1 + $0xa14] ss:$8 sps:$4 sm:$0xff]  }
 0x54c   :  { %4143 = vmatprep.subr.bf16.mxu0 %v7525_v6  ;;  %4778 = vmatprep.subr.bf16.mxu1 %v7525_v6  ;;  %v7570_v6 = vld [vmem:[%s10972_s1 + $0xa10] ss:$8 sps:$4 sm:$0xff]  }
 0x54f   :  { %4144 = vmatpush1.bf16.msra.mxu0 %v7526_v7  ;;  %4779 = vmatpush1.bf16.msra.mxu1 %v7526_v7  ;;  %v7571_v7 = vld [vmem:[%s10972_s1 + $0xa24] ss:$8 sps:$4 sm:$0xff]  }
 0x550   :  { %4145 = vmatprep.subr.bf16.mxu0 %v7527_v8  ;;  %4780 = vmatprep.subr.bf16.mxu1 %v7527_v8  ;;  %v7572_v8 = vld [vmem:[%s10972_s1 + $0xa20] ss:$8 sps:$4 sm:$0xff]  }
 0x553   :  { %4146 = vmatpush1.bf16.msra.mxu0 %v7528_v9  ;;  %4781 = vmatpush1.bf16.msra.mxu1 %v7528_v9  ;;  %v7573_v9 = vld [vmem:[%s10972_s1 + $0xa34] ss:$8 sps:$4 sm:$0xff]  }
 0x554   :  { %4147 = vmatprep.subr.bf16.mxu0 %v7529_v10  ;;  %4782 = vmatprep.subr.bf16.mxu1 %v7529_v10  ;;  %v7574_v10 = vld [vmem:[%s10972_s1 + $0xa30] ss:$8 sps:$4 sm:$0xff]  }
 0x557   :  { %4148 = vmatpush1.bf16.msra.mxu0 %v7530_v11  ;;  %4783 = vmatpush1.bf16.msra.mxu1 %v7530_v11  ;;  %v7575_v11 = vld [vmem:[%s10972_s1 + $0xa44] ss:$8 sps:$4 sm:$0xff]  }
 0x558   :  { %4149 = vmatprep.subr.bf16.mxu0 %v7531_v12  ;;  %4784 = vmatprep.subr.bf16.mxu1 %v7531_v12  ;;  %v7576_v12 = vld [vmem:[%s10972_s1 + $0xa40] ss:$8 sps:$4 sm:$0xff]  }
 0x55b   :  { %4150 = vmatpush1.bf16.msra.mxu0 %v7532_v14  ;;  %4785 = vmatpush1.bf16.msra.mxu1 %v7532_v14  ;;  %v7577_v14 = vld [vmem:[%s10972_s1 + $0xa54] ss:$8 sps:$4 sm:$0xff]  }
 0x55c   :  { %4151 = vmatprep.subr.bf16.mxu0 %v7533_v15  ;;  %4786 = vmatprep.subr.bf16.mxu1 %v7533_v15  ;;  %v7578_v15 = vld [vmem:[%s10972_s1 + $0xa50] ss:$8 sps:$4 sm:$0xff]  }
 0x55f   :  { %4152 = vmatpush1.bf16.msra.mxu0 %v7534_v20  ;;  %4787 = vmatpush1.bf16.msra.mxu1 %v7534_v20  ;;  %v7583_v20 = vld [vmem:[%s10972_s1 + $0xa84] ss:$8 sps:$4 sm:$0xff]  }
 0x560   :  { %4162 = vmatprep.subr.bf16.mxu0 %v7535_v21  ;;  %4797 = vmatprep.subr.bf16.mxu1 %v7535_v21  ;;  %v7584_v21 = vld [vmem:[%s10972_s1 + $0xa80] ss:$8 sps:$4 sm:$0xff]  }
 0x562   :  { %4154 = vmatmul.mubr.bf16.vlgmr.msra.gmra.mrb[4].mxu0 %v5941_v16  ;;  %4789 = vmatmul.mubr.bf16.vlgmr.msra.gmra.mrb[4].mxu1 %v5979_v17  ;;  %v7579_v16 = vld [vmem:[%s10972_s1 + $0xa64] ss:$8 sps:$4 sm:$0xff]   ;;  %v7580_v17 = vld [vmem:[%s10972_s1 + $0xa60] ss:$8 sps:$4 sm:$0xff]  }
 0x563   :  { %4163 = vmatpush1.bf16.msra.mxu0 %v7536_v24  ;;  %4798 = vmatpush1.bf16.msra.mxu1 %v7536_v24  ;;  %v7587_v24 = vld [vmem:[%s10972_s1 + $0xaa4] ss:$8 sps:$4 sm:$0xff]  }
 0x564   :  { %4164 = vmatprep.subr.bf16.mxu0 %v7537_v25  ;;  %4799 = vmatprep.subr.bf16.mxu1 %v7537_v25  ;;  %v7588_v25 = vld [vmem:[%s10972_s1 + $0xaa0] ss:$8 sps:$4 sm:$0xff]  }
 0x565   :  { %4194 = vmatprep.mubr.bf16.mxu0 %v5944_v22  ;;  %4829 = vmatprep.mubr.bf16.mxu1 %v5982_v23  ;;  %v7585_v22 = vld [vmem:[%s10972_s1 + $0xa94] ss:$8 sps:$4 sm:$0xff]   ;;  %v7586_v23 = vld [vmem:[%s10972_s1 + $0xa90] ss:$8 sps:$4 sm:$0xff]  }
 0x567   :  { %4165 = vmatpush1.bf16.msra.mxu0 %v7538_v26  ;;  %4800 = vmatpush1.bf16.msra.mxu1 %v7538_v26  ;;  %v7589_v26 = vld [vmem:[%s10972_s1 + $0xab4] ss:$8 sps:$4 sm:$0xff]  }
 0x568   :  { %4166 = vmatprep.subr.bf16.mxu0 %v7539_v27  ;;  %4801 = vmatprep.subr.bf16.mxu1 %v7539_v27  ;;  %v7590_v27 = vld [vmem:[%s10972_s1 + $0xab0] ss:$8 sps:$4 sm:$0xff]  }
 0x56b   :  { %4167 = vmatpush1.bf16.msra.mxu0 %v7540_v28  ;;  %4802 = vmatpush1.bf16.msra.mxu1 %v7540_v28  ;;  %v7591_v28 = vld [vmem:[%s10972_s1 + $0xac4] ss:$8 sps:$4 sm:$0xff]  }
 0x56c   :  { %4168 = vmatprep.subr.bf16.mxu0 %v7541_v29  ;;  %4803 = vmatprep.subr.bf16.mxu1 %v7541_v29  ;;  %v7592_v29 = vld [vmem:[%s10972_s1 + $0xac0] ss:$8 sps:$4 sm:$0xff]  }
 0x56f   :  { %4169 = vmatpush1.bf16.msra.mxu0 %v7542_v36  ;;  %4804 = vmatpush1.bf16.msra.mxu1 %v7542_v36  ;;  %v7593_v36 = vld [vmem:[%s10972_s1 + $0xad4] ss:$8 sps:$4 sm:$0xff]  }
 0x570   :  { %4170 = vmatprep.subr.bf16.mxu0 %v7543_v37  ;;  %4805 = vmatprep.subr.bf16.mxu1 %v7543_v37  ;;  %v7594_v37 = vld [vmem:[%s10972_s1 + $0xad0] ss:$8 sps:$4 sm:$0xff]  }
 0x573   :  { %4171 = vmatpush1.bf16.msra.mxu0 %v7544_v38  ;;  %4806 = vmatpush1.bf16.msra.mxu1 %v7544_v38  ;;  %v7595_v38 = vld [vmem:[%s10972_s1 + $0xae4] ss:$8 sps:$4 sm:$0xff]  }
 0x574   :  { %4172 = vmatprep.subr.bf16.mxu0 %v7545_v39  ;;  %4807 = vmatprep.subr.bf16.mxu1 %v7545_v39  ;;  %v7596_v39 = vld [vmem:[%s10972_s1 + $0xae0] ss:$8 sps:$4 sm:$0xff]  }
 0x577   :  { %4173 = vmatpush1.bf16.msra.mxu0 %v7546_v40  ;;  %4808 = vmatpush1.bf16.msra.mxu1 %v7546_v40  ;;  %v7597_v40 = vld [vmem:[%s10972_s1 + $0xaf4] ss:$8 sps:$4 sm:$0xff]  }
 0x578   :  { %4174 = vmatprep.subr.bf16.mxu0 %v7547_v41  ;;  %4809 = vmatprep.subr.bf16.mxu1 %v7547_v41  ;;  %v5945_v41 = vcombine.low %v10279_v62, %v10279_v62  ;;  %v7613_v62 = vld [vmem:[%s10972_s1 + $0xb74] ss:$8 sps:$4 sm:$0xff]  }
 0x57b   :  { %4175 = vmatpush1.bf16.msra.mxu0 %v7548_v42  ;;  %4810 = vmatpush1.bf16.msra.mxu1 %v7548_v42  ;;  %v5983_v42 = vcombine.low %v10284_v63, %v10284_v63  ;;  %v7614_v63 = vld [vmem:[%s10972_s1 + $0xb70] ss:$8 sps:$4 sm:$0xff]  }
 0x57c   :  { %4176 = vmatprep.subr.bf16.mxu0 %v7549_v43  ;;  %4811 = vmatprep.subr.bf16.mxu1 %v7549_v43  ;;  %v10393_v43 = vld [vmem:[%s10971_s0 + $0x120] sm:$0xff] }
 0x57f   :  { %4177 = vmatpush1.bf16.msra.mxu0 %v7550_v44  ;;  %4812 = vmatpush1.bf16.msra.mxu1 %v7550_v44  ;;  %v10398_v44 = vld [vmem:[%s10971_s0 + $0x184] sm:$0xff] }
 0x580   :  { %4178 = vmatprep.subr.bf16.mxu0 %v7551_v45  ;;  %4813 = vmatprep.subr.bf16.mxu1 %v7551_v45  ;;  %v7598_v45 = vld [vmem:[%s10972_s1 + $0xaf0] ss:$8 sps:$4 sm:$0xff]  }
 0x583   :  { %4179 = vmatpush1.bf16.msra.mxu0 %v7552_v46  ;;  %4814 = vmatpush1.bf16.msra.mxu1 %v7552_v46  ;;  %v7599_v46 = vld [vmem:[%s10972_s1 + $0xb04] ss:$8 sps:$4 sm:$0xff]  }
 0x584   :  { %4180 = vmatprep.subr.bf16.mxu0 %v7553_v47  ;;  %4815 = vmatprep.subr.bf16.mxu1 %v7553_v47  ;;  %v5948_v47 = vcombine.high %v10393_v43, %v10393_v43 }
 0x587   :  { %4181 = vmatpush1.bf16.msra.mxu0 %v7554_v48  ;;  %4816 = vmatpush1.bf16.msra.mxu1 %v7554_v48  ;;  %v5986_v48 = vcombine.high %v10398_v44, %v10398_v44 }
 0x588   :  { %4182 = vmatprep.subr.bf16.mxu0 %v7555_v49  ;;  %4817 = vmatprep.subr.bf16.mxu1 %v7555_v49  ;;  %v7600_v49 = vld [vmem:[%s10972_s1 + $0xb00] ss:$8 sps:$4 sm:$0xff]  }
 0x58b   :  { %4183 = vmatpush1.bf16.msra.mxu0 %v7556_v50  ;;  %4818 = vmatpush1.bf16.msra.mxu1 %v7556_v50  ;;  %v7601_v50 = vld [vmem:[%s10972_s1 + $0xb14] ss:$8 sps:$4 sm:$0xff]  }
 0x58c   :  { %4184 = vmatprep.subr.bf16.mxu0 %v7557_v51  ;;  %4819 = vmatprep.subr.bf16.mxu1 %v7557_v51  ;;  %v7602_v51 = vld [vmem:[%s10972_s1 + $0xb10] ss:$8 sps:$4 sm:$0xff]  }
 0x58f   :  { %4185 = vmatpush1.bf16.msra.mxu0 %v7558_v52  ;;  %4820 = vmatpush1.bf16.msra.mxu1 %v7558_v52  ;;  %v7603_v52 = vld [vmem:[%s10972_s1 + $0xb24] ss:$8 sps:$4 sm:$0xff]  }
 0x590   :  { %4186 = vmatprep.subr.bf16.mxu0 %v7559_v53  ;;  %4821 = vmatprep.subr.bf16.mxu1 %v7559_v53  ;;  %v7604_v53 = vld [vmem:[%s10972_s1 + $0xb20] ss:$8 sps:$4 sm:$0xff]  }
 0x593   :  { %4187 = vmatpush1.bf16.msra.mxu0 %v7560_v54  ;;  %4822 = vmatpush1.bf16.msra.mxu1 %v7560_v54  ;;  %v7605_v54 = vld [vmem:[%s10972_s1 + $0xb34] ss:$8 sps:$4 sm:$0xff]  }
 0x594   :  { %4188 = vmatprep.subr.bf16.mxu0 %v7561_v55  ;;  %4823 = vmatprep.subr.bf16.mxu1 %v7561_v55  ;;  %v7606_v55 = vld [vmem:[%s10972_s1 + $0xb30] ss:$8 sps:$4 sm:$0xff]  }
 0x597   :  { %4189 = vmatpush1.bf16.msra.mxu0 %v7562_v56  ;;  %4824 = vmatpush1.bf16.msra.mxu1 %v7562_v56  ;;  %v7607_v56 = vld [vmem:[%s10972_s1 + $0xb44] ss:$8 sps:$4 sm:$0xff]  }
 0x598   :  { %4190 = vmatprep.subr.bf16.mxu0 %v7563_v57  ;;  %4825 = vmatprep.subr.bf16.mxu1 %v7563_v57  ;;  %v7608_v57 = vld [vmem:[%s10972_s1 + $0xb40] ss:$8 sps:$4 sm:$0xff]  }
 0x59b   :  { %4191 = vmatpush1.bf16.msra.mxu0 %v7564_v58  ;;  %4826 = vmatpush1.bf16.msra.mxu1 %v7564_v58  ;;  %v7609_v58 = vld [vmem:[%s10972_s1 + $0xb54] ss:$8 sps:$4 sm:$0xff]  }
 0x59c   :  { %4192 = vmatprep.subr.bf16.mxu0 %v7565_v59  ;;  %4827 = vmatprep.subr.bf16.mxu1 %v7565_v59  ;;  %v7610_v59 = vld [vmem:[%s10972_s1 + $0xb50] ss:$8 sps:$4 sm:$0xff]  }
 0x59f   :  { %4193 = vmatpush1.bf16.msra.mxu0 %v7566_v0  ;;  %4828 = vmatpush1.bf16.msra.mxu1 %v7566_v0  ;;  %v7615_v0 = vld [vmem:[%s10972_s1 + $0xb84] ss:$8 sps:$4 sm:$0xff]  }
 0x5a0   :  { %4203 = vmatprep.subr.bf16.mxu0 %v7567_v1  ;;  %4838 = vmatprep.subr.bf16.mxu1 %v7567_v1  ;;  %v7616_v1 = vld [vmem:[%s10972_s1 + $0xb80] ss:$8 sps:$4 sm:$0xff]  }
 0x5a2   :  { %4195 = vmatmul.mubr.bf16.vlgmr.msra.gmra.mrb[4].mxu0 %v5943_v60  ;;  %4830 = vmatmul.mubr.bf16.vlgmr.msra.gmra.mrb[4].mxu1 %v5981_v61  ;;  %v7611_v60 = vld [vmem:[%s10972_s1 + $0xb64] ss:$8 sps:$4 sm:$0xff]   ;;  %v7612_v61 = vld [vmem:[%s10972_s1 + $0xb60] ss:$8 sps:$4 sm:$0xff]  }
 0x5a3   :  { %4204 = vmatpush1.bf16.msra.mxu0 %v7568_v4  ;;  %4839 = vmatpush1.bf16.msra.mxu1 %v7568_v4  ;;  %v7619_v4 = vld [vmem:[%s10972_s1 + $0xba4] ss:$8 sps:$4 sm:$0xff]  }
 0x5a4   :  { %4205 = vmatprep.subr.bf16.mxu0 %v7569_v5  ;;  %4840 = vmatprep.subr.bf16.mxu1 %v7569_v5  ;;  %v7620_v5 = vld [vmem:[%s10972_s1 + $0xba0] ss:$8 sps:$4 sm:$0xff]  }
 0x5a5   :  { %4235 = vmatprep.mubr.bf16.mxu0 %v5946_v2  ;;  %4870 = vmatprep.mubr.bf16.mxu1 %v5984_v3  ;;  %v7617_v2 = vld [vmem:[%s10972_s1 + $0xb94] ss:$8 sps:$4 sm:$0xff]   ;;  %v7618_v3 = vld [vmem:[%s10972_s1 + $0xb90] ss:$8 sps:$4 sm:$0xff]  }
 0x5a7   :  { %4206 = vmatpush1.bf16.msra.mxu0 %v7570_v6  ;;  %4841 = vmatpush1.bf16.msra.mxu1 %v7570_v6  ;;  %v7621_v6 = vld [vmem:[%s10972_s1 + $0xbb4] ss:$8 sps:$4 sm:$0xff]  }
 0x5a8   :  { %4207 = vmatprep.subr.bf16.mxu0 %v7571_v7  ;;  %4842 = vmatprep.subr.bf16.mxu1 %v7571_v7  ;;  %v7622_v7 = vld [vmem:[%s10972_s1 + $0xbb0] ss:$8 sps:$4 sm:$0xff]  }
 0x5ab   :  { %4208 = vmatpush1.bf16.msra.mxu0 %v7572_v8  ;;  %4843 = vmatpush1.bf16.msra.mxu1 %v7572_v8  ;;  %v7623_v8 = vld [vmem:[%s10972_s1 + $0xbc4] ss:$8 sps:$4 sm:$0xff]  }
 0x5ac   :  { %4209 = vmatprep.subr.bf16.mxu0 %v7573_v9  ;;  %4844 = vmatprep.subr.bf16.mxu1 %v7573_v9  ;;  %v7624_v9 = vld [vmem:[%s10972_s1 + $0xbc0] ss:$8 sps:$4 sm:$0xff]  }
 0x5af   :  { %4210 = vmatpush1.bf16.msra.mxu0 %v7574_v10  ;;  %4845 = vmatpush1.bf16.msra.mxu1 %v7574_v10  ;;  %v7625_v10 = vld [vmem:[%s10972_s1 + $0xbd4] ss:$8 sps:$4 sm:$0xff]  }
 0x5b0   :  { %4211 = vmatprep.subr.bf16.mxu0 %v7575_v11  ;;  %4846 = vmatprep.subr.bf16.mxu1 %v7575_v11  ;;  %v7626_v11 = vld [vmem:[%s10972_s1 + $0xbd0] ss:$8 sps:$4 sm:$0xff]  }
 0x5b3   :  { %4212 = vmatpush1.bf16.msra.mxu0 %v7576_v12  ;;  %4847 = vmatpush1.bf16.msra.mxu1 %v7576_v12  ;;  %v7627_v12 = vld [vmem:[%s10972_s1 + $0xbe4] ss:$8 sps:$4 sm:$0xff]  }
 0x5b4   :  { %4213 = vmatprep.subr.bf16.mxu0 %v7577_v14  ;;  %4848 = vmatprep.subr.bf16.mxu1 %v7577_v14  ;;  %v7628_v14 = vld [vmem:[%s10972_s1 + $0xbe0] ss:$8 sps:$4 sm:$0xff]  }
 0x5b7   :  { %4214 = vmatpush1.bf16.msra.mxu0 %v7578_v15  ;;  %4849 = vmatpush1.bf16.msra.mxu1 %v7578_v15  ;;  %v7629_v15 = vld [vmem:[%s10972_s1 + $0xbf4] ss:$8 sps:$4 sm:$0xff]  }
 0x5b8   :  { %4215 = vmatprep.subr.bf16.mxu0 %v7579_v16  ;;  %4850 = vmatprep.subr.bf16.mxu1 %v7579_v16  ;;  %v5947_v16 = vcombine.low %v10393_v43, %v10393_v43  ;;  %v4989_v43 = vld [vmem:[%s10974_s3 + $0x8] sm:$0xff] }
 0x5bb   :  { %4216 = vmatpush1.bf16.msra.mxu0 %v7580_v17  ;;  %4851 = vmatpush1.bf16.msra.mxu1 %v7580_v17  ;;  %v5985_v17 = vcombine.low %v10398_v44, %v10398_v44  ;;  %v7645_v44 = vld [vmem:[%s10972_s1 + $0xc74] ss:$8 sps:$4 sm:$0xff]  }
 0x5bc   :  { %4217 = vmatprep.subr.bf16.mxu0 %v7581_v18  ;;  %4852 = vmatprep.subr.bf16.mxu1 %v7581_v18  ;;  %v7630_v18 = vld [vmem:[%s10972_s1 + $0xbf0] ss:$8 sps:$4 sm:$0xff]  }
 0x5bf   :  { %4218 = vmatpush1.bf16.msra.mxu0 %v7582_v19  ;;  %4853 = vmatpush1.bf16.msra.mxu1 %v7582_v19  ;;  %v7631_v19 = vld [vmem:[%s10972_s1 + $0xc04] ss:$8 sps:$4 sm:$0xff]  }
 0x5c0   :  { %4219 = vmatprep.subr.bf16.mxu0 %v7583_v20  ;;  %4854 = vmatprep.subr.bf16.mxu1 %v7583_v20  ;;  %v7632_v20 = vld [vmem:[%s10972_s1 + $0xc00] ss:$8 sps:$4 sm:$0xff]  }
 0x5c3   :  { %4220 = vmatpush1.bf16.msra.mxu0 %v7584_v21  ;;  %4855 = vmatpush1.bf16.msra.mxu1 %v7584_v21  ;;  %v7633_v21 = vld [vmem:[%s10972_s1 + $0xc14] ss:$8 sps:$4 sm:$0xff]  }
 0x5c4   :  { %4221 = vmatprep.subr.bf16.mxu0 %v7585_v22  ;;  %4856 = vmatprep.subr.bf16.mxu1 %v7585_v22  ;;  %v7634_v22 = vld [vmem:[%s10972_s1 + $0xc10] ss:$8 sps:$4 sm:$0xff]  }
 0x5c7   :  { %4222 = vmatpush1.bf16.msra.mxu0 %v7586_v23  ;;  %4857 = vmatpush1.bf16.msra.mxu1 %v7586_v23  ;;  %v7635_v23 = vld [vmem:[%s10972_s1 + $0xc24] ss:$8 sps:$4 sm:$0xff]  }
 0x5c8   :  { %4223 = vmatprep.subr.bf16.mxu0 %v7587_v24  ;;  %4858 = vmatprep.subr.bf16.mxu1 %v7587_v24  ;;  %v7636_v24 = vld [vmem:[%s10972_s1 + $0xc20] ss:$8 sps:$4 sm:$0xff]  }
 0x5cb   :  { %4224 = vmatpush1.bf16.msra.mxu0 %v7588_v25  ;;  %4859 = vmatpush1.bf16.msra.mxu1 %v7588_v25  ;;  %v7638_v25 = vld [vmem:[%s10972_s1 + $0xc30] ss:$8 sps:$4 sm:$0xff]  }
 0x5cc   :  { %4225 = vmatprep.subr.bf16.mxu0 %v7589_v26  ;;  %4860 = vmatprep.subr.bf16.mxu1 %v7589_v26  ;;  %v7639_v26 = vld [vmem:[%s10972_s1 + $0xc44] ss:$8 sps:$4 sm:$0xff]  }
 0x5cf   :  { %4226 = vmatpush1.bf16.msra.mxu0 %v7590_v27  ;;  %4861 = vmatpush1.bf16.msra.mxu1 %v7590_v27  ;;  %v7640_v27 = vld [vmem:[%s10972_s1 + $0xc40] ss:$8 sps:$4 sm:$0xff]  }
 0x5d0   :  { %4227 = vmatprep.subr.bf16.mxu0 %v7591_v28  ;;  %4862 = vmatprep.subr.bf16.mxu1 %v7591_v28  ;;  %v7641_v28 = vld [vmem:[%s10972_s1 + $0xc54] ss:$8 sps:$4 sm:$0xff]  }
 0x5d3   :  { %4228 = vmatpush1.bf16.msra.mxu0 %v7592_v29  ;;  %4863 = vmatpush1.bf16.msra.mxu1 %v7592_v29  ;;  %v7642_v29 = vld [vmem:[%s10972_s1 + $0xc50] ss:$8 sps:$4 sm:$0xff]  }
 0x5d4   :  { %4229 = vmatprep.subr.bf16.mxu0 %v7593_v36  ;;  %4864 = vmatprep.subr.bf16.mxu1 %v7593_v36  ;;  %v7643_v36 = vld [vmem:[%s10972_s1 + $0xc64] ss:$8 sps:$4 sm:$0xff]  }
 0x5d7   :  { %4230 = vmatpush1.bf16.msra.mxu0 %v7594_v37  ;;  %4865 = vmatpush1.bf16.msra.mxu1 %v7594_v37  ;;  %v5004_v37 = vld [vmem:[%s10974_s3 + $0x80] sm:$0xff] }
 0x5d8   :  { %4231 = vmatprep.subr.bf16.mxu0 %v7595_v38  ;;  %4866 = vmatprep.subr.bf16.mxu1 %v7595_v38  ;;  %v5005_v38 = vld [vmem:[%s10974_s3 + $0x88] sm:$0xff] }
 0x5db   :  { %4232 = vmatpush1.bf16.msra.mxu0 %v7596_v39  ;;  %4867 = vmatpush1.bf16.msra.mxu1 %v7596_v39  ;;  %v6005_v39 = vld [vmem:[%s10974_s3 + $0x180] sm:$0xff] }
 0x5dc   :  { %4233 = vmatprep.subr.bf16.mxu0 %v7597_v40  ;;  %4868 = vmatprep.subr.bf16.mxu1 %v7597_v40  ;;  %v6006_v40 = vld [vmem:[%s10974_s3 + $0x188] sm:$0xff] }
 0x5df   :  { %4234 = vmatpush1.bf16.msra.mxu0 %v7598_v45  ;;  %4869 = vmatpush1.bf16.msra.mxu1 %v7598_v45  ;;  %v6225_v45 = vpack.c.bf16 %v5005_v38, %v5004_v37  ;;  %v6013_v38 = vld [vmem:[%s10974_s3 + $0x1c0] sm:$0xff] }
 0x5e0   :  { %4244 = vmatprep.subr.bf16.mxu0 %v7599_v46  ;;  %4879 = vmatprep.subr.bf16.mxu1 %v7599_v46  ;;  %v6257_v46 = vpack.c.bf16 %v6006_v40, %v6005_v39  ;;  %v6014_v39 = vld [vmem:[%s10974_s3 + $0x1c8] sm:$0xff] }
 0x5e1   :  { %v6273_v40 = vpack.c.bf16 %v6014_v39, %v6013_v38 }
 0x5e2   :  { %4236 = vmatmul.mubr.bf16.vlgmr.msra.gmra.mrb[4].mxu0 %v5945_v41  ;;  %4871 = vmatmul.mubr.bf16.vlgmr.msra.gmra.mrb[4].mxu1 %v5983_v42  ;;  %v7644_v41 = vld [vmem:[%s10972_s1 + $0xc60] ss:$8 sps:$4 sm:$0xff]  }
 0x5e3   :  { %4245 = vmatpush1.bf16.msra.mxu0 %v7600_v49  ;;  %4880 = vmatpush1.bf16.msra.mxu1 %v7600_v49  ;;  %v4988_v42 = vld [vmem:[%s10974_s3] sm:$0xff]  ;;  %v5006_v49 = vld [vmem:[%s10974_s3 + $0x90] sm:$0xff] }
 0x5e4   :  { %4246 = vmatprep.subr.bf16.mxu0 %v7601_v50  ;;  %4881 = vmatprep.subr.bf16.mxu1 %v7601_v50  ;;  %v5007_v50 = vld [vmem:[%s10974_s3 + $0x98] sm:$0xff] }
 0x5e5   :  { %4276 = vmatprep.mubr.bf16.mxu0 %v5948_v47  ;;  %4911 = vmatprep.mubr.bf16.mxu1 %v5986_v48  ;;  %v5989_v47 = vld [vmem:[%s10974_s3 + $0x100] sm:$0xff]  ;;  %v5990_v48 = vld [vmem:[%s10974_s3 + $0x108] sm:$0xff] }
 0x5e7   :  { %4247 = vmatpush1.bf16.msra.mxu0 %v7602_v51  ;;  %4882 = vmatpush1.bf16.msra.mxu1 %v7602_v51  ;;  %v6007_v51 = vld [vmem:[%s10974_s3 + $0x190] sm:$0xff] }
 0x5e8   :  { %4248 = vmatprep.subr.bf16.mxu0 %v7603_v52  ;;  %4883 = vmatprep.subr.bf16.mxu1 %v7603_v52  ;;  %v6008_v52 = vld [vmem:[%s10974_s3 + $0x198] sm:$0xff] }
 0x5eb   :  { %4249 = vmatpush1.bf16.msra.mxu0 %v7604_v53  ;;  %4884 = vmatpush1.bf16.msra.mxu1 %v7604_v53  ;;  %v7245_v53 = vld [vmem:[%s10971_s0 + $0x128] ss:$0 sps:$4 sm:$0xff]  }
 0x5ec   :  { %4250 = vmatprep.subr.bf16.mxu0 %v7605_v54  ;;  %4885 = vmatprep.subr.bf16.mxu1 %v7605_v54  ;;  %v7246_v54 = vld [vmem:[%s10971_s0 + $0x18c] ss:$0 sps:$4 sm:$0xff]  }
 0x5ef   :  { %4251 = vmatpush1.bf16.msra.mxu0 %v7606_v55  ;;  %4886 = vmatpush1.bf16.msra.mxu1 %v7606_v55  ;;  %v7646_v55 = vld [vmem:[%s10972_s1 + $0xc70] ss:$8 sps:$4 sm:$0xff]  }
 0x5f0   :  { %4252 = vmatprep.subr.bf16.mxu0 %v7607_v56  ;;  %4887 = vmatprep.subr.bf16.mxu1 %v7607_v56  ;;  %v6227_v56 = vpack.c.bf16 %v4989_v43, %v4988_v42  ;;  %v5998_v42 = vld [vmem:[%s10974_s3 + $0x148] sm:$0xff] }
 0x5f3   :  { %4253 = vmatpush1.bf16.msra.mxu0 %v7608_v57  ;;  %4888 = vmatpush1.bf16.msra.mxu1 %v7608_v57  ;;  %v6259_v57 = vpack.c.bf16 %v5990_v48, %v5989_v47  ;;  %v4998_v47 = vld [vmem:[%s10974_s3 + $0x50] sm:$0xff]  ;;  %v4999_v48 = vld [vmem:[%s10974_s3 + $0x58] sm:$0xff] }
 0x5f4   :  { %4254 = vmatprep.subr.bf16.mxu0 %v7609_v58  ;;  %4889 = vmatprep.subr.bf16.mxu1 %v7609_v58  ;;  %v4990_v58 = vld [vmem:[%s10974_s3 + $0x10] sm:$0xff] }
 0x5f7   :  { %4255 = vmatpush1.bf16.msra.mxu0 %v7610_v59  ;;  %4890 = vmatpush1.bf16.msra.mxu1 %v7610_v59  ;;  %v4991_v59 = vld [vmem:[%s10974_s3 + $0x18] sm:$0xff] }
 0x5f8   :  { %4256 = vmatprep.subr.bf16.mxu0 %v7611_v60  ;;  %4891 = vmatprep.subr.bf16.mxu1 %v7611_v60  ;;  %v6229_v60 = vpack.c.bf16 %v5007_v50, %v5006_v49  ;;  %v6247_v49 = vpack.c.bf16 %v4999_v48, %v4998_v47  ;;  %v6015_v50 = vld [vmem:[%s10974_s3 + $0x1d0] sm:$0xff] }
 0x5fb   :  { %4257 = vmatpush1.bf16.msra.mxu0 %v7612_v61  ;;  %4892 = vmatpush1.bf16.msra.mxu1 %v7612_v61  ;;  %v6261_v61 = vpack.c.bf16 %v6008_v52, %v6007_v51  ;;  %v6016_v51 = vld [vmem:[%s10974_s3 + $0x1d8] sm:$0xff] }
 0x5fc   :  { %4258 = vmatprep.subr.bf16.mxu0 %v7613_v62  ;;  %4893 = vmatprep.subr.bf16.mxu1 %v7613_v62  ;;  %v5991_v62 = vld [vmem:[%s10974_s3 + $0x110] sm:$0xff]  ;;  %v6277_v52 = vpack.c.bf16 %v6016_v51, %v6015_v50  ;;  %v6021_v51 = vld [vmem:[%s10974_s3 + $0x200] sm:$0xff] }
 0x5ff   :  { %4259 = vmatpush1.bf16.msra.mxu0 %v7614_v63  ;;  %4894 = vmatpush1.bf16.msra.mxu1 %v7614_v63  ;;  %v5992_v63 = vld [vmem:[%s10974_s3 + $0x118] sm:$0xff] }
 0x600   :  { %4260 = vmatprep.subr.bf16.mxu0 %v7615_v0  ;;  %4895 = vmatprep.subr.bf16.mxu1 %v7615_v0  ;;  %v5008_v0 = vld [vmem:[%s10974_s3 + $0xa0] sm:$0xff] }
 0x603   :  { %4261 = vmatpush1.bf16.msra.mxu0 %v7616_v1  ;;  %4896 = vmatpush1.bf16.msra.mxu1 %v7616_v1  ;;  %v5009_v1 = vld [vmem:[%s10974_s3 + $0xa8] sm:$0xff] }
 0x604   :  { %4262 = vmatprep.subr.bf16.mxu0 %v7617_v2  ;;  %4897 = vmatprep.subr.bf16.mxu1 %v7617_v2  ;;  %v6009_v2 = vld [vmem:[%s10974_s3 + $0x1a0] sm:$0xff] }
 0x607   :  { %4263 = vmatpush1.bf16.msra.mxu0 %v7618_v3  ;;  %4898 = vmatpush1.bf16.msra.mxu1 %v7618_v3  ;;  %v6010_v3 = vld [vmem:[%s10974_s3 + $0x1a8] sm:$0xff] }
 0x608   :  { %4264 = vmatprep.subr.bf16.mxu0 %v7619_v4  ;;  %4899 = vmatprep.subr.bf16.mxu1 %v7619_v4  ;;  %v6231_v4 = vpack.c.bf16 %v4991_v59, %v4990_v58  ;;  %v5000_v59 = vld [vmem:[%s10974_s3 + $0x60] sm:$0xff] }
 0x60b   :  { %4265 = vmatpush1.bf16.msra.mxu0 %v7620_v5  ;;  %4900 = vmatpush1.bf16.msra.mxu1 %v7620_v5  ;;  %v6263_v5 = vpack.c.bf16 %v5992_v63, %v5991_v62  ;;  %v6017_v62 = vld [vmem:[%s10974_s3 + $0x1e0] sm:$0xff]  ;;  %v6018_v63 = vld [vmem:[%s10974_s3 + $0x1e8] sm:$0xff] }
 0x60c   :  { %4266 = vmatprep.subr.bf16.mxu0 %v7621_v6  ;;  %4901 = vmatprep.subr.bf16.mxu1 %v7621_v6  ;;  %v4992_v6 = vld [vmem:[%s10974_s3 + $0x20] sm:$0xff] }
 0x60f   :  { %4267 = vmatpush1.bf16.msra.mxu0 %v7622_v7  ;;  %4902 = vmatpush1.bf16.msra.mxu1 %v7622_v7  ;;  %v6233_v7 = vpack.c.bf16 %v5009_v1, %v5008_v0  ;;  %v6281_v0 = vpack.c.bf16 %v6018_v63, %v6017_v62  ;;  %v6001_v1 = vld [vmem:[%s10974_s3 + $0x160] sm:$0xff] }
 0x610   :  { %4268 = vmatprep.subr.bf16.mxu0 %v7623_v8  ;;  %4903 = vmatprep.subr.bf16.mxu1 %v7623_v8  ;;  %v4993_v8 = vld [vmem:[%s10974_s3 + $0x28] sm:$0xff] }
 0x613   :  { %4269 = vmatpush1.bf16.msra.mxu0 %v7624_v9  ;;  %4904 = vmatpush1.bf16.msra.mxu1 %v7624_v9  ;;  %v6265_v9 = vpack.c.bf16 %v6010_v3, %v6009_v2  ;;  %v6002_v2 = vld [vmem:[%s10974_s3 + $0x168] sm:$0xff]  ;;  %v5018_v3 = vld [vmem:[%s10974_s3 + $0xf0] sm:$0xff] }
 0x614   :  { %4270 = vmatprep.subr.bf16.mxu0 %v7625_v10  ;;  %4905 = vmatprep.subr.bf16.mxu1 %v7625_v10  ;;  %v5993_v10 = vld [vmem:[%s10974_s3 + $0x120] sm:$0xff] }
 0x617   :  { %4271 = vmatpush1.bf16.msra.mxu0 %v7626_v11  ;;  %4906 = vmatpush1.bf16.msra.mxu1 %v7626_v11  ;;  %v5994_v11 = vld [vmem:[%s10974_s3 + $0x128] sm:$0xff] }
 0x618   :  { %4272 = vmatprep.subr.bf16.mxu0 %v7627_v12  ;;  %4907 = vmatprep.subr.bf16.mxu1 %v7627_v12  ;;  %v5010_v12 = vld [vmem:[%s10974_s3 + $0xb0] sm:$0xff] }
 0x61b   :  { %4273 = vmatpush1.bf16.msra.mxu0 %v7628_v14  ;;  %4908 = vmatpush1.bf16.msra.mxu1 %v7628_v14  ;;  %v5011_v14 = vld [vmem:[%s10974_s3 + $0xb8] sm:$0xff] }
 0x61c   :  { %4274 = vmatprep.subr.bf16.mxu0 %v7629_v15  ;;  %4909 = vmatprep.subr.bf16.mxu1 %v7629_v15  ;;  %v6235_v15 = vpack.c.bf16 %v4993_v8, %v4992_v6  ;;  %v5002_v6 = vld [vmem:[%s10974_s3 + $0x70] sm:$0xff] }
 0x61f   :  { %4275 = vmatpush1.bf16.msra.mxu0 %v7630_v18  ;;  %4910 = vmatpush1.bf16.msra.mxu1 %v7630_v18  ;;  %v4994_v18 = vld [vmem:[%s10974_s3 + $0x30] sm:$0xff] }
 0x620   :  { %4285 = vmatprep.subr.bf16.mxu0 %v7631_v19  ;;  %4920 = vmatprep.subr.bf16.mxu1 %v7631_v19  ;;  %v4995_v19 = vld [vmem:[%s10974_s3 + $0x38] sm:$0xff] }
 0x622   :  { %4277 = vmatmul.mubr.bf16.vlgmr.msra.gmra.mrb[4].mxu0 %v5947_v16  ;;  %4912 = vmatmul.mubr.bf16.vlgmr.msra.gmra.mrb[4].mxu1 %v5985_v17  ;;  %v6267_v16 = vpack.c.bf16 %v5994_v11, %v5993_v10  ;;  %v6237_v17 = vpack.c.bf16 %v5011_v14, %v5010_v12  ;;  %v6019_v10 = vld [vmem:[%s10974_s3 + $0x1f0] sm:$0xff]  ;;  %v6020_v11 = vld [vmem:[%s10974_s3 + $0x1f8] sm:$0xff] }
 0x623   :  { %4286 = vmatpush1.bf16.msra.mxu0 %v7632_v20  ;;  %4921 = vmatpush1.bf16.msra.mxu1 %v7632_v20  ;;  %v6239_v20 = vpack.c.bf16 %v4995_v19, %v4994_v18  ;;  %v6003_v12 = vld [vmem:[%s10974_s3 + $0x170] sm:$0xff]  ;;  %v6285_v14 = vpack.c.bf16 %v6020_v11, %v6019_v10  ;;  %v6038_v18 = vld [vmem:[%s10974_s3 + $0x288] sm:$0xff] }
 0x624   :  { %4287 = vmatprep.subr.bf16.mxu0 %v7633_v21  ;;  %4922 = vmatprep.subr.bf16.mxu1 %v7633_v21  ;;  %v6011_v21 = vld [vmem:[%s10974_s3 + $0x1b0] sm:$0xff]  ;;  %v6074_v10 = vld [vmem:[%s10974_s3 + $0x3a8] sm:$0xff] }
 0x625   :  { %4317 = vmatprep.mubr.bf16.mxu0 %v7671_v13  ;;  %4952 = vmatprep.mubr.bf16.mxu1 %v7671_v13  ;;  %v7637_v13 = vld [vmem:[%s10972_s1 + $0xc34] ss:$8 sps:$4 sm:$0xff]  }
 0x627   :  { %4288 = vmatpush1.bf16.msra.mxu0 %v7634_v22  ;;  %4923 = vmatpush1.bf16.msra.mxu1 %v7634_v22  ;;  %v6012_v22 = vld [vmem:[%s10974_s3 + $0x1b8] sm:$0xff] }
 0x628   :  { %4289 = vmatprep.subr.bf16.mxu0 %v7635_v23  ;;  %4924 = vmatprep.subr.bf16.mxu1 %v7635_v23  ;;  %v6269_v23 = vpack.c.bf16 %v6012_v22, %v6011_v21  ;;  %v6070_v21 = vld [vmem:[%s10974_s3 + $0x388] sm:$0xff] }
 0x62b   :  { %4290 = vmatpush1.bf16.msra.mxu0 %v7636_v24  ;;  %4925 = vmatpush1.bf16.msra.mxu1 %v7636_v24  ;;  %v5995_v24 = vld [vmem:[%s10974_s3 + $0x130] sm:$0xff] }
 0x62c   :  { %4291 = vmatprep.subr.bf16.mxu0 %v7637_v13  ;;  %4926 = vmatprep.subr.bf16.mxu1 %v7637_v13  ;;  %v5996_v13 = vld [vmem:[%s10974_s3 + $0x138] sm:$0xff] }
 0x62f   :  { %4292 = vmatpush1.bf16.msra.mxu0 %v7638_v25  ;;  %4927 = vmatpush1.bf16.msra.mxu1 %v7638_v25  ;;  %v6271_v25 = vpack.c.bf16 %v5996_v13, %v5995_v24 }
 0x630   :  { %4293 = vmatprep.subr.bf16.mxu0 %v7639_v26  ;;  %4928 = vmatprep.subr.bf16.mxu1 %v7639_v26  ;;  %v5012_v26 = vld [vmem:[%s10974_s3 + $0xc0] sm:$0xff] }
 0x633   :  { %4294 = vmatpush1.bf16.msra.mxu0 %v7640_v27  ;;  %4929 = vmatpush1.bf16.msra.mxu1 %v7640_v27  ;;  %v5013_v27 = vld [vmem:[%s10974_s3 + $0xc8] sm:$0xff] }
 0x634   :  { %4295 = vmatprep.subr.bf16.mxu0 %v7641_v28  ;;  %4930 = vmatprep.subr.bf16.mxu1 %v7641_v28  ;;  %v6241_v28 = vpack.c.bf16 %v5013_v27, %v5012_v26 }
 0x637   :  { %4296 = vmatpush1.bf16.msra.mxu0 %v7642_v29  ;;  %4931 = vmatpush1.bf16.msra.mxu1 %v7642_v29  ;;  %v4996_v29 = vld [vmem:[%s10974_s3 + $0x40] sm:$0xff] }
 0x638   :  { %4297 = vmatprep.subr.bf16.mxu0 %v7643_v36  ;;  %4932 = vmatprep.subr.bf16.mxu1 %v7643_v36  ;;  %v4997_v36 = vld [vmem:[%s10974_s3 + $0x48] sm:$0xff] }
 0x639   :  { %v6243_v37 = vpack.c.bf16 %v4997_v36, %v4996_v29 }
 0x63b   :  { %4298 = vmatpush1.bf16.msra.mxu0 %v7644_v41  ;;  %4933 = vmatpush1.bf16.msra.mxu1 %v7644_v41  ;;  %v5997_v41 = vld [vmem:[%s10974_s3 + $0x140] sm:$0xff] }
 0x63c   :  { %4299 = vmatprep.subr.bf16.mxu0 %v7645_v44  ;;  %4934 = vmatprep.subr.bf16.mxu1 %v7645_v44  ;;  %v6275_v43 = vpack.c.bf16 %v5998_v42, %v5997_v41  ;;  %v5014_v44 = vld [vmem:[%s10974_s3 + $0xd0] sm:$0xff] }
 0x63f   :  { %4300 = vmatpush1.bf16.msra.mxu0 %v7646_v55  ;;  %4935 = vmatpush1.bf16.msra.mxu1 %v7646_v55 }
 0x640   :  { %6226 = vmatprep.subr.bf16.mxu0 %v6225_v45  ;;  %6258 = vmatprep.subr.bf16.mxu1 %v6257_v46  ;;  %v5015_v45 = vld [vmem:[%s10974_s3 + $0xd8] sm:$0xff] }
 0x641   :  { %v6245_v46 = vpack.c.bf16 %v5015_v45, %v5014_v44 }
 0x642   :  { %4318 = vmatmul.mubr.bf16.vlgmr.msra.gmra.mrb[4].mxu0 %v7245_v53  ;;  %4953 = vmatmul.mubr.bf16.vlgmr.msra.gmra.mrb[4].mxu1 %v7246_v54  ;;  %v5999_v53 = vld [vmem:[%s10974_s3 + $0x150] sm:$0xff]  ;;  %v6000_v54 = vld [vmem:[%s10974_s3 + $0x158] sm:$0xff] }
 0x643   :  { %6228 = vmatpush3.bf16.msra.mxu0 %v6227_v56  ;;  %6260 = vmatpush3.bf16.msra.mxu1 %v6259_v57  ;;  %v6279_v55 = vpack.c.bf16 %v6000_v54, %v5999_v53  ;;  %v5016_v56 = vld [vmem:[%s10974_s3 + $0xe0] sm:$0xff]  ;;  %v5017_v57 = vld [vmem:[%s10974_s3 + $0xe8] sm:$0xff]  ;;  %v6071_v53 = vld [vmem:[%s10974_s3 + $0x390] sm:$0xff] }
 0x644   :  { %6230 = vmatprep.subr.bf16.mxu0 %v6229_v60  ;;  %6262 = vmatprep.subr.bf16.mxu1 %v6261_v61  ;;  %v6249_v58 = vpack.c.bf16 %v5017_v57, %v5016_v56  ;;  %v5001_v60 = vld [vmem:[%s10974_s3 + $0x68] sm:$0xff]  ;;  %v6072_v54 = vld [vmem:[%s10974_s3 + $0x398] sm:$0xff]  ;;  %v6041_v57 = vld [vmem:[%s10974_s3 + $0x2a0] sm:$0xff] }
 0x645   :  { %v6251_v61 = vpack.c.bf16 %v5001_v60, %v5000_v59 }
 0x647   :  { %6232 = vmatpush3.bf16.msra.mxu0 %v6231_v4  ;;  %6264 = vmatpush3.bf16.msra.mxu1 %v6263_v5  ;;  %v6283_v4 = vpack.c.bf16 %v6002_v2, %v6001_v1  ;;  %v5019_v5 = vld [vmem:[%s10974_s3 + $0xf8] sm:$0xff]  ;;  %v6293_v2 = vpack.c.bf16 %v6040_v34, %v6039_v33  ;;  %v6031_v33 = vld [vmem:[%s10974_s3 + $0x250] sm:$0xff] }
 0x648   :  { %6234 = vmatprep.subr.bf16.mxu0 %v6233_v7  ;;  %6266 = vmatprep.subr.bf16.mxu1 %v6265_v9  ;;  %v5003_v7 = vld [vmem:[%s10974_s3 + $0x78] sm:$0xff]  ;;  %v6253_v8 = vpack.c.bf16 %v5019_v5, %v5018_v3  ;;  %v6325_v5 = vpack.c.bf16 %v6072_v54, %v6071_v53  ;;  %v6050_v53 = vld [vmem:[%s10974_s3 + $0x2e8] sm:$0xff] }
 0x649   :  { %v6255_v9 = vpack.c.bf16 %v5003_v7, %v5002_v6  ;;  %v6055_v6 = vld [vmem:[%s10974_s3 + $0x310] sm:$0xff]  ;;  %v6056_v7 = vld [vmem:[%s10974_s3 + $0x318] sm:$0xff] }
 0x64a   :  { %v6032_v34 = vld [vmem:[%s10974_s3 + $0x258] sm:$0xff] }
 0x64b   :  { %6236 = vmatpush3.bf16.msra.mxu0 %v6235_v15  ;;  %6268 = vmatpush3.bf16.msra.mxu1 %v6267_v16  ;;  %v6004_v15 = vld [vmem:[%s10974_s3 + $0x178] sm:$0xff] }
 0x64c   :  { %6238 = vmatprep.subr.bf16.mxu0 %v6237_v17  ;;  %6270 = vmatprep.subr.bf16.mxu1 %v6269_v23  ;;  %v6287_v16 = vpack.c.bf16 %v6004_v15, %v6003_v12  ;;  %v6037_v17 = vld [vmem:[%s10974_s3 + $0x280] sm:$0xff]  ;;  %v4969_v23 = vlaneseq  ;;  %v6026_v15 = vld [vmem:[%s10974_s3 + $0x228] sm:$0xff] }
 0x64d   :  { %v6289_v19 = vpack.c.bf16 %v6038_v18, %v6037_v17  ;;  %v6043_v17 = vld [vmem:[%s10974_s3 + $0x2b0] sm:$0xff]  ;;  %v6044_v18 = vld [vmem:[%s10974_s3 + $0x2b8] sm:$0xff] }
 0x64e   :  { %v4970_v24 = vshrl.u32 %v4969_v23, 7  ;;  %v6075_v23 = vld [vmem:[%s10974_s3 + $0x3b0] sm:$0xff] }
 0x64f   :  { %6240 = vmatpush3.bf16.msra.mxu0 %v6239_v20  ;;  %6272 = vmatpush3.bf16.msra.mxu1 %v6271_v25  ;;  %v6069_v20 = vld [vmem:[%s10974_s3 + $0x380] sm:$0xff] }
 0x650   :  { %6242 = vmatprep.subr.bf16.mxu0 %v6241_v28  ;;  %6274 = vmatprep.subr.bf16.mxu1 %v6273_v40  ;;  %v6321_v22 = vpack.c.bf16 %v6070_v21, %v6069_v20  ;;  %v4971_v13 = vsub.s32 0, %v4970_v24  ;;  %v4967_v25 = vld [vmem:[%s10973_s2] sm:$0x3]  ;;  %v4975_v26 = vsub.s32 1, %v4970_v24  ;;  %v6058_v21 = vld [vmem:[%s10974_s3 + $0x328] sm:$0xff]  ;;  %v6076_v24 = vld [vmem:[%s10974_s3 + $0x3b8] sm:$0xff] }
 0x651   :  { %v6057_v20 = vld [vmem:[%s10974_s3 + $0x320] sm:$0xff] }
 0x652   :  { %v4972_v36 = vrot.slane %v4967_v25, %v4971_v13  ;;  %v4976_v40 = vrot.slane %v4967_v25, %v4975_v26  ;;  %v6301_v13 = vpack.c.bf16 %v6044_v18, %v6043_v17  ;;  %v6027_v25 = vld [vmem:[%s10974_s3 + $0x230] sm:$0xff]  ;;  %v6028_v26 = vld [vmem:[%s10974_s3 + $0x238] sm:$0xff] }
 0x653   :  { %6244 = vmatpush3.bf16.msra.mxu0 %v6243_v37  ;;  %6276 = vmatpush3.bf16.msra.mxu1 %v6275_v43 }
 0x654   :  { %6246 = vmatprep.subr.bf16.mxu0 %v6245_v46  ;;  %6278 = vmatprep.subr.bf16.mxu1 %v6277_v52  ;;  %v6024_v52 = vld [vmem:[%s10974_s3 + $0x218] sm:$0xff] }
 0x657   :  { %6248 = vmatpush3.bf16.msra.mxu0 %v6247_v49  ;;  %6280 = vmatpush3.bf16.msra.mxu1 %v6279_v55  ;;  %v6291_v55 = vpack.c.bf16 %v6022_v30, %v6021_v51  ;;  %v6079_v30 = vld [vmem:[%s10974_s3 + $0x3d0] sm:$0xff] }
 0x658   :  { %6250 = vmatprep.subr.bf16.mxu0 %v6249_v58  ;;  %6282 = vmatprep.subr.bf16.mxu1 %v6281_v0  ;;  %v6042_v58 = vld [vmem:[%s10974_s3 + $0x2a8] sm:$0xff] }
 0x659   :  { %v6297_v12 = vpack.c.bf16 %v6042_v58, %v6041_v57  ;;  %v6311_v57 = vpack.c.bf16 %v6032_v34, %v6031_v33  ;;  %v6081_v58 = vld [vmem:[%s10974_s3 + $0x3e0] sm:$0xff] }
 0x65b   :  { %6252 = vmatpush3.bf16.msra.mxu0 %v6251_v61  ;;  %6284 = vmatpush3.bf16.msra.mxu1 %v6283_v4 }
 0x65c   :  { %6254 = vmatprep.subr.bf16.mxu0 %v6253_v8  ;;  %6286 = vmatprep.subr.bf16.mxu1 %v6285_v14  ;;  %v6025_v14 = vld [vmem:[%s10974_s3 + $0x220] sm:$0xff] }
 0x65f   :  { %6256 = vmatpush3.bf16.msra.mxu0 %v6255_v9  ;;  %6288 = vmatpush3.bf16.msra.mxu1 %v6287_v16  ;;  %v6073_v9 = vld [vmem:[%s10974_s3 + $0x3a0] sm:$0xff]  ;;  %v6327_v16 = vpack.c.bf16 %v6056_v7, %v6055_v6  ;;  %v6083_v6 = vld [vmem:[%s10974_s3 + $0x3f0] sm:$0xff]  ;;  %v6084_v7 = vld [vmem:[%s10974_s3 + $0x3f8] sm:$0xff] }
 0x660   :  { %6290 = vmatprep.subr.bf16.mxu0 %v6289_v19  ;;  %6322 = vmatprep.subr.bf16.mxu1 %v6321_v22  ;;  %v6329_v19 = vpack.c.bf16 %v6074_v10, %v6073_v9  ;;  %v6299_v22 = vpack.c.bf16 %v6026_v15, %v6025_v14  ;;  %v6035_v9 = vld [vmem:[%s10974_s3 + $0x270] sm:$0xff]  ;;  %v6036_v10 = vld [vmem:[%s10974_s3 + $0x278] sm:$0xff] }
 0x661   :  { %v6067_v14 = vld [vmem:[%s10974_s3 + $0x370] sm:$0xff]  ;;  %v6068_v15 = vld [vmem:[%s10974_s3 + $0x378] sm:$0xff] }
 0x662   :  { %v6351_v17 = vpack.c.bf16 %v6068_v15, %v6067_v14 }
 0x715   :  { %v4319_v27 = vpop.f32.mrb[4].mxu0  ;;  %v4954_v28 = vpop.f32.mrb[4].mxu1 }
 0x716   :  { %v4963_v29 = vmax.f32 %v4319_v27, %v4954_v28  ;;  %v4321_v37 = vpop.f32.mrb[5].mxu0  ;;  %v4956_v38 = vpop.f32.mrb[5].mxu1  ;;  %v6331_v27 = vpack.c.bf16 %v6058_v21, %v6057_v20  ;;  %v6045_v28 = vld [vmem:[%s10974_s3 + $0x2c0] sm:$0xff] }
 0x717   :  { %v4964_v39 = vmax.f32 %v4321_v37, %v4956_v38  ;;  %v4323_v41 = vpop.f32.mrb[6].mxu0  ;;  %v4958_v42 = vpop.f32.mrb[6].mxu1  ;;  %v6059_v37 = vld [vmem:[%s10974_s3 + $0x330] sm:$0xff]  ;;  %v6060_v38 = vld [vmem:[%s10974_s3 + $0x338] sm:$0xff] }
 0x718   :  { %v4965_v43 = vmax.f32 %v4961_v32, %v4963_v29  ;;  %v4324_v44 = vpop.f32.mrb[7].mxu0  ;;  %v4959_v45 = vpop.f32.mrb[7].mxu1  ;;  %v6054_v32 = vld [vmem:[%s10974_s3 + $0x308] sm:$0xff] }
 0x719   :  { %v4966_v46 = vmax.f32 %v4962_v35, %v4964_v39  ;;  %v6023_v35 = vld [vmem:[%s10974_s3 + $0x210] sm:$0xff]  ;;  %v6323_v1 = vpack.c.bf16 %v6054_v32, %v6053_v31  ;;  %v6046_v29 = vld [vmem:[%s10974_s3 + $0x2c8] sm:$0xff]  ;;  %v6303_v39 = vpack.c.bf16 %v6028_v26, %v6027_v25  ;;  %v6335_v45 = vpack.c.bf16 %v6060_v38, %v6059_v37  ;;  %v6080_v31 = vld [vmem:[%s10974_s3 + $0x3d8] sm:$0xff] }
 0x71a   :  { %v4979_v47 = vadd.f32 %v4972_v36, %v4965_v43  ;;  %v6295_v8 = vpack.c.bf16 %v6024_v52, %v6023_v35  ;;  %v6333_v36 = vpack.c.bf16 %v6076_v24, %v6075_v23  ;;  %v6078_v41 = vld [vmem:[%s10974_s3 + $0x3c8] sm:$0xff]  ;;  %v6305_v42 = vpack.c.bf16 %v6046_v29, %v6045_v28  ;;  %v6029_v43 = vld [vmem:[%s10974_s3 + $0x240] sm:$0xff] }
 0x71b   :  { %v4980_v48 = vadd.f32 %v4976_v40, %v4966_v46  ;;  %v6077_v40 = vld [vmem:[%s10974_s3 + $0x3c0] sm:$0xff]  ;;  %v6030_v44 = vld [vmem:[%s10974_s3 + $0x248] sm:$0xff]  ;;  %v6047_v46 = vld [vmem:[%s10974_s3 + $0x2d0] sm:$0xff]  ;;  %v6341_v54 = vpack.c.bf16 %v6080_v31, %v6079_v30 }
 0x71c   :  { %v4981_v49 = vmax.f32 %v4979_v47, 0.0  ;;  %v6048_v47 = vld [vmem:[%s10974_s3 + $0x2d8] sm:$0xff]  ;;  %v6307_v51 = vpack.c.bf16 %v6030_v44, %v6029_v43  ;;  %v6049_v52 = vld [vmem:[%s10974_s3 + $0x2e0] sm:$0xff] }
 0x71d   :  { %v4982_v50 = vmax.f32 %v4980_v48, 0.0  ;;  %v6337_v48 = vpack.c.bf16 %v6078_v41, %v6077_v40  ;;  %v6309_v32 = vpack.c.bf16 %v6048_v47, %v6047_v46  ;;  %v5988_v23 = vld [vmem:[%s10975_s4] ss:$0 sm:$0xff] }
 0x71e   :  { %4983 = vst [vmem:[#allocation2] sm:$0xff] %v4981_v49  ;;  %v6061_v49 = vld [vmem:[%s10974_s3 + $0x340] sm:$0xff] }
 0x71f   :  { %4984 = vst [vmem:[#allocation2 + $0x8] sm:$0xff] %v4982_v50  ;;  %v6062_v50 = vld [vmem:[%s10974_s3 + $0x348] sm:$0xff] }
 0x720   :  { %v6339_v35 = vpack.c.bf16 %v6062_v50, %v6061_v49 }
 0x725   :  { %v5097_v56 = vld [vmem:[#allocation2] sm:$0xc]  ;;  %v4986_v62 = vld [vmem:[#allocation2] sm:$0x3]  ;;  %v5209_v18 = vld [vmem:[#allocation2] sm:$0x30] }
 0x726   :  { %v4987_v59 = vld [vmem:[#allocation2 + $0x8] sm:$0x3]  ;;  %v5098_v60 = vld [vmem:[#allocation2 + $0x8] sm:$0xc]  ;;  %v5210_v61 = vld [vmem:[#allocation2 + $0x8] sm:$0x30] }
 0x727   :  { %5084 = vmatprep.mubr.f32.mxu0 %v4987_v59  ;;  %v5135_v63 = vrot.slane %v5098_v60, 2  ;;  %v5247_v0 = vrot.slane %v5210_v61, 4  ;;  %v5322_v3 = vld [vmem:[#allocation2 + $0x8] sm:$0xc0]  ;;  %v5134_v4 = vrot.slane %v5097_v56, 2  ;;  %v6064_v56 = vld [vmem:[%s10974_s3 + $0x358] sm:$0xff]  ;;  %v6313_v60 = vpack.c.bf16 %v6050_v53, %v6049_v52 }
 0x728   :  { %5085 = vmatmul.mubr.f32.vlgmr.msra.gmra.mrb[8].mxu0 %v4986_v62  ;;  %v5359_v11 = vrot.slane %v5322_v3, 6  ;;  %v6082_v59 = vld [vmem:[%s10974_s3 + $0x3e8] sm:$0xff]  ;;  %v6033_v61 = vld [vmem:[%s10974_s3 + $0x260] sm:$0xff]  ;;  %v5246_v20 = vrot.slane %v5209_v18, 4 }
 0x729   :  { %6292 = vmatpush3.bf16.msra.mxu0 %v6291_v55  ;;  %5202 = vmatprep.mubr.f32.mxu1 %v5135_v63  ;;  %v6063_v55 = vld [vmem:[%s10974_s3 + $0x350] sm:$0xff]  ;;  %v6034_v62 = vld [vmem:[%s10974_s3 + $0x268] sm:$0xff]  ;;  %v6065_v3 = vld [vmem:[%s10974_s3 + $0x360] sm:$0xff] }
 0x72a   :  { %5314 = vmatprep.mubr.f32.mxu0 %v5247_v0  ;;  %5203 = vmatmul.mubr.f32.vlgmr.msra.gmra.mrb[8].mxu1 %v5134_v4  ;;  %v6343_v63 = vpack.c.bf16 %v6064_v56, %v6063_v55  ;;  %v6051_v0 = vld [vmem:[%s10974_s3 + $0x2f0] sm:$0xff]  ;;  %v6066_v4 = vld [vmem:[%s10974_s3 + $0x368] sm:$0xff] }
 0x72b   :  { %6324 = vmatpush3.bf16.msra.mxu1 %v6323_v1  ;;  %6294 = vmatprep.subr.bf16.mxu0 %v6293_v2  ;;  %v6052_v1 = vld [vmem:[%s10974_s3 + $0x2f8] sm:$0xff]  ;;  %v6345_v2 = vpack.c.bf16 %v6082_v59, %v6081_v58  ;;  %s7672_s3 = smov [#allocation3]  }
 0x72c   :  { %5426 = vmatprep.mubr.f32.mxu1 %v5359_v11  ;;  %6326 = vmatprep.subr.bf16.mxu1 %v6325_v5  ;;  %v6315_v5 = vpack.c.bf16 %v6034_v62, %v6033_v61  ;;  %v6347_v11 = vpack.c.bf16 %v6066_v4, %v6065_v3  ;;  %s5441_s9 = sshll.u32 %s7672_s3, 4  ;;  %s5442_s9 = int_to_ptr.vmem [resolvable:$true] %s5441_s9 }
 0x72d   :  { %6296 = vmatpush3.bf16.msra.mxu0 %v6295_v8  ;;  %v6317_v8 = vpack.c.bf16 %v6052_v1, %v6051_v0  ;;  %s7647_s4 = scalar_lea.vmem %s5442_s9, 32  ;;  %p7652_p1 = scmp.lt.s32.totalorder %s5442_s9, %s5442_s9 }
 0x72e   :  { %6298 = vmatprep.subr.bf16.mxu0 %v6297_v12  ;;  %v6349_v12 = vpack.c.bf16 %v6084_v7, %v6083_v6  ;;  %p7648_p0 = scmp.ne.s32.totalorder %s5442_s9, %s7647_s4  ;;  %p7653_p2 = scmp.lt.s32.totalorder %s7647_s4, %s7647_s4 }
 0x72f   :  { %6328 = vmatpush3.bf16.msra.mxu1 %v6327_v16  ;;  %v6319_v16 = vpack.c.bf16 %v6036_v10, %v6035_v9 }
 0x730   :  { %6330 = vmatprep.subr.bf16.mxu1 %v6329_v19  ;;  %v5321_v19 = vld [vmem:[#allocation2] sm:$0xc0]  ;;  %p7654_p3 = por %p7653_p2, %p7652_p1 }
 0x731   :  { %6300 = vmatpush3.bf16.msra.mxu0 %v6299_v22  ;;  %v5358_v21 = vrot.slane %v5321_v19, 6 }
 0x732   :  { %6302 = vmatprep.subr.bf16.mxu0 %v6301_v13  ;;  %p7655_p4 = pnand %p7654_p3, %p7648_p0 }
 0x733   :  { %6332 = vmatpush3.bf16.msra.mxu1 %v6331_v27 }
 0x734   :  { %6334 = vmatprep.subr.bf16.mxu1 %v6333_v36 }
 0x735   :  { %6304 = vmatpush3.bf16.msra.mxu0 %v6303_v39 }
 0x736   :  { %6306 = vmatprep.subr.bf16.mxu0 %v6305_v42 }
 0x737   :  { %6336 = vmatpush3.bf16.msra.mxu1 %v6335_v45 }
 0x738   :  { %6338 = vmatprep.subr.bf16.mxu1 %v6337_v48 }
 0x739   :  { %6308 = vmatpush3.bf16.msra.mxu0 %v6307_v51 }
 0x73a   :  { %6310 = vmatprep.subr.bf16.mxu0 %v6309_v32 }
 0x73b   :  { %6340 = vmatpush3.bf16.msra.mxu1 %v6339_v35 }
 0x73c   :  { %6342 = vmatprep.subr.bf16.mxu1 %v6341_v54 }
 0x73d   :  { %6312 = vmatpush3.bf16.msra.mxu0 %v6311_v57 }
 0x73e   :  { %6314 = vmatprep.subr.bf16.mxu0 %v6313_v60 }
 0x73f   :  { %6344 = vmatpush3.bf16.msra.mxu1 %v6343_v63 }
 0x740   :  { %6346 = vmatprep.subr.bf16.mxu1 %v6345_v2 }
 0x741   :  { %6316 = vmatpush3.bf16.msra.mxu0 %v6315_v5 }
 0x742   :  { %6318 = vmatprep.subr.bf16.mxu0 %v6317_v8 }
 0x743   :  { %6348 = vmatpush3.bf16.msra.mxu1 %v6347_v11 }
 0x744   :  { %6350 = vmatprep.subr.bf16.mxu1 %v6349_v12 }
 0x745   :  { %6320 = vmatpush3.bf16.msra.mxu0 %v6319_v16 }
 0x747   :  { %6352 = vmatpush3.bf16.msra.mxu1 %v6351_v17 }
 0x748   :  { %5315 = vmatmul.mubr.f32.vlgmr.msra.gmra.mrb[10].mxu0 %v5246_v20 }
 0x74a   :  { %5427 = vmatmul.mubr.f32.vlgmr.msra.gmra.mrb[10].mxu1 %v5358_v21 }
 0x7fb   :  { %v6117_v22 = vpop.f32.mrb[8].mxu0 }
 0x7fc   :  { %v6118_v24 = vpop.f32.mrb[9].mxu0 }
 0x7fd   :  { %v6119_v13 = vadd.f32 %v6118_v24, %v6117_v22  ;;  %v6152_v25 = vpop.f32.mrb[8].mxu1 }
 0x7fe   :  { %v6153_v26 = vpop.f32.mrb[9].mxu1 }
 0x7ff   :  { %v5096_v27 = vadd.f32 %v6119_v13, %v5988_v23  ;;  %v6154_v28 = vadd.f32 %v6153_v26, %v6152_v25 }
 0x801   :  { %v5208_v29 = vadd.f32 %v6154_v28, %v5096_v27 }
 0x81b   :  { %v6187_v36 = vpop.f32.mrb[10].mxu0 }
 0x81c   :  { %v6188_v37 = vpop.f32.mrb[11].mxu0 }
 0x81d   :  { %v6189_v38 = vadd.f32 %v6188_v37, %v6187_v36  ;;  %v6222_v39 = vpop.f32.mrb[10].mxu1 }
 0x81e   :  { %v6223_v40 = vpop.f32.mrb[11].mxu1 }
 0x81f   :  { %v5320_v41 = vadd.f32 %v6189_v38, %v5208_v29  ;;  %v6224_v42 = vadd.f32 %v6223_v40, %v6222_v39 }
 0x821   :  { %v5432_v43 = vadd.f32 %v6224_v42, %v5320_v41 }
 0x823   :  { %5434 = vst.msk [vmem:[#allocation3] sm:$0x3] %vm5433_vm0, %v5432_v43 }
 0x824   :  { %7658 = shalt.err (!%p7655_p4)
}
 0x825   :  { %s7659_s12 = scalar_lea.hbm %s10976_s5, 32 }
 0x826   :  { %p7660_p5 = scmp.ne.s32.totalorder %s10976_s5, %s7659_s12  ;;  %p7663_p6 = scmp.lt.u32.totalorder %s7659_s12, %s10976_s5 }
 0x828   :  { %p7665_p7 = pnand %p7663_p6, %p7660_p5 }
 0x82a   :  { %7668 = shalt.err (!%p7665_p7)
}
 0x82b   :  { %5444 = dma.vmem_to_hbm [thread:$0]  %s5442_s9, 32, %s10976_s5, [#allocation4]  }
 0x82c   :  { %7669 = dma.done.wait [#allocation4], 32  }
 0x82d   :  { %7670 = vsyncadd [#allocation4], 4294967264 }
 0x82e   :  { %5448 = vsyncpa [#allocation4], 1 }

</bundles_post_ra>
